<compile_context>
chip_gen: v7x
topology: tpu7x:2x2x1
jax: 0.10.0
libtpu: 0.0.40
codegen_flags: <defaults>
</compile_context>

<pallas_src>
import functools
import math

import jax
import jax.numpy as jnp
from jax import lax
from jax.experimental import pallas as pl
from jax.experimental.pallas import tpu as pltpu


# ----------------------------------------------------------------------------
# Kernel 1: weight-streaming linear (first projection)
# ----------------------------------------------------------------------------
def _linear_stream_kernel(x_ref, w_ref, b_ref, o_ref):
    """out = x @ w + b for one lane-dense N tile; full K, no reduction loop."""
    x = x_ref[...]                                   # (M, K) f32
    w = w_ref[...]                                   # (K, tn) bf16
    y = jnp.dot(x.astype(w.dtype), w, preferred_element_type=jnp.float32)
    o_ref[...] = (y + b_ref[...].astype(jnp.float32)).astype(o_ref.dtype)


def linear_stream_pallas(x, w, b, *, tn=512):
    """x:(M,K) @ w:(K,N) (+ b) with N tiled, K un-tiled (weight streaming)."""
    M, K = x.shape
    _, N = w.shape
    if N % tn != 0:
        tn = N
    grid = (N // tn,)
    return pl.pallas_call(
        _linear_stream_kernel,
        out_shape=jax.ShapeDtypeStruct((M, N), jnp.float32),
        grid_spec=pltpu.PrefetchScalarGridSpec(
            num_scalar_prefetch=0,
            grid=grid,
            in_specs=[
                pl.BlockSpec((M, K), lambda j: (0, 0)),     # activations (tiny, resident)
                pl.BlockSpec((K, tn), lambda j: (0, j)),    # weight stream
                pl.BlockSpec((1, tn), lambda j: (0, j)),    # bias slice
            ],
            out_specs=pl.BlockSpec((M, tn), lambda j: (0, j)),
        ),
        compiler_params=pltpu.CompilerParams(
            dimension_semantics=("parallel",)),
    )(x, w, b.reshape(1, N))


# ----------------------------------------------------------------------------
# Kernel 2: fully fused transformer encoder (all layers in one pallas_call)
# ----------------------------------------------------------------------------
def _encoder_layers_kernel(x_ref,
                           wq_ref, bq_ref, wk_ref, bk_ref, wv_ref, bv_ref,
                           wo_ref, bo_ref, w1_ref, b1_ref, w2_ref, b2_ref,
                           g1_ref, be1_ref, g2_ref, be2_ref,
                           o_ref, h_ref,
                           *, batch, seq, heads, eps):
    """One encoder layer per grid step; activation carried in VMEM scratch."""
    layer = pl.program_id(0)

    @pl.when(layer == 0)
    def _():
        h_ref[...] = x_ref[...].astype(jnp.float32)

    h = h_ref[...]                                   # (B*S, D) f32
    d_model = h.shape[-1]
    dh = d_model // heads
    scale = 1.0 / math.sqrt(dh)

    def proj(w_r, b_r, inp):
        return (jnp.dot(inp, w_r[0], preferred_element_type=jnp.float32)
                + b_r[0].astype(jnp.float32))

    # Fold the 1/sqrt(dh) scale into Q once (M*D muls) instead of scaling
    # every (S,S) score tile (B*H*S*S muls).
    q = proj(wq_ref, bq_ref, h) * scale              # (B*S, D)
    k = proj(wk_ref, bk_ref, h)
    v = proj(wv_ref, bv_ref, h)

    # Per-(batch, head) attention, statically unrolled (B*H tiny blocks, all
    # resident in VMEM / vregs — no HBM traffic, no extra kernel launches).
    batch_rows = []
    for b in range(batch):
        r0 = b * seq
        head_cols = []
        for hh in range(heads):
            c0 = hh * dh
            qh = q[r0:r0 + seq, c0:c0 + dh]          # (S, dh)
            kh = k[r0:r0 + seq, c0:c0 + dh]
            vh = v[r0:r0 + seq, c0:c0 + dh]
            s = lax.dot_general(qh, kh, (((1,), (1,)), ((), ())),
                                preferred_element_type=jnp.float32)
            s = s - jnp.max(s, axis=-1, keepdims=True)
            p = jnp.exp(s)
            # EUP reciprocal instead of VPU divide.
            p = p * pl.reciprocal(jnp.sum(p, axis=-1, keepdims=True),
                                  approx=True)
            head_cols.append(jnp.dot(p, vh, preferred_element_type=jnp.float32))
        batch_rows.append(jnp.concatenate(head_cols, axis=-1))
    attn = jnp.concatenate(batch_rows, axis=0)       # (B*S, D)

    attn = proj(wo_ref, bo_ref, attn)

    def layer_norm(y, g_r, b_r):
        mu = jnp.mean(y, axis=-1, keepdims=True)
        var = jnp.mean((y - mu) ** 2, axis=-1, keepdims=True)
        yn = (y - mu) * lax.rsqrt(var + eps)
        return yn * g_r[0].astype(jnp.float32) + b_r[0].astype(jnp.float32)

    x1 = layer_norm(attn + h, g1_ref, be1_ref)       # post-norm residual 1

    ff = jnp.maximum(proj(w1_ref, b1_ref, x1), 0.0)  # FFN + ReLU
    ff = proj(w2_ref, b2_ref, ff)

    x2 = layer_norm(ff + x1, g2_ref, be2_ref)        # post-norm residual 2

    h_ref[...] = x2
    o_ref[...] = x2.astype(o_ref.dtype)


def fused_encoder_pallas(x2d, p, *, batch, seq, heads, eps):
    """x2d:(B*S, D); p contains (L, ...)-stacked per-layer weights."""
    n_layers, d_model, _ = p["wq"].shape
    d_ff = p["w1"].shape[-1]
    M = x2d.shape[0]

    kernel = functools.partial(_encoder_layers_kernel, batch=batch, seq=seq,
                               heads=heads, eps=eps)

    def wspec(d1, d2):
        return pl.BlockSpec((1, d1, d2), lambda l: (l, 0, 0))

    full2d = pl.BlockSpec((M, d_model), lambda l: (0, 0))

    return pl.pallas_call(
        kernel,
        out_shape=jax.ShapeDtypeStruct((M, d_model), jnp.float32),
        grid_spec=pltpu.PrefetchScalarGridSpec(
            num_scalar_prefetch=0,
            grid=(n_layers,),
            in_specs=[
                full2d,                                   # x (layer-0 input)
                wspec(d_model, d_model), wspec(1, d_model),   # wq, bq
                wspec(d_model, d_model), wspec(1, d_model),   # wk, bk
                wspec(d_model, d_model), wspec(1, d_model),   # wv, bv
                wspec(d_model, d_model), wspec(1, d_model),   # wo, bo
                wspec(d_model, d_ff), wspec(1, d_ff),         # w1, b1
                wspec(d_ff, d_model), wspec(1, d_model),      # w2, b2
                wspec(1, d_model), wspec(1, d_model),         # ln1 gamma/beta
                wspec(1, d_model), wspec(1, d_model),         # ln2 gamma/beta
            ],
            out_specs=full2d,
            scratch_shapes=[pltpu.VMEM((M, d_model), jnp.float32)],
        ),
        compiler_params=pltpu.CompilerParams(
            dimension_semantics=("arbitrary",)),          # layers are sequential
    )(x2d, p["wq"], p["bq"], p["wk"], p["bk"], p["wv"], p["bv"],
      p["wo"], p["bo"], p["w1"], p["b1"], p["w2"], p["b2"],
      p["ln1_g"], p["ln1_b"], p["ln2_g"], p["ln2_b"])


# ----------------------------------------------------------------------------
# Parameter construction (deterministic, synthetic)
# ----------------------------------------------------------------------------
def sinusoidal_positional_encoding(max_len, d_model):
    pos = jnp.arange(max_len, dtype=jnp.float32)[:, None]
    i = jnp.arange(d_model, dtype=jnp.float32)[None, :]
    angle = pos / jnp.power(10000.0, (2.0 * jnp.floor(i / 2.0)) / d_model)
    pe = jnp.where(i % 2 == 0, jnp.sin(angle), jnp.cos(angle))
    return pe.astype(jnp.float32)  # (max_len, d_model)


def init_params(key, *, d_model, n_layers, d_ff, max_len, code_rate):
    def dense(k, fan_in, fan_out):
        kw, kb = jax.random.split(k)
        s = 1.0 / math.sqrt(fan_in)
        w = jax.random.uniform(kw, (fan_in, fan_out), jnp.float32, -s, s)
        b = jax.random.uniform(kb, (fan_out,), jnp.float32, -s, s)
        return w, b

    keys = jax.random.split(key, 1 + n_layers)
    lin_w, lin_b = dense(keys[0], 32 * 64 * code_rate, 32 * 64)

    acc = {n: [] for n in ("wq", "bq", "wk", "bk", "wv", "bv",
                           "wo", "bo", "w1", "b1", "w2", "b2")}
    for li in range(n_layers):
        lk = jax.random.split(keys[1 + li], 6)
        wq, bq = dense(lk[0], d_model, d_model)
        wk, bk = dense(lk[1], d_model, d_model)
        wv, bv = dense(lk[2], d_model, d_model)
        wo, bo = dense(lk[3], d_model, d_model)
        w1, b1 = dense(lk[4], d_model, d_ff)
        w2, b2 = dense(lk[5], d_ff, d_model)
        acc["wq"].append(wq); acc["bq"].append(bq.reshape(1, d_model))
        acc["wk"].append(wk); acc["bk"].append(bk.reshape(1, d_model))
        acc["wv"].append(wv); acc["bv"].append(bv.reshape(1, d_model))
        acc["wo"].append(wo); acc["bo"].append(bo.reshape(1, d_model))
        acc["w1"].append(w1); acc["b1"].append(b1.reshape(1, d_ff))
        acc["w2"].append(w2); acc["b2"].append(b2.reshape(1, d_model))

    stacked = {n: jnp.stack(v) for n, v in acc.items()}
    stacked["ln1_g"] = jnp.ones((n_layers, 1, d_model), jnp.float32)
    stacked["ln1_b"] = jnp.zeros((n_layers, 1, d_model), jnp.float32)
    stacked["ln2_g"] = jnp.ones((n_layers, 1, d_model), jnp.float32)
    stacked["ln2_b"] = jnp.zeros((n_layers, 1, d_model), jnp.float32)

    return dict(
        # bf16 weight for the HBM-bandwidth-bound first projection
        # (MXU-native on v5e/v6e/v7x; accumulation stays f32 in-kernel).
        lin_w=lin_w.astype(jnp.bfloat16),
        lin_b=lin_b,
        encoder=dict(pos_enc=sinusoidal_positional_encoding(max_len, d_model),
                     layers=stacked),
    )


# ----------------------------------------------------------------------------
# Forward pass
# ----------------------------------------------------------------------------
def encoder_forward(x, enc_params, *, heads, eps):
    B, S, D = x.shape
    x = x + enc_params["pos_enc"][:S][None, :, :]    # glue: positional encoding
    out2d = fused_encoder_pallas(x.reshape(B * S, D), enc_params["layers"],
                                 batch=B, seq=S, heads=heads, eps=eps)
    return out2d.reshape(B, S, D)


def bs_side_reconstructor_forward(x, params, *, heads, eps):
    y = linear_stream_pallas(x, params["lin_w"], params["lin_b"])   # (B, 2048)
    y = y.reshape(x.shape[0], 64, 32)                               # (B, 64, 32)
    return encoder_forward(y, params["encoder"], heads=heads, eps=eps)


# ----------------------------------------------------------------------------
if __name__ == "__main__":
    # Module hyper-parameters (small, consistent with the reshape to (B,64,32)).
    D_MODEL = 32
    N_LAYERS = 2
    D_FF = 64
    HEADS = 4
    MAX_LEN = 64
    EPS = 1e-5
    CODE_RATE = 1
    BATCH = 2

    key = jax.random.PRNGKey(0)
    pkey, xkey = jax.random.split(key)

    params = init_params(pkey, d_model=D_MODEL, n_layers=N_LAYERS,
                         d_ff=D_FF, max_len=MAX_LEN, code_rate=CODE_RATE)

    x = jax.random.normal(xkey, (BATCH, 32 * 64 * CODE_RATE), jnp.float32)

    fwd = jax.jit(functools.partial(bs_side_reconstructor_forward,
                                    heads=HEADS, eps=EPS))
    out = fwd(x, params)
    jax.block_until_ready(out)

    assert out.shape == (BATCH, 64, D_MODEL)
    assert jnp.all(jnp.isfinite(out))
    print("KERNEL_OK")
</pallas_src>

<mosaic_0001>
module attributes {stable_mosaic.version = 11 : i64} {
  func.func @_linear_stream_kernel(%arg0: i32, %arg1: memref<2x2048xf32, #tpu.memory_space<vmem>>, %arg2: memref<2048x512xbf16, #tpu.memory_space<vmem>>, %arg3: memref<1x512xf32, #tpu.memory_space<vmem>>, %arg4: memref<2x512xf32, #tpu.memory_space<vmem>>) attributes {dimension_semantics = [#tpu.dimension_semantics<parallel>], iteration_bounds = array<i64: 4>, scalar_prefetch = 0 : i64, scratch_operands = 0 : i64, tpu.core_type = #tpu.core_type<tc>, window_params = [{pipeline_mode = #tpu.pipeline_mode<synchronous>, transform_indices = @transform_0, window_bounds = array<i64: 2, 2048>}, {transform_indices = @transform_1, window_bounds = array<i64: 2048, 512>}, {transform_indices = @transform_2, window_bounds = array<i64: 1, 512>}, {transform_indices = @transform_3, window_bounds = array<i64: 2, 512>}]} {
    %c0 = arith.constant 0 : index
    %c0_0 = arith.constant 0 : index
    %0 = vector.load %arg1[%c0, %c0_0] : memref<2x2048xf32, #tpu.memory_space<vmem>>, vector<2x2048xf32>
    %c0_1 = arith.constant 0 : index
    %c0_2 = arith.constant 0 : index
    %1 = vector.load %arg2[%c0_1, %c0_2] : memref<2048x512xbf16, #tpu.memory_space<vmem>>, vector<2048x512xbf16>
    %2 = arith.truncf %0 : vector<2x2048xf32> to vector<2x2048xbf16>
    %cst = arith.constant dense<0.000000e+00> : vector<2x512xf32>
    %3 = tpu.matmul %2, %1, %cst {dimension_numbers = #tpu.dot_dimension_numbers<[1], [0], [0], [1], [0, 0, 1, 1], [], []>} : vector<2x2048xbf16>, vector<2048x512xbf16>, vector<2x512xf32> -> vector<2x512xf32>
    %c0_3 = arith.constant 0 : index
    %c0_4 = arith.constant 0 : index
    %4 = vector.load %arg3[%c0_3, %c0_4] : memref<1x512xf32, #tpu.memory_space<vmem>>, vector<1x512xf32>
    %5 = vector.broadcast %4 : vector<1x512xf32> to vector<2x512xf32>
    %6 = arith.addf %3, %5 : vector<2x512xf32>
    %c0_5 = arith.constant 0 : index
    %c0_6 = arith.constant 0 : index
    %7 = vector.load %arg4[%c0_5, %c0_6] : memref<2x512xf32, #tpu.memory_space<vmem>>, vector<2x512xf32>
    tpu.vector_store %arg4[%c0_5, %c0_6], %6 {strides = array<i32>} : memref<2x512xf32, #tpu.memory_space<vmem>>, vector<2x512xf32>,
    return
  }
  func.func @transform_0(%arg0: i32) -> (i32, i32) {
    %c0_i32 = arith.constant 0 : i32
    %c0_i32_0 = arith.constant 0 : i32
    %c0_i32_1 = arith.constant 0 : i32
    return %c0_i32, %c0_i32_0 : i32, i32
  }
  func.func @transform_1(%arg0: i32) -> (i32, i32) {
    %c0_i32 = arith.constant 0 : i32
    %c0_i32_0 = arith.constant 0 : i32
    return %c0_i32, %arg0 : i32, i32
  }
  func.func @transform_2(%arg0: i32) -> (i32, i32) {
    %c0_i32 = arith.constant 0 : i32
    %c0_i32_0 = arith.constant 0 : i32
    return %c0_i32, %arg0 : i32, i32
  }
  func.func @transform_3(%arg0: i32) -> (i32, i32) {
    %c0_i32 = arith.constant 0 : i32
    %c0_i32_0 = arith.constant 0 : i32
    return %c0_i32, %arg0 : i32, i32
  }
}

module attributes {stable_mosaic.version = 11 : i64} {
  func.func @_encoder_layers_kernel(%arg0: i32, %arg1: memref<128x32xf32, #tpu.memory_space<vmem>>, %arg2: memref<1x32x32xf32, #tpu.memory_space<vmem>>, %arg3: memref<1x1x32xf32, #tpu.memory_space<vmem>>, %arg4: memref<1x32x32xf32, #tpu.memory_space<vmem>>, %arg5: memref<1x1x32xf32, #tpu.memory_space<vmem>>, %arg6: memref<1x32x32xf32, #tpu.memory_space<vmem>>, %arg7: memref<1x1x32xf32, #tpu.memory_space<vmem>>, %arg8: memref<1x32x32xf32, #tpu.memory_space<vmem>>, %arg9: memref<1x1x32xf32, #tpu.memory_space<vmem>>, %arg10: memref<1x32x64xf32, #tpu.memory_space<vmem>>, %arg11: memref<1x1x64xf32, #tpu.memory_space<vmem>>, %arg12: memref<1x64x32xf32, #tpu.memory_space<vmem>>, %arg13: memref<1x1x32xf32, #tpu.memory_space<vmem>>, %arg14: memref<1x1x32xf32, #tpu.memory_space<vmem>>, %arg15: memref<1x1x32xf32, #tpu.memory_space<vmem>>, %arg16: memref<1x1x32xf32, #tpu.memory_space<vmem>>, %arg17: memref<1x1x32xf32, #tpu.memory_space<vmem>>, %arg18: memref<128x32xf32, #tpu.memory_space<vmem>>, %arg19: memref<128x32xf32, #tpu.memory_space<vmem>>) attributes {dimension_semantics = [#tpu.dimension_semantics<arbitrary>], iteration_bounds = array<i64: 2>, scalar_prefetch = 0 : i64, scratch_operands = 1 : i64, tpu.core_type = #tpu.core_type<tc>, window_params = [{pipeline_mode = #tpu.pipeline_mode<synchronous>, transform_indices = @transform_0, window_bounds = array<i64: 128, 32>}, {transform_indices = @transform_1, window_bounds = array<i64: 1, 32, 32>}, {transform_indices = @transform_2, window_bounds = array<i64: 1, 1, 32>}, {transform_indices = @transform_3, window_bounds = array<i64: 1, 32, 32>}, {transform_indices = @transform_4, window_bounds = array<i64: 1, 1, 32>}, {transform_indices = @transform_5, window_bounds = array<i64: 1, 32, 32>}, {transform_indices = @transform_6, window_bounds = array<i64: 1, 1, 32>}, {transform_indices = @transform_7, window_bounds = array<i64: 1, 32, 32>}, {transform_indices = @transform_8, window_bounds = array<i64: 1, 1, 32>}, {transform_indices = @transform_9, window_bounds = array<i64: 1, 32, 64>}, {transform_indices = @transform_10, window_bounds = array<i64: 1, 1, 64>}, {transform_indices = @transform_11, window_bounds = array<i64: 1, 64, 32>}, {transform_indices = @transform_12, window_bounds = array<i64: 1, 1, 32>}, {transform_indices = @transform_13, window_bounds = array<i64: 1, 1, 32>}, {transform_indices = @transform_14, window_bounds = array<i64: 1, 1, 32>}, {transform_indices = @transform_15, window_bounds = array<i64: 1, 1, 32>}, {transform_indices = @transform_16, window_bounds = array<i64: 1, 1, 32>}, {pipeline_mode = #tpu.pipeline_mode<synchronous>, transform_indices = @transform_17, window_bounds = array<i64: 128, 32>}]} {
    %c0_i32 = arith.constant 0 : i32
    %0 = arith.cmpi eq, %arg0, %c0_i32 : i32
    %1 = arith.extui %0 : i1 to i32
    %c0_i32_0 = arith.constant 0 : i32
    %2 = arith.cmpi ne, %1, %c0_i32_0 : i32
    scf.if %2 {
      %c0_103 = arith.constant 0 : index
      %c0_104 = arith.constant 0 : index
      %229 = vector.load %arg1[%c0_103, %c0_104] : memref<128x32xf32, #tpu.memory_space<vmem>>, vector<128x32xf32>
      %c0_105 = arith.constant 0 : index
      %c0_106 = arith.constant 0 : index
      %230 = vector.load %arg19[%c0_105, %c0_106] : memref<128x32xf32, #tpu.memory_space<vmem>>, vector<128x32xf32>
      tpu.vector_store %arg19[%c0_105, %c0_106], %229 {strides = array<i32>} : memref<128x32xf32, #tpu.memory_space<vmem>>, vector<128x32xf32>,
    } else {
    }
    %c0 = arith.constant 0 : index
    %c0_1 = arith.constant 0 : index
    %3 = vector.load %arg19[%c0, %c0_1] : memref<128x32xf32, #tpu.memory_space<vmem>>, vector<128x32xf32>
    %c0_2 = arith.constant 0 : index
    %c0_3 = arith.constant 0 : index
    %c0_4 = arith.constant 0 : index
    %4 = vector.load %arg2[%c0_2, %c0_3, %c0_4] : memref<1x32x32xf32, #tpu.memory_space<vmem>>, vector<1x32x32xf32>
    %5 = vector.shape_cast %4 : vector<1x32x32xf32> to vector<32x32xf32>
    %cst = arith.constant dense<0.000000e+00> : vector<128x32xf32>
    %6 = tpu.matmul %3, %5, %cst {dimension_numbers = #tpu.dot_dimension_numbers<[1], [0], [0], [1], [0, 0, 1, 1], [], []>} : vector<128x32xf32>, vector<32x32xf32>, vector<128x32xf32> -> vector<128x32xf32>
    %c0_5 = arith.constant 0 : index
    %c0_6 = arith.constant 0 : index
    %c0_7 = arith.constant 0 : index
    %7 = vector.load %arg3[%c0_5, %c0_6, %c0_7] : memref<1x1x32xf32, #tpu.memory_space<vmem>>, vector<1x1x32xf32>
    %8 = vector.shape_cast %7 : vector<1x1x32xf32> to vector<1x32xf32>
    %9 = vector.broadcast %8 : vector<1x32xf32> to vector<128x32xf32>
    %10 = arith.addf %6, %9 : vector<128x32xf32>
    %cst_8 = arith.constant 0.353553385 : f32
    %11 = vector.broadcast %cst_8 : f32 to vector<128x32xf32>
    %12 = arith.mulf %10, %11 : vector<128x32xf32>
    %c0_9 = arith.constant 0 : index
    %c0_10 = arith.constant 0 : index
    %c0_11 = arith.constant 0 : index
    %13 = vector.load %arg4[%c0_9, %c0_10, %c0_11] : memref<1x32x32xf32, #tpu.memory_space<vmem>>, vector<1x32x32xf32>
    %14 = vector.shape_cast %13 : vector<1x32x32xf32> to vector<32x32xf32>
    %cst_12 = arith.constant dense<0.000000e+00> : vector<128x32xf32>
    %15 = tpu.matmul %3, %14, %cst_12 {dimension_numbers = #tpu.dot_dimension_numbers<[1], [0], [0], [1], [0, 0, 1, 1], [], []>} : vector<128x32xf32>, vector<32x32xf32>, vector<128x32xf32> -> vector<128x32xf32>
    %c0_13 = arith.constant 0 : index
    %c0_14 = arith.constant 0 : index
    %c0_15 = arith.constant 0 : index
    %16 = vector.load %arg5[%c0_13, %c0_14, %c0_15] : memref<1x1x32xf32, #tpu.memory_space<vmem>>, vector<1x1x32xf32>
    %17 = vector.shape_cast %16 : vector<1x1x32xf32> to vector<1x32xf32>
    %18 = vector.broadcast %17 : vector<1x32xf32> to vector<128x32xf32>
    %19 = arith.addf %15, %18 : vector<128x32xf32>
    %c0_16 = arith.constant 0 : index
    %c0_17 = arith.constant 0 : index
    %c0_18 = arith.constant 0 : index
    %20 = vector.load %arg6[%c0_16, %c0_17, %c0_18] : memref<1x32x32xf32, #tpu.memory_space<vmem>>, vector<1x32x32xf32>
    %21 = vector.shape_cast %20 : vector<1x32x32xf32> to vector<32x32xf32>
    %cst_19 = arith.constant dense<0.000000e+00> : vector<128x32xf32>
    %22 = tpu.matmul %3, %21, %cst_19 {dimension_numbers = #tpu.dot_dimension_numbers<[1], [0], [0], [1], [0, 0, 1, 1], [], []>} : vector<128x32xf32>, vector<32x32xf32>, vector<128x32xf32> -> vector<128x32xf32>
    %c0_20 = arith.constant 0 : index
    %c0_21 = arith.constant 0 : index
    %c0_22 = arith.constant 0 : index
    %23 = vector.load %arg7[%c0_20, %c0_21, %c0_22] : memref<1x1x32xf32, #tpu.memory_space<vmem>>, vector<1x1x32xf32>
    %24 = vector.shape_cast %23 : vector<1x1x32xf32> to vector<1x32xf32>
    %25 = vector.broadcast %24 : vector<1x32xf32> to vector<128x32xf32>
    %26 = arith.addf %22, %25 : vector<128x32xf32>
    %27 = vector.extract_strided_slice %12 {offsets = [0, 0], sizes = [64, 8], strides = [1, 1]} : vector<128x32xf32> to vector<64x8xf32>
    %28 = vector.extract_strided_slice %19 {offsets = [0, 0], sizes = [64, 8], strides = [1, 1]} : vector<128x32xf32> to vector<64x8xf32>
    %29 = vector.extract_strided_slice %26 {offsets = [0, 0], sizes = [64, 8], strides = [1, 1]} : vector<128x32xf32> to vector<64x8xf32>
    %cst_23 = arith.constant dense<0.000000e+00> : vector<64x64xf32>
    %30 = tpu.matmul %27, %28, %cst_23 {dimension_numbers = #tpu.dot_dimension_numbers<[1], [1], [0], [0], [0, 0, 1, 0], [], []>} : vector<64x8xf32>, vector<64x8xf32>, vector<64x64xf32> -> vector<64x64xf32>
    %cst_24 = arith.constant dense<0xFF800000> : vector<64xf32>
    %31 = vector.multi_reduction <maximumf>, %30, %cst_24 [1] : vector<64x64xf32> to vector<64xf32>
    %32 = vector.shape_cast %31 : vector<64xf32> to vector<64x1xf32>
    %33 = vector.broadcast %32 : vector<64x1xf32> to vector<64x64xf32>
    %34 = arith.subf %30, %33 : vector<64x64xf32>
    %35 = math.exp %34 : vector<64x64xf32>
    %cst_25 = arith.constant dense<0.000000e+00> : vector<64xf32>
    %36 = vector.multi_reduction <add>, %35, %cst_25 [1] : vector<64x64xf32> to vector<64xf32>
    %37 = vector.shape_cast %36 : vector<64xf32> to vector<64x1xf32>
    %38 = tpu.reciprocal %37 {approx = true} : vector<64x1xf32> -> vector<64x1xf32>
    %39 = vector.broadcast %38 : vector<64x1xf32> to vector<64x64xf32>
    %40 = arith.mulf %35, %39 : vector<64x64xf32>
    %cst_26 = arith.constant dense<0.000000e+00> : vector<64x8xf32>
    %41 = tpu.matmul %40, %29, %cst_26 {dimension_numbers = #tpu.dot_dimension_numbers<[1], [0], [0], [1], [0, 0, 1, 1], [], []>} : vector<64x64xf32>, vector<64x8xf32>, vector<64x8xf32> -> vector<64x8xf32>
    %42 = vector.extract_strided_slice %12 {offsets = [0, 8], sizes = [64, 8], strides = [1, 1]} : vector<128x32xf32> to vector<64x8xf32>
    %43 = vector.extract_strided_slice %19 {offsets = [0, 8], sizes = [64, 8], strides = [1, 1]} : vector<128x32xf32> to vector<64x8xf32>
    %44 = vector.extract_strided_slice %26 {offsets = [0, 8], sizes = [64, 8], strides = [1, 1]} : vector<128x32xf32> to vector<64x8xf32>
    %cst_27 = arith.constant dense<0.000000e+00> : vector<64x64xf32>
    %45 = tpu.matmul %42, %43, %cst_27 {dimension_numbers = #tpu.dot_dimension_numbers<[1], [1], [0], [0], [0, 0, 1, 0], [], []>} : vector<64x8xf32>, vector<64x8xf32>, vector<64x64xf32> -> vector<64x64xf32>
    %cst_28 = arith.constant dense<0xFF800000> : vector<64xf32>
    %46 = vector.multi_reduction <maximumf>, %45, %cst_28 [1] : vector<64x64xf32> to vector<64xf32>
    %47 = vector.shape_cast %46 : vector<64xf32> to vector<64x1xf32>
    %48 = vector.broadcast %47 : vector<64x1xf32> to vector<64x64xf32>
    %49 = arith.subf %45, %48 : vector<64x64xf32>
    %50 = math.exp %49 : vector<64x64xf32>
    %cst_29 = arith.constant dense<0.000000e+00> : vector<64xf32>
    %51 = vector.multi_reduction <add>, %50, %cst_29 [1] : vector<64x64xf32> to vector<64xf32>
    %52 = vector.shape_cast %51 : vector<64xf32> to vector<64x1xf32>
    %53 = tpu.reciprocal %52 {approx = true} : vector<64x1xf32> -> vector<64x1xf32>
    %54 = vector.broadcast %53 : vector<64x1xf32> to vector<64x64xf32>
    %55 = arith.mulf %50, %54 : vector<64x64xf32>
    %cst_30 = arith.constant dense<0.000000e+00> : vector<64x8xf32>
    %56 = tpu.matmul %55, %44, %cst_30 {dimension_numbers = #tpu.dot_dimension_numbers<[1], [0], [0], [1], [0, 0, 1, 1], [], []>} : vector<64x64xf32>, vector<64x8xf32>, vector<64x8xf32> -> vector<64x8xf32>
    %57 = vector.extract_strided_slice %12 {offsets = [0, 16], sizes = [64, 8], strides = [1, 1]} : vector<128x32xf32> to vector<64x8xf32>
    %58 = vector.extract_strided_slice %19 {offsets = [0, 16], sizes = [64, 8], strides = [1, 1]} : vector<128x32xf32> to vector<64x8xf32>
    %59 = vector.extract_strided_slice %26 {offsets = [0, 16], sizes = [64, 8], strides = [1, 1]} : vector<128x32xf32> to vector<64x8xf32>
    %cst_31 = arith.constant dense<0.000000e+00> : vector<64x64xf32>
    %60 = tpu.matmul %57, %58, %cst_31 {dimension_numbers = #tpu.dot_dimension_numbers<[1], [1], [0], [0], [0, 0, 1, 0], [], []>} : vector<64x8xf32>, vector<64x8xf32>, vector<64x64xf32> -> vector<64x64xf32>
    %cst_32 = arith.constant dense<0xFF800000> : vector<64xf32>
    %61 = vector.multi_reduction <maximumf>, %60, %cst_32 [1] : vector<64x64xf32> to vector<64xf32>
    %62 = vector.shape_cast %61 : vector<64xf32> to vector<64x1xf32>
    %63 = vector.broadcast %62 : vector<64x1xf32> to vector<64x64xf32>
    %64 = arith.subf %60, %63 : vector<64x64xf32>
    %65 = math.exp %64 : vector<64x64xf32>
    %cst_33 = arith.constant dense<0.000000e+00> : vector<64xf32>
    %66 = vector.multi_reduction <add>, %65, %cst_33 [1] : vector<64x64xf32> to vector<64xf32>
    %67 = vector.shape_cast %66 : vector<64xf32> to vector<64x1xf32>
    %68 = tpu.reciprocal %67 {approx = true} : vector<64x1xf32> -> vector<64x1xf32>
    %69 = vector.broadcast %68 : vector<64x1xf32> to vector<64x64xf32>
    %70 = arith.mulf %65, %69 : vector<64x64xf32>
    %cst_34 = arith.constant dense<0.000000e+00> : vector<64x8xf32>
    %71 = tpu.matmul %70, %59, %cst_34 {dimension_numbers = #tpu.dot_dimension_numbers<[1], [0], [0], [1], [0, 0, 1, 1], [], []>} : vector<64x64xf32>, vector<64x8xf32>, vector<64x8xf32> -> vector<64x8xf32>
    %72 = vector.extract_strided_slice %12 {offsets = [0, 24], sizes = [64, 8], strides = [1, 1]} : vector<128x32xf32> to vector<64x8xf32>
    %73 = vector.extract_strided_slice %19 {offsets = [0, 24], sizes = [64, 8], strides = [1, 1]} : vector<128x32xf32> to vector<64x8xf32>
    %74 = vector.extract_strided_slice %26 {offsets = [0, 24], sizes = [64, 8], strides = [1, 1]} : vector<128x32xf32> to vector<64x8xf32>
    %cst_35 = arith.constant dense<0.000000e+00> : vector<64x64xf32>
    %75 = tpu.matmul %72, %73, %cst_35 {dimension_numbers = #tpu.dot_dimension_numbers<[1], [1], [0], [0], [0, 0, 1, 0], [], []>} : vector<64x8xf32>, vector<64x8xf32>, vector<64x64xf32> -> vector<64x64xf32>
    %cst_36 = arith.constant dense<0xFF800000> : vector<64xf32>
    %76 = vector.multi_reduction <maximumf>, %75, %cst_36 [1] : vector<64x64xf32> to vector<64xf32>
    %77 = vector.shape_cast %76 : vector<64xf32> to vector<64x1xf32>
    %78 = vector.broadcast %77 : vector<64x1xf32> to vector<64x64xf32>
    %79 = arith.subf %75, %78 : vector<64x64xf32>
    %80 = math.exp %79 : vector<64x64xf32>
    %cst_37 = arith.constant dense<0.000000e+00> : vector<64xf32>
    %81 = vector.multi_reduction <add>, %80, %cst_37 [1] : vector<64x64xf32> to vector<64xf32>
    %82 = vector.shape_cast %81 : vector<64xf32> to vector<64x1xf32>
    %83 = tpu.reciprocal %82 {approx = true} : vector<64x1xf32> -> vector<64x1xf32>
    %84 = vector.broadcast %83 : vector<64x1xf32> to vector<64x64xf32>
    %85 = arith.mulf %80, %84 : vector<64x64xf32>
    %cst_38 = arith.constant dense<0.000000e+00> : vector<64x8xf32>
    %86 = tpu.matmul %85, %74, %cst_38 {dimension_numbers = #tpu.dot_dimension_numbers<[1], [0], [0], [1], [0, 0, 1, 1], [], []>} : vector<64x64xf32>, vector<64x8xf32>, vector<64x8xf32> -> vector<64x8xf32>
    %87 = tpu.concatenate %41, %56, %71, %86 in 1 : vector<64x8xf32>, vector<64x8xf32>, vector<64x8xf32>, vector<64x8xf32> -> vector<64x32xf32>
    %88 = vector.extract_strided_slice %12 {offsets = [64, 0], sizes = [64, 8], strides = [1, 1]} : vector<128x32xf32> to vector<64x8xf32>
    %89 = vector.extract_strided_slice %19 {offsets = [64, 0], sizes = [64, 8], strides = [1, 1]} : vector<128x32xf32> to vector<64x8xf32>
    %90 = vector.extract_strided_slice %26 {offsets = [64, 0], sizes = [64, 8], strides = [1, 1]} : vector<128x32xf32> to vector<64x8xf32>
    %cst_39 = arith.constant dense<0.000000e+00> : vector<64x64xf32>
    %91 = tpu.matmul %88, %89, %cst_39 {dimension_numbers = #tpu.dot_dimension_numbers<[1], [1], [0], [0], [0, 0, 1, 0], [], []>} : vector<64x8xf32>, vector<64x8xf32>, vector<64x64xf32> -> vector<64x64xf32>
    %cst_40 = arith.constant dense<0xFF800000> : vector<64xf32>
    %92 = vector.multi_reduction <maximumf>, %91, %cst_40 [1] : vector<64x64xf32> to vector<64xf32>
    %93 = vector.shape_cast %92 : vector<64xf32> to vector<64x1xf32>
    %94 = vector.broadcast %93 : vector<64x1xf32> to vector<64x64xf32>
    %95 = arith.subf %91, %94 : vector<64x64xf32>
    %96 = math.exp %95 : vector<64x64xf32>
    %cst_41 = arith.constant dense<0.000000e+00> : vector<64xf32>
    %97 = vector.multi_reduction <add>, %96, %cst_41 [1] : vector<64x64xf32> to vector<64xf32>
    %98 = vector.shape_cast %97 : vector<64xf32> to vector<64x1xf32>
    %99 = tpu.reciprocal %98 {approx = true} : vector<64x1xf32> -> vector<64x1xf32>
    %100 = vector.broadcast %99 : vector<64x1xf32> to vector<64x64xf32>
    %101 = arith.mulf %96, %100 : vector<64x64xf32>
    %cst_42 = arith.constant dense<0.000000e+00> : vector<64x8xf32>
    %102 = tpu.matmul %101, %90, %cst_42 {dimension_numbers = #tpu.dot_dimension_numbers<[1], [0], [0], [1], [0, 0, 1, 1], [], []>} : vector<64x64xf32>, vector<64x8xf32>, vector<64x8xf32> -> vector<64x8xf32>
    %103 = vector.extract_strided_slice %12 {offsets = [64, 8], sizes = [64, 8], strides = [1, 1]} : vector<128x32xf32> to vector<64x8xf32>
    %104 = vector.extract_strided_slice %19 {offsets = [64, 8], sizes = [64, 8], strides = [1, 1]} : vector<128x32xf32> to vector<64x8xf32>
    %105 = vector.extract_strided_slice %26 {offsets = [64, 8], sizes = [64, 8], strides = [1, 1]} : vector<128x32xf32> to vector<64x8xf32>
    %cst_43 = arith.constant dense<0.000000e+00> : vector<64x64xf32>
    %106 = tpu.matmul %103, %104, %cst_43 {dimension_numbers = #tpu.dot_dimension_numbers<[1], [1], [0], [0], [0, 0, 1, 0], [], []>} : vector<64x8xf32>, vector<64x8xf32>, vector<64x64xf32> -> vector<64x64xf32>
    %cst_44 = arith.constant dense<0xFF800000> : vector<64xf32>
    %107 = vector.multi_reduction <maximumf>, %106, %cst_44 [1] : vector<64x64xf32> to vector<64xf32>
    %108 = vector.shape_cast %107 : vector<64xf32> to vector<64x1xf32>
    %109 = vector.broadcast %108 : vector<64x1xf32> to vector<64x64xf32>
    %110 = arith.subf %106, %109 : vector<64x64xf32>
    %111 = math.exp %110 : vector<64x64xf32>
    %cst_45 = arith.constant dense<0.000000e+00> : vector<64xf32>
    %112 = vector.multi_reduction <add>, %111, %cst_45 [1] : vector<64x64xf32> to vector<64xf32>
    %113 = vector.shape_cast %112 : vector<64xf32> to vector<64x1xf32>
    %114 = tpu.reciprocal %113 {approx = true} : vector<64x1xf32> -> vector<64x1xf32>
    %115 = vector.broadcast %114 : vector<64x1xf32> to vector<64x64xf32>
    %116 = arith.mulf %111, %115 : vector<64x64xf32>
    %cst_46 = arith.constant dense<0.000000e+00> : vector<64x8xf32>
    %117 = tpu.matmul %116, %105, %cst_46 {dimension_numbers = #tpu.dot_dimension_numbers<[1], [0], [0], [1], [0, 0, 1, 1], [], []>} : vector<64x64xf32>, vector<64x8xf32>, vector<64x8xf32> -> vector<64x8xf32>
    %118 = vector.extract_strided_slice %12 {offsets = [64, 16], sizes = [64, 8], strides = [1, 1]} : vector<128x32xf32> to vector<64x8xf32>
    %119 = vector.extract_strided_slice %19 {offsets = [64, 16], sizes = [64, 8], strides = [1, 1]} : vector<128x32xf32> to vector<64x8xf32>
    %120 = vector.extract_strided_slice %26 {offsets = [64, 16], sizes = [64, 8], strides = [1, 1]} : vector<128x32xf32> to vector<64x8xf32>
    %cst_47 = arith.constant dense<0.000000e+00> : vector<64x64xf32>
    %121 = tpu.matmul %118, %119, %cst_47 {dimension_numbers = #tpu.dot_dimension_numbers<[1], [1], [0], [0], [0, 0, 1, 0], [], []>} : vector<64x8xf32>, vector<64x8xf32>, vector<64x64xf32> -> vector<64x64xf32>
    %cst_48 = arith.constant dense<0xFF800000> : vector<64xf32>
    %122 = vector.multi_reduction <maximumf>, %121, %cst_48 [1] : vector<64x64xf32> to vector<64xf32>
    %123 = vector.shape_cast %122 : vector<64xf32> to vector<64x1xf32>
    %124 = vector.broadcast %123 : vector<64x1xf32> to vector<64x64xf32>
    %125 = arith.subf %121, %124 : vector<64x64xf32>
    %126 = math.exp %125 : vector<64x64xf32>
    %cst_49 = arith.constant dense<0.000000e+00> : vector<64xf32>
    %127 = vector.multi_reduction <add>, %126, %cst_49 [1] : vector<64x64xf32> to vector<64xf32>
    %128 = vector.shape_cast %127 : vector<64xf32> to vector<64x1xf32>
    %129 = tpu.reciprocal %128 {approx = true} : vector<64x1xf32> -> vector<64x1xf32>
    %130 = vector.broadcast %129 : vector<64x1xf32> to vector<64x64xf32>
    %131 = arith.mulf %126, %130 : vector<64x64xf32>
    %cst_50 = arith.constant dense<0.000000e+00> : vector<64x8xf32>
    %132 = tpu.matmul %131, %120, %cst_50 {dimension_numbers = #tpu.dot_dimension_numbers<[1], [0], [0], [1], [0, 0, 1, 1], [], []>} : vector<64x64xf32>, vector<64x8xf32>, vector<64x8xf32> -> vector<64x8xf32>
    %133 = vector.extract_strided_slice %12 {offsets = [64, 24], sizes = [64, 8], strides = [1, 1]} : vector<128x32xf32> to vector<64x8xf32>
    %134 = vector.extract_strided_slice %19 {offsets = [64, 24], sizes = [64, 8], strides = [1, 1]} : vector<128x32xf32> to vector<64x8xf32>
    %135 = vector.extract_strided_slice %26 {offsets = [64, 24], sizes = [64, 8], strides = [1, 1]} : vector<128x32xf32> to vector<64x8xf32>
    %cst_51 = arith.constant dense<0.000000e+00> : vector<64x64xf32>
    %136 = tpu.matmul %133, %134, %cst_51 {dimension_numbers = #tpu.dot_dimension_numbers<[1], [1], [0], [0], [0, 0, 1, 0], [], []>} : vector<64x8xf32>, vector<64x8xf32>, vector<64x64xf32> -> vector<64x64xf32>
    %cst_52 = arith.constant dense<0xFF800000> : vector<64xf32>
    %137 = vector.multi_reduction <maximumf>, %136, %cst_52 [1] : vector<64x64xf32> to vector<64xf32>
    %138 = vector.shape_cast %137 : vector<64xf32> to vector<64x1xf32>
    %139 = vector.broadcast %138 : vector<64x1xf32> to vector<64x64xf32>
    %140 = arith.subf %136, %139 : vector<64x64xf32>
    %141 = math.exp %140 : vector<64x64xf32>
    %cst_53 = arith.constant dense<0.000000e+00> : vector<64xf32>
    %142 = vector.multi_reduction <add>, %141, %cst_53 [1] : vector<64x64xf32> to vector<64xf32>
    %143 = vector.shape_cast %142 : vector<64xf32> to vector<64x1xf32>
    %144 = tpu.reciprocal %143 {approx = true} : vector<64x1xf32> -> vector<64x1xf32>
    %145 = vector.broadcast %144 : vector<64x1xf32> to vector<64x64xf32>
    %146 = arith.mulf %141, %145 : vector<64x64xf32>
    %cst_54 = arith.constant dense<0.000000e+00> : vector<64x8xf32>
    %147 = tpu.matmul %146, %135, %cst_54 {dimension_numbers = #tpu.dot_dimension_numbers<[1], [0], [0], [1], [0, 0, 1, 1], [], []>} : vector<64x64xf32>, vector<64x8xf32>, vector<64x8xf32> -> vector<64x8xf32>
    %148 = tpu.concatenate %102, %117, %132, %147 in 1 : vector<64x8xf32>, vector<64x8xf32>, vector<64x8xf32>, vector<64x8xf32> -> vector<64x32xf32>
    %149 = tpu.concatenate %87, %148 in 0 : vector<64x32xf32>, vector<64x32xf32> -> vector<128x32xf32>
    %c0_55 = arith.constant 0 : index
    %c0_56 = arith.constant 0 : index
    %c0_57 = arith.constant 0 : index
    %150 = vector.load %arg8[%c0_55, %c0_56, %c0_57] : memref<1x32x32xf32, #tpu.memory_space<vmem>>, vector<1x32x32xf32>
    %151 = vector.shape_cast %150 : vector<1x32x32xf32> to vector<32x32xf32>
    %cst_58 = arith.constant dense<0.000000e+00> : vector<128x32xf32>
    %152 = tpu.matmul %149, %151, %cst_58 {dimension_numbers = #tpu.dot_dimension_numbers<[1], [0], [0], [1], [0, 0, 1, 1], [], []>} : vector<128x32xf32>, vector<32x32xf32>, vector<128x32xf32> -> vector<128x32xf32>
    %c0_59 = arith.constant 0 : index
    %c0_60 = arith.constant 0 : index
    %c0_61 = arith.constant 0 : index
    %153 = vector.load %arg9[%c0_59, %c0_60, %c0_61] : memref<1x1x32xf32, #tpu.memory_space<vmem>>, vector<1x1x32xf32>
    %154 = vector.shape_cast %153 : vector<1x1x32xf32> to vector<1x32xf32>
    %155 = vector.broadcast %154 : vector<1x32xf32> to vector<128x32xf32>
    %156 = arith.addf %152, %155 : vector<128x32xf32>
    %157 = arith.addf %156, %3 : vector<128x32xf32>
    %cst_62 = arith.constant dense<0.000000e+00> : vector<128xf32>
    %158 = vector.multi_reduction <add>, %157, %cst_62 [1] : vector<128x32xf32> to vector<128xf32>
    %159 = vector.shape_cast %158 : vector<128xf32> to vector<128x1xf32>
    %cst_63 = arith.constant 3.200000e+01 : f32
    %160 = vector.broadcast %cst_63 : f32 to vector<128x1xf32>
    %161 = arith.divf %159, %160 : vector<128x1xf32>
    %162 = vector.broadcast %161 : vector<128x1xf32> to vector<128x32xf32>
    %163 = arith.subf %157, %162 : vector<128x32xf32>
    %164 = arith.mulf %163, %163 : vector<128x32xf32>
    %cst_64 = arith.constant dense<0.000000e+00> : vector<128xf32>
    %165 = vector.multi_reduction <add>, %164, %cst_64 [1] : vector<128x32xf32> to vector<128xf32>
    %166 = vector.shape_cast %165 : vector<128xf32> to vector<128x1xf32>
    %cst_65 = arith.constant 3.200000e+01 : f32
    %167 = vector.broadcast %cst_65 : f32 to vector<128x1xf32>
    %168 = arith.divf %166, %167 : vector<128x1xf32>
    %169 = vector.broadcast %161 : vector<128x1xf32> to vector<128x32xf32>
    %170 = arith.subf %157, %169 : vector<128x32xf32>
    %cst_66 = arith.constant 9.99999974E-6 : f32
    %171 = vector.broadcast %cst_66 : f32 to vector<128x1xf32>
    %172 = arith.addf %168, %171 : vector<128x1xf32>
    %173 = math.rsqrt %172 : vector<128x1xf32>
    %174 = vector.broadcast %173 : vector<128x1xf32> to vector<128x32xf32>
    %175 = arith.mulf %170, %174 : vector<128x32xf32>
    %c0_67 = arith.constant 0 : index
    %c0_68 = arith.constant 0 : index
    %c0_69 = arith.constant 0 : index
    %176 = vector.load %arg14[%c0_67, %c0_68, %c0_69] : memref<1x1x32xf32, #tpu.memory_space<vmem>>, vector<1x1x32xf32>
    %177 = vector.shape_cast %176 : vector<1x1x32xf32> to vector<1x32xf32>
    %178 = vector.broadcast %177 : vector<1x32xf32> to vector<128x32xf32>
    %179 = arith.mulf %175, %178 : vector<128x32xf32>
    %c0_70 = arith.constant 0 : index
    %c0_71 = arith.constant 0 : index
    %c0_72 = arith.constant 0 : index
    %180 = vector.load %arg15[%c0_70, %c0_71, %c0_72] : memref<1x1x32xf32, #tpu.memory_space<vmem>>, vector<1x1x32xf32>
    %181 = vector.shape_cast %180 : vector<1x1x32xf32> to vector<1x32xf32>
    %182 = vector.broadcast %181 : vector<1x32xf32> to vector<128x32xf32>
    %183 = arith.addf %179, %182 : vector<128x32xf32>
    %c0_73 = arith.constant 0 : index
    %c0_74 = arith.constant 0 : index
    %c0_75 = arith.constant 0 : index
    %184 = vector.load %arg10[%c0_73, %c0_74, %c0_75] : memref<1x32x64xf32, #tpu.memory_space<vmem>>, vector<1x32x64xf32>
    %185 = vector.shape_cast %184 : vector<1x32x64xf32> to vector<32x64xf32>
    %cst_76 = arith.constant dense<0.000000e+00> : vector<128x64xf32>
    %186 = tpu.matmul %183, %185, %cst_76 {dimension_numbers = #tpu.dot_dimension_numbers<[1], [0], [0], [1], [0, 0, 1, 1], [], []>} : vector<128x32xf32>, vector<32x64xf32>, vector<128x64xf32> -> vector<128x64xf32>
    %c0_77 = arith.constant 0 : index
    %c0_78 = arith.constant 0 : index
    %c0_79 = arith.constant 0 : index
    %187 = vector.load %arg11[%c0_77, %c0_78, %c0_79] : memref<1x1x64xf32, #tpu.memory_space<vmem>>, vector<1x1x64xf32>
    %188 = vector.shape_cast %187 : vector<1x1x64xf32> to vector<1x64xf32>
    %189 = vector.broadcast %188 : vector<1x64xf32> to vector<128x64xf32>
    %190 = arith.addf %186, %189 : vector<128x64xf32>
    %cst_80 = arith.constant 0.000000e+00 : f32
    %191 = vector.broadcast %cst_80 : f32 to vector<128x64xf32>
    %192 = arith.maximumf %190, %191 : vector<128x64xf32>
    %c0_81 = arith.constant 0 : index
    %c0_82 = arith.constant 0 : index
    %c0_83 = arith.constant 0 : index
    %193 = vector.load %arg12[%c0_81, %c0_82, %c0_83] : memref<1x64x32xf32, #tpu.memory_space<vmem>>, vector<1x64x32xf32>
    %194 = vector.shape_cast %193 : vector<1x64x32xf32> to vector<64x32xf32>
    %cst_84 = arith.constant dense<0.000000e+00> : vector<128x32xf32>
    %195 = tpu.matmul %192, %194, %cst_84 {dimension_numbers = #tpu.dot_dimension_numbers<[1], [0], [0], [1], [0, 0, 1, 1], [], []>} : vector<128x64xf32>, vector<64x32xf32>, vector<128x32xf32> -> vector<128x32xf32>
    %c0_85 = arith.constant 0 : index
    %c0_86 = arith.constant 0 : index
    %c0_87 = arith.constant 0 : index
    %196 = vector.load %arg13[%c0_85, %c0_86, %c0_87] : memref<1x1x32xf32, #tpu.memory_space<vmem>>, vector<1x1x32xf32>
    %197 = vector.shape_cast %196 : vector<1x1x32xf32> to vector<1x32xf32>
    %198 = vector.broadcast %197 : vector<1x32xf32> to vector<128x32xf32>
    %199 = arith.addf %195, %198 : vector<128x32xf32>
    %200 = arith.addf %199, %183 : vector<128x32xf32>
    %cst_88 = arith.constant dense<0.000000e+00> : vector<128xf32>
    %201 = vector.multi_reduction <add>, %200, %cst_88 [1] : vector<128x32xf32> to vector<128xf32>
    %202 = vector.shape_cast %201 : vector<128xf32> to vector<128x1xf32>
    %cst_89 = arith.constant 3.200000e+01 : f32
    %203 = vector.broadcast %cst_89 : f32 to vector<128x1xf32>
    %204 = arith.divf %202, %203 : vector<128x1xf32>
    %205 = vector.broadcast %204 : vector<128x1xf32> to vector<128x32xf32>
    %206 = arith.subf %200, %205 : vector<128x32xf32>
    %207 = arith.mulf %206, %206 : vector<128x32xf32>
    %cst_90 = arith.constant dense<0.000000e+00> : vector<128xf32>
    %208 = vector.multi_reduction <add>, %207, %cst_90 [1] : vector<128x32xf32> to vector<128xf32>
    %209 = vector.shape_cast %208 : vector<128xf32> to vector<128x1xf32>
    %cst_91 = arith.constant 3.200000e+01 : f32
    %210 = vector.broadcast %cst_91 : f32 to vector<128x1xf32>
    %211 = arith.divf %209, %210 : vector<128x1xf32>
    %212 = vector.broadcast %204 : vector<128x1xf32> to vector<128x32xf32>
    %213 = arith.subf %200, %212 : vector<128x32xf32>
    %cst_92 = arith.constant 9.99999974E-6 : f32
    %214 = vector.broadcast %cst_92 : f32 to vector<128x1xf32>
    %215 = arith.addf %211, %214 : vector<128x1xf32>
    %216 = math.rsqrt %215 : vector<128x1xf32>
    %217 = vector.broadcast %216 : vector<128x1xf32> to vector<128x32xf32>
    %218 = arith.mulf %213, %217 : vector<128x32xf32>
    %c0_93 = arith.constant 0 : index
    %c0_94 = arith.constant 0 : index
    %c0_95 = arith.constant 0 : index
    %219 = vector.load %arg16[%c0_93, %c0_94, %c0_95] : memref<1x1x32xf32, #tpu.memory_space<vmem>>, vector<1x1x32xf32>
    %220 = vector.shape_cast %219 : vector<1x1x32xf32> to vector<1x32xf32>
    %221 = vector.broadcast %220 : vector<1x32xf32> to vector<128x32xf32>
    %222 = arith.mulf %218, %221 : vector<128x32xf32>
    %c0_96 = arith.constant 0 : index
    %c0_97 = arith.constant 0 : index
    %c0_98 = arith.constant 0 : index
    %223 = vector.load %arg17[%c0_96, %c0_97, %c0_98] : memref<1x1x32xf32, #tpu.memory_space<vmem>>, vector<1x1x32xf32>
    %224 = vector.shape_cast %223 : vector<1x1x32xf32> to vector<1x32xf32>
    %225 = vector.broadcast %224 : vector<1x32xf32> to vector<128x32xf32>
    %226 = arith.addf %222, %225 : vector<128x32xf32>
    %c0_99 = arith.constant 0 : index
    %c0_100 = arith.constant 0 : index
    %227 = vector.load %arg19[%c0_99, %c0_100] : memref<128x32xf32, #tpu.memory_space<vmem>>, vector<128x32xf32>
    tpu.vector_store %arg19[%c0_99, %c0_100], %226 {strides = array<i32>} : memref<128x32xf32, #tpu.memory_space<vmem>>, vector<128x32xf32>,
    %c0_101 = arith.constant 0 : index
    %c0_102 = arith.constant 0 : index
    %228 = vector.load %arg18[%c0_101, %c0_102] : memref<128x32xf32, #tpu.memory_space<vmem>>, vector<128x32xf32>
    tpu.vector_store %arg18[%c0_101, %c0_102], %226 {strides = array<i32>} : memref<128x32xf32, #tpu.memory_space<vmem>>, vector<128x32xf32>,
    return
  }
  func.func @transform_0(%arg0: i32) -> (i32, i32) {
    %c0_i32 = arith.constant 0 : i32
    %c0_i32_0 = arith.constant 0 : i32
    %c0_i32_1 = arith.constant 0 : i32
    return %c0_i32, %c0_i32_0 : i32, i32
  }
  func.func @transform_1(%arg0: i32) -> (i32, i32, i32) {
    %c0_i32 = arith.constant 0 : i32
    %c0_i32_0 = arith.constant 0 : i32
    %c0_i32_1 = arith.constant 0 : i32
    return %arg0, %c0_i32, %c0_i32_0 : i32, i32, i32
  }
  func.func @transform_2(%arg0: i32) -> (i32, i32, i32) {
    %c0_i32 = arith.constant 0 : i32
    %c0_i32_0 = arith.constant 0 : i32
    %c0_i32_1 = arith.constant 0 : i32
    return %arg0, %c0_i32, %c0_i32_0 : i32, i32, i32
  }
  func.func @transform_3(%arg0: i32) -> (i32, i32, i32) {
    %c0_i32 = arith.constant 0 : i32
    %c0_i32_0 = arith.constant 0 : i32
    %c0_i32_1 = arith.constant 0 : i32
    return %arg0, %c0_i32, %c0_i32_0 : i32, i32, i32
  }
  func.func @transform_4(%arg0: i32) -> (i32, i32, i32) {
    %c0_i32 = arith.constant 0 : i32
    %c0_i32_0 = arith.constant 0 : i32
    %c0_i32_1 = arith.constant 0 : i32
    return %arg0, %c0_i32, %c0_i32_0 : i32, i32, i32
  }
  func.func @transform_5(%arg0: i32) -> (i32, i32, i32) {
    %c0_i32 = arith.constant 0 : i32
    %c0_i32_0 = arith.constant 0 : i32
    %c0_i32_1 = arith.constant 0 : i32
    return %arg0, %c0_i32, %c0_i32_0 : i32, i32, i32
  }
  func.func @transform_6(%arg0: i32) -> (i32, i32, i32) {
    %c0_i32 = arith.constant 0 : i32
    %c0_i32_0 = arith.constant 0 : i32
    %c0_i32_1 = arith.constant 0 : i32
    return %arg0, %c0_i32, %c0_i32_0 : i32, i32, i32
  }
  func.func @transform_7(%arg0: i32) -> (i32, i32, i32) {
    %c0_i32 = arith.constant 0 : i32
    %c0_i32_0 = arith.constant 0 : i32
    %c0_i32_1 = arith.constant 0 : i32
    return %arg0, %c0_i32, %c0_i32_0 : i32, i32, i32
  }
  func.func @transform_8(%arg0: i32) -> (i32, i32, i32) {
    %c0_i32 = arith.constant 0 : i32
    %c0_i32_0 = arith.constant 0 : i32
    %c0_i32_1 = arith.constant 0 : i32
    return %arg0, %c0_i32, %c0_i32_0 : i32, i32, i32
  }
  func.func @transform_9(%arg0: i32) -> (i32, i32, i32) {
    %c0_i32 = arith.constant 0 : i32
    %c0_i32_0 = arith.constant 0 : i32
    %c0_i32_1 = arith.constant 0 : i32
    return %arg0, %c0_i32, %c0_i32_0 : i32, i32, i32
  }
  func.func @transform_10(%arg0: i32) -> (i32, i32, i32) {
    %c0_i32 = arith.constant 0 : i32
    %c0_i32_0 = arith.constant 0 : i32
    %c0_i32_1 = arith.constant 0 : i32
    return %arg0, %c0_i32, %c0_i32_0 : i32, i32, i32
  }
  func.func @transform_11(%arg0: i32) -> (i32, i32, i32) {
    %c0_i32 = arith.constant 0 : i32
    %c0_i32_0 = arith.constant 0 : i32
    %c0_i32_1 = arith.constant 0 : i32
    return %arg0, %c0_i32, %c0_i32_0 : i32, i32, i32
  }
  func.func @transform_12(%arg0: i32) -> (i32, i32, i32) {
    %c0_i32 = arith.constant 0 : i32
    %c0_i32_0 = arith.constant 0 : i32
    %c0_i32_1 = arith.constant 0 : i32
    return %arg0, %c0_i32, %c0_i32_0 : i32, i32, i32
  }
  func.func @transform_13(%arg0: i32) -> (i32, i32, i32) {
    %c0_i32 = arith.constant 0 : i32
    %c0_i32_0 = arith.constant 0 : i32
    %c0_i32_1 = arith.constant 0 : i32
    return %arg0, %c0_i32, %c0_i32_0 : i32, i32, i32
  }
  func.func @transform_14(%arg0: i32) -> (i32, i32, i32) {
    %c0_i32 = arith.constant 0 : i32
    %c0_i32_0 = arith.constant 0 : i32
    %c0_i32_1 = arith.constant 0 : i32
    return %arg0, %c0_i32, %c0_i32_0 : i32, i32, i32
  }
  func.func @transform_15(%arg0: i32) -> (i32, i32, i32) {
    %c0_i32 = arith.constant 0 : i32
    %c0_i32_0 = arith.constant 0 : i32
    %c0_i32_1 = arith.constant 0 : i32
    return %arg0, %c0_i32, %c0_i32_0 : i32, i32, i32
  }
  func.func @transform_16(%arg0: i32) -> (i32, i32, i32) {
    %c0_i32 = arith.constant 0 : i32
    %c0_i32_0 = arith.constant 0 : i32
    %c0_i32_1 = arith.constant 0 : i32
    return %arg0, %c0_i32, %c0_i32_0 : i32, i32, i32
  }
  func.func @transform_17(%arg0: i32) -> (i32, i32) {
    %c0_i32 = arith.constant 0 : i32
    %c0_i32_0 = arith.constant 0 : i32
    %c0_i32_1 = arith.constant 0 : i32
    return %c0_i32, %c0_i32_0 : i32, i32
  }
}

</mosaic_0001>

<bundles_post_ra>
// kernel: bs_side_reconstructor_forward.2
= control target key start
LH: loop header
LB: loop body
LE: loop exit
PB: predicated region body
PF: predicated region fallthrough
CT: control target
= control target key end

     0   :  { %8 = vsyncpa [#allocation3], 0  ;;  %s6577_s0 = inlined_call_operand.hbm [shape: f32[2,2048], index: 0, kind: input, shape index: {}]   ;;  %s6578_s1 = inlined_call_operand.hbm [shape: bf16[2048,2048], index: 1, kind: input, shape index: {}]   ;;  %s6579_s2 = inlined_call_operand.hbm [shape: f32[1,2048], index: 2, kind: input, shape index: {}]   ;;  %s6580_s3 = inlined_call_operand.vmem [shape: f32[2,2048], index: 3, kind: output, shape index: {}]  }
   0x1   :  { %9 = vsyncpa [#allocation5], 0 }
   0x2   :  { %11 = vsyncpa [#allocation5 + $0x1], 0  ;;  %s5801_s12 = smov 0   ;;  %s5803_s13 = smov 0  }
   0x3   :  { %s5805_s14 = smov 0   ;;  %s5807_s15 = smov 0  }
   0x4 LB: > { %s5822_s16 = sadd.s32 1, %s5772_s15   ;;  %s45_s17 = sadd.s32 1, %s5768_s14  ;;  %s5772_s15 = sphi %s5807_s15, %s6601_s15   ;;  %s5768_s14 = sphi %s5805_s14, %s6600_s14   ;;  %s5764_s13 = sphi %s5803_s13, %s6599_s13   ;;  %s5760_s12 = sphi %s5801_s12, %s6598_s12  }
   0x5   : > { %s42_s18 = ssub.s32 %s5772_s15, %s5822_s16  ;;  %p52_p0 = scmp.ne.s32.totalorder %s5768_s14, %s5764_s13 }
   0x6   : > { %p43_p1 = scmp.eq.s32.totalorder %s42_s18, 0  ;;  %p53_p2 = scmp.eq.s32.totalorder %s5772_s15, 0 }
   0x7   : > { %p4835_p3 = scmp.lt.s32.totalorder %s5772_s15, 4  ;;  %s145_s20 = sand.u32 1, %s5772_s15  }
   0x8   : > { %s5832_s19 = scalar_select %p43_p1, %s5768_s14, %s45_s17  }
   0x9   : > { %p54_p4 = por %p53_p2, %p52_p0  ;;  %s147_s21 = sand.u32 1, %s5768_s14  }
   0xa   : > { %s4227_s22 = sshll.u32 %s147_s21, 12  ;;  %s4753_s23 = sshll.u32 %s5772_s15, 8 }
   0xb   : > { %s5842_s26 = scalar_lea.hbm %s6578_s1, %s4753_s23  ;;  %s149_s27 = scalar_lea.vmem [#allocation4], %s4227_s22 }
   0xc   : > { %s156_s28 = sshll.u32 %s149_s27, 4  ;;  %p5844_p5 = pnand %p4835_p3, %p54_p4  ;;  %s5848_s28 = int_to_ptr.vmem [resolvable:$true] %s156_s28 }
   0xd   : > { %s5850_s30 = scalar_lea.sflag [#allocation5], %s145_s20  ;;  %s5646_s4 = scalar_lea.hbm %s5842_s26, 65536 }
   0xe   : > { %s6587_s29 = scalar_select %p5844_p5, 1, 0 }
   0xf   : > { %p5647_p6 = scmp.ne.s32.totalorder %s5842_s26, %s5646_s4  ;;  %p6582_p7 = pneg %p5844_p5 }
  0x10   : > { %s5651_s7 = scalar_lea.hbm %s6578_s1, 262144  ;;  %p5652_p10 = scmp.lt.u32.totalorder %s5842_s26, %s6578_s1 }
  0x11   : > { %p5649_p8 = pnand %p6582_p7, %p5647_p6  ;;  %p5653_p11 = scmp.lt.u32.totalorder %s5651_s7, %s5646_s4 }
  0x12   : > { %p5655_p13 = scmp.lt.u32.totalorder %s5646_s4, %s5842_s26 }
  0x13   : > { %p5650_p9 = pneg %p5649_p8  ;;  %p5654_p12 = por %p5653_p11, %p5652_p10 }
  0x15   : > { %p5656_p0 = por %p5655_p13, %p5654_p12 }
  0x17   : > { %p5657_p1 = pnand %p5656_p0, %p5650_p9 }
  0x19   : > { %5660 = shalt.err (!%p5657_p1)
}
  0x1a   : > { %s5661_s10 = scalar_lea.vmem %s5848_s28, 65536  ;;  %s5774_s11 = smov [#allocation4]  }
  0x1b   : > { %p5662_p2 = scmp.ne.s32.totalorder %s5848_s28, %s5661_s10  ;;  %s5666_s17 = sshll.u32 %s5774_s11, 4  ;;  %s5667_s17 = int_to_ptr.vmem [resolvable:$false] %s5666_s17 }
  0x1c   : > { %s5668_s18 = scalar_lea.vmem %s5667_s17, 131072  ;;  %p5669_p6 = scmp.lt.s32.totalorder %s5848_s28, %s5667_s17 }
  0x1d   : > { %p5664_p3 = pnand %p5662_p2, %p6582_p7  ;;  %p5670_p8 = scmp.lt.s32.totalorder %s5668_s18, %s5661_s10 }
  0x1f   : > { %p5665_p4 = pneg %p5664_p3  ;;  %p5671_p10 = por %p5670_p8, %p5669_p6 }
  0x21   : > { %p5672_p11 = pnand %p5671_p10, %p5665_p4 }
  0x23   : > { %5675 = shalt.err (!%p5672_p11)
}
  0x24   : > { %s5775_s20 = smov 1024   ;;  %s5776_s22 = smov 256  }
  0x25   : > { %s5777_s23 = smov 16   ;;  %s5879_s24 = sadd.s32 4294967295, %s5772_s15  }
  0x26   : > { %4830 = dma.hbm_to_vmem [thread:$0]  (!%p5844_p5), %s5842_s26, 65536, %s5848_s28, %s5850_s30, %s5775_s20, %s5776_s22, %s5777_s23  }
  0x27   : > { %p58_p9 = scmp.ne.s32.totalorder %s5764_s13, %s5760_s12  ;;  %p6581_p12 = scmp.eq.s32.totalorder %s5879_s24, 0 }
  0x28   : > { %p4224_p13 = scmp.ge.s32.totalorder %s5772_s15, 1  ;;  %p121_p0 = scmp.lt.s32.totalorder %s5772_s15, 5 }
  0x29   : > { %p5888_p1 = por %p6581_p12, %p58_p9  ;;  %s5778_s26 = smov [#allocation2]  }
  0x2a   : > { %p5892_p2 = pnand %p4224_p13, %p121_p0  ;;  %s134_s28 = sshll.u32 %s5778_s26, 4  ;;  %s135_s28 = int_to_ptr.vmem [resolvable:$true] %s134_s28 }
  0x2b   : > { %s6588_s25 = scalar_select %p5888_p1, 1, 0 }
  0x2c   : > { %s6589_s27 = scalar_select %p5892_p2, 1, 0 }
  0x2d   : > { %s4230_s4 = sshll.u32 %s147_s21, 2  ;;  %p4823_p3 = pneg %p5892_p2 }
  0x2e   : > { %s4754_s12 = sshll.u32 %s5772_s15, 6  ;;  %s170_s9 = scalar_lea.vmem [#allocation6], %s4230_s4 }
  0x2f   : > { %p5903_p4 = pnand %p4823_p3, %p6581_p12  ;;  %s5910_s8 = scalar_lea.hbm %s6579_s2, %s4754_s12 }
  0x30   : > { %s178_s10 = sshll.u32 %s170_s9, 4  ;;  %s5676_s15 = scalar_lea.hbm %s6577_s0, 512  ;;  %s5912_s10 = int_to_ptr.vmem [resolvable:$true] %s178_s10 }
  0x31   : > { %p5677_p6 = scmp.ne.s32.totalorder %s6577_s0, %s5676_s15  ;;  %p5678_p8 = pneg %p5903_p4 }
  0x32   : > { %p5683_p9 = scmp.lt.u32.totalorder %s5676_s15, %s6577_s0 }
  0x33   : > { %p5679_p10 = pnand %p5678_p8, %p5677_p6 }
  0x35   : > { %p5680_p11 = pneg %p5679_p10 }
  0x37   : > { %p5685_p13 = pnand %p5683_p9, %p5680_p11 }
  0x39   : > { %5688 = shalt.err (!%p5685_p13)
}
  0x3a   : > { %s5689_s23 = scalar_lea.vmem %s135_s28, 512  ;;  %p5697_p7 = scmp.lt.s32.totalorder %s135_s28, %s135_s28 }
  0x3b   : > { %p5690_p0 = scmp.ne.s32.totalorder %s135_s28, %s5689_s23  ;;  %p5698_p1 = scmp.lt.s32.totalorder %s5689_s23, %s5689_s23 }
  0x3d   : > { %p5692_p3 = pnand %p5690_p0, %p5678_p8  ;;  %p5699_p2 = por %p5698_p1, %p5697_p7 }
  0x3f   : > { %p5693_p12 = pneg %p5692_p3 }
  0x41   : > { %p5700_p5 = pnand %p5699_p2, %p5693_p12 }
  0x43   : > { %5703 = shalt.err (!%p5700_p5)
}
  0x44   : > { %4826 = dma.hbm_to_vmem [thread:$0]  (!%p5903_p4), %s6577_s0, 512, %s135_s28, [#allocation3]  }
  0x45   : > { %s5704_s12 = scalar_lea.hbm %s5910_s8, 64  ;;  %p6591_p8 = scmp.ne.s32.totalorder %s6587_s29, 0 }
  0x46   : > { %p5705_p6 = scmp.ne.s32.totalorder %s5910_s8, %s5704_s12  ;;  %s5709_s9 = scalar_lea.hbm %s6579_s2, 256 }
  0x47   : > { %p6592_p10 = pneg %p6591_p8  ;;  %p5710_p5 = scmp.lt.u32.totalorder %s5910_s8, %s6579_s2 }
  0x48   : > { %p5711_p7 = scmp.lt.u32.totalorder %s5709_s9, %s5704_s12  ;;  %p5713_p1 = scmp.lt.u32.totalorder %s5704_s12, %s5910_s8 }
  0x49   : > { %p5707_p11 = pnand %p5705_p6, %p6592_p10 }
  0x4a   : > { %p5712_p12 = por %p5711_p7, %p5710_p5 }
  0x4b   : > { %p5708_p9 = pneg %p5707_p11 }
  0x4c   : > { %p5714_p2 = por %p5713_p1, %p5712_p12 }
  0x4e   : > { %p5715_p13 = pnand %p5714_p2, %p5708_p9 }
  0x50   : > { %5718 = shalt.err (!%p5715_p13)
}
  0x51   : > { %s5719_s28 = scalar_lea.vmem %s5912_s10, 64  ;;  %p6593_p0 = pmov %p6592_p10 }
  0x52   : > { %p5720_p4 = scmp.ne.s32.totalorder %s5912_s10, %s5719_s28  ;;  %s5779_s11 = smov [#allocation6]  }
  0x53   : > { %s5724_s15 = sshll.u32 %s5779_s11, 4  ;;  %s5725_s15 = int_to_ptr.vmem [resolvable:$false] %s5724_s15 }
  0x54   : > { %p5722_p3 = pnand %p5720_p4, %p6593_p0  ;;  %s5726_s17 = scalar_lea.vmem %s5725_s15, 128 }
  0x55   : > { %p5727_p10 = scmp.lt.s32.totalorder %s5912_s10, %s5725_s15  ;;  %p5728_p11 = scmp.lt.s32.totalorder %s5726_s17, %s5719_s28 }
  0x56   : > { %p5723_p6 = pneg %p5722_p3 }
  0x57   : > { %p5729_p5 = por %p5728_p11, %p5727_p10 }
  0x59   : > { %p5730_p7 = pnand %p5729_p5, %p5723_p6 }
  0x5b   : > { %5733 = shalt.err (!%p5730_p7)
}
  0x5c   : > { %4833 = dma.hbm_to_vmem [thread:$0]  (!%p6591_p8), %s5910_s8, 64, %s5912_s10, %s5850_s30  }
  0x5d   : > { %p6594_p9 = scmp.ne.s32.totalorder %s6589_s27, 0 }
  0x5e   : > { %p6595_p12 = scmp.eq.s32.totalorder (!%p6594_p9), %s5879_s24, 0 }
  0x5f   : > { %187 = sbr.rel (%p6594_p9) target bundleno = 843 (0x34b), region = 32 }
  0x66   : > { %5751 = dma.done.wait (%p6595_p12), [#allocation3], 512   ;;  %p6596_p1 = pmov %p6595_p12 }
  0x67   : > { %s193_s18 = sand.u32 1, %s5879_s24   ;;  %s195_s20 = sand.u32 1, %s5764_s13  }
  0x68   : > { %5753 = vsyncadd (%p6596_p1), [#allocation3], 4294966784  ;;  %s4235_s29 = sshll.u32 %s195_s20, 12  ;;  %s194_s22 = scalar_lea.sflag [#allocation5], %s193_s18 }
  0x69   : > { %s5964_s23 = scalar_lea.vmem [#allocation4], %s4235_s29  ;;  %p6597_p8 = scmp.ne.s32.totalorder %s6588_s25, 0 }
  0x6b   : > { %5755 = dma.done.wait (%p6597_p8), %s194_s22, 65600  }
  0x6c   : > { %5757 = vsyncadd (%p6597_p8), %s194_s22, 4294901696  ;;  %v4874_v0 = vld [vmem:[%s5964_s23 + $0x4] ss:$16 sps:$4 sm:$0xff]   ;;  %v4876_v1 = vld [vmem:[%s5964_s23 + $0xc] ss:$16 sps:$4 sm:$0xff]   ;;  %v766_v38 = vlaneseq  ;;  %s4236_s30 = sshll.u32 %s195_s20, 2 }
  0x6d   : > { %3444 = vmatprep.subr.bf16.mxu0 %v4874_v0  ;;  %v4878_v2 = vld [vmem:[%s5964_s23] ss:$16 sps:$4 sm:$0xff]   ;;  %v4879_v3 = vld [vmem:[%s5964_s23 + $0x8] ss:$16 sps:$4 sm:$0xff]   ;;  %3772 = vmatprep.subr.bf16.mxu1 %v4876_v1  ;;  %v4880_v4 = vld [vmem:[%s5964_s23 + $0x24] ss:$16 sps:$4 sm:$0xff]  }
  0x6e   : > { %3445 = vmatpush1.bf16.msra.mxu0 %v4878_v2  ;;  %3773 = vmatpush1.bf16.msra.mxu1 %v4879_v3  ;;  %v4882_v5 = vld [vmem:[%s5964_s23 + $0x2c] ss:$16 sps:$4 sm:$0xff]   ;;  %v4884_v6 = vld [vmem:[%s5964_s23 + $0x20] ss:$16 sps:$4 sm:$0xff]   ;;  %v4885_v7 = vld [vmem:[%s5964_s23 + $0x28] ss:$16 sps:$4 sm:$0xff]  }
  0x6f   : > { %3446 = vmatprep.subr.bf16.mxu0 %v4880_v4  ;;  %3774 = vmatprep.subr.bf16.mxu1 %v4882_v5  ;;  %v4886_v8 = vld [vmem:[%s5964_s23 + $0x44] ss:$16 sps:$4 sm:$0xff]   ;;  %v4888_v9 = vld [vmem:[%s5964_s23 + $0x4c] ss:$16 sps:$4 sm:$0xff]   ;;  %v4890_v10 = vld [vmem:[%s5964_s23 + $0x40] ss:$16 sps:$4 sm:$0xff]  }
  0x70   : > { %v4891_v11 = vld [vmem:[%s5964_s23 + $0x48] ss:$16 sps:$4 sm:$0xff]   ;;  %v4892_v12 = vld [vmem:[%s5964_s23 + $0x64] ss:$16 sps:$4 sm:$0xff]   ;;  %v4894_v13 = vld [vmem:[%s5964_s23 + $0x6c] ss:$16 sps:$4 sm:$0xff]  }
  0x71   : > { %v4896_v14 = vld [vmem:[%s5964_s23 + $0x60] ss:$16 sps:$4 sm:$0xff]   ;;  %v4897_v15 = vld [vmem:[%s5964_s23 + $0x68] ss:$16 sps:$4 sm:$0xff]   ;;  %v4898_v16 = vld [vmem:[%s5964_s23 + $0x84] ss:$16 sps:$4 sm:$0xff]  }
  0x72   : > { %3447 = vmatpush1.bf16.msra.mxu0 %v4884_v6  ;;  %3775 = vmatpush1.bf16.msra.mxu1 %v4885_v7  ;;  %v4900_v17 = vld [vmem:[%s5964_s23 + $0x8c] ss:$16 sps:$4 sm:$0xff]   ;;  %v4902_v18 = vld [vmem:[%s5964_s23 + $0x80] ss:$16 sps:$4 sm:$0xff]   ;;  %v4903_v19 = vld [vmem:[%s5964_s23 + $0x88] ss:$16 sps:$4 sm:$0xff]  }
  0x73   : > { %3448 = vmatprep.subr.bf16.mxu0 %v4886_v8  ;;  %3776 = vmatprep.subr.bf16.mxu1 %v4888_v9  ;;  %v4904_v20 = vld [vmem:[%s5964_s23 + $0xa4] ss:$16 sps:$4 sm:$0xff]   ;;  %v4906_v21 = vld [vmem:[%s5964_s23 + $0xac] ss:$16 sps:$4 sm:$0xff]   ;;  %v4908_v22 = vld [vmem:[%s5964_s23 + $0xa0] ss:$16 sps:$4 sm:$0xff]  }
  0x74   : > { %v4909_v23 = vld [vmem:[%s5964_s23 + $0xa8] ss:$16 sps:$4 sm:$0xff]   ;;  %v4910_v24 = vld [vmem:[%s5964_s23 + $0xc4] ss:$16 sps:$4 sm:$0xff]   ;;  %v4912_v25 = vld [vmem:[%s5964_s23 + $0xcc] ss:$16 sps:$4 sm:$0xff]  }
  0x75   : > { %v4914_v26 = vld [vmem:[%s5964_s23 + $0xc0] ss:$16 sps:$4 sm:$0xff]   ;;  %v4915_v27 = vld [vmem:[%s5964_s23 + $0xc8] ss:$16 sps:$4 sm:$0xff]   ;;  %v4916_v28 = vld [vmem:[%s5964_s23 + $0xe4] ss:$16 sps:$4 sm:$0xff]  }
  0x76   : > { %3449 = vmatpush1.bf16.msra.mxu0 %v4890_v10  ;;  %3777 = vmatpush1.bf16.msra.mxu1 %v4891_v11  ;;  %v4918_v29 = vld [vmem:[%s5964_s23 + $0xec] ss:$16 sps:$4 sm:$0xff]   ;;  %v4920_v30 = vld [vmem:[%s5964_s23 + $0xe0] ss:$16 sps:$4 sm:$0xff]   ;;  %v4921_v31 = vld [vmem:[%s5964_s23 + $0xe8] ss:$16 sps:$4 sm:$0xff]  }
  0x77   : > { %3450 = vmatprep.subr.bf16.mxu0 %v4892_v12  ;;  %3778 = vmatprep.subr.bf16.mxu1 %v4894_v13  ;;  %v4922_v32 = vld [vmem:[%s5964_s23 + $0x104] ss:$16 sps:$4 sm:$0xff]   ;;  %v4924_v33 = vld [vmem:[%s5964_s23 + $0x10c] ss:$16 sps:$4 sm:$0xff]   ;;  %v4926_v34 = vld [vmem:[%s5964_s23 + $0x100] ss:$16 sps:$4 sm:$0xff]  }
  0x78   : > { %v4927_v35 = vld [vmem:[%s5964_s23 + $0x108] ss:$16 sps:$4 sm:$0xff]   ;;  %v5780_v36 = vmov 1983009808   ;;  %v4928_v39 = vld [vmem:[%s5964_s23 + $0x124] ss:$16 sps:$4 sm:$0xff]  }
  0x79   : > { %v764_v37 = vunpack.c.l.s4 %v5780_v36  ;;  %v4930_v40 = vld [vmem:[%s5964_s23 + $0x12c] ss:$16 sps:$4 sm:$0xff]   ;;  %v4932_v41 = vld [vmem:[%s5964_s23 + $0x120] ss:$16 sps:$4 sm:$0xff]   ;;  %v6009_v43 = vshrl.u32 %v766_v38, 7  ;;  %s4237_s25 = sshll.u32 %s5879_s24, 2 }
  0x7a   : > { %3451 = vmatpush1.bf16.msra.mxu0 %v4896_v14  ;;  %3779 = vmatpush1.bf16.msra.mxu1 %v4897_v15  ;;  %v4933_v44 = vld [vmem:[%s5964_s23 + $0x128] ss:$16 sps:$4 sm:$0xff]   ;;  %v4934_v45 = vld [vmem:[%s5964_s23 + $0x144] ss:$16 sps:$4 sm:$0xff]   ;;  %v4936_v46 = vld [vmem:[%s5964_s23 + $0x14c] ss:$16 sps:$4 sm:$0xff]  }
  0x7b   : > { %3452 = vmatprep.subr.bf16.mxu0 %v4898_v16  ;;  %3780 = vmatprep.subr.bf16.mxu1 %v4900_v17  ;;  %v765_v42 = vunpack.c.0.s8 %v764_v37  ;;  %v4938_v47 = vld [vmem:[%s5964_s23 + $0x140] ss:$16 sps:$4 sm:$0xff]   ;;  %v4939_v48 = vld [vmem:[%s5964_s23 + $0x148] ss:$16 sps:$4 sm:$0xff]   ;;  %v4940_v50 = vld [vmem:[%s5964_s23 + $0x164] ss:$16 sps:$4 sm:$0xff]  }
  0x7c   : > { %v4942_v51 = vld [vmem:[%s5964_s23 + $0x16c] ss:$16 sps:$4 sm:$0xff]   ;;  %v242_v52 = vld [vmem:[#allocation2] sm:$0xff]  ;;  %v4945_v55 = vld [vmem:[%s5964_s23 + $0x168] ss:$16 sps:$4 sm:$0xff]   ;;  %s206_s27 = scalar_lea.vmem [#allocation6], %s4236_s30 }
  0x7d   : > { %v6017_v49 = vsub.s32 %v765_v42, %v6009_v43  ;;  %v4944_v53 = vld [vmem:[%s5964_s23 + $0x160] ss:$16 sps:$4 sm:$0xff]   ;;  %v4946_v56 = vld [vmem:[%s5964_s23 + $0x184] ss:$16 sps:$4 sm:$0xff]   ;;  %v4948_v57 = vld [vmem:[%s5964_s23 + $0x18c] ss:$16 sps:$4 sm:$0xff]   ;;  %v762_v4 = vcombine.high %v242_v52, %v242_v52 }
  0x7e   : > { %3453 = vmatpush1.bf16.msra.mxu0 %v4902_v18  ;;  %3781 = vmatpush1.bf16.msra.mxu1 %v4903_v19  ;;  %v4950_v59 = vld [vmem:[%s5964_s23 + $0x180] ss:$16 sps:$4 sm:$0xff]   ;;  %v4951_v61 = vld [vmem:[%s5964_s23 + $0x188] ss:$16 sps:$4 sm:$0xff]   ;;  %v4952_v62 = vld [vmem:[%s5964_s23 + $0x1a4] ss:$16 sps:$4 sm:$0xff]  }
  0x7f   : > { %3454 = vmatprep.subr.bf16.mxu0 %v4904_v20  ;;  %3782 = vmatprep.subr.bf16.mxu1 %v4906_v21  ;;  %v769_v54 = vrot.slane %v242_v52, %v6017_v49  ;;  %v4954_v63 = vld [vmem:[%s5964_s23 + $0x1ac] ss:$16 sps:$4 sm:$0xff]   ;;  %v4956_v0 = vld [vmem:[%s5964_s23 + $0x1a0] ss:$16 sps:$4 sm:$0xff]   ;;  %v4957_v1 = vld [vmem:[%s5964_s23 + $0x1a8] ss:$16 sps:$4 sm:$0xff]   ;;  %v6039_v9 = vrot.slane %v762_v4, %v6017_v49 }
  0x80   : > { %v4958_v2 = vld [vmem:[%s5964_s23 + $0x1c4] ss:$16 sps:$4 sm:$0xff]   ;;  %v4960_v3 = vld [vmem:[%s5964_s23 + $0x1cc] ss:$16 sps:$4 sm:$0xff]   ;;  %v4962_v5 = vld [vmem:[%s5964_s23 + $0x1c0] ss:$16 sps:$4 sm:$0xff]  }
  0x81   : > { %v777_v58 = vcombine.high %v769_v54, %v769_v54  ;;  %v4963_v6 = vld [vmem:[%s5964_s23 + $0x1c8] ss:$16 sps:$4 sm:$0xff]   ;;  %v4964_v7 = vld [vmem:[%s5964_s23 + $0x1e4] ss:$16 sps:$4 sm:$0xff]   ;;  %v4966_v8 = vld [vmem:[%s5964_s23 + $0x1ec] ss:$16 sps:$4 sm:$0xff]   ;;  %v778_v14 = vcombine.high %v6039_v9, %v6039_v9  ;;  %v846_v16 = vpack.c.bf16 %v769_v54, %v769_v54 }
  0x82   : > { %3455 = vmatpush1.bf16.msra.mxu0 %v4908_v22  ;;  %3783 = vmatpush1.bf16.msra.mxu1 %v4909_v23  ;;  %v4968_v10 = vld [vmem:[%s5964_s23 + $0x1e0] ss:$16 sps:$4 sm:$0xff]   ;;  %v4969_v11 = vld [vmem:[%s5964_s23 + $0x1e8] ss:$16 sps:$4 sm:$0xff]   ;;  %v4973_v12 = vld [vmem:[%s5964_s23 + $0x204] ss:$16 sps:$4 sm:$0xff]  }
  0x83   : > { %3456 = vmatprep.subr.bf16.mxu0 %v4910_v24  ;;  %3784 = vmatprep.subr.bf16.mxu1 %v4912_v25  ;;  %v847_v60 = vpack.c.bf16 %v777_v58, %v777_v58  ;;  %v4976_v13 = vld [vmem:[%s5964_s23 + $0x20c] ss:$16 sps:$4 sm:$0xff]   ;;  %v4971_v15 = vld [vmem:[%s5964_s23 + $0x200] ss:$16 sps:$4 sm:$0xff]   ;;  %v4974_v17 = vld [vmem:[%s5964_s23 + $0x208] ss:$16 sps:$4 sm:$0xff]   ;;  %v849_v20 = vpack.c.bf16 %v778_v14, %v778_v14 }
  0x84   : > { %v4979_v18 = vld [vmem:[%s5964_s23 + $0x224] ss:$16 sps:$4 sm:$0xff]   ;;  %v4982_v19 = vld [vmem:[%s5964_s23 + $0x22c] ss:$16 sps:$4 sm:$0xff]   ;;  %v4977_v21 = vld [vmem:[%s5964_s23 + $0x220] ss:$16 sps:$4 sm:$0xff]  }
  0x85   : > { %3476 = vmatprep.mubr.bf16.mxu0 %v847_v60  ;;  %3804 = vmatprep.mubr.bf16.mxu1 %v847_v60  ;;  %v4980_v22 = vld [vmem:[%s5964_s23 + $0x228] ss:$16 sps:$4 sm:$0xff]   ;;  %v4985_v23 = vld [vmem:[%s5964_s23 + $0x244] ss:$16 sps:$4 sm:$0xff]   ;;  %v4988_v24 = vld [vmem:[%s5964_s23 + $0x24c] ss:$16 sps:$4 sm:$0xff]  }
  0x86   : > { %3457 = vmatpush1.bf16.msra.mxu0 %v4914_v26  ;;  %3785 = vmatpush1.bf16.msra.mxu1 %v4915_v27  ;;  %v4983_v25 = vld [vmem:[%s5964_s23 + $0x240] ss:$16 sps:$4 sm:$0xff]   ;;  %v4986_v26 = vld [vmem:[%s5964_s23 + $0x248] ss:$16 sps:$4 sm:$0xff]   ;;  %v4991_v27 = vld [vmem:[%s5964_s23 + $0x264] ss:$16 sps:$4 sm:$0xff]  }
  0x87   : > { %3458 = vmatprep.subr.bf16.mxu0 %v4916_v28  ;;  %3786 = vmatprep.subr.bf16.mxu1 %v4918_v29  ;;  %v4994_v28 = vld [vmem:[%s5964_s23 + $0x26c] ss:$16 sps:$4 sm:$0xff]   ;;  %v4989_v29 = vld [vmem:[%s5964_s23 + $0x260] ss:$16 sps:$4 sm:$0xff]   ;;  %v5004_v38 = vld [vmem:[%s5964_s23 + $0x2a8] ss:$16 sps:$4 sm:$0xff]  }
  0x88   : > { %v5006_v36 = vld [vmem:[%s5964_s23 + $0x2ac] ss:$16 sps:$4 sm:$0xff]   ;;  %v5001_v37 = vld [vmem:[%s5964_s23 + $0x2a0] ss:$16 sps:$4 sm:$0xff]   ;;  %v5010_v42 = vld [vmem:[%s5964_s23 + $0x2c8] ss:$16 sps:$4 sm:$0xff]  }
  0x89   : > { %v5022_v52 = vld [vmem:[%s5964_s23 + $0x308] ss:$16 sps:$4 sm:$0xff]   ;;  %v5030_v54 = vld [vmem:[%s5964_s23 + $0x32c] ss:$16 sps:$4 sm:$0xff]   ;;  %v5063_v14 = vld [vmem:[%s5964_s23 + $0x3e4] ss:$16 sps:$4 sm:$0xff]  }
  0x8a   : > { %3459 = vmatpush1.bf16.msra.mxu0 %v4920_v30  ;;  %3787 = vmatpush1.bf16.msra.mxu1 %v4921_v31  ;;  %v4992_v30 = vld [vmem:[%s5964_s23 + $0x268] ss:$16 sps:$4 sm:$0xff]   ;;  %v4997_v31 = vld [vmem:[%s5964_s23 + $0x284] ss:$16 sps:$4 sm:$0xff]   ;;  %v5036_v58 = vld [vmem:[%s5964_s23 + $0x34c] ss:$16 sps:$4 sm:$0xff]  }
  0x8b   : > { %3460 = vmatprep.subr.bf16.mxu0 %v4922_v32  ;;  %3788 = vmatprep.subr.bf16.mxu1 %v4924_v33  ;;  %v5000_v32 = vld [vmem:[%s5964_s23 + $0x28c] ss:$16 sps:$4 sm:$0xff]   ;;  %v4995_v33 = vld [vmem:[%s5964_s23 + $0x280] ss:$16 sps:$4 sm:$0xff]   ;;  %v5034_v60 = vld [vmem:[%s5964_s23 + $0x348] ss:$16 sps:$4 sm:$0xff]  }
  0x8c   : > { %v5046_v4 = vld [vmem:[%s5964_s23 + $0x388] ss:$16 sps:$4 sm:$0xff]   ;;  %p237_p2 = scmp.lt.s32.totalorder %s4237_s25, 15 }
  0x8e   : > { %3461 = vmatpush1.bf16.msra.mxu0 %v4926_v34  ;;  %3789 = vmatpush1.bf16.msra.mxu1 %v4927_v35  ;;  %v4998_v34 = vld [vmem:[%s5964_s23 + $0x288] ss:$16 sps:$4 sm:$0xff]   ;;  %v5003_v35 = vld [vmem:[%s5964_s23 + $0x2a4] ss:$16 sps:$4 sm:$0xff]   ;;  %s6603_s25 = smov (!%p237_p2, %s4237_s25), 15 }
  0x8f   : > { %3462 = vmatprep.subr.bf16.mxu0 %v4928_v39  ;;  %3790 = vmatprep.subr.bf16.mxu1 %v4930_v40  ;;  %v5009_v39 = vld [vmem:[%s5964_s23 + $0x2c4] ss:$16 sps:$4 sm:$0xff]   ;;  %v5012_v40 = vld [vmem:[%s5964_s23 + $0x2cc] ss:$16 sps:$4 sm:$0xff]   ;;  %s4238_s24 = sshll.u32 %s6603_s25, 1 }
  0x90   : > { %s240_s26 = scalar_lea.vmem %s6580_s3, %s4238_s24 }
  0x92   : > { %3463 = vmatpush1.bf16.msra.mxu0 %v4932_v41  ;;  %3791 = vmatpush1.bf16.msra.mxu1 %v4933_v44  ;;  %v5007_v41 = vld [vmem:[%s5964_s23 + $0x2c0] ss:$16 sps:$4 sm:$0xff]   ;;  %v5015_v44 = vld [vmem:[%s5964_s23 + $0x2e4] ss:$16 sps:$4 sm:$0xff]  }
  0x93   : > { %3464 = vmatprep.subr.bf16.mxu0 %v4934_v45  ;;  %3792 = vmatprep.subr.bf16.mxu1 %v4936_v46  ;;  %v5018_v45 = vld [vmem:[%s5964_s23 + $0x2ec] ss:$16 sps:$4 sm:$0xff]   ;;  %v5013_v46 = vld [vmem:[%s5964_s23 + $0x2e0] ss:$16 sps:$4 sm:$0xff]  }
  0x96   : > { %3465 = vmatpush1.bf16.msra.mxu0 %v4938_v47  ;;  %3793 = vmatpush1.bf16.msra.mxu1 %v4939_v48  ;;  %v5016_v47 = vld [vmem:[%s5964_s23 + $0x2e8] ss:$16 sps:$4 sm:$0xff]   ;;  %v5021_v48 = vld [vmem:[%s5964_s23 + $0x304] ss:$16 sps:$4 sm:$0xff]  }
  0x97   : > { %3466 = vmatprep.subr.bf16.mxu0 %v4940_v50  ;;  %3794 = vmatprep.subr.bf16.mxu1 %v4942_v51  ;;  %v5024_v50 = vld [vmem:[%s5964_s23 + $0x30c] ss:$16 sps:$4 sm:$0xff]   ;;  %v5019_v51 = vld [vmem:[%s5964_s23 + $0x300] ss:$16 sps:$4 sm:$0xff]  }
  0x9a   : > { %3467 = vmatpush1.bf16.msra.mxu0 %v4944_v53  ;;  %3795 = vmatpush1.bf16.msra.mxu1 %v4945_v55  ;;  %v5027_v53 = vld [vmem:[%s5964_s23 + $0x324] ss:$16 sps:$4 sm:$0xff]   ;;  %v5025_v55 = vld [vmem:[%s5964_s23 + $0x320] ss:$16 sps:$4 sm:$0xff]  }
  0x9b   : > { %3468 = vmatprep.subr.bf16.mxu0 %v4946_v56  ;;  %3796 = vmatprep.subr.bf16.mxu1 %v4948_v57  ;;  %v5028_v56 = vld [vmem:[%s5964_s23 + $0x328] ss:$16 sps:$4 sm:$0xff]   ;;  %v5033_v57 = vld [vmem:[%s5964_s23 + $0x344] ss:$16 sps:$4 sm:$0xff]  }
  0x9e   : > { %3469 = vmatpush1.bf16.msra.mxu0 %v4950_v59  ;;  %3797 = vmatpush1.bf16.msra.mxu1 %v4951_v61  ;;  %v5031_v59 = vld [vmem:[%s5964_s23 + $0x340] ss:$16 sps:$4 sm:$0xff]   ;;  %v5039_v61 = vld [vmem:[%s5964_s23 + $0x364] ss:$16 sps:$4 sm:$0xff]  }
  0x9f   : > { %3470 = vmatprep.subr.bf16.mxu0 %v4952_v62  ;;  %3798 = vmatprep.subr.bf16.mxu1 %v4954_v63  ;;  %v5042_v62 = vld [vmem:[%s5964_s23 + $0x36c] ss:$16 sps:$4 sm:$0xff]   ;;  %v5037_v63 = vld [vmem:[%s5964_s23 + $0x360] ss:$16 sps:$4 sm:$0xff]  }
  0xa2   : > { %3471 = vmatpush1.bf16.msra.mxu0 %v4956_v0  ;;  %3799 = vmatpush1.bf16.msra.mxu1 %v4957_v1  ;;  %v5040_v0 = vld [vmem:[%s5964_s23 + $0x368] ss:$16 sps:$4 sm:$0xff]   ;;  %v5045_v1 = vld [vmem:[%s5964_s23 + $0x384] ss:$16 sps:$4 sm:$0xff]  }
  0xa3   : > { %3472 = vmatprep.subr.bf16.mxu0 %v4958_v2  ;;  %3800 = vmatprep.subr.bf16.mxu1 %v4960_v3  ;;  %v5048_v2 = vld [vmem:[%s5964_s23 + $0x38c] ss:$16 sps:$4 sm:$0xff]   ;;  %v5043_v3 = vld [vmem:[%s5964_s23 + $0x380] ss:$16 sps:$4 sm:$0xff]  }
  0xa6   : > { %3473 = vmatpush1.bf16.msra.mxu0 %v4962_v5  ;;  %3801 = vmatpush1.bf16.msra.mxu1 %v4963_v6  ;;  %v5051_v5 = vld [vmem:[%s5964_s23 + $0x3a4] ss:$16 sps:$4 sm:$0xff]   ;;  %v5054_v6 = vld [vmem:[%s5964_s23 + $0x3ac] ss:$16 sps:$4 sm:$0xff]  }
  0xa7   : > { %3474 = vmatprep.subr.bf16.mxu0 %v4964_v7  ;;  %3802 = vmatprep.subr.bf16.mxu1 %v4966_v8  ;;  %v5049_v7 = vld [vmem:[%s5964_s23 + $0x3a0] ss:$16 sps:$4 sm:$0xff]   ;;  %v5052_v8 = vld [vmem:[%s5964_s23 + $0x3a8] ss:$16 sps:$4 sm:$0xff]  }
  0xaa   : > { %3475 = vmatpush1.bf16.msra.mxu0 %v4968_v10  ;;  %3803 = vmatpush1.bf16.msra.mxu1 %v4969_v11  ;;  %v5057_v10 = vld [vmem:[%s5964_s23 + $0x3c4] ss:$16 sps:$4 sm:$0xff]   ;;  %v5060_v11 = vld [vmem:[%s5964_s23 + $0x3cc] ss:$16 sps:$4 sm:$0xff]  }
  0xab   : > { %3485 = vmatprep.subr.bf16.mxu0 %v4973_v12  ;;  %3813 = vmatprep.subr.bf16.mxu1 %v4976_v13  ;;  %v5055_v12 = vld [vmem:[%s5964_s23 + $0x3c0] ss:$16 sps:$4 sm:$0xff]   ;;  %v5058_v13 = vld [vmem:[%s5964_s23 + $0x3c8] ss:$16 sps:$4 sm:$0xff]  }
  0xad   : > { %3477 = vmatmul.mubr.bf16.vlgmr.msra.gmra.mrb[0].mxu0 %v846_v16  ;;  %3805 = vmatmul.mubr.bf16.vlgmr.msra.gmra.mrb[0].mxu1 %v846_v16  ;;  %v5061_v16 = vld [vmem:[%s5964_s23 + $0x3e0] ss:$16 sps:$4 sm:$0xff]  }
  0xae   : > { %3486 = vmatpush1.bf16.msra.mxu0 %v4971_v15  ;;  %3814 = vmatpush1.bf16.msra.mxu1 %v4974_v17  ;;  %v5066_v15 = vld [vmem:[%s5964_s23 + $0x3ec] ss:$16 sps:$4 sm:$0xff]   ;;  %v5064_v17 = vld [vmem:[%s5964_s23 + $0x3e8] ss:$16 sps:$4 sm:$0xff]  }
  0xaf   : > { %3487 = vmatprep.subr.bf16.mxu0 %v4979_v18  ;;  %3815 = vmatprep.subr.bf16.mxu1 %v4982_v19  ;;  %v5069_v18 = vld [vmem:[%s5964_s23 + $0x404] ss:$16 sps:$4 sm:$0xff]   ;;  %v5072_v19 = vld [vmem:[%s5964_s23 + $0x40c] ss:$16 sps:$4 sm:$0xff]  }
  0xb0   : > { %3517 = vmatprep.mubr.bf16.mxu0 %v849_v20  ;;  %3845 = vmatprep.mubr.bf16.mxu1 %v849_v20  ;;  %v5067_v20 = vld [vmem:[%s5964_s23 + $0x400] ss:$16 sps:$4 sm:$0xff]  }
  0xb2   : > { %3488 = vmatpush1.bf16.msra.mxu0 %v4977_v21  ;;  %3816 = vmatpush1.bf16.msra.mxu1 %v4980_v22  ;;  %v848_v21 = vpack.c.bf16 %v6039_v9, %v6039_v9  ;;  %v5070_v22 = vld [vmem:[%s5964_s23 + $0x408] ss:$16 sps:$4 sm:$0xff]  }
  0xb3   : > { %3489 = vmatprep.subr.bf16.mxu0 %v4985_v23  ;;  %3817 = vmatprep.subr.bf16.mxu1 %v4988_v24  ;;  %v6115_v23 = vld [vmem:[#allocation2 + $0x8] sm:$0xff]  ;;  %v5075_v24 = vld [vmem:[%s5964_s23 + $0x424] ss:$16 sps:$4 sm:$0xff]  }
  0xb6   : > { %3490 = vmatpush1.bf16.msra.mxu0 %v4983_v25  ;;  %3818 = vmatpush1.bf16.msra.mxu1 %v4986_v26  ;;  %v5078_v25 = vld [vmem:[%s5964_s23 + $0x42c] ss:$16 sps:$4 sm:$0xff]   ;;  %v6121_v26 = vrot.slane %v6115_v23, %v6017_v49 }
  0xb7   : > { %3491 = vmatprep.subr.bf16.mxu0 %v4991_v27  ;;  %3819 = vmatprep.subr.bf16.mxu1 %v4994_v28  ;;  %v5073_v27 = vld [vmem:[%s5964_s23 + $0x420] ss:$16 sps:$4 sm:$0xff]   ;;  %v5076_v28 = vld [vmem:[%s5964_s23 + $0x428] ss:$16 sps:$4 sm:$0xff]  }
  0xb8   : > { %v794_v9 = vcombine.high %v6121_v26, %v6121_v26 }
  0xba   : > { %3492 = vmatpush1.bf16.msra.mxu0 %v4989_v29  ;;  %3820 = vmatpush1.bf16.msra.mxu1 %v4992_v30  ;;  %v5081_v29 = vld [vmem:[%s5964_s23 + $0x444] ss:$16 sps:$4 sm:$0xff]   ;;  %v5084_v30 = vld [vmem:[%s5964_s23 + $0x44c] ss:$16 sps:$4 sm:$0xff]  }
  0xbb   : > { %3493 = vmatprep.subr.bf16.mxu0 %v4997_v31  ;;  %3821 = vmatprep.subr.bf16.mxu1 %v5000_v32  ;;  %v851_v31 = vpack.c.bf16 %v794_v9, %v794_v9  ;;  %v5079_v32 = vld [vmem:[%s5964_s23 + $0x440] ss:$16 sps:$4 sm:$0xff]   ;;  %v5160_v9 = vld [vmem:[%s5964_s23 + $0x5e8] ss:$16 sps:$4 sm:$0xff]  }
  0xbe   : > { %3494 = vmatpush1.bf16.msra.mxu0 %v4995_v33  ;;  %3822 = vmatpush1.bf16.msra.mxu1 %v4998_v34  ;;  %v5082_v33 = vld [vmem:[%s5964_s23 + $0x448] ss:$16 sps:$4 sm:$0xff]   ;;  %v5087_v34 = vld [vmem:[%s5964_s23 + $0x464] ss:$16 sps:$4 sm:$0xff]  }
  0xbf   : > { %3495 = vmatprep.subr.bf16.mxu0 %v5003_v35  ;;  %3823 = vmatprep.subr.bf16.mxu1 %v5006_v36  ;;  %v5090_v35 = vld [vmem:[%s5964_s23 + $0x46c] ss:$16 sps:$4 sm:$0xff]   ;;  %v5085_v36 = vld [vmem:[%s5964_s23 + $0x460] ss:$16 sps:$4 sm:$0xff]  }
  0xc2   : > { %3496 = vmatpush1.bf16.msra.mxu0 %v5001_v37  ;;  %3824 = vmatpush1.bf16.msra.mxu1 %v5004_v38  ;;  %v5088_v37 = vld [vmem:[%s5964_s23 + $0x468] ss:$16 sps:$4 sm:$0xff]   ;;  %v5093_v38 = vld [vmem:[%s5964_s23 + $0x484] ss:$16 sps:$4 sm:$0xff]  }
  0xc3   : > { %3497 = vmatprep.subr.bf16.mxu0 %v5009_v39  ;;  %3825 = vmatprep.subr.bf16.mxu1 %v5012_v40  ;;  %v5096_v39 = vld [vmem:[%s5964_s23 + $0x48c] ss:$16 sps:$4 sm:$0xff]   ;;  %v5091_v40 = vld [vmem:[%s5964_s23 + $0x480] ss:$16 sps:$4 sm:$0xff]  }
  0xc6   : > { %3498 = vmatpush1.bf16.msra.mxu0 %v5007_v41  ;;  %3826 = vmatpush1.bf16.msra.mxu1 %v5010_v42  ;;  %v5094_v41 = vld [vmem:[%s5964_s23 + $0x488] ss:$16 sps:$4 sm:$0xff]   ;;  %v5099_v42 = vld [vmem:[%s5964_s23 + $0x4a4] ss:$16 sps:$4 sm:$0xff]  }
  0xc7   : > { %3499 = vmatprep.subr.bf16.mxu0 %v5015_v44  ;;  %3827 = vmatprep.subr.bf16.mxu1 %v5018_v45  ;;  %v5102_v44 = vld [vmem:[%s5964_s23 + $0x4ac] ss:$16 sps:$4 sm:$0xff]   ;;  %v5097_v45 = vld [vmem:[%s5964_s23 + $0x4a0] ss:$16 sps:$4 sm:$0xff]  }
  0xca   : > { %3500 = vmatpush1.bf16.msra.mxu0 %v5013_v46  ;;  %3828 = vmatpush1.bf16.msra.mxu1 %v5016_v47  ;;  %v5100_v46 = vld [vmem:[%s5964_s23 + $0x4a8] ss:$16 sps:$4 sm:$0xff]   ;;  %v5105_v47 = vld [vmem:[%s5964_s23 + $0x4c4] ss:$16 sps:$4 sm:$0xff]  }
  0xcb   : > { %3501 = vmatprep.subr.bf16.mxu0 %v5021_v48  ;;  %3829 = vmatprep.subr.bf16.mxu1 %v5024_v50  ;;  %v5108_v48 = vld [vmem:[%s5964_s23 + $0x4cc] ss:$16 sps:$4 sm:$0xff]   ;;  %v5103_v50 = vld [vmem:[%s5964_s23 + $0x4c0] ss:$16 sps:$4 sm:$0xff]  }
  0xce   : > { %3502 = vmatpush1.bf16.msra.mxu0 %v5019_v51  ;;  %3830 = vmatpush1.bf16.msra.mxu1 %v5022_v52  ;;  %v5106_v51 = vld [vmem:[%s5964_s23 + $0x4c8] ss:$16 sps:$4 sm:$0xff]   ;;  %v5111_v52 = vld [vmem:[%s5964_s23 + $0x4e4] ss:$16 sps:$4 sm:$0xff]  }
  0xcf   : > { %3503 = vmatprep.subr.bf16.mxu0 %v5027_v53  ;;  %3831 = vmatprep.subr.bf16.mxu1 %v5030_v54  ;;  %v5114_v53 = vld [vmem:[%s5964_s23 + $0x4ec] ss:$16 sps:$4 sm:$0xff]   ;;  %v5109_v54 = vld [vmem:[%s5964_s23 + $0x4e0] ss:$16 sps:$4 sm:$0xff]  }
  0xd2   : > { %3504 = vmatpush1.bf16.msra.mxu0 %v5025_v55  ;;  %3832 = vmatpush1.bf16.msra.mxu1 %v5028_v56  ;;  %v5112_v55 = vld [vmem:[%s5964_s23 + $0x4e8] ss:$16 sps:$4 sm:$0xff]   ;;  %v5117_v56 = vld [vmem:[%s5964_s23 + $0x504] ss:$16 sps:$4 sm:$0xff]  }
  0xd3   : > { %3505 = vmatprep.subr.bf16.mxu0 %v5033_v57  ;;  %3833 = vmatprep.subr.bf16.mxu1 %v5036_v58  ;;  %v5120_v57 = vld [vmem:[%s5964_s23 + $0x50c] ss:$16 sps:$4 sm:$0xff]   ;;  %v5115_v58 = vld [vmem:[%s5964_s23 + $0x500] ss:$16 sps:$4 sm:$0xff]  }
  0xd6   : > { %3506 = vmatpush1.bf16.msra.mxu0 %v5031_v59  ;;  %3834 = vmatpush1.bf16.msra.mxu1 %v5034_v60  ;;  %v5118_v59 = vld [vmem:[%s5964_s23 + $0x508] ss:$16 sps:$4 sm:$0xff]   ;;  %v5123_v60 = vld [vmem:[%s5964_s23 + $0x524] ss:$16 sps:$4 sm:$0xff]  }
  0xd7   : > { %3507 = vmatprep.subr.bf16.mxu0 %v5039_v61  ;;  %3835 = vmatprep.subr.bf16.mxu1 %v5042_v62  ;;  %v5126_v61 = vld [vmem:[%s5964_s23 + $0x52c] ss:$16 sps:$4 sm:$0xff]   ;;  %v5121_v62 = vld [vmem:[%s5964_s23 + $0x520] ss:$16 sps:$4 sm:$0xff]  }
  0xda   : > { %3508 = vmatpush1.bf16.msra.mxu0 %v5037_v63  ;;  %3836 = vmatpush1.bf16.msra.mxu1 %v5040_v0  ;;  %v5124_v63 = vld [vmem:[%s5964_s23 + $0x528] ss:$16 sps:$4 sm:$0xff]   ;;  %v5129_v0 = vld [vmem:[%s5964_s23 + $0x544] ss:$16 sps:$4 sm:$0xff]  }
  0xdb   : > { %3509 = vmatprep.subr.bf16.mxu0 %v5045_v1  ;;  %3837 = vmatprep.subr.bf16.mxu1 %v5048_v2  ;;  %v5132_v1 = vld [vmem:[%s5964_s23 + $0x54c] ss:$16 sps:$4 sm:$0xff]   ;;  %v5127_v2 = vld [vmem:[%s5964_s23 + $0x540] ss:$16 sps:$4 sm:$0xff]  }
  0xde   : > { %3510 = vmatpush1.bf16.msra.mxu0 %v5043_v3  ;;  %3838 = vmatpush1.bf16.msra.mxu1 %v5046_v4  ;;  %v5130_v3 = vld [vmem:[%s5964_s23 + $0x548] ss:$16 sps:$4 sm:$0xff]   ;;  %v5135_v4 = vld [vmem:[%s5964_s23 + $0x564] ss:$16 sps:$4 sm:$0xff]  }
  0xdf   : > { %3511 = vmatprep.subr.bf16.mxu0 %v5051_v5  ;;  %3839 = vmatprep.subr.bf16.mxu1 %v5054_v6  ;;  %v5138_v5 = vld [vmem:[%s5964_s23 + $0x56c] ss:$16 sps:$4 sm:$0xff]   ;;  %v5133_v6 = vld [vmem:[%s5964_s23 + $0x560] ss:$16 sps:$4 sm:$0xff]  }
  0xe2   : > { %3512 = vmatpush1.bf16.msra.mxu0 %v5049_v7  ;;  %3840 = vmatpush1.bf16.msra.mxu1 %v5052_v8  ;;  %v5136_v7 = vld [vmem:[%s5964_s23 + $0x568] ss:$16 sps:$4 sm:$0xff]   ;;  %v5141_v8 = vld [vmem:[%s5964_s23 + $0x584] ss:$16 sps:$4 sm:$0xff]  }
  0xe3   : > { %3513 = vmatprep.subr.bf16.mxu0 %v5057_v10  ;;  %3841 = vmatprep.subr.bf16.mxu1 %v5060_v11  ;;  %v5144_v10 = vld [vmem:[%s5964_s23 + $0x58c] ss:$16 sps:$4 sm:$0xff]   ;;  %v5139_v11 = vld [vmem:[%s5964_s23 + $0x580] ss:$16 sps:$4 sm:$0xff]  }
  0xe6   : > { %3514 = vmatpush1.bf16.msra.mxu0 %v5055_v12  ;;  %3842 = vmatpush1.bf16.msra.mxu1 %v5058_v13  ;;  %v5142_v12 = vld [vmem:[%s5964_s23 + $0x588] ss:$16 sps:$4 sm:$0xff]   ;;  %v5147_v13 = vld [vmem:[%s5964_s23 + $0x5a4] ss:$16 sps:$4 sm:$0xff]  }
  0xe7   : > { %3515 = vmatprep.subr.bf16.mxu0 %v5063_v14  ;;  %3843 = vmatprep.subr.bf16.mxu1 %v5066_v15  ;;  %v5150_v14 = vld [vmem:[%s5964_s23 + $0x5ac] ss:$16 sps:$4 sm:$0xff]   ;;  %v5145_v15 = vld [vmem:[%s5964_s23 + $0x5a0] ss:$16 sps:$4 sm:$0xff]  }
  0xea   : > { %3516 = vmatpush1.bf16.msra.mxu0 %v5061_v16  ;;  %3844 = vmatpush1.bf16.msra.mxu1 %v5064_v17  ;;  %v5148_v16 = vld [vmem:[%s5964_s23 + $0x5a8] ss:$16 sps:$4 sm:$0xff]   ;;  %v5153_v17 = vld [vmem:[%s5964_s23 + $0x5c4] ss:$16 sps:$4 sm:$0xff]  }
  0xeb   : > { %3526 = vmatprep.subr.bf16.mxu0 %v5069_v18  ;;  %3854 = vmatprep.subr.bf16.mxu1 %v5072_v19  ;;  %v5156_v18 = vld [vmem:[%s5964_s23 + $0x5cc] ss:$16 sps:$4 sm:$0xff]   ;;  %v779_v19 = vcombine.high %v6115_v23, %v6115_v23  ;;  %v5157_v23 = vld [vmem:[%s5964_s23 + $0x5e0] ss:$16 sps:$4 sm:$0xff]  }
  0xed   : > { %3518 = vmatmul.mubr.bf16.vlgmr.msra.gmra.mrb[0].mxu0 %v848_v21  ;;  %3846 = vmatmul.mubr.bf16.vlgmr.msra.gmra.mrb[0].mxu1 %v848_v21  ;;  %v5154_v21 = vld [vmem:[%s5964_s23 + $0x5c8] ss:$16 sps:$4 sm:$0xff]  }
  0xee   : > { %3527 = vmatpush1.bf16.msra.mxu0 %v5067_v20  ;;  %3855 = vmatpush1.bf16.msra.mxu1 %v5070_v22  ;;  %v5151_v20 = vld [vmem:[%s5964_s23 + $0x5c0] ss:$16 sps:$4 sm:$0xff]   ;;  %v5159_v22 = vld [vmem:[%s5964_s23 + $0x5e4] ss:$16 sps:$4 sm:$0xff]  }
  0xef   : > { %3528 = vmatprep.subr.bf16.mxu0 %v5075_v24  ;;  %3856 = vmatprep.subr.bf16.mxu1 %v5078_v25  ;;  %v5162_v24 = vld [vmem:[%s5964_s23 + $0x5ec] ss:$16 sps:$4 sm:$0xff]   ;;  %v6184_v25 = vrot.slane %v779_v19, %v6017_v49  ;;  %v5238_v19 = vld [vmem:[%s5964_s23 + $0x788] ss:$16 sps:$4 sm:$0xff]  }
  0xf0   : > { %3558 = vmatprep.mubr.bf16.mxu0 %v851_v31  ;;  %3886 = vmatprep.mubr.bf16.mxu1 %v851_v31  ;;  %v5163_v31 = vld [vmem:[%s5964_s23 + $0x600] ss:$16 sps:$4 sm:$0xff]  }
  0xf2   : > { %3529 = vmatpush1.bf16.msra.mxu0 %v5073_v27  ;;  %3857 = vmatpush1.bf16.msra.mxu1 %v5076_v28  ;;  %v5165_v27 = vld [vmem:[%s5964_s23 + $0x604] ss:$16 sps:$4 sm:$0xff]   ;;  %v5168_v28 = vld [vmem:[%s5964_s23 + $0x60c] ss:$16 sps:$4 sm:$0xff]  }
  0xf3   : > { %3530 = vmatprep.subr.bf16.mxu0 %v5081_v29  ;;  %3858 = vmatprep.subr.bf16.mxu1 %v5084_v30  ;;  %v795_v29 = vcombine.high %v6184_v25, %v6184_v25  ;;  %v850_v30 = vpack.c.bf16 %v6121_v26, %v6121_v26  ;;  %v5169_v26 = vld [vmem:[%s5964_s23 + $0x620] ss:$16 sps:$4 sm:$0xff]  }
  0xf6   : > { %3531 = vmatpush1.bf16.msra.mxu0 %v5079_v32  ;;  %3859 = vmatpush1.bf16.msra.mxu1 %v5082_v33  ;;  %v5166_v32 = vld [vmem:[%s5964_s23 + $0x608] ss:$16 sps:$4 sm:$0xff]   ;;  %v5171_v33 = vld [vmem:[%s5964_s23 + $0x624] ss:$16 sps:$4 sm:$0xff]  }
  0xf7   : > { %3532 = vmatprep.subr.bf16.mxu0 %v5087_v34  ;;  %3860 = vmatprep.subr.bf16.mxu1 %v5090_v35  ;;  %v5174_v34 = vld [vmem:[%s5964_s23 + $0x62c] ss:$16 sps:$4 sm:$0xff]   ;;  %v853_v35 = vpack.c.bf16 %v795_v29, %v795_v29  ;;  %v5250_v29 = vld [vmem:[%s5964_s23 + $0x7c8] ss:$16 sps:$4 sm:$0xff]  }
  0xfa   : > { %3533 = vmatpush1.bf16.msra.mxu0 %v5085_v36  ;;  %3861 = vmatpush1.bf16.msra.mxu1 %v5088_v37  ;;  %v5172_v36 = vld [vmem:[%s5964_s23 + $0x628] ss:$16 sps:$4 sm:$0xff]   ;;  %v5177_v37 = vld [vmem:[%s5964_s23 + $0x644] ss:$16 sps:$4 sm:$0xff]  }
  0xfb   : > { %3534 = vmatprep.subr.bf16.mxu0 %v5093_v38  ;;  %3862 = vmatprep.subr.bf16.mxu1 %v5096_v39  ;;  %v5180_v38 = vld [vmem:[%s5964_s23 + $0x64c] ss:$16 sps:$4 sm:$0xff]   ;;  %v5175_v39 = vld [vmem:[%s5964_s23 + $0x640] ss:$16 sps:$4 sm:$0xff]  }
  0xfe   : > { %3535 = vmatpush1.bf16.msra.mxu0 %v5091_v40  ;;  %3863 = vmatpush1.bf16.msra.mxu1 %v5094_v41  ;;  %v5178_v40 = vld [vmem:[%s5964_s23 + $0x648] ss:$16 sps:$4 sm:$0xff]   ;;  %v5183_v41 = vld [vmem:[%s5964_s23 + $0x664] ss:$16 sps:$4 sm:$0xff]  }
  0xff   : > { %3536 = vmatprep.subr.bf16.mxu0 %v5099_v42  ;;  %3864 = vmatprep.subr.bf16.mxu1 %v5102_v44  ;;  %v5186_v42 = vld [vmem:[%s5964_s23 + $0x66c] ss:$16 sps:$4 sm:$0xff]   ;;  %v5181_v44 = vld [vmem:[%s5964_s23 + $0x660] ss:$16 sps:$4 sm:$0xff]  }
 0x102   : > { %3537 = vmatpush1.bf16.msra.mxu0 %v5097_v45  ;;  %3865 = vmatpush1.bf16.msra.mxu1 %v5100_v46  ;;  %v5184_v45 = vld [vmem:[%s5964_s23 + $0x668] ss:$16 sps:$4 sm:$0xff]   ;;  %v5189_v46 = vld [vmem:[%s5964_s23 + $0x684] ss:$16 sps:$4 sm:$0xff]  }
 0x103   : > { %3538 = vmatprep.subr.bf16.mxu0 %v5105_v47  ;;  %3866 = vmatprep.subr.bf16.mxu1 %v5108_v48  ;;  %v5192_v47 = vld [vmem:[%s5964_s23 + $0x68c] ss:$16 sps:$4 sm:$0xff]   ;;  %v5187_v48 = vld [vmem:[%s5964_s23 + $0x680] ss:$16 sps:$4 sm:$0xff]  }
 0x106   : > { %3539 = vmatpush1.bf16.msra.mxu0 %v5103_v50  ;;  %3867 = vmatpush1.bf16.msra.mxu1 %v5106_v51  ;;  %v5190_v50 = vld [vmem:[%s5964_s23 + $0x688] ss:$16 sps:$4 sm:$0xff]   ;;  %v5195_v51 = vld [vmem:[%s5964_s23 + $0x6a4] ss:$16 sps:$4 sm:$0xff]  }
 0x107   : > { %3540 = vmatprep.subr.bf16.mxu0 %v5111_v52  ;;  %3868 = vmatprep.subr.bf16.mxu1 %v5114_v53  ;;  %v5198_v52 = vld [vmem:[%s5964_s23 + $0x6ac] ss:$16 sps:$4 sm:$0xff]   ;;  %v5193_v53 = vld [vmem:[%s5964_s23 + $0x6a0] ss:$16 sps:$4 sm:$0xff]  }
 0x10a   : > { %3541 = vmatpush1.bf16.msra.mxu0 %v5109_v54  ;;  %3869 = vmatpush1.bf16.msra.mxu1 %v5112_v55  ;;  %v5196_v54 = vld [vmem:[%s5964_s23 + $0x6a8] ss:$16 sps:$4 sm:$0xff]   ;;  %v5201_v55 = vld [vmem:[%s5964_s23 + $0x6c4] ss:$16 sps:$4 sm:$0xff]  }
 0x10b   : > { %3542 = vmatprep.subr.bf16.mxu0 %v5117_v56  ;;  %3870 = vmatprep.subr.bf16.mxu1 %v5120_v57  ;;  %v5204_v56 = vld [vmem:[%s5964_s23 + $0x6cc] ss:$16 sps:$4 sm:$0xff]   ;;  %v5199_v57 = vld [vmem:[%s5964_s23 + $0x6c0] ss:$16 sps:$4 sm:$0xff]  }
 0x10e   : > { %3543 = vmatpush1.bf16.msra.mxu0 %v5115_v58  ;;  %3871 = vmatpush1.bf16.msra.mxu1 %v5118_v59  ;;  %v5202_v58 = vld [vmem:[%s5964_s23 + $0x6c8] ss:$16 sps:$4 sm:$0xff]   ;;  %v5207_v59 = vld [vmem:[%s5964_s23 + $0x6e4] ss:$16 sps:$4 sm:$0xff]  }
 0x10f   : > { %3544 = vmatprep.subr.bf16.mxu0 %v5123_v60  ;;  %3872 = vmatprep.subr.bf16.mxu1 %v5126_v61  ;;  %v5210_v60 = vld [vmem:[%s5964_s23 + $0x6ec] ss:$16 sps:$4 sm:$0xff]   ;;  %v5205_v61 = vld [vmem:[%s5964_s23 + $0x6e0] ss:$16 sps:$4 sm:$0xff]  }
 0x112   : > { %3545 = vmatpush1.bf16.msra.mxu0 %v5121_v62  ;;  %3873 = vmatpush1.bf16.msra.mxu1 %v5124_v63  ;;  %v5208_v62 = vld [vmem:[%s5964_s23 + $0x6e8] ss:$16 sps:$4 sm:$0xff]   ;;  %v5213_v63 = vld [vmem:[%s5964_s23 + $0x704] ss:$16 sps:$4 sm:$0xff]  }
 0x113   : > { %3546 = vmatprep.subr.bf16.mxu0 %v5129_v0  ;;  %3874 = vmatprep.subr.bf16.mxu1 %v5132_v1  ;;  %v5216_v0 = vld [vmem:[%s5964_s23 + $0x70c] ss:$16 sps:$4 sm:$0xff]   ;;  %v5211_v1 = vld [vmem:[%s5964_s23 + $0x700] ss:$16 sps:$4 sm:$0xff]  }
 0x116   : > { %3547 = vmatpush1.bf16.msra.mxu0 %v5127_v2  ;;  %3875 = vmatpush1.bf16.msra.mxu1 %v5130_v3  ;;  %v5214_v2 = vld [vmem:[%s5964_s23 + $0x708] ss:$16 sps:$4 sm:$0xff]   ;;  %v5219_v3 = vld [vmem:[%s5964_s23 + $0x724] ss:$16 sps:$4 sm:$0xff]  }
 0x117   : > { %3548 = vmatprep.subr.bf16.mxu0 %v5135_v4  ;;  %3876 = vmatprep.subr.bf16.mxu1 %v5138_v5  ;;  %v5222_v4 = vld [vmem:[%s5964_s23 + $0x72c] ss:$16 sps:$4 sm:$0xff]   ;;  %v5217_v5 = vld [vmem:[%s5964_s23 + $0x720] ss:$16 sps:$4 sm:$0xff]  }
 0x11a   : > { %3549 = vmatpush1.bf16.msra.mxu0 %v5133_v6  ;;  %3877 = vmatpush1.bf16.msra.mxu1 %v5136_v7  ;;  %v5220_v6 = vld [vmem:[%s5964_s23 + $0x728] ss:$16 sps:$4 sm:$0xff]   ;;  %v5225_v7 = vld [vmem:[%s5964_s23 + $0x744] ss:$16 sps:$4 sm:$0xff]  }
 0x11b   : > { %3550 = vmatprep.subr.bf16.mxu0 %v5141_v8  ;;  %3878 = vmatprep.subr.bf16.mxu1 %v5144_v10  ;;  %v5228_v8 = vld [vmem:[%s5964_s23 + $0x74c] ss:$16 sps:$4 sm:$0xff]   ;;  %v5223_v10 = vld [vmem:[%s5964_s23 + $0x740] ss:$16 sps:$4 sm:$0xff]  }
 0x11e   : > { %3551 = vmatpush1.bf16.msra.mxu0 %v5139_v11  ;;  %3879 = vmatpush1.bf16.msra.mxu1 %v5142_v12  ;;  %v5226_v11 = vld [vmem:[%s5964_s23 + $0x748] ss:$16 sps:$4 sm:$0xff]   ;;  %v5231_v12 = vld [vmem:[%s5964_s23 + $0x764] ss:$16 sps:$4 sm:$0xff]  }
 0x11f   : > { %3552 = vmatprep.subr.bf16.mxu0 %v5147_v13  ;;  %3880 = vmatprep.subr.bf16.mxu1 %v5150_v14  ;;  %v5234_v13 = vld [vmem:[%s5964_s23 + $0x76c] ss:$16 sps:$4 sm:$0xff]   ;;  %v5229_v14 = vld [vmem:[%s5964_s23 + $0x760] ss:$16 sps:$4 sm:$0xff]  }
 0x122   : > { %3553 = vmatpush1.bf16.msra.mxu0 %v5145_v15  ;;  %3881 = vmatpush1.bf16.msra.mxu1 %v5148_v16  ;;  %v5232_v15 = vld [vmem:[%s5964_s23 + $0x768] ss:$16 sps:$4 sm:$0xff]   ;;  %v5237_v16 = vld [vmem:[%s5964_s23 + $0x784] ss:$16 sps:$4 sm:$0xff]  }
 0x123   : > { %3554 = vmatprep.subr.bf16.mxu0 %v5153_v17  ;;  %3882 = vmatprep.subr.bf16.mxu1 %v5156_v18  ;;  %v5240_v17 = vld [vmem:[%s5964_s23 + $0x78c] ss:$16 sps:$4 sm:$0xff]   ;;  %v5235_v18 = vld [vmem:[%s5964_s23 + $0x780] ss:$16 sps:$4 sm:$0xff]  }
 0x126   : > { %3555 = vmatpush1.bf16.msra.mxu0 %v5151_v20  ;;  %3883 = vmatpush1.bf16.msra.mxu1 %v5154_v21  ;;  %v5243_v20 = vld [vmem:[%s5964_s23 + $0x7a4] ss:$16 sps:$4 sm:$0xff]   ;;  %v5246_v21 = vld [vmem:[%s5964_s23 + $0x7ac] ss:$16 sps:$4 sm:$0xff]  }
 0x127   : > { %3556 = vmatprep.subr.bf16.mxu0 %v5159_v22  ;;  %3884 = vmatprep.subr.bf16.mxu1 %v5162_v24  ;;  %v5241_v22 = vld [vmem:[%s5964_s23 + $0x7a0] ss:$16 sps:$4 sm:$0xff]   ;;  %v5244_v24 = vld [vmem:[%s5964_s23 + $0x7a8] ss:$16 sps:$4 sm:$0xff]  }
 0x12a   : > { %3557 = vmatpush1.bf16.msra.mxu0 %v5157_v23  ;;  %3885 = vmatpush1.bf16.msra.mxu1 %v5160_v9  ;;  %v5249_v23 = vld [vmem:[%s5964_s23 + $0x7c4] ss:$16 sps:$4 sm:$0xff]   ;;  %v5252_v9 = vld [vmem:[%s5964_s23 + $0x7cc] ss:$16 sps:$4 sm:$0xff]  }
 0x12b   : > { %3567 = vmatprep.subr.bf16.mxu0 %v5165_v27  ;;  %3895 = vmatprep.subr.bf16.mxu1 %v5168_v28  ;;  %v5247_v27 = vld [vmem:[%s5964_s23 + $0x7c0] ss:$16 sps:$4 sm:$0xff]  }
 0x12c   : > { %v6251_v28 = vld [vmem:[#allocation2 + $0x10] sm:$0xff] }
 0x12d   : > { %3559 = vmatmul.mubr.bf16.vlgmr.msra.gmra.mrb[0].mxu0 %v850_v30  ;;  %3887 = vmatmul.mubr.bf16.vlgmr.msra.gmra.mrb[0].mxu1 %v850_v30  ;;  %v5255_v30 = vld [vmem:[%s5964_s23 + $0x7e4] ss:$16 sps:$4 sm:$0xff]  }
 0x12e   : > { %3568 = vmatpush1.bf16.msra.mxu0 %v5163_v31  ;;  %3896 = vmatpush1.bf16.msra.mxu1 %v5166_v32  ;;  %v5258_v31 = vld [vmem:[%s5964_s23 + $0x7ec] ss:$16 sps:$4 sm:$0xff]   ;;  %v6258_v32 = vrot.slane %v6251_v28, %v6017_v49 }
 0x12f   : > { %3569 = vmatprep.subr.bf16.mxu0 %v5171_v33  ;;  %3897 = vmatprep.subr.bf16.mxu1 %v5174_v34  ;;  %v5253_v33 = vld [vmem:[%s5964_s23 + $0x7e0] ss:$16 sps:$4 sm:$0xff]   ;;  %v5256_v34 = vld [vmem:[%s5964_s23 + $0x7e8] ss:$16 sps:$4 sm:$0xff]  }
 0x130   : > { %3599 = vmatprep.mubr.bf16.mxu0 %v853_v35  ;;  %3927 = vmatprep.mubr.bf16.mxu1 %v853_v35  ;;  %v5262_v35 = vld [vmem:[%s5964_s23 + $0x804] ss:$16 sps:$4 sm:$0xff]  }
 0x132   : > { %3570 = vmatpush1.bf16.msra.mxu0 %v5169_v26  ;;  %3898 = vmatpush1.bf16.msra.mxu1 %v5172_v36  ;;  %v5265_v26 = vld [vmem:[%s5964_s23 + $0x80c] ss:$16 sps:$4 sm:$0xff]   ;;  %v811_v36 = vcombine.high %v6258_v32, %v6258_v32 }
 0x133   : > { %3571 = vmatprep.subr.bf16.mxu0 %v5177_v37  ;;  %3899 = vmatprep.subr.bf16.mxu1 %v5180_v38  ;;  %v5260_v37 = vld [vmem:[%s5964_s23 + $0x800] ss:$16 sps:$4 sm:$0xff]   ;;  %v852_v38 = vpack.c.bf16 %v6184_v25, %v6184_v25  ;;  %v5274_v25 = vld [vmem:[%s5964_s23 + $0x844] ss:$16 sps:$4 sm:$0xff]  }
 0x136   : > { %3572 = vmatpush1.bf16.msra.mxu0 %v5175_v39  ;;  %3900 = vmatpush1.bf16.msra.mxu1 %v5178_v40  ;;  %v5263_v39 = vld [vmem:[%s5964_s23 + $0x808] ss:$16 sps:$4 sm:$0xff]   ;;  %v5268_v40 = vld [vmem:[%s5964_s23 + $0x824] ss:$16 sps:$4 sm:$0xff]  }
 0x137   : > { %3573 = vmatprep.subr.bf16.mxu0 %v5183_v41  ;;  %3901 = vmatprep.subr.bf16.mxu1 %v5186_v42  ;;  %v5271_v41 = vld [vmem:[%s5964_s23 + $0x82c] ss:$16 sps:$4 sm:$0xff]   ;;  %v855_v42 = vpack.c.bf16 %v811_v36, %v811_v36  ;;  %v5344_v36 = vld [vmem:[%s5964_s23 + $0x9c0] ss:$16 sps:$4 sm:$0xff]  }
 0x13a   : > { %3574 = vmatpush1.bf16.msra.mxu0 %v5181_v44  ;;  %3902 = vmatpush1.bf16.msra.mxu1 %v5184_v45  ;;  %v5266_v44 = vld [vmem:[%s5964_s23 + $0x820] ss:$16 sps:$4 sm:$0xff]   ;;  %v5269_v45 = vld [vmem:[%s5964_s23 + $0x828] ss:$16 sps:$4 sm:$0xff]  }
 0x13b   : > { %3575 = vmatprep.subr.bf16.mxu0 %v5189_v46  ;;  %3903 = vmatprep.subr.bf16.mxu1 %v5192_v47  ;;  %v5277_v46 = vld [vmem:[%s5964_s23 + $0x84c] ss:$16 sps:$4 sm:$0xff]   ;;  %v5272_v47 = vld [vmem:[%s5964_s23 + $0x840] ss:$16 sps:$4 sm:$0xff]  }
 0x13e   : > { %3576 = vmatpush1.bf16.msra.mxu0 %v5187_v48  ;;  %3904 = vmatpush1.bf16.msra.mxu1 %v5190_v50  ;;  %v5275_v48 = vld [vmem:[%s5964_s23 + $0x848] ss:$16 sps:$4 sm:$0xff]   ;;  %v5280_v50 = vld [vmem:[%s5964_s23 + $0x864] ss:$16 sps:$4 sm:$0xff]  }
 0x13f   : > { %3577 = vmatprep.subr.bf16.mxu0 %v5195_v51  ;;  %3905 = vmatprep.subr.bf16.mxu1 %v5198_v52  ;;  %v5283_v51 = vld [vmem:[%s5964_s23 + $0x86c] ss:$16 sps:$4 sm:$0xff]   ;;  %v5278_v52 = vld [vmem:[%s5964_s23 + $0x860] ss:$16 sps:$4 sm:$0xff]  }
 0x142   : > { %3578 = vmatpush1.bf16.msra.mxu0 %v5193_v53  ;;  %3906 = vmatpush1.bf16.msra.mxu1 %v5196_v54  ;;  %v5281_v53 = vld [vmem:[%s5964_s23 + $0x868] ss:$16 sps:$4 sm:$0xff]   ;;  %v5286_v54 = vld [vmem:[%s5964_s23 + $0x884] ss:$16 sps:$4 sm:$0xff]  }
 0x143   : > { %3579 = vmatprep.subr.bf16.mxu0 %v5201_v55  ;;  %3907 = vmatprep.subr.bf16.mxu1 %v5204_v56  ;;  %v5289_v55 = vld [vmem:[%s5964_s23 + $0x88c] ss:$16 sps:$4 sm:$0xff]   ;;  %v5284_v56 = vld [vmem:[%s5964_s23 + $0x880] ss:$16 sps:$4 sm:$0xff]  }
 0x146   : > { %3580 = vmatpush1.bf16.msra.mxu0 %v5199_v57  ;;  %3908 = vmatpush1.bf16.msra.mxu1 %v5202_v58  ;;  %v5287_v57 = vld [vmem:[%s5964_s23 + $0x888] ss:$16 sps:$4 sm:$0xff]   ;;  %v5292_v58 = vld [vmem:[%s5964_s23 + $0x8a4] ss:$16 sps:$4 sm:$0xff]  }
 0x147   : > { %3581 = vmatprep.subr.bf16.mxu0 %v5207_v59  ;;  %3909 = vmatprep.subr.bf16.mxu1 %v5210_v60  ;;  %v5295_v59 = vld [vmem:[%s5964_s23 + $0x8ac] ss:$16 sps:$4 sm:$0xff]   ;;  %v5290_v60 = vld [vmem:[%s5964_s23 + $0x8a0] ss:$16 sps:$4 sm:$0xff]  }
 0x14a   : > { %3582 = vmatpush1.bf16.msra.mxu0 %v5205_v61  ;;  %3910 = vmatpush1.bf16.msra.mxu1 %v5208_v62  ;;  %v5293_v61 = vld [vmem:[%s5964_s23 + $0x8a8] ss:$16 sps:$4 sm:$0xff]   ;;  %v5298_v62 = vld [vmem:[%s5964_s23 + $0x8c4] ss:$16 sps:$4 sm:$0xff]  }
 0x14b   : > { %3583 = vmatprep.subr.bf16.mxu0 %v5213_v63  ;;  %3911 = vmatprep.subr.bf16.mxu1 %v5216_v0  ;;  %v5301_v63 = vld [vmem:[%s5964_s23 + $0x8cc] ss:$16 sps:$4 sm:$0xff]   ;;  %v5296_v0 = vld [vmem:[%s5964_s23 + $0x8c0] ss:$16 sps:$4 sm:$0xff]  }
 0x14e   : > { %3584 = vmatpush1.bf16.msra.mxu0 %v5211_v1  ;;  %3912 = vmatpush1.bf16.msra.mxu1 %v5214_v2  ;;  %v5299_v1 = vld [vmem:[%s5964_s23 + $0x8c8] ss:$16 sps:$4 sm:$0xff]   ;;  %v5304_v2 = vld [vmem:[%s5964_s23 + $0x8e4] ss:$16 sps:$4 sm:$0xff]  }
 0x14f   : > { %3585 = vmatprep.subr.bf16.mxu0 %v5219_v3  ;;  %3913 = vmatprep.subr.bf16.mxu1 %v5222_v4  ;;  %v5307_v3 = vld [vmem:[%s5964_s23 + $0x8ec] ss:$16 sps:$4 sm:$0xff]   ;;  %v5302_v4 = vld [vmem:[%s5964_s23 + $0x8e0] ss:$16 sps:$4 sm:$0xff]  }
 0x152   : > { %3586 = vmatpush1.bf16.msra.mxu0 %v5217_v5  ;;  %3914 = vmatpush1.bf16.msra.mxu1 %v5220_v6  ;;  %v5305_v5 = vld [vmem:[%s5964_s23 + $0x8e8] ss:$16 sps:$4 sm:$0xff]   ;;  %v5310_v6 = vld [vmem:[%s5964_s23 + $0x904] ss:$16 sps:$4 sm:$0xff]  }
 0x153   : > { %3587 = vmatprep.subr.bf16.mxu0 %v5225_v7  ;;  %3915 = vmatprep.subr.bf16.mxu1 %v5228_v8  ;;  %v5313_v7 = vld [vmem:[%s5964_s23 + $0x90c] ss:$16 sps:$4 sm:$0xff]   ;;  %v5308_v8 = vld [vmem:[%s5964_s23 + $0x900] ss:$16 sps:$4 sm:$0xff]  }
 0x156   : > { %3588 = vmatpush1.bf16.msra.mxu0 %v5223_v10  ;;  %3916 = vmatpush1.bf16.msra.mxu1 %v5226_v11  ;;  %v5311_v10 = vld [vmem:[%s5964_s23 + $0x908] ss:$16 sps:$4 sm:$0xff]   ;;  %v5316_v11 = vld [vmem:[%s5964_s23 + $0x924] ss:$16 sps:$4 sm:$0xff]  }
 0x157   : > { %3589 = vmatprep.subr.bf16.mxu0 %v5231_v12  ;;  %3917 = vmatprep.subr.bf16.mxu1 %v5234_v13  ;;  %v5319_v12 = vld [vmem:[%s5964_s23 + $0x92c] ss:$16 sps:$4 sm:$0xff]   ;;  %v5314_v13 = vld [vmem:[%s5964_s23 + $0x920] ss:$16 sps:$4 sm:$0xff]  }
 0x15a   : > { %3590 = vmatpush1.bf16.msra.mxu0 %v5229_v14  ;;  %3918 = vmatpush1.bf16.msra.mxu1 %v5232_v15  ;;  %v5317_v14 = vld [vmem:[%s5964_s23 + $0x928] ss:$16 sps:$4 sm:$0xff]   ;;  %v5322_v15 = vld [vmem:[%s5964_s23 + $0x944] ss:$16 sps:$4 sm:$0xff]  }
 0x15b   : > { %3591 = vmatprep.subr.bf16.mxu0 %v5237_v16  ;;  %3919 = vmatprep.subr.bf16.mxu1 %v5240_v17  ;;  %v5325_v16 = vld [vmem:[%s5964_s23 + $0x94c] ss:$16 sps:$4 sm:$0xff]   ;;  %v5320_v17 = vld [vmem:[%s5964_s23 + $0x940] ss:$16 sps:$4 sm:$0xff]  }
 0x15e   : > { %3592 = vmatpush1.bf16.msra.mxu0 %v5235_v18  ;;  %3920 = vmatpush1.bf16.msra.mxu1 %v5238_v19  ;;  %v5323_v18 = vld [vmem:[%s5964_s23 + $0x948] ss:$16 sps:$4 sm:$0xff]   ;;  %v5328_v19 = vld [vmem:[%s5964_s23 + $0x964] ss:$16 sps:$4 sm:$0xff]  }
 0x15f   : > { %3593 = vmatprep.subr.bf16.mxu0 %v5243_v20  ;;  %3921 = vmatprep.subr.bf16.mxu1 %v5246_v21  ;;  %v5331_v20 = vld [vmem:[%s5964_s23 + $0x96c] ss:$16 sps:$4 sm:$0xff]   ;;  %v5326_v21 = vld [vmem:[%s5964_s23 + $0x960] ss:$16 sps:$4 sm:$0xff]  }
 0x162   : > { %3594 = vmatpush1.bf16.msra.mxu0 %v5241_v22  ;;  %3922 = vmatpush1.bf16.msra.mxu1 %v5244_v24  ;;  %v5329_v22 = vld [vmem:[%s5964_s23 + $0x968] ss:$16 sps:$4 sm:$0xff]   ;;  %v5334_v24 = vld [vmem:[%s5964_s23 + $0x984] ss:$16 sps:$4 sm:$0xff]  }
 0x163   : > { %3595 = vmatprep.subr.bf16.mxu0 %v5249_v23  ;;  %3923 = vmatprep.subr.bf16.mxu1 %v5252_v9  ;;  %v5337_v23 = vld [vmem:[%s5964_s23 + $0x98c] ss:$16 sps:$4 sm:$0xff]   ;;  %v5332_v9 = vld [vmem:[%s5964_s23 + $0x980] ss:$16 sps:$4 sm:$0xff]  }
 0x166   : > { %3596 = vmatpush1.bf16.msra.mxu0 %v5247_v27  ;;  %3924 = vmatpush1.bf16.msra.mxu1 %v5250_v29  ;;  %v5335_v27 = vld [vmem:[%s5964_s23 + $0x988] ss:$16 sps:$4 sm:$0xff]   ;;  %v5340_v29 = vld [vmem:[%s5964_s23 + $0x9a4] ss:$16 sps:$4 sm:$0xff]  }
 0x167   : > { %3597 = vmatprep.subr.bf16.mxu0 %v5255_v30  ;;  %3925 = vmatprep.subr.bf16.mxu1 %v5258_v31  ;;  %v5343_v30 = vld [vmem:[%s5964_s23 + $0x9ac] ss:$16 sps:$4 sm:$0xff]   ;;  %v5338_v31 = vld [vmem:[%s5964_s23 + $0x9a0] ss:$16 sps:$4 sm:$0xff]  }
 0x16a   : > { %3598 = vmatpush1.bf16.msra.mxu0 %v5253_v33  ;;  %3926 = vmatpush1.bf16.msra.mxu1 %v5256_v34  ;;  %v5341_v33 = vld [vmem:[%s5964_s23 + $0x9a8] ss:$16 sps:$4 sm:$0xff]   ;;  %v5346_v34 = vld [vmem:[%s5964_s23 + $0x9c4] ss:$16 sps:$4 sm:$0xff]  }
 0x16b   : > { %3608 = vmatprep.subr.bf16.mxu0 %v5262_v35  ;;  %3936 = vmatprep.subr.bf16.mxu1 %v5265_v26  ;;  %v5349_v35 = vld [vmem:[%s5964_s23 + $0x9cc] ss:$16 sps:$4 sm:$0xff]   ;;  %v796_v26 = vcombine.high %v6251_v28, %v6251_v28  ;;  %v5350_v28 = vld [vmem:[%s5964_s23 + $0x9e0] ss:$16 sps:$4 sm:$0xff]  }
 0x16d   : > { %3600 = vmatmul.mubr.bf16.vlgmr.msra.gmra.mrb[0].mxu0 %v852_v38  ;;  %3928 = vmatmul.mubr.bf16.vlgmr.msra.gmra.mrb[0].mxu1 %v852_v38  ;;  %v5352_v38 = vld [vmem:[%s5964_s23 + $0x9e4] ss:$16 sps:$4 sm:$0xff]  }
 0x16e   : > { %3609 = vmatpush1.bf16.msra.mxu0 %v5260_v37  ;;  %3937 = vmatpush1.bf16.msra.mxu1 %v5263_v39  ;;  %v5347_v37 = vld [vmem:[%s5964_s23 + $0x9c8] ss:$16 sps:$4 sm:$0xff]   ;;  %v5355_v39 = vld [vmem:[%s5964_s23 + $0x9ec] ss:$16 sps:$4 sm:$0xff]  }
 0x16f   : > { %3610 = vmatprep.subr.bf16.mxu0 %v5268_v40  ;;  %3938 = vmatprep.subr.bf16.mxu1 %v5271_v41  ;;  %v6331_v40 = vrot.slane %v796_v26, %v6017_v49  ;;  %v5353_v41 = vld [vmem:[%s5964_s23 + $0x9e8] ss:$16 sps:$4 sm:$0xff]  }
 0x170   : > { %3640 = vmatprep.mubr.bf16.mxu0 %v855_v42  ;;  %3968 = vmatprep.mubr.bf16.mxu1 %v855_v42  ;;  %v5358_v42 = vld [vmem:[%s5964_s23 + $0xa04] ss:$16 sps:$4 sm:$0xff]   ;;  %v5431_v26 = vld [vmem:[%s5964_s23 + $0xb88] ss:$16 sps:$4 sm:$0xff]  }
 0x172   : > { %3611 = vmatpush1.bf16.msra.mxu0 %v5266_v44  ;;  %3939 = vmatpush1.bf16.msra.mxu1 %v5269_v45  ;;  %v5361_v44 = vld [vmem:[%s5964_s23 + $0xa0c] ss:$16 sps:$4 sm:$0xff]   ;;  %v812_v45 = vcombine.high %v6331_v40, %v6331_v40 }
 0x173   : > { %3612 = vmatprep.subr.bf16.mxu0 %v5274_v25  ;;  %3940 = vmatprep.subr.bf16.mxu1 %v5277_v46  ;;  %v854_v25 = vpack.c.bf16 %v6258_v32, %v6258_v32  ;;  %v5356_v46 = vld [vmem:[%s5964_s23 + $0xa00] ss:$16 sps:$4 sm:$0xff]  }
 0x174   : > { %v5362_v32 = vld [vmem:[%s5964_s23 + $0xa20] ss:$16 sps:$4 sm:$0xff]  }
 0x176   : > { %3613 = vmatpush1.bf16.msra.mxu0 %v5272_v47  ;;  %3941 = vmatpush1.bf16.msra.mxu1 %v5275_v48  ;;  %v5359_v47 = vld [vmem:[%s5964_s23 + $0xa08] ss:$16 sps:$4 sm:$0xff]   ;;  %v5364_v48 = vld [vmem:[%s5964_s23 + $0xa24] ss:$16 sps:$4 sm:$0xff]  }
 0x177   : > { %3614 = vmatprep.subr.bf16.mxu0 %v5280_v50  ;;  %3942 = vmatprep.subr.bf16.mxu1 %v5283_v51  ;;  %v5367_v50 = vld [vmem:[%s5964_s23 + $0xa2c] ss:$16 sps:$4 sm:$0xff]   ;;  %v857_v51 = vpack.c.bf16 %v812_v45, %v812_v45  ;;  %v5443_v45 = vld [vmem:[%s5964_s23 + $0xbc8] ss:$16 sps:$4 sm:$0xff]  }
 0x17a   : > { %3615 = vmatpush1.bf16.msra.mxu0 %v5278_v52  ;;  %3943 = vmatpush1.bf16.msra.mxu1 %v5281_v53  ;;  %v5365_v52 = vld [vmem:[%s5964_s23 + $0xa28] ss:$16 sps:$4 sm:$0xff]   ;;  %v5370_v53 = vld [vmem:[%s5964_s23 + $0xa44] ss:$16 sps:$4 sm:$0xff]  }
 0x17b   : > { %3616 = vmatprep.subr.bf16.mxu0 %v5286_v54  ;;  %3944 = vmatprep.subr.bf16.mxu1 %v5289_v55  ;;  %v5373_v54 = vld [vmem:[%s5964_s23 + $0xa4c] ss:$16 sps:$4 sm:$0xff]   ;;  %v5368_v55 = vld [vmem:[%s5964_s23 + $0xa40] ss:$16 sps:$4 sm:$0xff]  }
 0x17e   : > { %3617 = vmatpush1.bf16.msra.mxu0 %v5284_v56  ;;  %3945 = vmatpush1.bf16.msra.mxu1 %v5287_v57  ;;  %v5371_v56 = vld [vmem:[%s5964_s23 + $0xa48] ss:$16 sps:$4 sm:$0xff]   ;;  %v5376_v57 = vld [vmem:[%s5964_s23 + $0xa64] ss:$16 sps:$4 sm:$0xff]  }
 0x17f   : > { %3618 = vmatprep.subr.bf16.mxu0 %v5292_v58  ;;  %3946 = vmatprep.subr.bf16.mxu1 %v5295_v59  ;;  %v5379_v58 = vld [vmem:[%s5964_s23 + $0xa6c] ss:$16 sps:$4 sm:$0xff]   ;;  %v5374_v59 = vld [vmem:[%s5964_s23 + $0xa60] ss:$16 sps:$4 sm:$0xff]  }
 0x182   : > { %3619 = vmatpush1.bf16.msra.mxu0 %v5290_v60  ;;  %3947 = vmatpush1.bf16.msra.mxu1 %v5293_v61  ;;  %v5377_v60 = vld [vmem:[%s5964_s23 + $0xa68] ss:$16 sps:$4 sm:$0xff]   ;;  %v5382_v61 = vld [vmem:[%s5964_s23 + $0xa84] ss:$16 sps:$4 sm:$0xff]  }
 0x183   : > { %3620 = vmatprep.subr.bf16.mxu0 %v5298_v62  ;;  %3948 = vmatprep.subr.bf16.mxu1 %v5301_v63  ;;  %v5385_v62 = vld [vmem:[%s5964_s23 + $0xa8c] ss:$16 sps:$4 sm:$0xff]   ;;  %v5380_v63 = vld [vmem:[%s5964_s23 + $0xa80] ss:$16 sps:$4 sm:$0xff]  }
 0x186   : > { %3621 = vmatpush1.bf16.msra.mxu0 %v5296_v0  ;;  %3949 = vmatpush1.bf16.msra.mxu1 %v5299_v1  ;;  %v5383_v0 = vld [vmem:[%s5964_s23 + $0xa88] ss:$16 sps:$4 sm:$0xff]   ;;  %v5388_v1 = vld [vmem:[%s5964_s23 + $0xaa4] ss:$16 sps:$4 sm:$0xff]  }
 0x187   : > { %3622 = vmatprep.subr.bf16.mxu0 %v5304_v2  ;;  %3950 = vmatprep.subr.bf16.mxu1 %v5307_v3  ;;  %v5391_v2 = vld [vmem:[%s5964_s23 + $0xaac] ss:$16 sps:$4 sm:$0xff]   ;;  %v5386_v3 = vld [vmem:[%s5964_s23 + $0xaa0] ss:$16 sps:$4 sm:$0xff]  }
 0x18a   : > { %3623 = vmatpush1.bf16.msra.mxu0 %v5302_v4  ;;  %3951 = vmatpush1.bf16.msra.mxu1 %v5305_v5  ;;  %v5389_v4 = vld [vmem:[%s5964_s23 + $0xaa8] ss:$16 sps:$4 sm:$0xff]   ;;  %v5394_v5 = vld [vmem:[%s5964_s23 + $0xac4] ss:$16 sps:$4 sm:$0xff]  }
 0x18b   : > { %3624 = vmatprep.subr.bf16.mxu0 %v5310_v6  ;;  %3952 = vmatprep.subr.bf16.mxu1 %v5313_v7  ;;  %v5397_v6 = vld [vmem:[%s5964_s23 + $0xacc] ss:$16 sps:$4 sm:$0xff]   ;;  %v5392_v7 = vld [vmem:[%s5964_s23 + $0xac0] ss:$16 sps:$4 sm:$0xff]  }
 0x18e   : > { %3625 = vmatpush1.bf16.msra.mxu0 %v5308_v8  ;;  %3953 = vmatpush1.bf16.msra.mxu1 %v5311_v10  ;;  %v5395_v8 = vld [vmem:[%s5964_s23 + $0xac8] ss:$16 sps:$4 sm:$0xff]   ;;  %v5400_v10 = vld [vmem:[%s5964_s23 + $0xae4] ss:$16 sps:$4 sm:$0xff]  }
 0x18f   : > { %3626 = vmatprep.subr.bf16.mxu0 %v5316_v11  ;;  %3954 = vmatprep.subr.bf16.mxu1 %v5319_v12  ;;  %v5403_v11 = vld [vmem:[%s5964_s23 + $0xaec] ss:$16 sps:$4 sm:$0xff]   ;;  %v5398_v12 = vld [vmem:[%s5964_s23 + $0xae0] ss:$16 sps:$4 sm:$0xff]  }
 0x192   : > { %3627 = vmatpush1.bf16.msra.mxu0 %v5314_v13  ;;  %3955 = vmatpush1.bf16.msra.mxu1 %v5317_v14  ;;  %v5401_v13 = vld [vmem:[%s5964_s23 + $0xae8] ss:$16 sps:$4 sm:$0xff]   ;;  %v5406_v14 = vld [vmem:[%s5964_s23 + $0xb04] ss:$16 sps:$4 sm:$0xff]  }
 0x193   : > { %3628 = vmatprep.subr.bf16.mxu0 %v5322_v15  ;;  %3956 = vmatprep.subr.bf16.mxu1 %v5325_v16  ;;  %v5409_v15 = vld [vmem:[%s5964_s23 + $0xb0c] ss:$16 sps:$4 sm:$0xff]   ;;  %v5404_v16 = vld [vmem:[%s5964_s23 + $0xb00] ss:$16 sps:$4 sm:$0xff]  }
 0x196   : > { %3629 = vmatpush1.bf16.msra.mxu0 %v5320_v17  ;;  %3957 = vmatpush1.bf16.msra.mxu1 %v5323_v18  ;;  %v5407_v17 = vld [vmem:[%s5964_s23 + $0xb08] ss:$16 sps:$4 sm:$0xff]   ;;  %v5412_v18 = vld [vmem:[%s5964_s23 + $0xb24] ss:$16 sps:$4 sm:$0xff]  }
 0x197   : > { %3630 = vmatprep.subr.bf16.mxu0 %v5328_v19  ;;  %3958 = vmatprep.subr.bf16.mxu1 %v5331_v20  ;;  %v5415_v19 = vld [vmem:[%s5964_s23 + $0xb2c] ss:$16 sps:$4 sm:$0xff]   ;;  %v5410_v20 = vld [vmem:[%s5964_s23 + $0xb20] ss:$16 sps:$4 sm:$0xff]  }
 0x19a   : > { %3631 = vmatpush1.bf16.msra.mxu0 %v5326_v21  ;;  %3959 = vmatpush1.bf16.msra.mxu1 %v5329_v22  ;;  %v5413_v21 = vld [vmem:[%s5964_s23 + $0xb28] ss:$16 sps:$4 sm:$0xff]   ;;  %v5418_v22 = vld [vmem:[%s5964_s23 + $0xb44] ss:$16 sps:$4 sm:$0xff]  }
 0x19b   : > { %3632 = vmatprep.subr.bf16.mxu0 %v5334_v24  ;;  %3960 = vmatprep.subr.bf16.mxu1 %v5337_v23  ;;  %v5421_v24 = vld [vmem:[%s5964_s23 + $0xb4c] ss:$16 sps:$4 sm:$0xff]   ;;  %v5416_v23 = vld [vmem:[%s5964_s23 + $0xb40] ss:$16 sps:$4 sm:$0xff]  }
 0x19e   : > { %3633 = vmatpush1.bf16.msra.mxu0 %v5332_v9  ;;  %3961 = vmatpush1.bf16.msra.mxu1 %v5335_v27  ;;  %v5419_v9 = vld [vmem:[%s5964_s23 + $0xb48] ss:$16 sps:$4 sm:$0xff]   ;;  %v5424_v27 = vld [vmem:[%s5964_s23 + $0xb64] ss:$16 sps:$4 sm:$0xff]  }
 0x19f   : > { %3634 = vmatprep.subr.bf16.mxu0 %v5340_v29  ;;  %3962 = vmatprep.subr.bf16.mxu1 %v5343_v30  ;;  %v5427_v29 = vld [vmem:[%s5964_s23 + $0xb6c] ss:$16 sps:$4 sm:$0xff]   ;;  %v5422_v30 = vld [vmem:[%s5964_s23 + $0xb60] ss:$16 sps:$4 sm:$0xff]  }
 0x1a2   : > { %3635 = vmatpush1.bf16.msra.mxu0 %v5338_v31  ;;  %3963 = vmatpush1.bf16.msra.mxu1 %v5341_v33  ;;  %v5425_v31 = vld [vmem:[%s5964_s23 + $0xb68] ss:$16 sps:$4 sm:$0xff]   ;;  %v5430_v33 = vld [vmem:[%s5964_s23 + $0xb84] ss:$16 sps:$4 sm:$0xff]  }
 0x1a3   : > { %3636 = vmatprep.subr.bf16.mxu0 %v5346_v34  ;;  %3964 = vmatprep.subr.bf16.mxu1 %v5349_v35  ;;  %v5433_v34 = vld [vmem:[%s5964_s23 + $0xb8c] ss:$16 sps:$4 sm:$0xff]   ;;  %v5428_v35 = vld [vmem:[%s5964_s23 + $0xb80] ss:$16 sps:$4 sm:$0xff]  }
 0x1a6   : > { %3637 = vmatpush1.bf16.msra.mxu0 %v5344_v36  ;;  %3965 = vmatpush1.bf16.msra.mxu1 %v5347_v37  ;;  %v5436_v36 = vld [vmem:[%s5964_s23 + $0xba4] ss:$16 sps:$4 sm:$0xff]   ;;  %v5439_v37 = vld [vmem:[%s5964_s23 + $0xbac] ss:$16 sps:$4 sm:$0xff]  }
 0x1a7   : > { %3638 = vmatprep.subr.bf16.mxu0 %v5352_v38  ;;  %3966 = vmatprep.subr.bf16.mxu1 %v5355_v39  ;;  %v5434_v38 = vld [vmem:[%s5964_s23 + $0xba0] ss:$16 sps:$4 sm:$0xff]   ;;  %v5437_v39 = vld [vmem:[%s5964_s23 + $0xba8] ss:$16 sps:$4 sm:$0xff]  }
 0x1aa   : > { %3639 = vmatpush1.bf16.msra.mxu0 %v5350_v28  ;;  %3967 = vmatpush1.bf16.msra.mxu1 %v5353_v41  ;;  %v5442_v28 = vld [vmem:[%s5964_s23 + $0xbc4] ss:$16 sps:$4 sm:$0xff]   ;;  %v5445_v41 = vld [vmem:[%s5964_s23 + $0xbcc] ss:$16 sps:$4 sm:$0xff]  }
 0x1ab   : > { %3649 = vmatprep.subr.bf16.mxu0 %v5358_v42  ;;  %3977 = vmatprep.subr.bf16.mxu1 %v5361_v44  ;;  %v6397_v42 = vld [vmem:[#allocation2 + $0x18] sm:$0xff]  ;;  %v5440_v44 = vld [vmem:[%s5964_s23 + $0xbc0] ss:$16 sps:$4 sm:$0xff]  }
 0x1ad   : > { %3641 = vmatmul.mubr.bf16.vlgmr.msra.gmra.mrb[0].mxu0 %v854_v25  ;;  %3969 = vmatmul.mubr.bf16.vlgmr.msra.gmra.mrb[0].mxu1 %v854_v25  ;;  %v5448_v25 = vld [vmem:[%s5964_s23 + $0xbe4] ss:$16 sps:$4 sm:$0xff]  }
 0x1ae   : > { %3650 = vmatpush1.bf16.msra.mxu0 %v5356_v46  ;;  %3978 = vmatpush1.bf16.msra.mxu1 %v5359_v47  ;;  %v5451_v46 = vld [vmem:[%s5964_s23 + $0xbec] ss:$16 sps:$4 sm:$0xff]   ;;  %v6405_v47 = vrot.slane %v6397_v42, %v6017_v49 }
 0x1af   : > { %3651 = vmatprep.subr.bf16.mxu0 %v5364_v48  ;;  %3979 = vmatprep.subr.bf16.mxu1 %v5367_v50  ;;  %v5446_v48 = vld [vmem:[%s5964_s23 + $0xbe0] ss:$16 sps:$4 sm:$0xff]   ;;  %v5449_v50 = vld [vmem:[%s5964_s23 + $0xbe8] ss:$16 sps:$4 sm:$0xff]  }
 0x1b0   : > { %3681 = vmatprep.mubr.bf16.mxu0 %v857_v51  ;;  %4009 = vmatprep.mubr.bf16.mxu1 %v857_v51  ;;  %v5455_v51 = vld [vmem:[%s5964_s23 + $0xc04] ss:$16 sps:$4 sm:$0xff]  }
 0x1b2   : > { %3652 = vmatpush1.bf16.msra.mxu0 %v5362_v32  ;;  %3980 = vmatpush1.bf16.msra.mxu1 %v5365_v52  ;;  %v5458_v32 = vld [vmem:[%s5964_s23 + $0xc0c] ss:$16 sps:$4 sm:$0xff]   ;;  %v828_v52 = vcombine.high %v6405_v47, %v6405_v47 }
 0x1b3   : > { %3653 = vmatprep.subr.bf16.mxu0 %v5370_v53  ;;  %3981 = vmatprep.subr.bf16.mxu1 %v5373_v54  ;;  %v856_v53 = vpack.c.bf16 %v6331_v40, %v6331_v40  ;;  %v5453_v54 = vld [vmem:[%s5964_s23 + $0xc00] ss:$16 sps:$4 sm:$0xff]  }
 0x1b4   : > { %v5459_v40 = vld [vmem:[%s5964_s23 + $0xc20] ss:$16 sps:$4 sm:$0xff]  }
 0x1b6   : > { %3654 = vmatpush1.bf16.msra.mxu0 %v5368_v55  ;;  %3982 = vmatpush1.bf16.msra.mxu1 %v5371_v56  ;;  %v5456_v55 = vld [vmem:[%s5964_s23 + $0xc08] ss:$16 sps:$4 sm:$0xff]   ;;  %v5461_v56 = vld [vmem:[%s5964_s23 + $0xc24] ss:$16 sps:$4 sm:$0xff]  }
 0x1b7   : > { %3655 = vmatprep.subr.bf16.mxu0 %v5376_v57  ;;  %3983 = vmatprep.subr.bf16.mxu1 %v5379_v58  ;;  %v5464_v57 = vld [vmem:[%s5964_s23 + $0xc2c] ss:$16 sps:$4 sm:$0xff]   ;;  %v859_v58 = vpack.c.bf16 %v828_v52, %v828_v52  ;;  %v5537_v52 = vld [vmem:[%s5964_s23 + $0xdc0] ss:$16 sps:$4 sm:$0xff]  }
 0x1ba   : > { %3656 = vmatpush1.bf16.msra.mxu0 %v5374_v59  ;;  %3984 = vmatpush1.bf16.msra.mxu1 %v5377_v60  ;;  %v5462_v59 = vld [vmem:[%s5964_s23 + $0xc28] ss:$16 sps:$4 sm:$0xff]   ;;  %v5467_v60 = vld [vmem:[%s5964_s23 + $0xc44] ss:$16 sps:$4 sm:$0xff]  }
 0x1bb   : > { %3657 = vmatprep.subr.bf16.mxu0 %v5382_v61  ;;  %3985 = vmatprep.subr.bf16.mxu1 %v5385_v62  ;;  %v5470_v61 = vld [vmem:[%s5964_s23 + $0xc4c] ss:$16 sps:$4 sm:$0xff]   ;;  %v5465_v62 = vld [vmem:[%s5964_s23 + $0xc40] ss:$16 sps:$4 sm:$0xff]  }
 0x1be   : > { %3658 = vmatpush1.bf16.msra.mxu0 %v5380_v63  ;;  %3986 = vmatpush1.bf16.msra.mxu1 %v5383_v0  ;;  %v5468_v63 = vld [vmem:[%s5964_s23 + $0xc48] ss:$16 sps:$4 sm:$0xff]   ;;  %v5473_v0 = vld [vmem:[%s5964_s23 + $0xc64] ss:$16 sps:$4 sm:$0xff]  }
 0x1bf   : > { %3659 = vmatprep.subr.bf16.mxu0 %v5388_v1  ;;  %3987 = vmatprep.subr.bf16.mxu1 %v5391_v2  ;;  %v5476_v1 = vld [vmem:[%s5964_s23 + $0xc6c] ss:$16 sps:$4 sm:$0xff]   ;;  %v5471_v2 = vld [vmem:[%s5964_s23 + $0xc60] ss:$16 sps:$4 sm:$0xff]  }
 0x1c2   : > { %3660 = vmatpush1.bf16.msra.mxu0 %v5386_v3  ;;  %3988 = vmatpush1.bf16.msra.mxu1 %v5389_v4  ;;  %v5474_v3 = vld [vmem:[%s5964_s23 + $0xc68] ss:$16 sps:$4 sm:$0xff]   ;;  %v5479_v4 = vld [vmem:[%s5964_s23 + $0xc84] ss:$16 sps:$4 sm:$0xff]  }
 0x1c3   : > { %3661 = vmatprep.subr.bf16.mxu0 %v5394_v5  ;;  %3989 = vmatprep.subr.bf16.mxu1 %v5397_v6  ;;  %v5482_v5 = vld [vmem:[%s5964_s23 + $0xc8c] ss:$16 sps:$4 sm:$0xff]   ;;  %v5477_v6 = vld [vmem:[%s5964_s23 + $0xc80] ss:$16 sps:$4 sm:$0xff]  }
 0x1c6   : > { %3662 = vmatpush1.bf16.msra.mxu0 %v5392_v7  ;;  %3990 = vmatpush1.bf16.msra.mxu1 %v5395_v8  ;;  %v5480_v7 = vld [vmem:[%s5964_s23 + $0xc88] ss:$16 sps:$4 sm:$0xff]   ;;  %v5485_v8 = vld [vmem:[%s5964_s23 + $0xca4] ss:$16 sps:$4 sm:$0xff]  }
 0x1c7   : > { %3663 = vmatprep.subr.bf16.mxu0 %v5400_v10  ;;  %3991 = vmatprep.subr.bf16.mxu1 %v5403_v11  ;;  %v5488_v10 = vld [vmem:[%s5964_s23 + $0xcac] ss:$16 sps:$4 sm:$0xff]   ;;  %v5483_v11 = vld [vmem:[%s5964_s23 + $0xca0] ss:$16 sps:$4 sm:$0xff]  }
 0x1ca   : > { %3664 = vmatpush1.bf16.msra.mxu0 %v5398_v12  ;;  %3992 = vmatpush1.bf16.msra.mxu1 %v5401_v13  ;;  %v5486_v12 = vld [vmem:[%s5964_s23 + $0xca8] ss:$16 sps:$4 sm:$0xff]   ;;  %v5491_v13 = vld [vmem:[%s5964_s23 + $0xcc4] ss:$16 sps:$4 sm:$0xff]  }
 0x1cb   : > { %3665 = vmatprep.subr.bf16.mxu0 %v5406_v14  ;;  %3993 = vmatprep.subr.bf16.mxu1 %v5409_v15  ;;  %v5494_v14 = vld [vmem:[%s5964_s23 + $0xccc] ss:$16 sps:$4 sm:$0xff]   ;;  %v5489_v15 = vld [vmem:[%s5964_s23 + $0xcc0] ss:$16 sps:$4 sm:$0xff]  }
 0x1ce   : > { %3666 = vmatpush1.bf16.msra.mxu0 %v5404_v16  ;;  %3994 = vmatpush1.bf16.msra.mxu1 %v5407_v17  ;;  %v5492_v16 = vld [vmem:[%s5964_s23 + $0xcc8] ss:$16 sps:$4 sm:$0xff]   ;;  %v5497_v17 = vld [vmem:[%s5964_s23 + $0xce4] ss:$16 sps:$4 sm:$0xff]  }
 0x1cf   : > { %3667 = vmatprep.subr.bf16.mxu0 %v5412_v18  ;;  %3995 = vmatprep.subr.bf16.mxu1 %v5415_v19  ;;  %v5500_v18 = vld [vmem:[%s5964_s23 + $0xcec] ss:$16 sps:$4 sm:$0xff]   ;;  %v5495_v19 = vld [vmem:[%s5964_s23 + $0xce0] ss:$16 sps:$4 sm:$0xff]  }
 0x1d2   : > { %3668 = vmatpush1.bf16.msra.mxu0 %v5410_v20  ;;  %3996 = vmatpush1.bf16.msra.mxu1 %v5413_v21  ;;  %v5498_v20 = vld [vmem:[%s5964_s23 + $0xce8] ss:$16 sps:$4 sm:$0xff]   ;;  %v5503_v21 = vld [vmem:[%s5964_s23 + $0xd04] ss:$16 sps:$4 sm:$0xff]  }
 0x1d3   : > { %3669 = vmatprep.subr.bf16.mxu0 %v5418_v22  ;;  %3997 = vmatprep.subr.bf16.mxu1 %v5421_v24  ;;  %v5506_v22 = vld [vmem:[%s5964_s23 + $0xd0c] ss:$16 sps:$4 sm:$0xff]   ;;  %v5501_v24 = vld [vmem:[%s5964_s23 + $0xd00] ss:$16 sps:$4 sm:$0xff]  }
 0x1d6   : > { %3670 = vmatpush1.bf16.msra.mxu0 %v5416_v23  ;;  %3998 = vmatpush1.bf16.msra.mxu1 %v5419_v9  ;;  %v5504_v23 = vld [vmem:[%s5964_s23 + $0xd08] ss:$16 sps:$4 sm:$0xff]   ;;  %v5509_v9 = vld [vmem:[%s5964_s23 + $0xd24] ss:$16 sps:$4 sm:$0xff]  }
 0x1d7   : > { %3671 = vmatprep.subr.bf16.mxu0 %v5424_v27  ;;  %3999 = vmatprep.subr.bf16.mxu1 %v5427_v29  ;;  %v5512_v27 = vld [vmem:[%s5964_s23 + $0xd2c] ss:$16 sps:$4 sm:$0xff]   ;;  %v5507_v29 = vld [vmem:[%s5964_s23 + $0xd20] ss:$16 sps:$4 sm:$0xff]  }
 0x1da   : > { %3672 = vmatpush1.bf16.msra.mxu0 %v5422_v30  ;;  %4000 = vmatpush1.bf16.msra.mxu1 %v5425_v31  ;;  %v5510_v30 = vld [vmem:[%s5964_s23 + $0xd28] ss:$16 sps:$4 sm:$0xff]   ;;  %v5515_v31 = vld [vmem:[%s5964_s23 + $0xd44] ss:$16 sps:$4 sm:$0xff]  }
 0x1db   : > { %3673 = vmatprep.subr.bf16.mxu0 %v5430_v33  ;;  %4001 = vmatprep.subr.bf16.mxu1 %v5433_v34  ;;  %v5518_v33 = vld [vmem:[%s5964_s23 + $0xd4c] ss:$16 sps:$4 sm:$0xff]   ;;  %v5513_v34 = vld [vmem:[%s5964_s23 + $0xd40] ss:$16 sps:$4 sm:$0xff]  }
 0x1de   : > { %3674 = vmatpush1.bf16.msra.mxu0 %v5428_v35  ;;  %4002 = vmatpush1.bf16.msra.mxu1 %v5431_v26  ;;  %v5516_v35 = vld [vmem:[%s5964_s23 + $0xd48] ss:$16 sps:$4 sm:$0xff]   ;;  %v5521_v26 = vld [vmem:[%s5964_s23 + $0xd64] ss:$16 sps:$4 sm:$0xff]  }
 0x1df   : > { %3675 = vmatprep.subr.bf16.mxu0 %v5436_v36  ;;  %4003 = vmatprep.subr.bf16.mxu1 %v5439_v37  ;;  %v5524_v36 = vld [vmem:[%s5964_s23 + $0xd6c] ss:$16 sps:$4 sm:$0xff]   ;;  %v5519_v37 = vld [vmem:[%s5964_s23 + $0xd60] ss:$16 sps:$4 sm:$0xff]  }
 0x1e2   : > { %3676 = vmatpush1.bf16.msra.mxu0 %v5434_v38  ;;  %4004 = vmatpush1.bf16.msra.mxu1 %v5437_v39  ;;  %v5522_v38 = vld [vmem:[%s5964_s23 + $0xd68] ss:$16 sps:$4 sm:$0xff]   ;;  %v5527_v39 = vld [vmem:[%s5964_s23 + $0xd84] ss:$16 sps:$4 sm:$0xff]  }
 0x1e3   : > { %3677 = vmatprep.subr.bf16.mxu0 %v5442_v28  ;;  %4005 = vmatprep.subr.bf16.mxu1 %v5445_v41  ;;  %v5530_v28 = vld [vmem:[%s5964_s23 + $0xd8c] ss:$16 sps:$4 sm:$0xff]   ;;  %v5525_v41 = vld [vmem:[%s5964_s23 + $0xd80] ss:$16 sps:$4 sm:$0xff]  }
 0x1e6   : > { %3678 = vmatpush1.bf16.msra.mxu0 %v5440_v44  ;;  %4006 = vmatpush1.bf16.msra.mxu1 %v5443_v45  ;;  %v5528_v44 = vld [vmem:[%s5964_s23 + $0xd88] ss:$16 sps:$4 sm:$0xff]   ;;  %v5533_v45 = vld [vmem:[%s5964_s23 + $0xda4] ss:$16 sps:$4 sm:$0xff]  }
 0x1e7   : > { %3679 = vmatprep.subr.bf16.mxu0 %v5448_v25  ;;  %4007 = vmatprep.subr.bf16.mxu1 %v5451_v46  ;;  %v5536_v25 = vld [vmem:[%s5964_s23 + $0xdac] ss:$16 sps:$4 sm:$0xff]   ;;  %v5531_v46 = vld [vmem:[%s5964_s23 + $0xda0] ss:$16 sps:$4 sm:$0xff]  }
 0x1ea   : > { %3680 = vmatpush1.bf16.msra.mxu0 %v5446_v48  ;;  %4008 = vmatpush1.bf16.msra.mxu1 %v5449_v50  ;;  %v5534_v48 = vld [vmem:[%s5964_s23 + $0xda8] ss:$16 sps:$4 sm:$0xff]   ;;  %v5539_v50 = vld [vmem:[%s5964_s23 + $0xdc4] ss:$16 sps:$4 sm:$0xff]  }
 0x1eb   : > { %3690 = vmatprep.subr.bf16.mxu0 %v5455_v51  ;;  %4018 = vmatprep.subr.bf16.mxu1 %v5458_v32  ;;  %v5542_v51 = vld [vmem:[%s5964_s23 + $0xdcc] ss:$16 sps:$4 sm:$0xff]   ;;  %v813_v32 = vcombine.high %v6397_v42, %v6397_v42  ;;  %v5543_v42 = vld [vmem:[%s5964_s23 + $0xde0] ss:$16 sps:$4 sm:$0xff]  }
 0x1ed   : > { %3682 = vmatmul.mubr.bf16.vlgmr.msra.gmra.mrb[0].mxu0 %v856_v53  ;;  %4010 = vmatmul.mubr.bf16.vlgmr.msra.gmra.mrb[0].mxu1 %v856_v53  ;;  %v5540_v53 = vld [vmem:[%s5964_s23 + $0xdc8] ss:$16 sps:$4 sm:$0xff]  }
 0x1ee   : > { %3691 = vmatpush1.bf16.msra.mxu0 %v5453_v54  ;;  %4019 = vmatpush1.bf16.msra.mxu1 %v5456_v55  ;;  %v5545_v54 = vld [vmem:[%s5964_s23 + $0xde4] ss:$16 sps:$4 sm:$0xff]   ;;  %v5548_v55 = vld [vmem:[%s5964_s23 + $0xdec] ss:$16 sps:$4 sm:$0xff]  }
 0x1ef   : > { %3692 = vmatprep.subr.bf16.mxu0 %v5461_v56  ;;  %4020 = vmatprep.subr.bf16.mxu1 %v5464_v57  ;;  %v6478_v56 = vrot.slane %v813_v32, %v6017_v49  ;;  %v5546_v57 = vld [vmem:[%s5964_s23 + $0xde8] ss:$16 sps:$4 sm:$0xff]  }
 0x1f0   : > { %3722 = vmatprep.mubr.bf16.mxu0 %v859_v58  ;;  %4050 = vmatprep.mubr.bf16.mxu1 %v859_v58  ;;  %v5551_v58 = vld [vmem:[%s5964_s23 + $0xe04] ss:$16 sps:$4 sm:$0xff]   ;;  %v5624_v32 = vld [vmem:[%s5964_s23 + $0xf88] ss:$16 sps:$4 sm:$0xff]  }
 0x1f2   : > { %3693 = vmatpush1.bf16.msra.mxu0 %v5459_v40  ;;  %4021 = vmatpush1.bf16.msra.mxu1 %v5462_v59  ;;  %v5554_v40 = vld [vmem:[%s5964_s23 + $0xe0c] ss:$16 sps:$4 sm:$0xff]   ;;  %v829_v59 = vcombine.high %v6478_v56, %v6478_v56 }
 0x1f3   : > { %3694 = vmatprep.subr.bf16.mxu0 %v5467_v60  ;;  %4022 = vmatprep.subr.bf16.mxu1 %v5470_v61  ;;  %v858_v60 = vpack.c.bf16 %v6405_v47, %v6405_v47  ;;  %v5549_v61 = vld [vmem:[%s5964_s23 + $0xe00] ss:$16 sps:$4 sm:$0xff]  }
 0x1f4   : > { %v5555_v47 = vld [vmem:[%s5964_s23 + $0xe20] ss:$16 sps:$4 sm:$0xff]  }
 0x1f6   : > { %3695 = vmatpush1.bf16.msra.mxu0 %v5465_v62  ;;  %4023 = vmatpush1.bf16.msra.mxu1 %v5468_v63  ;;  %v5552_v62 = vld [vmem:[%s5964_s23 + $0xe08] ss:$16 sps:$4 sm:$0xff]   ;;  %v5557_v63 = vld [vmem:[%s5964_s23 + $0xe24] ss:$16 sps:$4 sm:$0xff]  }
 0x1f7   : > { %3696 = vmatprep.subr.bf16.mxu0 %v5473_v0  ;;  %4024 = vmatprep.subr.bf16.mxu1 %v5476_v1  ;;  %v5560_v0 = vld [vmem:[%s5964_s23 + $0xe2c] ss:$16 sps:$4 sm:$0xff]   ;;  %v861_v1 = vpack.c.bf16 %v829_v59, %v829_v59  ;;  %v5641_v59 = vld [vmem:[%s5964_s23 + $0xfe4] ss:$16 sps:$4 sm:$0xff]  }
 0x1fa   : > { %3697 = vmatpush1.bf16.msra.mxu0 %v5471_v2  ;;  %4025 = vmatpush1.bf16.msra.mxu1 %v5474_v3  ;;  %v5558_v2 = vld [vmem:[%s5964_s23 + $0xe28] ss:$16 sps:$4 sm:$0xff]   ;;  %v5563_v3 = vld [vmem:[%s5964_s23 + $0xe44] ss:$16 sps:$4 sm:$0xff]  }
 0x1fb   : > { %3698 = vmatprep.subr.bf16.mxu0 %v5479_v4  ;;  %4026 = vmatprep.subr.bf16.mxu1 %v5482_v5  ;;  %v5566_v4 = vld [vmem:[%s5964_s23 + $0xe4c] ss:$16 sps:$4 sm:$0xff]   ;;  %v5561_v5 = vld [vmem:[%s5964_s23 + $0xe40] ss:$16 sps:$4 sm:$0xff]  }
 0x1fe   : > { %3699 = vmatpush1.bf16.msra.mxu0 %v5477_v6  ;;  %4027 = vmatpush1.bf16.msra.mxu1 %v5480_v7  ;;  %v5564_v6 = vld [vmem:[%s5964_s23 + $0xe48] ss:$16 sps:$4 sm:$0xff]   ;;  %v5569_v7 = vld [vmem:[%s5964_s23 + $0xe64] ss:$16 sps:$4 sm:$0xff]  }
 0x1ff   : > { %3700 = vmatprep.subr.bf16.mxu0 %v5485_v8  ;;  %4028 = vmatprep.subr.bf16.mxu1 %v5488_v10  ;;  %v5572_v8 = vld [vmem:[%s5964_s23 + $0xe6c] ss:$16 sps:$4 sm:$0xff]   ;;  %v5567_v10 = vld [vmem:[%s5964_s23 + $0xe60] ss:$16 sps:$4 sm:$0xff]  }
 0x202   : > { %3701 = vmatpush1.bf16.msra.mxu0 %v5483_v11  ;;  %4029 = vmatpush1.bf16.msra.mxu1 %v5486_v12  ;;  %v5570_v11 = vld [vmem:[%s5964_s23 + $0xe68] ss:$16 sps:$4 sm:$0xff]   ;;  %v5575_v12 = vld [vmem:[%s5964_s23 + $0xe84] ss:$16 sps:$4 sm:$0xff]  }
 0x203   : > { %3702 = vmatprep.subr.bf16.mxu0 %v5491_v13  ;;  %4030 = vmatprep.subr.bf16.mxu1 %v5494_v14  ;;  %v5578_v13 = vld [vmem:[%s5964_s23 + $0xe8c] ss:$16 sps:$4 sm:$0xff]   ;;  %v5573_v14 = vld [vmem:[%s5964_s23 + $0xe80] ss:$16 sps:$4 sm:$0xff]  }
 0x206   : > { %3703 = vmatpush1.bf16.msra.mxu0 %v5489_v15  ;;  %4031 = vmatpush1.bf16.msra.mxu1 %v5492_v16  ;;  %v5576_v15 = vld [vmem:[%s5964_s23 + $0xe88] ss:$16 sps:$4 sm:$0xff]   ;;  %v5581_v16 = vld [vmem:[%s5964_s23 + $0xea4] ss:$16 sps:$4 sm:$0xff]  }
 0x207   : > { %3704 = vmatprep.subr.bf16.mxu0 %v5497_v17  ;;  %4032 = vmatprep.subr.bf16.mxu1 %v5500_v18  ;;  %v5584_v17 = vld [vmem:[%s5964_s23 + $0xeac] ss:$16 sps:$4 sm:$0xff]   ;;  %v5579_v18 = vld [vmem:[%s5964_s23 + $0xea0] ss:$16 sps:$4 sm:$0xff]  }
 0x20a   : > { %3705 = vmatpush1.bf16.msra.mxu0 %v5495_v19  ;;  %4033 = vmatpush1.bf16.msra.mxu1 %v5498_v20  ;;  %v5582_v19 = vld [vmem:[%s5964_s23 + $0xea8] ss:$16 sps:$4 sm:$0xff]   ;;  %v5587_v20 = vld [vmem:[%s5964_s23 + $0xec4] ss:$16 sps:$4 sm:$0xff]  }
 0x20b   : > { %3706 = vmatprep.subr.bf16.mxu0 %v5503_v21  ;;  %4034 = vmatprep.subr.bf16.mxu1 %v5506_v22  ;;  %v5590_v21 = vld [vmem:[%s5964_s23 + $0xecc] ss:$16 sps:$4 sm:$0xff]   ;;  %v5585_v22 = vld [vmem:[%s5964_s23 + $0xec0] ss:$16 sps:$4 sm:$0xff]  }
 0x20e   : > { %3707 = vmatpush1.bf16.msra.mxu0 %v5501_v24  ;;  %4035 = vmatpush1.bf16.msra.mxu1 %v5504_v23  ;;  %v5588_v24 = vld [vmem:[%s5964_s23 + $0xec8] ss:$16 sps:$4 sm:$0xff]   ;;  %v5593_v23 = vld [vmem:[%s5964_s23 + $0xee4] ss:$16 sps:$4 sm:$0xff]  }
 0x20f   : > { %3708 = vmatprep.subr.bf16.mxu0 %v5509_v9  ;;  %4036 = vmatprep.subr.bf16.mxu1 %v5512_v27  ;;  %v5596_v9 = vld [vmem:[%s5964_s23 + $0xeec] ss:$16 sps:$4 sm:$0xff]   ;;  %v5591_v27 = vld [vmem:[%s5964_s23 + $0xee0] ss:$16 sps:$4 sm:$0xff]  }
 0x212   : > { %3709 = vmatpush1.bf16.msra.mxu0 %v5507_v29  ;;  %4037 = vmatpush1.bf16.msra.mxu1 %v5510_v30  ;;  %v5594_v29 = vld [vmem:[%s5964_s23 + $0xee8] ss:$16 sps:$4 sm:$0xff]   ;;  %v5599_v30 = vld [vmem:[%s5964_s23 + $0xf04] ss:$16 sps:$4 sm:$0xff]  }
 0x213   : > { %3710 = vmatprep.subr.bf16.mxu0 %v5515_v31  ;;  %4038 = vmatprep.subr.bf16.mxu1 %v5518_v33  ;;  %v5602_v31 = vld [vmem:[%s5964_s23 + $0xf0c] ss:$16 sps:$4 sm:$0xff]   ;;  %v5597_v33 = vld [vmem:[%s5964_s23 + $0xf00] ss:$16 sps:$4 sm:$0xff]  }
 0x216   : > { %3711 = vmatpush1.bf16.msra.mxu0 %v5513_v34  ;;  %4039 = vmatpush1.bf16.msra.mxu1 %v5516_v35  ;;  %v5600_v34 = vld [vmem:[%s5964_s23 + $0xf08] ss:$16 sps:$4 sm:$0xff]   ;;  %v5605_v35 = vld [vmem:[%s5964_s23 + $0xf24] ss:$16 sps:$4 sm:$0xff]  }
 0x217   : > { %3712 = vmatprep.subr.bf16.mxu0 %v5521_v26  ;;  %4040 = vmatprep.subr.bf16.mxu1 %v5524_v36  ;;  %v5608_v26 = vld [vmem:[%s5964_s23 + $0xf2c] ss:$16 sps:$4 sm:$0xff]   ;;  %v5603_v36 = vld [vmem:[%s5964_s23 + $0xf20] ss:$16 sps:$4 sm:$0xff]  }
 0x21a   : > { %3713 = vmatpush1.bf16.msra.mxu0 %v5519_v37  ;;  %4041 = vmatpush1.bf16.msra.mxu1 %v5522_v38  ;;  %v5606_v37 = vld [vmem:[%s5964_s23 + $0xf28] ss:$16 sps:$4 sm:$0xff]   ;;  %v5611_v38 = vld [vmem:[%s5964_s23 + $0xf44] ss:$16 sps:$4 sm:$0xff]  }
 0x21b   : > { %3714 = vmatprep.subr.bf16.mxu0 %v5527_v39  ;;  %4042 = vmatprep.subr.bf16.mxu1 %v5530_v28  ;;  %v5614_v39 = vld [vmem:[%s5964_s23 + $0xf4c] ss:$16 sps:$4 sm:$0xff]   ;;  %v5609_v28 = vld [vmem:[%s5964_s23 + $0xf40] ss:$16 sps:$4 sm:$0xff]  }
 0x21e   : > { %3715 = vmatpush1.bf16.msra.mxu0 %v5525_v41  ;;  %4043 = vmatpush1.bf16.msra.mxu1 %v5528_v44  ;;  %v5612_v41 = vld [vmem:[%s5964_s23 + $0xf48] ss:$16 sps:$4 sm:$0xff]   ;;  %v5617_v44 = vld [vmem:[%s5964_s23 + $0xf64] ss:$16 sps:$4 sm:$0xff]  }
 0x21f   : > { %3716 = vmatprep.subr.bf16.mxu0 %v5533_v45  ;;  %4044 = vmatprep.subr.bf16.mxu1 %v5536_v25  ;;  %v5620_v45 = vld [vmem:[%s5964_s23 + $0xf6c] ss:$16 sps:$4 sm:$0xff]   ;;  %v5615_v25 = vld [vmem:[%s5964_s23 + $0xf60] ss:$16 sps:$4 sm:$0xff]  }
 0x222   : > { %3717 = vmatpush1.bf16.msra.mxu0 %v5531_v46  ;;  %4045 = vmatpush1.bf16.msra.mxu1 %v5534_v48  ;;  %v5618_v46 = vld [vmem:[%s5964_s23 + $0xf68] ss:$16 sps:$4 sm:$0xff]   ;;  %v5623_v48 = vld [vmem:[%s5964_s23 + $0xf84] ss:$16 sps:$4 sm:$0xff]  }
 0x223   : > { %3718 = vmatprep.subr.bf16.mxu0 %v5539_v50  ;;  %4046 = vmatprep.subr.bf16.mxu1 %v5542_v51  ;;  %v5626_v50 = vld [vmem:[%s5964_s23 + $0xf8c] ss:$16 sps:$4 sm:$0xff]   ;;  %v5621_v51 = vld [vmem:[%s5964_s23 + $0xf80] ss:$16 sps:$4 sm:$0xff]  }
 0x226   : > { %3719 = vmatpush1.bf16.msra.mxu0 %v5537_v52  ;;  %4047 = vmatpush1.bf16.msra.mxu1 %v5540_v53  ;;  %v5629_v52 = vld [vmem:[%s5964_s23 + $0xfa4] ss:$16 sps:$4 sm:$0xff]   ;;  %v5632_v53 = vld [vmem:[%s5964_s23 + $0xfac] ss:$16 sps:$4 sm:$0xff]  }
 0x227   : > { %3720 = vmatprep.subr.bf16.mxu0 %v5545_v54  ;;  %4048 = vmatprep.subr.bf16.mxu1 %v5548_v55  ;;  %v5627_v54 = vld [vmem:[%s5964_s23 + $0xfa0] ss:$16 sps:$4 sm:$0xff]   ;;  %v5630_v55 = vld [vmem:[%s5964_s23 + $0xfa8] ss:$16 sps:$4 sm:$0xff]  }
 0x22a   : > { %3721 = vmatpush1.bf16.msra.mxu0 %v5543_v42  ;;  %4049 = vmatpush1.bf16.msra.mxu1 %v5546_v57  ;;  %v5635_v42 = vld [vmem:[%s5964_s23 + $0xfc4] ss:$16 sps:$4 sm:$0xff]   ;;  %v5638_v57 = vld [vmem:[%s5964_s23 + $0xfcc] ss:$16 sps:$4 sm:$0xff]  }
 0x22b   : > { %3731 = vmatprep.subr.bf16.mxu0 %v5551_v58  ;;  %4059 = vmatprep.subr.bf16.mxu1 %v5554_v40  ;;  %v5633_v58 = vld [vmem:[%s5964_s23 + $0xfc0] ss:$16 sps:$4 sm:$0xff]   ;;  %v5636_v40 = vld [vmem:[%s5964_s23 + $0xfc8] ss:$16 sps:$4 sm:$0xff]  }
 0x22d   : > { %3723 = vmatmul.mubr.bf16.vlgmr.msra.gmra.mrb[0].mxu0 %v858_v60  ;;  %4051 = vmatmul.mubr.bf16.vlgmr.msra.gmra.mrb[0].mxu1 %v858_v60  ;;  %v5644_v60 = vld [vmem:[%s5964_s23 + $0xfec] ss:$16 sps:$4 sm:$0xff]  }
 0x22e   : > { %3732 = vmatpush1.bf16.msra.mxu0 %v5549_v61  ;;  %4060 = vmatpush1.bf16.msra.mxu1 %v5552_v62  ;;  %v5639_v61 = vld [vmem:[%s5964_s23 + $0xfe0] ss:$16 sps:$4 sm:$0xff]   ;;  %v5642_v62 = vld [vmem:[%s5964_s23 + $0xfe8] ss:$16 sps:$4 sm:$0xff]  }
 0x22f   : > { %3733 = vmatprep.subr.bf16.mxu0 %v5557_v63  ;;  %4061 = vmatprep.subr.bf16.mxu1 %v5560_v0  ;;  %v860_v63 = vpack.c.bf16 %v6478_v56, %v6478_v56  ;;  %v866_v0 = vsub.s32 0, %v6009_v43 }
 0x230   : > { %3763 = vmatprep.mubr.bf16.mxu0 %v861_v1  ;;  %4091 = vmatprep.mubr.bf16.mxu1 %v861_v1  ;;  %v874_v1 = vsub.s32 2, %v6009_v43 }
 0x232   : > { %3734 = vmatpush1.bf16.msra.mxu0 %v5555_v47  ;;  %4062 = vmatpush1.bf16.msra.mxu1 %v5558_v2  ;;  %v862_v47 = vld [vmem:[%s206_s27] sm:$0xf]  ;;  %v870_v2 = vsub.s32 1, %v6009_v43 }
 0x233   : > { %3735 = vmatprep.subr.bf16.mxu0 %v5563_v3  ;;  %4063 = vmatprep.subr.bf16.mxu1 %v5566_v4  ;;  %v878_v3 = vsub.s32 3, %v6009_v43  ;;  %v867_v4 = vrot.slane %v862_v47, %v866_v0  ;;  %v875_v56 = vrot.slane %v862_v47, %v874_v1 }
 0x236   : > { %3736 = vmatpush1.bf16.msra.mxu0 %v5561_v5  ;;  %4064 = vmatpush1.bf16.msra.mxu1 %v5564_v6  ;;  %v871_v5 = vrot.slane %v862_v47, %v870_v2  ;;  %v879_v6 = vrot.slane %v862_v47, %v878_v3 }
 0x237   : > { %3737 = vmatprep.subr.bf16.mxu0 %v5569_v7  ;;  %4065 = vmatprep.subr.bf16.mxu1 %v5572_v8 }
 0x23a   : > { %3738 = vmatpush1.bf16.msra.mxu0 %v5567_v10  ;;  %4066 = vmatpush1.bf16.msra.mxu1 %v5570_v11 }
 0x23b   : > { %3739 = vmatprep.subr.bf16.mxu0 %v5575_v12  ;;  %4067 = vmatprep.subr.bf16.mxu1 %v5578_v13 }
 0x23e   : > { %3740 = vmatpush1.bf16.msra.mxu0 %v5573_v14  ;;  %4068 = vmatpush1.bf16.msra.mxu1 %v5576_v15 }
 0x23f   : > { %3741 = vmatprep.subr.bf16.mxu0 %v5581_v16  ;;  %4069 = vmatprep.subr.bf16.mxu1 %v5584_v17 }
 0x242   : > { %3742 = vmatpush1.bf16.msra.mxu0 %v5579_v18  ;;  %4070 = vmatpush1.bf16.msra.mxu1 %v5582_v19 }
 0x243   : > { %3743 = vmatprep.subr.bf16.mxu0 %v5587_v20  ;;  %4071 = vmatprep.subr.bf16.mxu1 %v5590_v21 }
 0x246   : > { %3744 = vmatpush1.bf16.msra.mxu0 %v5585_v22  ;;  %4072 = vmatpush1.bf16.msra.mxu1 %v5588_v24 }
 0x247   : > { %3745 = vmatprep.subr.bf16.mxu0 %v5593_v23  ;;  %4073 = vmatprep.subr.bf16.mxu1 %v5596_v9 }
 0x24a   : > { %3746 = vmatpush1.bf16.msra.mxu0 %v5591_v27  ;;  %4074 = vmatpush1.bf16.msra.mxu1 %v5594_v29 }
 0x24b   : > { %3747 = vmatprep.subr.bf16.mxu0 %v5599_v30  ;;  %4075 = vmatprep.subr.bf16.mxu1 %v5602_v31 }
 0x24e   : > { %3748 = vmatpush1.bf16.msra.mxu0 %v5597_v33  ;;  %4076 = vmatpush1.bf16.msra.mxu1 %v5600_v34 }
 0x24f   : > { %3749 = vmatprep.subr.bf16.mxu0 %v5605_v35  ;;  %4077 = vmatprep.subr.bf16.mxu1 %v5608_v26 }
 0x252   : > { %3750 = vmatpush1.bf16.msra.mxu0 %v5603_v36  ;;  %4078 = vmatpush1.bf16.msra.mxu1 %v5606_v37 }
 0x253   : > { %3751 = vmatprep.subr.bf16.mxu0 %v5611_v38  ;;  %4079 = vmatprep.subr.bf16.mxu1 %v5614_v39 }
 0x256   : > { %3752 = vmatpush1.bf16.msra.mxu0 %v5609_v28  ;;  %4080 = vmatpush1.bf16.msra.mxu1 %v5612_v41 }
 0x257   : > { %3753 = vmatprep.subr.bf16.mxu0 %v5617_v44  ;;  %4081 = vmatprep.subr.bf16.mxu1 %v5620_v45 }
 0x25a   : > { %3754 = vmatpush1.bf16.msra.mxu0 %v5615_v25  ;;  %4082 = vmatpush1.bf16.msra.mxu1 %v5618_v46 }
 0x25b   : > { %3755 = vmatprep.subr.bf16.mxu0 %v5623_v48  ;;  %4083 = vmatprep.subr.bf16.mxu1 %v5626_v50 }
 0x25e   : > { %3756 = vmatpush1.bf16.msra.mxu0 %v5621_v51  ;;  %4084 = vmatpush1.bf16.msra.mxu1 %v5624_v32 }
 0x25f   : > { %3757 = vmatprep.subr.bf16.mxu0 %v5629_v52  ;;  %4085 = vmatprep.subr.bf16.mxu1 %v5632_v53 }
 0x262   : > { %3758 = vmatpush1.bf16.msra.mxu0 %v5627_v54  ;;  %4086 = vmatpush1.bf16.msra.mxu1 %v5630_v55 }
 0x263   : > { %3759 = vmatprep.subr.bf16.mxu0 %v5635_v42  ;;  %4087 = vmatprep.subr.bf16.mxu1 %v5638_v57 }
 0x266   : > { %3760 = vmatpush1.bf16.msra.mxu0 %v5633_v58  ;;  %4088 = vmatpush1.bf16.msra.mxu1 %v5636_v40 }
 0x267   : > { %3761 = vmatprep.subr.bf16.mxu0 %v5641_v59  ;;  %4089 = vmatprep.subr.bf16.mxu1 %v5644_v60 }
 0x26a   : > { %3762 = vmatpush1.bf16.msra.mxu0 %v5639_v61  ;;  %4090 = vmatpush1.bf16.msra.mxu1 %v5642_v62 }
 0x26d   : > { %3764 = vmatmul.mubr.bf16.vlgmr.msra.gmra.mrb[0].mxu0 %v860_v63  ;;  %4092 = vmatmul.mubr.bf16.vlgmr.msra.gmra.mrb[0].mxu1 %v860_v63 }
 0x340   : > { %v3765_v7 = vpop.f32.mrb[0].mxu0  ;;  %v4093_v8 = vpop.f32.mrb[0].mxu1 }
 0x341   : > { %v4755_v10 = vadd.f32 %v3765_v7, %v867_v4  ;;  %v4757_v11 = vadd.f32 %v4093_v8, %v875_v56  ;;  %v3767_v12 = vpop.f32.mrb[1].mxu0  ;;  %v4095_v13 = vpop.f32.mrb[1].mxu1 }
 0x342   : > { %v4756_v14 = vadd.f32 %v3767_v12, %v871_v5  ;;  %v4758_v15 = vadd.f32 %v4095_v13, %v879_v6  ;;  %v3769_v16 = vpop.f32.mrb[2].mxu0  ;;  %v4097_v17 = vpop.f32.mrb[2].mxu1 }
 0x343   : > { %v3770_v18 = vpop.f32.mrb[3].mxu0  ;;  %v4098_v19 = vpop.f32.mrb[3].mxu1 }
 0x344   : > { %v4104_v20 = vcombine.low %v4755_v10, %v4756_v14  ;;  %v4105_v43 = vcombine.low %v4757_v11, %v4758_v15 }
 0x346   : > { %v4112_v21 = vrot.slane %v4104_v20, %v6017_v49  ;;  %v4119_v22 = vrot.slane %v4105_v43, %v6017_v49 }
 0x348   : > { %v4120_v24 = vcombine.low %v4112_v21, %v4119_v22 }
 0x34a   : > { %4122 = vst [vmem:[%s240_s26] sm:$0xff] %v4120_v24 }
 0x34b PF: > { %p14_p13 = scmp.ge.s32.totalorder %s5822_s16, 6   ;;  %s6598_s12 = smov %s5764_s13 }
 0x34c   : > { %s6599_s13 = smov %s5768_s14  ;;  %s6600_s14 = smov %s5832_s19 }
 0x34d   : > { %s6601_s15 = smov %s5822_s16  ;;  %16 = sbr.rel (!%p14_p13) target bundleno = 4 (0x4), region = 88 }
 0x354   :  { %4145 = vsyncpa [#allocation3], 1 }
 0x355   :  { %4147 = vsyncpa [#allocation3 + $0x1], 1 }
 0x356   :  { %4148 = vsyncpa [#allocation5], 1 }
 0x357   :  { %4150 = vsyncpa [#allocation5 + $0x1], 1 }

// kernel: bs_side_reconstructor_forward.3
= control target key start
LH: loop header
LB: loop body
LE: loop exit
PB: predicated region body
PF: predicated region fallthrough
CT: control target
= control target key end

     0   :  { %s8628_s24 = smov 0   ;;  %s11034_s0 = inlined_call_operand.vmem [shape: f32[128,32], index: 0, kind: input, shape index: {}]   ;;  %s11035_s1 = inlined_call_operand.vmem [shape: f32[2,32,32], index: 1, kind: input, shape index: {}]   ;;  %s11036_s2 = inlined_call_operand.vmem [shape: f32[2,1,32], index: 2, kind: input, shape index: {}]   ;;  %s11037_s3 = inlined_call_operand.vmem [shape: f32[2,32,32], index: 3, kind: input, shape index: {}]   ;;  %s11038_s4 = inlined_call_operand.vmem [shape: f32[2,1,32], index: 4, kind: input, shape index: {}]   ;;  %s11039_s5 = inlined_call_operand.vmem [shape: f32[2,32,32], index: 5, kind: input, shape index: {}]   ;;  %s11040_s6 = inlined_call_operand.vmem [shape: f32[2,1,32], index: 6, kind: input, shape index: {}]   ;;  %s11041_s7 = inlined_call_operand.vmem [shape: f32[2,32,32], index: 7, kind: input, shape index: {}]   ;;  %s11042_s8 = inlined_call_operand.vmem [shape: f32[2,1,32], index: 8, kind: input, shape index: {}]   ;;  %s11043_s9 = inlined_call_operand.vmem [shape: f32[2,32,64], index: 9, kind: input, shape index: {}]   ;;  %s11044_s10 = inlined_call_operand.vmem [shape: f32[2,1,64], index: 10, kind: input, shape index: {}]   ;;  %s11045_s11 = inlined_call_operand.vmem [shape: f32[2,64,32], index: 11, kind: input, shape index: {}]   ;;  %s11046_s12 = inlined_call_operand.vmem [shape: f32[2,1,32], index: 12, kind: input, shape index: {}]   ;;  %s11047_s13 = inlined_call_operand.vmem [shape: f32[2,1,32], index: 13, kind: input, shape index: {}]   ;;  %s11048_s14 = inlined_call_operand.vmem [shape: f32[2,1,32], index: 14, kind: input, shape index: {}]   ;;  %s11049_s15 = inlined_call_operand.vmem [shape: f32[2,1,32], index: 15, kind: input, shape index: {}]   ;;  %s11050_s16 = inlined_call_operand.vmem [shape: f32[2,1,32], index: 16, kind: input, shape index: {}]   ;;  %s11051_s17 = inlined_call_operand.vmem [shape: f32[128,32], index: 17, kind: output, shape index: {}]  }
   0x1   :  { %11071 = sst [smem:[#allocation36_spill]] %s11034_s0 }
   0x2   :  { %11072 = sst [smem:[#allocation37_spill]] %s11035_s1 }
   0x3   :  { %11073 = sst [smem:[#allocation38_spill]] %s11036_s2 }
   0x4   :  { %11074 = sst [smem:[#allocation39_spill]] %s11037_s3 }
   0x5   :  { %11075 = sst [smem:[#allocation40_spill]] %s11039_s5 }
   0x6   :  { %11076 = sst [smem:[#allocation41_spill]] %s11041_s7 }
   0x7   :  { %11077 = sst [smem:[#allocation42_spill]] %s11043_s9 }
   0x8   :  { %11078 = sst [smem:[#allocation43_spill]] %s11044_s10 }
   0x9   :  { %11079 = sst [smem:[#allocation44_spill]] %s11049_s15 }
   0xa   :  { %11080 = sst [smem:[#allocation45_spill]] %s11050_s16 }
   0xb   :  { %11081 = sst [smem:[#allocation46_spill]] %s11051_s17 }
   0xc LB: > { %11082 = sst [smem:[#allocation3_spill]] %s8530_s24  ;;  %s6203_s25 = sadd.s32 4294967295, %s8530_s24   ;;  %s8530_s24 = sphi %s8628_s24, %s27_s24  }
   0xd   : > { %p6206_p0 = scmp.ge.s32.totalorder %s8530_s24, 1  ;;  %p612_p1 = scmp.lt.s32.totalorder %s8530_s24, 3 }
   0xf   : > { %p613_p2 = pnand %p6206_p0, %p612_p1 }
  0x11   : > { %616 = sbr.rel (%p613_p2) target bundleno = 5711 (0x164f), region = 88 }
  0x18   : > { %p714_p3 = scmp.lt.s32.totalorder %s6203_s25, 1  ;;  %s11084_s19 = sld [smem:[#allocation37_spill]] }
  0x19   : > { %s11085_s3 = sld [smem:[#allocation39_spill]]  ;;  %s11086_s5 = sld [smem:[#allocation40_spill]] }
  0x1a   : > { %s8636_s26 = scalar_select %p714_p3, %s6203_s25, 1 }
  0x1b   : > { %s11087_s7 = sld [smem:[#allocation41_spill]]  ;;  %s11088_s9 = sld [smem:[#allocation42_spill]] }
  0x1c   : > { %s6520_s27 = sshll.u32 %s8636_s26, 5  ;;  %s6525_s0 = sshll.u32 %s8636_s26, 6 }
  0x1d   : > { %s8688_s18 = scalar_lea.vmem %s11045_s11, %s6525_s0  ;;  %s764_s24 = scalar_lea.vmem %s11047_s13, %s8636_s26 }
  0x1e   : > { %s8646_s1 = scalar_lea.vmem %s11084_s19, %s6520_s27  ;;  %s11092_s0 = sld [smem:[#allocation45_spill]] }
  0x1f   : > { %s8651_s22 = scalar_lea.vmem %s11085_s3, %s6520_s27  ;;  %s8660_s28 = scalar_lea.vmem %s11086_s5, %s6520_s27 }
  0x20   : > { %s11091_s5 = sld [smem:[#allocation44_spill]]  ;;  %p6219_p4 = scmp.ne.s32.totalorder %s6203_s25, 0 }
  0x21   : > { %s8669_s2 = scalar_lea.vmem %s11087_s7, %s6520_s27  ;;  %s8678_s17 = scalar_lea.vmem %s11088_s9, %s6520_s27  ;;  %vm794_vm0 = vcmask (!%p6219_p4), 261120  }
  0x22   : > { %11089 = sst [smem:[#allocation4_spill]] %s8678_s17  ;;  %s767_s9 = scalar_lea.vmem %s11048_s14, %s8636_s26 }
  0x23   : > { %777 = sbr.rel (%p6219_p4) target bundleno = 50 (0x32), region = 92  ;;  %s11093_s20 = sld [smem:[#allocation36_spill]] (!%p6219_p4) }
  0x24   : > { %s773_s29 = scalar_lea.vmem %s11092_s0, %s8636_s26 }
  0x26   : > { %s770_s10 = scalar_lea.vmem %s11091_s5, %s8636_s26 }
  0x29   : > { %v778_v0 = vld [vmem:[%s11093_s20] sm:$0xff] (!%p6219_p4)  ;;  %v779_v1 = vld [vmem:[%s11093_s20 + $0x8] sm:$0xff] (!%p6219_p4)  ;;  %v780_v2 = vld [vmem:[%s11093_s20 + $0x10] sm:$0xff] (!%p6219_p4) }
  0x2a   : > { %795 = vst.msk [vmem:[#allocation2] sm:$0xff] %vm794_vm0, %v778_v0  ;;  %796 = vst.msk [vmem:[#allocation2 + $0x8] sm:$0xff] %vm794_vm0, %v779_v1  ;;  %v781_v3 = vld [vmem:[%s11093_s20 + $0x18] sm:$0xff]  ;;  %v782_v4 = vld [vmem:[%s11093_s20 + $0x20] sm:$0xff] }
  0x2b   : > { %797 = vst.msk [vmem:[#allocation2 + $0x10] sm:$0xff] %vm794_vm0, %v780_v2  ;;  %v783_v5 = vld [vmem:[%s11093_s20 + $0x28] sm:$0xff]  ;;  %798 = vst.msk [vmem:[#allocation2 + $0x18] sm:$0xff] %vm794_vm0, %v781_v3  ;;  %v784_v6 = vld [vmem:[%s11093_s20 + $0x30] sm:$0xff] }
  0x2c   : > { %799 = vst.msk [vmem:[#allocation2 + $0x20] sm:$0xff] %vm794_vm0, %v782_v4  ;;  %800 = vst.msk [vmem:[#allocation2 + $0x28] sm:$0xff] %vm794_vm0, %v783_v5  ;;  %v785_v7 = vld [vmem:[%s11093_s20 + $0x38] sm:$0xff]  ;;  %v786_v8 = vld [vmem:[%s11093_s20 + $0x40] sm:$0xff] }
  0x2d   : > { %801 = vst.msk [vmem:[#allocation2 + $0x30] sm:$0xff] %vm794_vm0, %v784_v6  ;;  %802 = vst.msk [vmem:[#allocation2 + $0x38] sm:$0xff] %vm794_vm0, %v785_v7  ;;  %v787_v9 = vld [vmem:[%s11093_s20 + $0x48] sm:$0xff]  ;;  %v788_v10 = vld [vmem:[%s11093_s20 + $0x50] sm:$0xff] }
  0x2e   : > { %803 = vst.msk [vmem:[#allocation2 + $0x40] sm:$0xff] %vm794_vm0, %v786_v8  ;;  %v789_v11 = vld [vmem:[%s11093_s20 + $0x58] sm:$0xff]  ;;  %804 = vst.msk [vmem:[#allocation2 + $0x48] sm:$0xff] %vm794_vm0, %v787_v9  ;;  %v790_v12 = vld [vmem:[%s11093_s20 + $0x60] sm:$0xff] }
  0x2f   : > { %805 = vst.msk [vmem:[#allocation2 + $0x50] sm:$0xff] %vm794_vm0, %v788_v10  ;;  %806 = vst.msk [vmem:[#allocation2 + $0x58] sm:$0xff] %vm794_vm0, %v789_v11  ;;  %v791_v13 = vld [vmem:[%s11093_s20 + $0x68] sm:$0xff]  ;;  %v792_v14 = vld [vmem:[%s11093_s20 + $0x70] sm:$0xff] }
  0x30   : > { %807 = vst.msk [vmem:[#allocation2 + $0x60] sm:$0xff] %vm794_vm0, %v790_v12  ;;  %808 = vst.msk [vmem:[#allocation2 + $0x68] sm:$0xff] %vm794_vm0, %v791_v13  ;;  %v793_v15 = vld [vmem:[%s11093_s20 + $0x78] sm:$0xff] }
  0x31   : > { %809 = vst.msk [vmem:[#allocation2 + $0x70] sm:$0xff] %vm794_vm0, %v792_v14  ;;  %810 = vst.msk [vmem:[#allocation2 + $0x78] sm:$0xff] %vm794_vm0, %v793_v15 }
  0x32 PF: > { %v827_v16 = vld [vmem:[%s8646_s1] sm:$0xff]  ;;  %v828_v17 = vld [vmem:[%s8646_s1 + $0x8] sm:$0xff]  ;;  %v829_v18 = vld [vmem:[%s8646_s1 + $0x10] sm:$0xff]  ;;  %vm838_vm1 = vcmask 261120   ;;  %vm1360_vm2 = vcmask 64512   ;;  %s11104_s15 = scalar_lea.vmem %s11038_s4, %s8636_s26  ;;  %s8532_s16 = smov 120  }
  0x33   : > { %v7554_v19 = vpack.c.bf16 %v828_v17, %v827_v16  ;;  %v830_v20 = vld [vmem:[%s8646_s1 + $0x18] sm:$0xff]  ;;  %v1048_v23 = vld [vmem:[%s8651_s22] sm:$0xff]  ;;  %v1049_v24 = vld [vmem:[%s8651_s22 + $0x8] sm:$0xff]  ;;  %s8533_s30 = smov 112   ;;  %s11107_s19 = scalar_lea.vmem %s11040_s6, %s8636_s26  ;;  %vm1514_vm4 = vcmask 523264   ;;  %vm3074_vm5 = vcmask 130048  }
  0x34   : > { %v7558_v22 = vpack.c.bf16 %v830_v20, %v829_v18  ;;  %v7562_v25 = vpack.c.bf16 %v1049_v24, %v1048_v23  ;;  %v1050_v27 = vld [vmem:[%s8651_s22 + $0x10] sm:$0xff]  ;;  %v1051_v28 = vld [vmem:[%s8651_s22 + $0x18] sm:$0xff]  ;;  %v1204_v30 = vld [vmem:[%s8660_s28] sm:$0xff]  ;;  %s8534_s3 = smov 104   ;;  %s8535_s21 = smov 8   ;;  %vm3083_vm6 = vcmask 195584  }
  0x35   : > { %v8778_v21 = vld [vmem:[#allocation2 + $0x40] sm:$0xff]  ;;  %7930 = vmatprep.subr.bf16.mxu1 %v7554_v19  ;;  %7555 = vmatprep.subr.bf16.mxu0 %v7554_v19  ;;  %v8787_v29 = vld [vmem:[#allocation2 + $0x48] sm:$0xff]  ;;  %v7566_v33 = vpack.c.bf16 %v1051_v28, %v1050_v27  ;;  %v1206_v36 = vld [vmem:[%s8660_s28 + $0x10] sm:$0xff]  ;;  %s8536_s27 = smov 16   ;;  %s8537_s23 = smov 24  }
  0x36   : > { %6926 = vmatprep.mubr.msk.f32.mxu1 %vm838_vm1, %v8778_v21  ;;  %7932 = vmatpush3.bf16.msra.mxu1 %v7554_v19  ;;  %v1205_v31 = vld [vmem:[%s8660_s28 + $0x8] sm:$0xff]  ;;  %v821_v32 = vld [vmem:[#allocation2 + $0x50] sm:$0xff]  ;;  %v1207_v37 = vld [vmem:[%s8660_s28 + $0x18] sm:$0xff]  ;;  %s11094_s28 = sld [smem:[#allocation38_spill]]  ;;  %s11188_s22 = scalar_lea.vmem %s11042_s8, %s8636_s26 }
  0x37   : > { %7557 = vmatpush3.bf16.msra.mxu0 %v7554_v19  ;;  %7931 = vmatprep.subr.bf16.mxu1 %v7558_v22  ;;  %v7570_v35 = vpack.c.bf16 %v1205_v31, %v1204_v30  ;;  %v822_v38 = vld [vmem:[#allocation2 + $0x58] sm:$0xff]  ;;  %v813_v39 = vld [vmem:[#allocation2 + $0x10] sm:$0xff]  ;;  %v823_v40 = vld [vmem:[#allocation2 + $0x60] sm:$0xff]  ;;  %v7574_v42 = vpack.c.bf16 %v1207_v37, %v1206_v36  ;;  %s11200_s7 = scalar_lea.vmem %s11046_s12, %s8636_s26 }
  0x38   : > { %7559 = vmatprep.subr.bf16.mxu0 %v7558_v22  ;;  %v814_v41 = vld [vmem:[#allocation2 + $0x18] sm:$0xff]  ;;  %v824_v43 = vld [vmem:[#allocation2 + $0x68] sm:$0xff]  ;;  %v815_v44 = vld [vmem:[#allocation2 + $0x20] sm:$0xff] }
  0x39   : > { %v811_v26 = vld [vmem:[#allocation2] sm:$0xff]  ;;  %v812_v34 = vld [vmem:[#allocation2 + $0x8] sm:$0xff]  ;;  %v825_v45 = vld [vmem:[#allocation2 + $0x70] sm:$0xff] }
  0x3a   : > { %6914 = vmatprep.mubr.msk.f32.mxu0 %vm838_vm1, %v811_v26  ;;  %7933 = vmatpush3.bf16.msra.mxu1 %v7558_v22  ;;  %v816_v46 = vld [vmem:[#allocation2 + $0x28] sm:$0xff]  ;;  %v817_v47 = vld [vmem:[#allocation2 + $0x30] sm:$0xff]  ;;  %v826_v48 = vld [vmem:[#allocation2 + $0x78] sm:$0xff] }
  0x3b   : > { %7561 = vmatpush3.bf16.msra.mxu0 %v7558_v22  ;;  %7563 = vmatprep.subr.bf16.mxu1 %v7562_v25  ;;  %v818_v49 = vld [vmem:[#allocation2 + $0x38] sm:$0xff]  ;;  %v8889_v13 = vld [vmem:[%s11104_s15] ss:$0 sm:$0xff]  ;;  %vm8895_vm3 = vmpackc.low %vm1360_vm2, %vm1360_vm2 }
  0x3c   : > { %7571 = vmatprep.subr.bf16.mxu0 %v7570_v35  ;;  %s11095_s5 = scalar_lea.vmem %s11094_s28, %s8636_s26  ;;  %s11197_s28 = sld [smem:[#allocation4_spill]] }
  0x3d   : > { %6927 = vmatmul.mubr.msk.f32.vlgmr.msra.gmra.mrb[0].mxu1 %vm838_vm1, %v8787_v29  ;;  %v8849_v50 = vld [vmem:[%s11095_s5] ss:$0 sm:$0xff] }
  0x3e   : > { %6915 = vmatmul.mubr.msk.f32.vlgmr.msra.gmra.mrb[0].mxu0 %vm838_vm1, %v812_v34  ;;  %7565 = vmatpush3.bf16.msra.mxu1 %v7562_v25 }
  0x3f   : > { %6929 = vmatprep.mubr.msk.f32.mxu1 %vm838_vm1, %v821_v32  ;;  %7567 = vmatprep.subr.bf16.mxu1 %v7566_v33 }
  0x40   : > { %6917 = vmatprep.mubr.msk.f32.mxu0 %vm838_vm1, %v813_v39  ;;  %7573 = vmatpush3.bf16.msra.mxu0 %v7570_v35 }
  0x41   : > { %6930 = vmatmul.mubr.msk.f32.gmra.mrb[2].mxu1 %vm838_vm1, %v822_v38  ;;  %7575 = vmatprep.subr.bf16.mxu0 %v7574_v42 }
  0x42   : > { %6918 = vmatmul.mubr.msk.f32.gmra.mrb[2].mxu0 %vm838_vm1, %v814_v41  ;;  %6932 = vmatprep.mubr.msk.f32.mxu1 %vm838_vm1, %v823_v40 }
  0x43   : > { %7569 = vmatpush3.bf16.msra.mxu1 %v7566_v33  ;;  %6920 = vmatprep.mubr.msk.f32.mxu0 %vm838_vm1, %v815_v44 }
  0x44   : > { %7577 = vmatpush3.bf16.msra.mxu0 %v7574_v42 }
  0x45   : > { %6933 = vmatmul.mubr.msk.f32.gmra.mrb[4].mxu1 %vm838_vm1, %v824_v43 }
  0x46   : > { %6921 = vmatmul.mubr.msk.f32.gmra.mrb[4].mxu0 %vm838_vm1, %v816_v46  ;;  %6935 = vmatprep.mubr.msk.f32.mxu1 %vm838_vm1, %v825_v45 }
  0x47   : > { %6923 = vmatprep.mubr.msk.f32.mxu0 %vm838_vm1, %v817_v47 }
  0x49   : > { %6936 = vmatmul.mubr.msk.f32.gmra.mrb[6].mxu1 %vm838_vm1, %v826_v48 }
  0x4a   : > { %6924 = vmatmul.mubr.msk.f32.gmra.mrb[6].mxu0 %vm838_vm1, %v818_v49  ;;  %6946 = vmatprep.mubr.msk.f32.mxu1 %vm838_vm1, %v811_v26 }
  0x4b   : > { %6978 = vmatprep.mubr.msk.f32.mxu0 %vm838_vm1, %v811_v26 }
  0x4d   : > { %6947 = vmatmul.mubr.msk.f32.vlgmr.msra.gmra.mrb[8].mxu1 %vm838_vm1, %v812_v34 }
  0x4e   : > { %6979 = vmatmul.mubr.msk.f32.vlgmr.msra.gmra.mrb[8].mxu0 %vm838_vm1, %v812_v34  ;;  %6949 = vmatprep.mubr.msk.f32.mxu1 %vm838_vm1, %v813_v39 }
  0x4f   : > { %6981 = vmatprep.mubr.msk.f32.mxu0 %vm838_vm1, %v813_v39 }
  0x51   : > { %6950 = vmatmul.mubr.msk.f32.gmra.mrb[10].mxu1 %vm838_vm1, %v814_v41 }
  0x52   : > { %6982 = vmatmul.mubr.msk.f32.gmra.mrb[10].mxu0 %vm838_vm1, %v814_v41  ;;  %6952 = vmatprep.mubr.msk.f32.mxu1 %vm838_vm1, %v815_v44 }
  0x53   : > { %6984 = vmatprep.mubr.msk.f32.mxu0 %vm838_vm1, %v815_v44 }
  0x55   : > { %6953 = vmatmul.mubr.msk.f32.gmra.mrb[12].mxu1 %vm838_vm1, %v816_v46 }
  0x56   : > { %6985 = vmatmul.mubr.msk.f32.gmra.mrb[12].mxu0 %vm838_vm1, %v816_v46  ;;  %6955 = vmatprep.mubr.msk.f32.mxu1 %vm838_vm1, %v817_v47 }
  0x57   : > { %6987 = vmatprep.mubr.msk.f32.mxu0 %vm838_vm1, %v817_v47 }
  0x59   : > { %6956 = vmatmul.mubr.msk.f32.gmra.mrb[14].mxu1 %vm838_vm1, %v818_v49 }
  0x5a   : > { %6988 = vmatmul.mubr.msk.f32.gmra.mrb[14].mxu0 %vm838_vm1, %v818_v49  ;;  %6958 = vmatprep.mubr.msk.f32.mxu1 %vm838_vm1, %v8778_v21 }
  0x5b   : > { %6990 = vmatprep.mubr.msk.f32.mxu0 %vm838_vm1, %v8778_v21 }
  0x5d   : > { %6959 = vmatmul.mubr.msk.f32.gmra.mrb[16].mxu1 %vm838_vm1, %v8787_v29 }
  0x5e   : > { %6991 = vmatmul.mubr.msk.f32.gmra.mrb[16].mxu0 %vm838_vm1, %v8787_v29  ;;  %6961 = vmatprep.mubr.msk.f32.mxu1 %vm838_vm1, %v821_v32 }
  0x5f   : > { %6993 = vmatprep.mubr.msk.f32.mxu0 %vm838_vm1, %v821_v32 }
  0x61   : > { %6962 = vmatmul.mubr.msk.f32.gmra.mrb[18].mxu1 %vm838_vm1, %v822_v38 }
  0x62   : > { %6994 = vmatmul.mubr.msk.f32.gmra.mrb[18].mxu0 %vm838_vm1, %v822_v38  ;;  %6964 = vmatprep.mubr.msk.f32.mxu1 %vm838_vm1, %v823_v40 }
  0x63   : > { %6996 = vmatprep.mubr.msk.f32.mxu0 %vm838_vm1, %v823_v40 }
  0x65   : > { %6965 = vmatmul.mubr.msk.f32.gmra.mrb[20].mxu1 %vm838_vm1, %v824_v43 }
  0x66   : > { %6997 = vmatmul.mubr.msk.f32.gmra.mrb[20].mxu0 %vm838_vm1, %v824_v43  ;;  %6967 = vmatprep.mubr.msk.f32.mxu1 %vm838_vm1, %v825_v45 }
  0x67   : > { %6999 = vmatprep.mubr.msk.f32.mxu0 %vm838_vm1, %v825_v45 }
  0x69   : > { %6968 = vmatmul.mubr.msk.f32.gmra.mrb[22].mxu1 %vm838_vm1, %v826_v48 }
  0x6a   : > { %7000 = vmatmul.mubr.msk.f32.gmra.mrb[22].mxu0 %vm838_vm1, %v826_v48 }
 0x110   : > { %v6928_v51 = vpop.f32.mrb[0].mxu1 }
 0x111   : > { %v6916_v52 = vpop.f32.mrb[0].mxu0  ;;  %v8852_v53 = vadd.f32 %v6928_v51, %v8849_v50  ;;  %v993_v54 = vpop.f32.mrb[1].mxu1 }
 0x112   : > { %v953_v55 = vpop.f32.mrb[1].mxu0  ;;  %v8855_v56 = vadd.f32 %v8849_v50, %v993_v54  ;;  %v959_v31 = vadd.f32 %v6916_v52, %v8849_v50 }
 0x113   : > { %11096 = vst [vmem:[#allocation5_spill] sm:$0xff] %v8852_v53  ;;  %v954_v57 = vadd.f32 %v8849_v50, %v953_v55  ;;  %v9019_v55 = vld [vmem:[%s11107_s19] ss:$0 sm:$0xff] }
 0x114   : > { %11097 = vst [vmem:[#allocation6_spill] sm:$0xff] %v8855_v56  ;;  %v6931_v58 = vpop.f32.mrb[2].mxu1  ;;  %v8921_v37 = vmul.f32 0.35355338, %v959_v31 }
 0x115   : > { %v8858_v59 = vmul.f32 0.35355338, %v954_v57  ;;  %v6919_v60 = vpop.f32.mrb[2].mxu0  ;;  %v8861_v61 = vadd.f32 %v6931_v58, %v8849_v50  ;;  %v1003_v62 = vpop.f32.mrb[3].mxu1 }
 0x116   : > { %v963_v63 = vpop.f32.mrb[3].mxu0  ;;  %v8864_v0 = vadd.f32 %v8849_v50, %v1003_v62  ;;  %v969_v41 = vadd.f32 %v6919_v60, %v8849_v50 }
 0x117   : > { %11098 = vst [vmem:[#allocation7_spill] sm:$0xff] %v8861_v61  ;;  %7018 = vmatprep.mubr.msk.f32.mxu1 %vm1360_vm2, %v8858_v59  ;;  %v964_v43 = vadd.f32 %v8849_v50, %v963_v63 }
 0x118   : > { %11099 = vst [vmem:[#allocation8_spill] sm:$0xff] %v8864_v0  ;;  %v6934_v1 = vpop.f32.mrb[4].mxu1  ;;  %v8939_v42 = vmul.f32 0.35355338, %v969_v41 }
 0x119   : > { %v8868_v2 = vpop.f32.mrb[4].mxu0  ;;  %v8871_v3 = vadd.f32 %v6934_v1, %v8849_v50  ;;  %v1013_v4 = vpop.f32.mrb[5].mxu1  ;;  %v8951_v45 = vmul.f32 0.35355338, %v964_v43 }
 0x11a   : > { %v973_v5 = vpop.f32.mrb[5].mxu0  ;;  %v8874_v6 = vadd.f32 %v8849_v50, %v1013_v4  ;;  %v979_v48 = vadd.f32 %v8868_v2, %v8849_v50 }
 0x11b   : > { %11100 = vst [vmem:[#allocation9_spill] sm:$0xff] %v8871_v3  ;;  %v974_v44 = vadd.f32 %v8849_v50, %v973_v5 }
 0x11c   : > { %11101 = vst [vmem:[#allocation10_spill] sm:$0xff] %v8874_v6  ;;  %v6937_v7 = vpop.f32.mrb[6].mxu1  ;;  %v8970_v51 = vmul.f32 0.35355338, %v979_v48 }
 0x11d   : > { %v8876_v8 = vpop.f32.mrb[6].mxu0  ;;  %v8879_v9 = vadd.f32 %v6937_v7, %v8849_v50  ;;  %v1023_v10 = vpop.f32.mrb[7].mxu1  ;;  %v8953_v46 = vmul.f32 0.35355338, %v974_v44 }
 0x11e   : > { %v983_v11 = vpop.f32.mrb[7].mxu0  ;;  %v8882_v12 = vadd.f32 %v8849_v50, %v1023_v10  ;;  %v989_v52 = vadd.f32 %v8876_v8, %v8849_v50 }
 0x11f   : > { %11102 = vst [vmem:[#allocation11_spill] sm:$0xff] %v8879_v9  ;;  %v984_v47 = vadd.f32 %v8849_v50, %v983_v11 }
 0x120   : > { %11103 = vst [vmem:[#allocation12_spill] sm:$0xff] %v8882_v12  ;;  %v6948_v14 = vpop.f32.mrb[8].mxu1  ;;  %v8978_v54 = vmul.f32 0.35355338, %v989_v52 }
 0x121   : > { %v1131_v15 = vadd.f32 %v6948_v14, %v8889_v13  ;;  %v1125_v16 = vpop.f32.mrb[9].mxu1  ;;  %v8962_v49 = vmul.f32 0.35355338, %v984_v47  ;;  %v6980_v50 = vpop.f32.mrb[8].mxu0 }
 0x122   : > { %v1126_v17 = vadd.f32 %v8889_v13, %v1125_v16  ;;  %v1287_v57 = vadd.f32 %v6980_v50, %v9019_v55  ;;  %v1281_v58 = vpop.f32.mrb[9].mxu0 }
 0x123   : > { %v1282_v60 = vadd.f32 %v9019_v55, %v1281_v58 }
 0x124   : > { %v6951_v19 = vpop.f32.mrb[10].mxu1  ;;  %v8899_v20 = vpack.i.bf16 %v1131_v15, %v1126_v17  ;;  %v7578_v21 = vpack.c.bf16 %v1131_v15, %v1126_v17 }
 0x125   : > { %v1141_v22 = vadd.f32 %v6951_v19, %v8889_v13  ;;  %v1135_v23 = vpop.f32.mrb[11].mxu1  ;;  %v6983_v62 = vpop.f32.mrb[10].mxu0  ;;  %v9027_v7 = vpack.i.bf16 %v1287_v57, %v1282_v60  ;;  %v7602_v8 = vpack.c.bf16 %v1287_v57, %v1282_v60 }
 0x126   : > { %v1136_v24 = vadd.f32 %v8889_v13, %v1135_v23  ;;  %7949 = vrot.lane.b32.xlu0 %v8899_v20, %s8532_s16  ;;  %7580 = vmatprep.subr.msk.bf16.mxu1 %vm8895_vm3, %v7578_v21  ;;  %v1297_v63 = vadd.f32 %v6983_v62, %v9019_v55  ;;  %v1291_v1 = vpop.f32.mrb[11].mxu0 }
 0x127   : > { %7583 = vmatpush3.bf16.xpose.msk.msra.mxu1 %vm8895_vm3, %v7578_v21  ;;  %v1292_v4 = vadd.f32 %v9019_v55, %v1291_v1 }
 0x128   : > { %v6954_v25 = vpop.f32.mrb[12].mxu1  ;;  %v8909_v26 = vpack.i.bf16 %v1141_v22, %v1136_v24  ;;  %v7584_v27 = vpack.c.bf16 %v1141_v22, %v1136_v24 }
 0x129   : > { %v1151_v28 = vadd.f32 %v6954_v25, %v8889_v13  ;;  %v1145_v29 = vpop.f32.mrb[13].mxu1  ;;  %v6986_v5 = vpop.f32.mrb[12].mxu0  ;;  %v9034_v16 = vpack.i.bf16 %v1297_v63, %v1292_v4  ;;  %v7606_v24 = vpack.c.bf16 %v1297_v63, %v1292_v4 }
 0x12a   : > { %v1146_v30 = vadd.f32 %v8889_v13, %v1145_v29  ;;  %7954 = vrot.lane.b32.xlu0 %v8909_v26, %s8532_s16  ;;  %7586 = vmatprep.subr.msk.bf16.mxu1 %vm8895_vm3, %v7584_v27  ;;  %v1307_v11 = vadd.f32 %v6986_v5, %v9019_v55  ;;  %v1301_v14 = vpop.f32.mrb[13].mxu0 }
 0x12b   : > { %11108 = vst [vmem:[#allocation13_spill] sm:$0xff] %v9034_v16  ;;  %v1302_v17 = vadd.f32 %v9019_v55, %v1301_v14 }
 0x12c   : > { %v6957_v32 = vpop.f32.mrb[14].mxu1  ;;  %v8918_v33 = vpack.i.bf16 %v1151_v28, %v1146_v30  ;;  %v7590_v34 = vpack.c.bf16 %v1151_v28, %v1146_v30 }
 0x12d   : > { %v1161_v35 = vadd.f32 %v6957_v32, %v8889_v13  ;;  %v1155_v36 = vpop.f32.mrb[15].mxu1  ;;  %v6989_v19 = vpop.f32.mrb[14].mxu0  ;;  %v9047_v28 = vpack.i.bf16 %v1307_v11, %v1302_v17  ;;  %v7610_v31 = vpack.c.bf16 %v1307_v11, %v1302_v17 }
 0x12e   : > { %v1156_v38 = vadd.f32 %v8889_v13, %v1155_v36  ;;  %7959 = vrot.lane.b32.xlu1 %v8918_v33, %s8532_s16  ;;  %7969 = vrot.lane.b32.xlu0 %v8899_v20, %s8533_s30  ;;  %v1317_v22 = vadd.f32 %v6989_v19, %v9019_v55  ;;  %v1311_v23 = vpop.f32.mrb[15].mxu0 }
 0x12f   : > { %7589 = vmatpush3.bf16.xpose.msk.msra.mxu1 %vm8895_vm3, %v7584_v27  ;;  %v1312_v27 = vadd.f32 %v9019_v55, %v1311_v23  ;;  %11109 = vst [vmem:[#allocation14_spill] sm:$0xff] %v9047_v28 }
 0x130   : > { %v8930_v39 = vpack.i.bf16 %v1161_v35, %v1156_v38  ;;  %7592 = vmatprep.subr.msk.bf16.mxu1 %vm8895_vm3, %v7590_v34  ;;  %v7596_v40 = vpack.c.bf16 %v1161_v35, %v1156_v38  ;;  %v9024_v2 = vpop.f32.mrb[16].mxu1 }
 0x131   : > { %v9029_v10 = vpop.f32.mrb[17].mxu1  ;;  %v9055_v32 = vpack.i.bf16 %v1317_v22, %v1312_v27  ;;  %v7614_v41 = vpack.c.bf16 %v1317_v22, %v1312_v27  ;;  %v9078_v11 = vpop.f32.mrb[16].mxu0 }
 0x132   : > { %7964 = vrot.lane.b32.xlu1 %v8930_v39, %s8532_s16  ;;  %1734 = vrot.lane.b32.xlu0 %v8921_v37, %s8532_s16  ;;  %v9082_v14 = vpop.f32.mrb[17].mxu0 }
 0x133   : > { %11110 = vst [vmem:[#allocation15_spill] sm:$0xff] %v9055_v32 }
 0x134   : > { %v9032_v15 = vpop.f32.mrb[18].mxu1 }
 0x135   : > { %v9039_v21 = vpop.f32.mrb[19].mxu1  ;;  %v9086_v17 = vpop.f32.mrb[18].mxu0 }
 0x136   : > { %7979 = vrot.lane.b32.xlu0 %v8918_v33, %s8533_s30  ;;  %1732 = vrot.lane.b32.xlu1 %v8858_v59, %s8532_s16  ;;  %v9088_v27 = vpop.f32.mrb[19].mxu0 }
 0x137   : > { %7595 = vmatpush3.bf16.xpose.msk.msra.mxu1 %vm8895_vm3, %v7590_v34 }
 0x138   : > { %7598 = vmatprep.subr.msk.bf16.mxu1 %vm8895_vm3, %v7596_v40  ;;  %v9042_v25 = vpop.f32.mrb[20].mxu1 }
 0x139   : > { %v9049_v29 = vpop.f32.mrb[21].mxu1 }
 0x13a   : > { %1738 = vrot.lane.b32.xlu0 %v8939_v42, %s8532_s16  ;;  %7974 = vrot.lane.b32.xlu1 %v8909_v26, %s8533_s30 }
 0x13c   : > { %v9051_v30 = vpop.f32.mrb[22].mxu1 }
 0x13d   : > { %v9057_v34 = vpop.f32.mrb[23].mxu1 }
 0x13e   : > { %1740 = vrot.lane.b32.xlu0 %v8953_v46, %s8532_s16  ;;  %1736 = vrot.lane.b32.xlu1 %v8951_v45, %s8532_s16 }
 0x13f   : > { %7601 = vmatpush3.bf16.xpose.msk.msra.mxu1 %vm8895_vm3, %v7596_v40 }
 0x140   : > { %7603 = vmatprep.subr.bf16.mxu1 %v7602_v8 }
 0x142   : > { %1744 = vrot.lane.b32.xlu0 %v8962_v49, %s8532_s16  ;;  %7984 = vrot.lane.b32.xlu1 %v8930_v39, %s8533_s30 }
 0x146   : > { %2150 = vrot.lane.b32.xlu0 %v8858_v59, %s8533_s30  ;;  %1742 = vrot.lane.b32.xlu1 %v8970_v51, %s8532_s16 }
 0x147   : > { %7019 = vmatmul.mubr.msk.f32.vlgmr.msra.gmra.mrb[24].mxu1 %vm1360_vm2, %v8921_v37 }
 0x148   : > { %7021 = vmatprep.mubr.msk.f32.mxu1 %vm1360_vm2, %v8951_v45  ;;  %7605 = vmatpush3.bf16.msra.mxu1 %v7602_v8 }
 0x149   : > { %7607 = vmatprep.subr.bf16.mxu1 %v7606_v24 }
 0x14a   : > { %1746 = vrot.lane.b32.xlu1 %v8978_v54, %s8532_s16  ;;  %2154 = vrot.lane.b32.xlu0 %v8951_v45, %s8533_s30 }
 0x14b   : > { %7022 = vmatmul.mubr.msk.f32.gmra.mrb[26].mxu1 %vm1360_vm2, %v8939_v42 }
 0x14c   : > { %7024 = vmatprep.mubr.msk.f32.mxu1 %vm1360_vm2, %v8953_v46  ;;  %7609 = vmatpush3.bf16.msra.mxu1 %v7606_v24 }
 0x14d   : > { %7611 = vmatprep.subr.bf16.mxu1 %v7610_v31 }
 0x14e   : > { %2152 = vrot.lane.b32.xlu1 %v8921_v37, %s8533_s30  ;;  %2158 = vrot.lane.b32.xlu0 %v8953_v46, %s8533_s30 }
 0x14f   : > { %7025 = vmatmul.mubr.msk.f32.gmra.mrb[28].mxu1 %vm1360_vm2, %v8970_v51 }
 0x150   : > { %7027 = vmatprep.mubr.msk.f32.mxu1 %vm1360_vm2, %v8962_v49  ;;  %7613 = vmatpush3.bf16.msra.mxu1 %v7610_v31  ;;  %v1171_v31 = vadd.f32 %v9024_v2, %v8889_v13  ;;  %v1176_v2 = vadd.f32 %v8889_v13, %v9039_v21 }
 0x151   : > { %7615 = vmatprep.subr.bf16.mxu1 %v7614_v41 }
 0x152   : > { %2156 = vrot.lane.b32.xlu1 %v8939_v42, %s8533_s30  ;;  %2162 = vrot.lane.b32.xlu0 %v8962_v49, %s8533_s30 }
 0x153   : > { %7028 = vmatmul.mubr.msk.f32.gmra.mrb[30].mxu1 %vm1360_vm2, %v8978_v54 }
 0x154   : > { %7617 = vmatpush3.bf16.msra.mxu1 %v7614_v41  ;;  %v1181_v41 = vadd.f32 %v9032_v15, %v8889_v13 }
 0x156   : > { %2160 = vrot.lane.b32.xlu1 %v8970_v51, %s8533_s30  ;;  %7989 = vrot.lane.b32.xlu0 %v9027_v7, %s8532_s16  ;;  %v9120_v21 = vpack.i.bf16 %v1181_v41, %v1176_v2 }
 0x158   : > { %11114 = vst [vmem:[#allocation19_spill] sm:$0xff] %v9120_v21 }
 0x15a   : > { %2164 = vrot.lane.b32.xlu1 %v8978_v54, %s8533_s30  ;;  %7999 = vrot.lane.b32.xlu0 %v9047_v28, %s8532_s16 }
 0x15e   : > { %7994 = vrot.lane.b32.xlu1 %v9034_v16, %s8532_s16  ;;  %8004 = vrot.lane.b32.xlu0 %v9027_v7, %s8533_s30 }
 0x162   : > { %8009 = vrot.lane.b32.xlu1 %v9034_v16, %s8533_s30  ;;  %8014 = vrot.lane.b32.xlu0 %v9047_v28, %s8533_s30 }
 0x166   : > { %8019 = vrot.lane.b32.xlu1 %v9055_v32, %s8532_s16 }
 0x198   : > { %v7950_v35 = vpop.permute.xlu0 %7949 }
 0x199   : > { %v7952_v36 = vunpack.i.h.bf16 %v7950_v35  ;;  %v7951_v38 = vunpack.i.l.bf16 %v7950_v35  ;;  %v1166_v35 = vadd.f32 %v8889_v13, %v9029_v10 }
 0x19b   : > { %v7618_v40 = vpack.c.bf16 %v7952_v36, %v7951_v38  ;;  %v9094_v36 = vpop.f32.mrb[20].mxu0  ;;  %v9108_v10 = vpack.c.bf16 %v1171_v31, %v1166_v35 }
 0x19c   : > { %v7955_v43 = vpop.permute.xlu0 %7954  ;;  %v9096_v38 = vpop.f32.mrb[21].mxu0 }
 0x19d   : > { %v7957_v44 = vunpack.i.h.bf16 %v7955_v43  ;;  %v7956_v47 = vunpack.i.l.bf16 %v7955_v43  ;;  %7620 = vmatprep.subr.msk.bf16.mxu0 %vm8895_vm3, %v7618_v40  ;;  %v9100_v43 = vpop.f32.mrb[22].mxu0  ;;  %11111 = vst [vmem:[#allocation16_spill] sm:$0xff] %v9108_v10 }
 0x19e   : > { %7623 = vmatpush3.bf16.xpose.msk.msra.mxu0 %vm8895_vm3, %v7618_v40 }
 0x19f   : > { %v7624_v48 = vpack.c.bf16 %v7957_v44, %v7956_v47  ;;  %v9106_v47 = vpop.f32.mrb[23].mxu0 }
 0x1a0   : > { %v7960_v52 = vpop.permute.xlu1 %7959  ;;  %v7970_v62 = vpop.permute.xlu0 %7969 }
 0x1a1   : > { %v7962_v50 = vunpack.i.h.bf16 %v7960_v52  ;;  %v7961_v57 = vunpack.i.l.bf16 %v7960_v52  ;;  %7626 = vmatprep.subr.msk.bf16.mxu0 %vm8895_vm3, %v7624_v48  ;;  %v7972_v22 = vunpack.i.h.bf16 %v7970_v62  ;;  %v7971_v23 = vunpack.i.l.bf16 %v7970_v62 }
 0x1a3   : > { %v7630_v58 = vpack.c.bf16 %v7962_v50, %v7961_v57  ;;  %v7658_v40 = vpack.c.bf16 %v7972_v22, %v7971_v23  ;;  %v1191_v57 = vadd.f32 %v9042_v25, %v8889_v13 }
 0x1a4   : > { %v7965_v60 = vpop.permute.xlu1 %7964  ;;  %v1735_v8 = vpop.permute.xlu0 %1734 }
 0x1a5   : > { %v7967_v63 = vunpack.i.h.bf16 %v7965_v60  ;;  %v7966_v1 = vunpack.i.l.bf16 %v7965_v60  ;;  %v9118_v60 = vpack.c.bf16 %v1181_v41, %v1176_v2 }
 0x1a6   : > { %7629 = vmatpush3.bf16.xpose.msk.msra.mxu0 %vm8895_vm3, %v7624_v48  ;;  %v9110_v48 = vpack.i.bf16 %v1171_v31, %v1166_v35 }
 0x1a7   : > { %7632 = vmatprep.subr.msk.bf16.mxu0 %vm8895_vm3, %v7630_v58  ;;  %v7636_v5 = vpack.c.bf16 %v7967_v63, %v7966_v1  ;;  %11113 = vst [vmem:[#allocation18_spill] sm:$0xff] %v9118_v60 }
 0x1a8   : > { %v1733_v4 = vpop.permute.xlu1 %1732  ;;  %v7980_v24 = vpop.permute.xlu0 %7979  ;;  %11112 = vst [vmem:[#allocation17_spill] sm:$0xff] %v9110_v48 }
 0x1a9   : > { %7074 = vmatprep.mubr.msk.f32.mxu0 %vm1360_vm2, %v1733_v4  ;;  %v1201_v4 = vadd.f32 %v9051_v30, %v8889_v13 }
 0x1ac   : > { %v7975_v19 = vpop.permute.xlu1 %7974  ;;  %v1739_v52 = vpop.permute.xlu0 %1738 }
 0x1ad   : > { %v7977_v15 = vunpack.i.h.bf16 %v7975_v19  ;;  %v7976_v50 = vunpack.i.l.bf16 %v7975_v19  ;;  %v7982_v19 = vunpack.i.h.bf16 %v7980_v24 }
 0x1ae   : > { %7635 = vmatpush3.bf16.xpose.msk.msra.mxu0 %vm8895_vm3, %v7630_v58  ;;  %v1186_v58 = vadd.f32 %v8889_v13, %v9049_v29 }
 0x1af   : > { %7638 = vmatprep.subr.msk.bf16.mxu0 %vm8895_vm3, %v7636_v5  ;;  %v7664_v63 = vpack.c.bf16 %v7977_v15, %v7976_v50 }
 0x1b0   : > { %v1737_v44 = vpop.permute.xlu1 %1736  ;;  %v1741_v1 = vpop.permute.xlu0 %1740  ;;  %v9130_v25 = vpack.c.bf16 %v1191_v57, %v1186_v58  ;;  %v9132_v29 = vpack.i.bf16 %v1191_v57, %v1186_v58 }
 0x1b2   : > { %11115 = vst [vmem:[#allocation20_spill] sm:$0xff] %v9130_v25  ;;  %11116 = vst [vmem:[#allocation21_spill] sm:$0xff] %v9132_v29 }
 0x1b4   : > { %v7985_v62 = vpop.permute.xlu1 %7984  ;;  %v1745_v22 = vpop.permute.xlu0 %1744 }
 0x1b5   : > { %v7987_v31 = vunpack.i.h.bf16 %v7985_v62  ;;  %v7986_v35 = vunpack.i.l.bf16 %v7985_v62 }
 0x1b6   : > { %7641 = vmatpush3.bf16.xpose.msk.msra.mxu0 %vm8895_vm3, %v7636_v5  ;;  %v1196_v5 = vadd.f32 %v8889_v13, %v9057_v34 }
 0x1b7   : > { %7660 = vmatprep.subr.msk.bf16.mxu0 %vm8895_vm3, %v7658_v40  ;;  %v7676_v41 = vpack.c.bf16 %v7987_v31, %v7986_v35  ;;  %v1342_v31 = vadd.f32 %v9019_v55, %v9096_v38 }
 0x1b8   : > { %v1743_v30 = vpop.permute.xlu1 %1742  ;;  %v9138_v13 = vpack.c.bf16 %v1201_v4, %v1196_v5  ;;  %v9140_v34 = vpack.i.bf16 %v1201_v4, %v1196_v5  ;;  %v1327_v5 = vadd.f32 %v9078_v11, %v9019_v55 }
 0x1ba   : > { %11117 = vst [vmem:[#allocation22_spill] sm:$0xff] %v9138_v13  ;;  %11118 = vst [vmem:[#allocation23_spill] sm:$0xff] %v9140_v34 }
 0x1bd   : > { %7075 = vmatmul.mubr.msk.f32.vlgmr.msra.gmra.mrb[24].mxu0 %vm1360_vm2, %v1735_v8  ;;  %v7981_v8 = vunpack.i.l.bf16 %v7980_v24  ;;  %v1747_v24 = vpop.permute.xlu1 %1746 }
 0x1be   : > { %7663 = vmatpush3.bf16.xpose.msk.msra.mxu0 %vm8895_vm3, %v7658_v40  ;;  %7077 = vmatprep.mubr.msk.f32.mxu0 %vm1360_vm2, %v1737_v44  ;;  %v2151_v40 = vpop.permute.xlu0 %2150 }
 0x1bf   : > { %7666 = vmatprep.subr.msk.bf16.mxu0 %vm8895_vm3, %v7664_v63  ;;  %v7670_v23 = vpack.c.bf16 %v7982_v19, %v7981_v8  ;;  %v1322_v19 = vadd.f32 %v9019_v55, %v9082_v14  ;;  %v1337_v8 = vadd.f32 %v9086_v17, %v9019_v55  ;;  %v1357_v14 = vadd.f32 %v9100_v43, %v9019_v55 }
 0x1c0   : > { %v1352_v17 = vadd.f32 %v9019_v55, %v9106_v47 }
 0x1c1   : > { %7078 = vmatmul.mubr.msk.f32.gmra.mrb[26].mxu0 %vm1360_vm2, %v1739_v52  ;;  %v2153_v52 = vpop.permute.xlu1 %2152 }
 0x1c2   : > { %7080 = vmatprep.mubr.msk.f32.mxu0 %vm1360_vm2, %v1741_v1  ;;  %v2155_v44 = vpop.permute.xlu0 %2154 }
 0x1c5   : > { %7081 = vmatmul.mubr.msk.f32.gmra.mrb[28].mxu0 %vm1360_vm2, %v1743_v30  ;;  %v2157_v50 = vpop.permute.xlu1 %2156  ;;  %v1332_v30 = vadd.f32 %v9019_v55, %v9088_v27 }
 0x1c6   : > { %7669 = vmatpush3.bf16.xpose.msk.msra.mxu0 %vm8895_vm3, %v7664_v63  ;;  %7083 = vmatprep.mubr.msk.f32.mxu0 %vm1360_vm2, %v1745_v22  ;;  %v2159_v2 = vpop.permute.xlu0 %2158  ;;  %v9174_v22 = vpack.c.bf16 %v1327_v5, %v1322_v19 }
 0x1c7   : > { %7672 = vmatprep.subr.msk.bf16.mxu0 %vm8895_vm3, %v7670_v23  ;;  %v9182_v11 = vpack.c.bf16 %v1337_v8, %v1332_v30  ;;  %v9184_v35 = vpack.i.bf16 %v1337_v8, %v1332_v30 }
 0x1c9   : > { %7084 = vmatmul.mubr.msk.f32.gmra.mrb[30].mxu0 %vm1360_vm2, %v1747_v24  ;;  %v2161_v1 = vpop.permute.xlu1 %2160  ;;  %v1347_v24 = vadd.f32 %v9094_v36, %v9019_v55  ;;  %11120 = vst [vmem:[#allocation25_spill] sm:$0xff] %v9184_v35  ;;  %v9196_v36 = vpack.i.bf16 %v1357_v14, %v1352_v17 }
 0x1ca   : > { %7130 = vmatprep.mubr.msk.f32.mxu0 %vm1360_vm2, %v2151_v40  ;;  %v2163_v15 = vpop.permute.xlu0 %2162 }
 0x1cb   : > { %v9190_v27 = vpack.c.bf16 %v1347_v24, %v1342_v31  ;;  %v9192_v40 = vpack.i.bf16 %v1347_v24, %v1342_v31  ;;  %11122 = vst [vmem:[#allocation27_spill] sm:$0xff] %v9196_v36 }
 0x1cd   : > { %v2165_v4 = vpop.permute.xlu1 %2164  ;;  %11121 = vst [vmem:[#allocation26_spill] sm:$0xff] %v9192_v40 }
 0x1ce   : > { %7675 = vmatpush3.bf16.xpose.msk.msra.mxu0 %vm8895_vm3, %v7670_v23  ;;  %v7990_v57 = vpop.permute.xlu0 %7989  ;;  %v9176_v23 = vpack.i.bf16 %v1327_v5, %v1322_v19 }
 0x1cf   : > { %7678 = vmatprep.subr.msk.bf16.mxu0 %vm8895_vm3, %v7676_v41  ;;  %v7992_v58 = vunpack.i.h.bf16 %v7990_v57  ;;  %v7991_v62 = vunpack.i.l.bf16 %v7990_v57 }
 0x1d0   : > { %11119 = vst [vmem:[#allocation24_spill] sm:$0xff] %v9176_v23 }
 0x1d1   : > { %v9159_v63 = vpack.c.bf16 %v7992_v58, %v7991_v62 }
 0x1d3   : > { %7643 = vmatprep.subr.bf16.mxu1 %v9159_v63 }
 0x1d6   : > { %7681 = vmatpush3.bf16.xpose.msk.msra.mxu0 %vm8895_vm3, %v7676_v41  ;;  %v9194_v41 = vpack.c.bf16 %v1357_v14, %v1352_v17 }
 0x1dd   : > { %7131 = vmatmul.mubr.msk.f32.vlgmr.msra.gmra.mrb[32].mxu0 %vm1360_vm2, %v2153_v52 }
 0x1de   : > { %7133 = vmatprep.mubr.msk.f32.mxu0 %vm1360_vm2, %v2155_v44 }
 0x1e1   : > { %7134 = vmatmul.mubr.msk.f32.gmra.mrb[34].mxu0 %vm1360_vm2, %v2157_v50 }
 0x1e2   : > { %7136 = vmatprep.mubr.msk.f32.mxu0 %vm1360_vm2, %v2159_v2 }
 0x1e5   : > { %7137 = vmatmul.mubr.msk.f32.gmra.mrb[36].mxu0 %vm1360_vm2, %v2161_v1 }
 0x1e6   : > { %7139 = vmatprep.mubr.msk.f32.mxu0 %vm1360_vm2, %v2163_v15 }
 0x1e9   : > { %7140 = vmatmul.mubr.msk.f32.gmra.mrb[38].mxu0 %vm1360_vm2, %v2165_v4 }
 0x21a   : > { %v7020_v38 = vpop.f32.mrb[24].mxu1 }
 0x21b   : > { %v1475_v44 = vpop.f32.mrb[25].mxu1  ;;  %v1518_v2 = vsel %vm1514_vm4, %v7020_v38, -inf }
 0x21c   : > { %1519 = vmax.xlane.f32.xlu1 %v1518_v2  ;;  %v1515_v52 = vsel %vm1514_vm4, %v1475_v44, -inf }
 0x21d   : > { %1516 = vmax.xlane.f32.xlu0 %v1515_v52 }
 0x21e   : > { %v9200_v43 = vpop.f32.mrb[26].mxu1 }
 0x21f   : > { %v1524_v55 = vsel %vm1514_vm4, %v9200_v43, -inf  ;;  %v9204_v47 = vpop.f32.mrb[27].mxu1 }
 0x220   : > { %v1521_v57 = vsel %vm1514_vm4, %v9204_v47, -inf }
 0x221   : > { %1525 = vmax.xlane.f32.xlu0 %v1524_v55 }
 0x222   : > { %v9206_v15 = vpop.f32.mrb[28].mxu1 }
 0x223   : > { %v9208_v50 = vpop.f32.mrb[29].mxu1  ;;  %v1530_v1 = vsel %vm1514_vm4, %v9206_v15, -inf }
 0x224   : > { %v1527_v58 = vsel %vm1514_vm4, %v9208_v50, -inf }
 0x225   : > { %1522 = vmax.xlane.f32.xlu0 %v1521_v57  ;;  %1528 = vmax.xlane.f32.xlu1 %v1527_v58 }
 0x226   : > { %v9214_v62 = vpop.f32.mrb[30].mxu1 }
 0x227   : > { %v9218_v4 = vpop.f32.mrb[31].mxu1  ;;  %v1536_v19 = vsel %vm1514_vm4, %v9214_v62, -inf }
 0x228   : > { %v1533_v5 = vsel %vm1514_vm4, %v9218_v4, -inf }
 0x229   : > { %1531 = vmax.xlane.f32.xlu0 %v1530_v1  ;;  %1534 = vmax.xlane.f32.xlu1 %v1533_v5  ;;  %v9248_v5 = vpop.permute.xlu1 %7994 }
 0x22d   : > { %1537 = vmax.xlane.f32.xlu0 %v1536_v19  ;;  %v9250_v19 = vpop.permute.xlu0 %7999 }
 0x231   : > { %v9262_v36 = vpop.permute.xlu0 %8004 }
 0x290   : > { %v9224_v8 = vpop.f32.mrb[24].mxu0 }
 0x291   : > { %v9226_v30 = vpop.f32.mrb[25].mxu0  ;;  %v1904_v24 = vsel %vm1514_vm4, %v9224_v8, -inf }
 0x292   : > { %1905 = vmax.xlane.f32.xlu0 %v1904_v24  ;;  %v1901_v31 = vsel %vm1514_vm4, %v9226_v30, -inf }
 0x293   : > { %1902 = vmax.xlane.f32.xlu1 %v1901_v31 }
 0x294   : > { %v9232_v14 = vpop.f32.mrb[26].mxu0 }
 0x295   : > { %v9234_v17 = vpop.f32.mrb[27].mxu0  ;;  %v1910_v2 = vsel %vm1514_vm4, %v9232_v14, -inf }
 0x296   : > { %1911 = vmax.xlane.f32.xlu0 %v1910_v2  ;;  %v1907_v52 = vsel %vm1514_vm4, %v9234_v17, -inf }
 0x297   : > { %1908 = vmax.xlane.f32.xlu1 %v1907_v52 }
 0x298   : > { %v9240_v55 = vpop.f32.mrb[28].mxu0 }
 0x299   : > { %v9242_v57 = vpop.f32.mrb[29].mxu0  ;;  %v1916_v58 = vsel %vm1514_vm4, %v9240_v55, -inf }
 0x29a   : > { %1917 = vmax.xlane.f32.xlu0 %v1916_v58  ;;  %v1913_v1 = vsel %vm1514_vm4, %v9242_v57, -inf  ;;  %v9260_v58 = vpop.permute.xlu1 %8009 }
 0x29b   : > { %1914 = vmax.xlane.f32.xlu1 %v1913_v1  ;;  %v9266_v1 = vpop.permute.xlu0 %8014 }
 0x29c   : > { %v9252_v24 = vpop.f32.mrb[30].mxu0 }
 0x29d   : > { %v9254_v31 = vpop.f32.mrb[31].mxu0  ;;  %v1922_v2 = vsel %vm1514_vm4, %v9252_v24, -inf }
 0x29e   : > { %1923 = vmax.xlane.f32.xlu0 %v1922_v2  ;;  %v1919_v52 = vsel %vm1514_vm4, %v9254_v31, -inf  ;;  %v9264_v40 = vpop.permute.xlu1 %8019 }
 0x29f   : > { %1920 = vmax.xlane.f32.xlu1 %v1919_v52 }
 0x2a9   : > { %v1520_v35 = vpop.xlane.xlu1 %1519 }
 0x2aa   : > { %v1540_v23 = vsub.f32 %v7020_v38, %v1520_v35  ;;  %v1517_v21 = vpop.xlane.xlu0 %1516 }
 0x2ab   : > { %v1539_v34 = vsub.f32 %v1475_v44, %v1517_v21 }
 0x2ac   : > { %v1549_v29 = vmul.f32 1.442695, %v1540_v23 }
 0x2ad   : > { %v1547_v48 = vmul.f32 1.442695, %v1539_v34 }
 0x2ae   : > { %v1526_v9 = vpop.xlane.xlu0 %1525  ;;  %8188 = vpow2.f32 %v1549_v29 }
 0x2af   : > { %8190 = vpow2.f32 %v1547_v48 }
 0x2b0   : > { %v9268_v2 = vpop.f32.mrb[32].mxu0 }
 0x2b1   : > { %v9270_v52 = vpop.f32.mrb[33].mxu0  ;;  %v2322_v12 = vsel %vm1514_vm4, %v9268_v2, -inf }
 0x2b2   : > { %v1523_v3 = vpop.xlane.xlu0 %1522  ;;  %v1529_v6 = vpop.xlane.xlu1 %1528  ;;  %2323 = vmax.xlane.f32.xlu0 %v2322_v12  ;;  %v2319_v35 = vsel %vm1514_vm4, %v9270_v52, -inf }
 0x2b3   : > { %v1541_v21 = vsub.f32 %v9204_v47, %v1523_v3  ;;  %2320 = vmax.xlane.f32.xlu1 %v2319_v35  ;;  %v1543_v23 = vsub.f32 %v9208_v50, %v1529_v6 }
 0x2b4   : > { %v9277_v34 = vpop.f32.mrb[34].mxu0 }
 0x2b5   : > { %v1551_v29 = vmul.f32 1.442695, %v1541_v21  ;;  %v9280_v48 = vpop.f32.mrb[35].mxu0  ;;  %v2328_v38 = vsel %vm1514_vm4, %v9277_v34, -inf  ;;  %v1555_v3 = vmul.f32 1.442695, %v1543_v23 }
 0x2b6   : > { %v1535_v44 = vpop.xlane.xlu1 %1534  ;;  %2329 = vmax.xlane.f32.xlu0 %v2328_v38  ;;  %v2325_v12 = vsel %vm1514_vm4, %v9280_v48, -inf }
 0x2b7   : > { %2326 = vmax.xlane.f32.xlu1 %v2325_v12  ;;  %8192 = vpow2.f32 %v1551_v29  ;;  %v1545_v47 = vsub.f32 %v9218_v4, %v1535_v44 }
 0x2b8   : > { %v9286_v61 = vpop.f32.mrb[36].mxu0  ;;  %v9293_v50 = vpop.eup %8188  ;;  %8194 = vpow2.f32 %v1555_v3 }
 0x2b9   : > { %v9289_v35 = vpop.f32.mrb[37].mxu0  ;;  %v2334_v6 = vsel %vm1514_vm4, %v9286_v61, -inf  ;;  %v9297_v38 = vpop.eup %8190  ;;  %v1559_v29 = vmul.f32 1.442695, %v1545_v47  ;;  %v1566_v4 = vsel %vm1514_vm4, %v9293_v50, 0.0 }
 0x2ba   : > { %2335 = vmax.xlane.f32.xlu0 %v2334_v6  ;;  %v2331_v21 = vsel %vm1514_vm4, %v9289_v35, -inf  ;;  %v1563_v44 = vsel %vm1514_vm4, %v9297_v38, 0.0 }
 0x2bb   : > { %2332 = vmax.xlane.f32.xlu1 %v2331_v21  ;;  %8196 = vpow2.f32 %v1559_v29 }
 0x2bc   : > { %v9299_v12 = vpop.f32.mrb[38].mxu0 }
 0x2bd   : > { %v9301_v23 = vpop.f32.mrb[39].mxu0  ;;  %v2340_v6 = vsel %vm1514_vm4, %v9299_v12, -inf }
 0x2be   : > { %1567 = vadd.xlane.f32.xlu0 %v1566_v4  ;;  %v2337_v21 = vsel %vm1514_vm4, %v9301_v23, -inf }
 0x2bf   : > { %1564 = vadd.xlane.f32.xlu1 %v1563_v44 }
 0x2c1   : > { %v9311_v3 = vpop.eup %8192 }
 0x2c2   : > { %2341 = vmax.xlane.f32.xlu0 %v2340_v6  ;;  %v1569_v47 = vsel %vm1514_vm4, %v9311_v3, 0.0  ;;  %v9315_v0 = vpop.eup %8194  ;;  %v1532_v6 = vpop.xlane.xlu0 %1531 }
 0x2c3   : > { %2338 = vmax.xlane.f32.xlu1 %v2337_v21  ;;  %v1575_v4 = vsel %vm1514_vm4, %v9315_v0, 0.0  ;;  %v1542_v21 = vsub.f32 %v9200_v43, %v1526_v9  ;;  %v1544_v56 = vsub.f32 %v9206_v15, %v1532_v6 }
 0x2c5   : > { %v9319_v29 = vpop.eup %8196  ;;  %v1553_v53 = vmul.f32 1.442695, %v1542_v21  ;;  %v1557_v13 = vmul.f32 1.442695, %v1544_v56 }
 0x2c6   : > { %v1581_v44 = vsel %vm1514_vm4, %v9319_v29, 0.0 }
 0x2c7   : > { %1570 = vadd.xlane.f32.xlu1 %v1569_v47  ;;  %v1538_v47 = vpop.xlane.xlu0 %1537  ;;  %8198 = vpow2.f32 %v1553_v53 }
 0x2c8   : > { %v1546_v25 = vsub.f32 %v9214_v62, %v1538_v47  ;;  %8200 = vpow2.f32 %v1557_v13 }
 0x2cb   : > { %1576 = vadd.xlane.f32.xlu1 %v1575_v4  ;;  %v1561_v4 = vmul.f32 1.442695, %v1546_v25 }
 0x2cd   : > { %8202 = vpow2.f32 %v1561_v4 }
 0x2cf   : > { %1582 = vadd.xlane.f32.xlu1 %v1581_v44 }
 0x2d1   : > { %v9328_v60 = vpop.eup %8198 }
 0x2d2   : > { %v1572_v44 = vsel %vm1514_vm4, %v9328_v60, 0.0  ;;  %v9332_v10 = vpop.eup %8200 }
 0x2d3   : > { %v1578_v9 = vsel %vm1514_vm4, %v9332_v10, 0.0 }
 0x2d7   : > { %v9336_v43 = vpop.eup %8202 }
 0x2d8   : > { %8024 = vrot.lane.b32.xlu0 %v9055_v32, %s8533_s30  ;;  %v1584_v53 = vsel %vm1514_vm4, %v9336_v43, 0.0 }
 0x2f7   : > { %1573 = vadd.xlane.f32.xlu0 %v1572_v44 }
 0x2fb   : > { %1579 = vadd.xlane.f32.xlu0 %v1578_v9 }
 0x2ff   : > { %1585 = vadd.xlane.f32.xlu0 %v1584_v53 }
 0x31f   : > { %v1906_v56 = vpop.xlane.xlu0 %1905 }
 0x320   : > { %v1926_v25 = vsub.f32 %v9224_v8, %v1906_v56  ;;  %v1903_v13 = vpop.xlane.xlu1 %1902 }
 0x321   : > { %v1925_v15 = vsub.f32 %v9226_v30, %v1903_v13 }
 0x322   : > { %v1935_v62 = vmul.f32 1.442695, %v1926_v25 }
 0x323   : > { %v1933_v6 = vmul.f32 1.442695, %v1925_v15  ;;  %v1912_v21 = vpop.xlane.xlu0 %1911 }
 0x324   : > { %8204 = vpow2.f32 %v1935_v62  ;;  %v1928_v47 = vsub.f32 %v9232_v14, %v1912_v21  ;;  %v1909_v4 = vpop.xlane.xlu1 %1908 }
 0x325   : > { %8206 = vpow2.f32 %v1933_v6  ;;  %v1927_v44 = vsub.f32 %v9234_v17, %v1909_v4 }
 0x326   : > { %v1939_v9 = vmul.f32 1.442695, %v1928_v47 }
 0x327   : > { %v1937_v16 = vmul.f32 1.442695, %v1927_v44  ;;  %v1918_v32 = vpop.xlane.xlu0 %1917 }
 0x328   : > { %8208 = vpow2.f32 %v1939_v9  ;;  %v1930_v53 = vsub.f32 %v9240_v55, %v1918_v32  ;;  %v1915_v8 = vpop.xlane.xlu1 %1914 }
 0x329   : > { %v1929_v56 = vsub.f32 %v9242_v57, %v1915_v8  ;;  %8210 = vpow2.f32 %v1937_v16 }
 0x32a   : > { %v1943_v30 = vmul.f32 1.442695, %v1930_v53 }
 0x32b   : > { %v1941_v25 = vmul.f32 1.442695, %v1929_v56  ;;  %v1924_v13 = vpop.xlane.xlu0 %1923 }
 0x32c   : > { %8212 = vpow2.f32 %v1943_v30  ;;  %v1932_v14 = vsub.f32 %v9252_v24, %v1924_v13  ;;  %v1921_v15 = vpop.xlane.xlu1 %1920 }
 0x32d   : > { %8214 = vpow2.f32 %v1941_v25  ;;  %v1931_v21 = vsub.f32 %v9254_v31, %v1921_v15 }
 0x32e   : > { %v9347_v62 = vpop.eup %8204  ;;  %v1947_v6 = vmul.f32 1.442695, %v1932_v14 }
 0x32f   : > { %v9349_v17 = vpop.eup %8206  ;;  %v1952_v32 = vsel %vm1514_vm4, %v9347_v62, 0.0  ;;  %v1945_v57 = vmul.f32 1.442695, %v1931_v21 }
 0x330   : > { %1953 = vadd.xlane.f32.xlu0 %v1952_v32  ;;  %v1949_v16 = vsel %vm1514_vm4, %v9349_v17, 0.0  ;;  %8216 = vpow2.f32 %v1947_v6 }
 0x331   : > { %1950 = vadd.xlane.f32.xlu1 %v1949_v16  ;;  %8218 = vpow2.f32 %v1945_v57 }
 0x332   : > { %v9356_v55 = vpop.eup %8208 }
 0x333   : > { %v1958_v24 = vsel %vm1514_vm4, %v9356_v55, 0.0  ;;  %v9360_v47 = vpop.eup %8210 }
 0x334   : > { %v1955_v44 = vsel %vm1514_vm4, %v9360_v47, 0.0 }
 0x335   : > { %1959 = vadd.xlane.f32.xlu1 %v1958_v24 }
 0x336   : > { %v9362_v4 = vpop.eup %8212 }
 0x337   : > { %v1964_v31 = vsel %vm1514_vm4, %v9362_v4, 0.0  ;;  %v9368_v9 = vpop.eup %8214 }
 0x338   : > { %1965 = vadd.xlane.f32.xlu0 %v1964_v31  ;;  %v1961_v53 = vsel %vm1514_vm4, %v9368_v9, 0.0 }
 0x339   : > { %1956 = vadd.xlane.f32.xlu1 %v1955_v44 }
 0x33a   : > { %v9372_v8 = vpop.eup %8216 }
 0x33b   : > { %v1970_v25 = vsel %vm1514_vm4, %v9372_v8, 0.0  ;;  %v9378_v13 = vpop.eup %8218 }
 0x33c   : > { %v1967_v32 = vsel %vm1514_vm4, %v9378_v13, 0.0 }
 0x33d   : > { %1962 = vadd.xlane.f32.xlu1 %v1961_v53 }
 0x33f   : > { %v9374_v56 = vpop.xlane.xlu0 %2323 }
 0x340   : > { %v2321_v30 = vpop.xlane.xlu1 %2320 }
 0x341   : > { %v2343_v14 = vsub.f32 %v9270_v52, %v2321_v30  ;;  %1971 = vadd.xlane.f32.xlu1 %v1970_v25 }
 0x343   : > { %v2351_v15 = vmul.f32 1.442695, %v2343_v14  ;;  %v9381_v6 = vpop.xlane.xlu0 %2329 }
 0x344   : > { %v2327_v21 = vpop.xlane.xlu1 %2326 }
 0x345   : > { %8220 = vpow2.f32 %v2351_v15  ;;  %v2345_v16 = vsub.f32 %v9280_v48, %v2327_v21  ;;  %1968 = vadd.xlane.f32.xlu1 %v1967_v32 }
 0x347   : > { %v2355_v57 = vmul.f32 1.442695, %v2345_v16  ;;  %v2336_v24 = vpop.xlane.xlu0 %2335 }
 0x348   : > { %v2348_v31 = vsub.f32 %v9286_v61, %v2336_v24  ;;  %v2333_v44 = vpop.xlane.xlu1 %2332 }
 0x349   : > { %8222 = vpow2.f32 %v2355_v57  ;;  %v2347_v52 = vsub.f32 %v9289_v35, %v2333_v44 }
 0x34a   : > { %v2361_v53 = vmul.f32 1.442695, %v2348_v31 }
 0x34b   : > { %v2359_v30 = vmul.f32 1.442695, %v2347_v52  ;;  %v1568_v25 = vpop.xlane.xlu0 %1567 }
 0x34c   : > { %8224 = vpow2.f32 %v2361_v53  ;;  %v1565_v14 = vpop.xlane.xlu1 %1564 }
 0x34d   : > { %8226 = vpow2.f32 %v2359_v30  ;;  %v7997_v30 = vunpack.i.h.bf16 %v9248_v5 }
 0x34e   : > { %8228 = vrcp.f32 %v1568_v25  ;;  %v7996_v25 = vunpack.i.l.bf16 %v9248_v5 }
 0x34f   : > { %v9388_v28 = vpop.eup %8220  ;;  %8230 = vrcp.f32 %v1565_v14  ;;  %v2342_v48 = vpop.xlane.xlu0 %2341 }
 0x350   : > { %v2350_v15 = vsub.f32 %v9299_v12, %v2342_v48  ;;  %v2339_v21 = vpop.xlane.xlu1 %2338  ;;  %v2367_v61 = vsel %vm1514_vm4, %v9388_v28, 0.0 }
 0x351   : > { %v2349_v32 = vsub.f32 %v9301_v23, %v2339_v21  ;;  %2368 = vadd.xlane.f32.xlu0 %v2367_v61  ;;  %v8001_v21 = vunpack.i.l.bf16 %v9250_v19  ;;  %v7646_v61 = vpack.c.bf16 %v7997_v30, %v7996_v25 }
 0x352   : > { %v2365_v35 = vmul.f32 1.442695, %v2350_v15  ;;  %v8002_v15 = vunpack.i.h.bf16 %v9250_v19 }
 0x353   : > { %v9394_v16 = vpop.eup %8222  ;;  %v2363_v57 = vmul.f32 1.442695, %v2349_v32 }
 0x354   : > { %8232 = vpow2.f32 %v2365_v35  ;;  %v1571_v24 = vpop.xlane.xlu1 %1570  ;;  %v2373_v31 = vsel %vm1514_vm4, %v9394_v16, 0.0  ;;  %v8022_v35 = vunpack.i.h.bf16 %v9264_v40  ;;  %v7650_v19 = vpack.c.bf16 %v8002_v15, %v8001_v21 }
 0x355   : > { %2374 = vadd.xlane.f32.xlu0 %v2373_v31  ;;  %8234 = vrcp.f32 %v1571_v24 }
 0x356   : > { %v9398_v44 = vpop.eup %8224  ;;  %8029 = vrot.lane.b32.xlu1 %v8899_v20, %s8534_s3  ;;  %8236 = vpow2.f32 %v2363_v57  ;;  %v8021_v57 = vunpack.i.l.bf16 %v9264_v40 }
 0x357   : > { %v9402_v12 = vpop.eup %8226  ;;  %v2382_v23 = vsel %vm1514_vm4, %v9398_v44, 0.0 }
 0x358   : > { %v8229_v52 = vpop.eup %8228  ;;  %v2379_v20 = vsel %vm1514_vm4, %v9402_v12, 0.0 }
 0x359   : > { %v8231_v53 = vpop.eup %8230  ;;  %2383 = vadd.xlane.f32.xlu0 %v2382_v23  ;;  %v1596_v48 = vmul.f32 %v8229_v52, %v9293_v50  ;;  %v8007_v23 = vunpack.i.h.bf16 %v9262_v36  ;;  %v8006_v52 = vunpack.i.l.bf16 %v9262_v36 }
 0x35a   : > { %v1595_v14 = vmul.f32 %v8231_v53, %v9297_v38  ;;  %v7654_v53 = vpack.c.bf16 %v8022_v35, %v8021_v57  ;;  %v8012_v57 = vunpack.i.h.bf16 %v9260_v58 }
 0x35b   : > { %v9435_v30 = vpack.c.bf16 %v8007_v23, %v8006_v52 }
 0x35c   : > { %7046 = vmatprep.mubr.msk.f32.mxu1 %vm1514_vm4, %v1595_v14  ;;  %v9450_v14 = vpop.permute.xlu0 %8024 }
 0x35d   : > { %7047 = vmatmul.mubr.msk.f32.vlgmr.msra.gmra.mrb[32].mxu1 %vm1514_vm4, %v1596_v48  ;;  %2380 = vadd.xlane.f32.xlu0 %v2379_v20 }
 0x35e   : > { %v9416_v32 = vpop.eup %8232  ;;  %7645 = vmatpush3.bf16.msra.mxu1 %v9159_v63  ;;  %v2344_v63 = vsub.f32 %v9268_v2, %v9374_v56 }
 0x35f   : > { %7647 = vmatprep.subr.bf16.mxu1 %v7646_v61  ;;  %v2388_v5 = vsel %vm1514_vm4, %v9416_v32, 0.0  ;;  %v8235_v50 = vpop.eup %8234 }
 0x360   : > { %v9421_v38 = vpop.eup %8236  ;;  %v1597_v24 = vmul.f32 %v8235_v50, %v9311_v3  ;;  %v2353_v40 = vmul.f32 1.442695, %v2344_v63  ;;  %v2346_v3 = vsub.f32 %v9277_v34, %v9381_v6  ;;  %v1577_v6 = vpop.xlane.xlu1 %1576  ;;  %v8016_v63 = vunpack.i.l.bf16 %v9266_v1 }
 0x361   : > { %2389 = vadd.xlane.f32.xlu0 %v2388_v5  ;;  %v2385_v31 = vsel %vm1514_vm4, %v9421_v38, 0.0 }
 0x362   : > { %7649 = vmatpush3.bf16.msra.mxu1 %v7646_v61  ;;  %7049 = vmatprep.mubr.msk.f32.mxu1 %vm1514_vm4, %v1597_v24  ;;  %8238 = vpow2.f32 %v2353_v40  ;;  %v2357_v2 = vmul.f32 1.442695, %v2346_v3  ;;  %v8017_v24 = vunpack.i.h.bf16 %v9266_v1 }
 0x363   : > { %7651 = vmatprep.subr.bf16.mxu1 %v7650_v19 }
 0x364   : > { %8240 = vpow2.f32 %v2357_v2  ;;  %v1583_v20 = vpop.xlane.xlu1 %1582 }
 0x365   : > { %2386 = vadd.xlane.f32.xlu0 %v2385_v31  ;;  %8242 = vrcp.f32 %v1577_v6 }
 0x366   : > { %7653 = vmatpush3.bf16.msra.mxu1 %v7650_v19 }
 0x367   : > { %7655 = vmatprep.subr.bf16.mxu1 %v7654_v53 }
 0x36a   : > { %7657 = vmatpush3.bf16.msra.mxu1 %v7654_v53  ;;  %v7690_v53 = vpack.c.bf16 %v8017_v24, %v8016_v63 }
 0x36b   : > { %7683 = vmatprep.subr.bf16.mxu1 %v9435_v30 }
 0x36c   : > { %v9438_v56 = vpop.eup %8238 }
 0x36d   : > { %v2370_v36 = vsel %vm1514_vm4, %v9438_v56, 0.0 }
 0x36e   : > { %v9442_v25 = vpop.eup %8240 }
 0x36f   : > { %v2376_v34 = vsel %vm1514_vm4, %v9442_v25, 0.0  ;;  %v8243_v21 = vpop.eup %8242 }
 0x37a   : > { %2371 = vadd.xlane.f32.xlu1 %v2370_v36 }
 0x37b   : > { %8034 = vrot.lane.b32.xlu0 %v8909_v26, %s8534_s3 }
 0x37e   : > { %2377 = vadd.xlane.f32.xlu1 %v2376_v34 }
 0x37f   : > { %2564 = vrot.lane.b32.xlu0 %v8951_v45, %s8534_s3 }
 0x383   : > { %2568 = vrot.lane.b32.xlu0 %v8953_v46, %s8534_s3  ;;  %v1599_v46 = vmul.f32 %v8243_v21, %v9315_v0 }
 0x384   : > { %v1574_v48 = vpop.xlane.xlu0 %1573 }
 0x385   : > { %8244 = vrcp.f32 %v1574_v48 }
 0x386   : > { %8246 = vrcp.f32 %v1583_v20 }
 0x387   : > { %2572 = vrot.lane.b32.xlu0 %v8962_v49, %s8534_s3 }
 0x388   : > { %v1580_v26 = vpop.xlane.xlu0 %1579 }
 0x389   : > { %8248 = vrcp.f32 %v1580_v26 }
 0x38c   : > { %v1586_v15 = vpop.xlane.xlu0 %1585 }
 0x38d   : > { %8250 = vrcp.f32 %v1586_v15 }
 0x38f   : > { %v8245_v61 = vpop.eup %8244  ;;  %8039 = vrot.lane.b32.xlu1 %v8918_v33, %s8534_s3 }
 0x390   : > { %v1598_v45 = vmul.f32 %v8245_v61, %v9328_v60  ;;  %v8247_v5 = vpop.eup %8246 }
 0x391   : > { %v1601_v35 = vmul.f32 %v8247_v5, %v9319_v29 }
 0x392   : > { %7050 = vmatmul.mubr.msk.f32.gmra.mrb[34].mxu1 %vm1514_vm4, %v1598_v45 }
 0x393   : > { %v8249_v50 = vpop.eup %8248  ;;  %8044 = vrot.lane.b32.xlu1 %v8930_v39, %s8534_s3  ;;  %7052 = vmatprep.mubr.msk.f32.mxu1 %vm1514_vm4, %v1599_v46 }
 0x394   : > { %v1600_v49 = vmul.f32 %v8249_v50, %v9332_v10 }
 0x396   : > { %7053 = vmatmul.mubr.msk.f32.gmra.mrb[36].mxu1 %vm1514_vm4, %v1600_v49 }
 0x397   : > { %v8251_v33 = vpop.eup %8250  ;;  %2560 = vrot.lane.b32.xlu1 %v8858_v59, %s8534_s3  ;;  %7055 = vmatprep.mubr.msk.f32.mxu1 %vm1514_vm4, %v1601_v35 }
 0x398   : > { %v1602_v0 = vmul.f32 %v8251_v33, %v9336_v43 }
 0x39a   : > { %7056 = vmatmul.mubr.msk.f32.gmra.mrb[38].mxu1 %vm1514_vm4, %v1602_v0 }
 0x39b   : > { %2562 = vrot.lane.b32.xlu1 %v8921_v37, %s8534_s3 }
 0x39f   : > { %2566 = vrot.lane.b32.xlu1 %v8939_v42, %s8534_s3  ;;  %v8011_v42 = vunpack.i.l.bf16 %v9260_v58 }
 0x3a1   : > { %v7686_v31 = vpack.c.bf16 %v8012_v57, %v8011_v42 }
 0x3a3   : > { %2570 = vrot.lane.b32.xlu1 %v8970_v51, %s8534_s3 }
 0x3a7   : > { %2574 = vrot.lane.b32.xlu1 %v8978_v54, %s8534_s3 }
 0x3bd   : > { %v1954_v39 = vpop.xlane.xlu0 %1953 }
 0x3be   : > { %8252 = vrcp.f32 %v1954_v39  ;;  %v1951_v59 = vpop.xlane.xlu1 %1950 }
 0x3bf   : > { %8254 = vrcp.f32 %v1951_v59 }
 0x3c2   : > { %v1960_v10 = vpop.xlane.xlu1 %1959 }
 0x3c3   : > { %8256 = vrcp.f32 %v1960_v10 }
 0x3c5   : > { %v1966_v29 = vpop.xlane.xlu0 %1965 }
 0x3c6   : > { %v1957_v60 = vpop.xlane.xlu1 %1956 }
 0x3c7   : > { %8258 = vrcp.f32 %v1957_v60 }
 0x3c8   : > { %v8253_v43 = vpop.eup %8252  ;;  %8260 = vrcp.f32 %v1966_v29 }
 0x3c9   : > { %v8255_v37 = vpop.eup %8254  ;;  %v1982_v54 = vmul.f32 %v8253_v43, %v9347_v62  ;;  %v8026_v62 = vunpack.i.l.bf16 %v9450_v14 }
 0x3ca   : > { %v1963_v51 = vpop.xlane.xlu1 %1962  ;;  %v1981_v19 = vmul.f32 %v8255_v37, %v9349_v17  ;;  %v8027_v17 = vunpack.i.h.bf16 %v9450_v14 }
 0x3cb   : > { %8262 = vrcp.f32 %v1963_v51 }
 0x3cc   : > { %7102 = vmatprep.mubr.msk.f32.mxu1 %vm1514_vm4, %v1981_v19  ;;  %v7694_v36 = vpack.c.bf16 %v8027_v17, %v8026_v62 }
 0x3cd   : > { %7103 = vmatmul.mubr.msk.f32.vlgmr.msra.gmra.mrb[40].mxu1 %vm1514_vm4, %v1982_v54  ;;  %v8257_v58 = vpop.eup %8256 }
 0x3ce   : > { %7685 = vmatpush3.bf16.msra.mxu1 %v9435_v30  ;;  %v1972_v23 = vpop.xlane.xlu1 %1971  ;;  %v1984_v1 = vmul.f32 %v8257_v58, %v9356_v55 }
 0x3cf   : > { %7687 = vmatprep.subr.bf16.mxu1 %v7686_v31  ;;  %8264 = vrcp.f32 %v1972_v23 }
 0x3d1   : > { %v8259_v52 = vpop.eup %8258 }
 0x3d2   : > { %7689 = vmatpush3.bf16.msra.mxu1 %v7686_v31  ;;  %v1969_v40 = vpop.xlane.xlu1 %1968  ;;  %v1983_v3 = vmul.f32 %v8259_v52, %v9360_v47  ;;  %v8261_v2 = vpop.eup %8260 }
 0x3d3   : > { %7691 = vmatprep.subr.bf16.mxu1 %v7690_v53  ;;  %8266 = vrcp.f32 %v1969_v40  ;;  %v1986_v47 = vmul.f32 %v8261_v2, %v9362_v4 }
 0x3d4   : > { %7105 = vmatprep.mubr.msk.f32.mxu1 %vm1514_vm4, %v1983_v3 }
 0x3d5   : > { %v8263_v30 = vpop.eup %8262  ;;  %7106 = vmatmul.mubr.msk.f32.gmra.mrb[42].mxu1 %vm1514_vm4, %v1984_v1 }
 0x3d6   : > { %7693 = vmatpush3.bf16.msra.mxu1 %v7690_v53  ;;  %v8030_v34 = vpop.permute.xlu1 %8029  ;;  %v1985_v6 = vmul.f32 %v8263_v30, %v9368_v9 }
 0x3d7   : > { %7695 = vmatprep.subr.bf16.mxu1 %v7694_v36  ;;  %v8032_v14 = vunpack.i.h.bf16 %v8030_v34  ;;  %v8031_v48 = vunpack.i.l.bf16 %v8030_v34 }
 0x3d8   : > { %7108 = vmatprep.mubr.msk.f32.mxu1 %vm1514_vm4, %v1985_v6 }
 0x3d9   : > { %v7698_v20 = vpack.c.bf16 %v8032_v14, %v8031_v48  ;;  %7109 = vmatmul.mubr.msk.f32.gmra.mrb[44].mxu1 %vm1514_vm4, %v1986_v47  ;;  %v8265_v55 = vpop.eup %8264 }
 0x3da   : > { %7697 = vmatpush3.bf16.msra.mxu1 %v7694_v36  ;;  %v1988_v9 = vmul.f32 %v8265_v55, %v9372_v8 }
 0x3db   : > { %7700 = vmatprep.subr.msk.bf16.mxu1 %vm8895_vm3, %v7698_v20 }
 0x3dd   : > { %v8267_v26 = vpop.eup %8266 }
 0x3de   : > { %v2369_v15 = vpop.xlane.xlu0 %2368  ;;  %v1987_v21 = vmul.f32 %v8267_v26, %v9378_v13 }
 0x3df   : > { %8268 = vrcp.f32 %v2369_v15 }
 0x3e0   : > { %7111 = vmatprep.mubr.msk.f32.mxu1 %vm1514_vm4, %v1987_v21 }
 0x3e1   : > { %7112 = vmatmul.mubr.msk.f32.gmra.mrb[46].mxu1 %vm1514_vm4, %v1988_v9 }
 0x3e2   : > { %v2375_v45 = vpop.xlane.xlu0 %2374 }
 0x3e3   : > { %8270 = vrcp.f32 %v2375_v45 }
 0x3e6   : > { %v2384_v46 = vpop.xlane.xlu0 %2383 }
 0x3e9   : > { %v8269_v4 = vpop.eup %8268 }
 0x3ea   : > { %v2399_v61 = vmul.f32 %v8269_v4, %v9388_v28  ;;  %v2381_v5 = vpop.xlane.xlu0 %2380 }
 0x3ec   : > { %7158 = vmatprep.mubr.msk.f32.mxu1 %vm1514_vm4, %v2399_v61 }
 0x3ed   : > { %v8271_v33 = vpop.eup %8270 }
 0x3ee   : > { %v2390_v50 = vpop.xlane.xlu0 %2389  ;;  %v2401_v10 = vmul.f32 %v8271_v33, %v9394_v16 }
 0x3f2   : > { %v2387_v35 = vpop.xlane.xlu0 %2386 }
 0x3f6   : > { %v8035_v8 = vpop.permute.xlu0 %8034 }
 0x3f7   : > { %v8037_v0 = vunpack.i.h.bf16 %v8035_v8  ;;  %v8036_v39 = vunpack.i.l.bf16 %v8035_v8 }
 0x3f9   : > { %v7704_v29 = vpack.c.bf16 %v8037_v0, %v8036_v39 }
 0x3fa   : > { %v2565_v17 = vpop.permute.xlu0 %2564 }
 0x3fe   : > { %v2569_v40 = vpop.permute.xlu0 %2568 }
 0x402   : > { %v2573_v1 = vpop.permute.xlu0 %2572 }
 0x407   : > { %v2372_v49 = vpop.xlane.xlu1 %2371 }
 0x408   : > { %8272 = vrcp.f32 %v2372_v49 }
 0x409   : > { %8274 = vrcp.f32 %v2381_v5 }
 0x40b   : > { %v2378_v13 = vpop.xlane.xlu1 %2377 }
 0x40c   : > { %8276 = vrcp.f32 %v2378_v13 }
 0x40d   : > { %8278 = vrcp.f32 %v2384_v46 }
 0x40e   : > { %8280 = vrcp.f32 %v2387_v35 }
 0x40f   : > { %8282 = vrcp.f32 %v2390_v50  ;;  %v8040_v43 = vpop.permute.xlu1 %8039 }
 0x410   : > { %v8042_v51 = vunpack.i.h.bf16 %v8040_v43  ;;  %v8041_v19 = vunpack.i.l.bf16 %v8040_v43 }
 0x412   : > { %v8273_v28 = vpop.eup %8272  ;;  %v7710_v23 = vpack.c.bf16 %v8042_v51, %v8041_v19 }
 0x413   : > { %v2400_v59 = vmul.f32 %v8273_v28, %v9438_v56  ;;  %v8275_v60 = vpop.eup %8274  ;;  %v8045_v54 = vpop.permute.xlu1 %8044 }
 0x414   : > { %v2403_v56 = vmul.f32 %v8275_v60, %v9402_v12  ;;  %v8046_v58 = vunpack.i.l.bf16 %v8045_v54 }
 0x415   : > { %7159 = vmatmul.mubr.msk.f32.vlgmr.msra.gmra.mrb[48].mxu1 %vm1514_vm4, %v2400_v59 }
 0x416   : > { %v8277_v37 = vpop.eup %8276  ;;  %7703 = vmatpush3.bf16.xpose.msk.msra.mxu1 %vm8895_vm3, %v7698_v20  ;;  %7161 = vmatprep.mubr.msk.f32.mxu1 %vm1514_vm4, %v2401_v10 }
 0x417   : > { %7706 = vmatprep.subr.msk.bf16.mxu1 %vm8895_vm3, %v7704_v29  ;;  %v2402_v57 = vmul.f32 %v8277_v37, %v9442_v25  ;;  %v8279_v42 = vpop.eup %8278  ;;  %v8047_v25 = vunpack.i.h.bf16 %v8045_v54  ;;  %v2561_v52 = vpop.permute.xlu1 %2560 }
 0x418   : > { %v8281_v16 = vpop.eup %8280  ;;  %v2404_v24 = vmul.f32 %v8279_v42, %v9398_v44  ;;  %v11131_v42 = vld [vmem:[#allocation14_spill] sm:$0xff] }
 0x419   : > { %7162 = vmatmul.mubr.msk.f32.gmra.mrb[50].mxu1 %vm1514_vm4, %v2402_v57  ;;  %v8283_v63 = vpop.eup %8282  ;;  %v2405_v31 = vmul.f32 %v8281_v16, %v9421_v38  ;;  %v7716_v44 = vpack.c.bf16 %v8047_v25, %v8046_v58 }
 0x41a   : > { %7164 = vmatprep.mubr.msk.f32.mxu1 %vm1514_vm4, %v2403_v56  ;;  %v2406_v12 = vmul.f32 %v8283_v63, %v9416_v32 }
 0x41b   : > { %v2563_v38 = vpop.permute.xlu1 %2562 }
 0x41d   : > { %7165 = vmatmul.mubr.msk.f32.gmra.mrb[52].mxu1 %vm1514_vm4, %v2404_v24 }
 0x41e   : > { %7709 = vmatpush3.bf16.xpose.msk.msra.mxu1 %vm8895_vm3, %v7704_v29  ;;  %7167 = vmatprep.mubr.msk.f32.mxu1 %vm1514_vm4, %v2405_v31 }
 0x41f   : > { %7712 = vmatprep.subr.msk.bf16.mxu1 %vm8895_vm3, %v7710_v23  ;;  %v2567_v53 = vpop.permute.xlu1 %2566 }
 0x421   : > { %7168 = vmatmul.mubr.msk.f32.gmra.mrb[54].mxu1 %vm1514_vm4, %v2406_v12 }
 0x422   : > { %7186 = vmatprep.mubr.msk.f32.mxu1 %vm1360_vm2, %v2561_v52 }
 0x423   : > { %v2571_v3 = vpop.permute.xlu1 %2570 }
 0x426   : > { %7715 = vmatpush3.bf16.xpose.msk.msra.mxu1 %vm8895_vm3, %v7710_v23 }
 0x427   : > { %7718 = vmatprep.subr.msk.bf16.mxu1 %vm8895_vm3, %v7716_v44 }
 0x42e   : > { %7721 = vmatpush3.bf16.xpose.msk.msra.mxu1 %vm8895_vm3, %v7716_v44 }
 0x42f   : > { %7763 = vmatprep.subr.bf16.mxu1 %v9174_v22 }
 0x430   : > { %v9537_v32 = vpop.f32.mrb[32].mxu1 }
 0x431   : > { %11123 = vst [vmem:[#allocation28_spill] sm:$0xff] %v9537_v32  ;;  %v9539_v62 = vpop.f32.mrb[33].mxu1 }
 0x432   : > { %11124 = vst [vmem:[#allocation29_spill] sm:$0xff] %v9539_v62 }
 0x435   : > { %7187 = vmatmul.mubr.msk.f32.vlgmr.msra.gmra.mrb[56].mxu1 %vm1360_vm2, %v2563_v38  ;;  %v11132_v38 = vld [vmem:[#allocation15_spill] sm:$0xff] }
 0x436   : > { %7189 = vmatprep.mubr.msk.f32.mxu1 %vm1360_vm2, %v2565_v17  ;;  %7765 = vmatpush3.bf16.msra.mxu1 %v9174_v22  ;;  %v2575_v22 = vpop.permute.xlu1 %2574 }
 0x437   : > { %7767 = vmatprep.subr.bf16.mxu1 %v9182_v11 }
 0x439   : > { %7190 = vmatmul.mubr.msk.f32.gmra.mrb[58].mxu1 %vm1360_vm2, %v2567_v53  ;;  %v11133_v53 = vld [vmem:[#allocation13_spill] sm:$0xff] }
 0x43a   : > { %7192 = vmatprep.mubr.msk.f32.mxu1 %vm1360_vm2, %v2569_v40  ;;  %7769 = vmatpush3.bf16.msra.mxu1 %v9182_v11 }
 0x43b   : > { %7771 = vmatprep.subr.bf16.mxu1 %v9190_v27 }
 0x43d   : > { %7193 = vmatmul.mubr.msk.f32.gmra.mrb[60].mxu1 %vm1360_vm2, %v2571_v3 }
 0x43e   : > { %7195 = vmatprep.mubr.msk.f32.mxu1 %vm1360_vm2, %v2573_v1  ;;  %7773 = vmatpush3.bf16.msra.mxu1 %v9190_v27 }
 0x43f   : > { %7775 = vmatprep.subr.bf16.mxu1 %v9194_v41 }
 0x441   : > { %7196 = vmatmul.mubr.msk.f32.gmra.mrb[62].mxu1 %vm1360_vm2, %v2575_v22 }
 0x442   : > { %7777 = vmatpush3.bf16.msra.mxu1 %v9194_v41 }
 0x465   : > { %v9555_v2 = vpop.f32.mrb[34].mxu1 }
 0x466   : > { %11125 = vst [vmem:[#allocation30_spill] sm:$0xff] %v9555_v2  ;;  %v9557_v30 = vpop.f32.mrb[35].mxu1 }
 0x467   : > { %11126 = vst [vmem:[#allocation31_spill] sm:$0xff] %v9557_v30 }
 0x469   : > { %v9559_v11 = vpop.f32.mrb[36].mxu1 }
 0x46a   : > { %11127 = vst [vmem:[#allocation32_spill] sm:$0xff] %v9559_v11  ;;  %v9561_v36 = vpop.f32.mrb[37].mxu1 }
 0x46b   : > { %11128 = vst [vmem:[#allocation33_spill] sm:$0xff] %v9561_v36 }
 0x46d   : > { %v9563_v34 = vpop.f32.mrb[38].mxu1 }
 0x46e   : > { %11129 = vst [vmem:[#allocation34_spill] sm:$0xff] %v9563_v34  ;;  %v9565_v6 = vpop.f32.mrb[39].mxu1 }
 0x46f   : > { %11130 = vst [vmem:[#allocation35_spill] sm:$0xff] %v9565_v6 }
 0x4a0   : > { %v9567_v27 = vpop.f32.mrb[40].mxu1 }
 0x4a1   : > { %v9569_v14 = vpop.f32.mrb[41].mxu1 }
 0x4a8   : > { %v9571_v48 = vpop.f32.mrb[42].mxu1 }
 0x4a9   : > { %v9573_v47 = vpop.f32.mrb[43].mxu1 }
 0x4ac   : > { %v9575_v41 = vpop.f32.mrb[44].mxu1 }
 0x4ad   : > { %v9577_v20 = vpop.f32.mrb[45].mxu1 }
 0x4b4   : > { %v9579_v55 = vpop.f32.mrb[46].mxu1 }
 0x4b5   : > { %v9581_v26 = vpop.f32.mrb[47].mxu1 }
 0x4e8   : > { %v9583_v15 = vpop.f32.mrb[48].mxu1 }
 0x4e9   : > { %v9585_v21 = vpop.f32.mrb[49].mxu1 }
 0x4ec   : > { %v9587_v9 = vpop.f32.mrb[50].mxu1 }
 0x4ed   : > { %v9589_v4 = vpop.f32.mrb[51].mxu1 }
 0x4f0   : > { %v9591_v61 = vpop.f32.mrb[52].mxu1 }
 0x4f1   : > { %v9593_v45 = vpop.f32.mrb[53].mxu1 }
 0x4f4   : > { %v9595_v46 = vpop.f32.mrb[54].mxu1 }
 0x4f5   : > { %v9597_v5 = vpop.f32.mrb[55].mxu1 }
 0x508   : > { %v7188_v50 = vpop.f32.mrb[56].mxu1 }
 0x509   : > { %v2690_v49 = vpop.f32.mrb[57].mxu1  ;;  %v2732_v35 = vsel %vm1514_vm4, %v7188_v50, -inf }
 0x50a   : > { %2733 = vmax.xlane.f32.xlu1 %v2732_v35  ;;  %v2729_v13 = vsel %vm1514_vm4, %v2690_v49, -inf }
 0x50b   : > { %2730 = vmax.xlane.f32.xlu0 %v2729_v13 }
 0x50c   : > { %v7191_v8 = vpop.f32.mrb[58].mxu1 }
 0x50d   : > { %v2700_v33 = vpop.f32.mrb[59].mxu1  ;;  %v2738_v59 = vsel %vm1514_vm4, %v7191_v8, -inf }
 0x50e   : > { %v2735_v0 = vsel %vm1514_vm4, %v2700_v33, -inf }
 0x50f   : > { %2736 = vmax.xlane.f32.xlu0 %v2735_v0 }
 0x510   : > { %v7194_v39 = vpop.f32.mrb[60].mxu1 }
 0x511   : > { %v2710_v28 = vpop.f32.mrb[61].mxu1  ;;  %v2744_v43 = vsel %vm1514_vm4, %v7194_v39, -inf }
 0x512   : > { %v2741_v10 = vsel %vm1514_vm4, %v2710_v28, -inf }
 0x513   : > { %2739 = vmax.xlane.f32.xlu0 %v2738_v59  ;;  %2742 = vmax.xlane.f32.xlu1 %v2741_v10 }
 0x514   : > { %v7197_v60 = vpop.f32.mrb[62].mxu1 }
 0x515   : > { %v2720_v29 = vpop.f32.mrb[63].mxu1  ;;  %v2750_v37 = vsel %vm1514_vm4, %v7197_v60, -inf }
 0x516   : > { %v2747_v57 = vsel %vm1514_vm4, %v2720_v29, -inf }
 0x517   : > { %2745 = vmax.xlane.f32.xlu0 %v2744_v43 }
 0x51b   : > { %2751 = vmax.xlane.f32.xlu0 %v2750_v37 }
 0x524   : > { %8049 = vrot.lane.b32.xlu1 %v9027_v7, %s8534_s3 }
 0x548   : > { %2748 = vmax.xlane.f32.xlu1 %v2747_v57 }
 0x559   : > { %8059 = vrot.lane.b32.xlu1 %v11131_v42, %s8534_s3 }
 0x597   : > { %v2734_v56 = vpop.xlane.xlu1 %2733 }
 0x598   : > { %v2754_v16 = vsub.f32 %v7188_v50, %v2734_v56  ;;  %v2731_v51 = vpop.xlane.xlu0 %2730 }
 0x599   : > { %v2753_v19 = vsub.f32 %v2690_v49, %v2731_v51 }
 0x59a   : > { %v2763_v54 = vmul.f32 1.442695, %v2754_v16 }
 0x59b   : > { %v2761_v24 = vmul.f32 1.442695, %v2753_v19 }
 0x59c   : > { %8284 = vpow2.f32 %v2763_v54  ;;  %v2737_v17 = vpop.xlane.xlu0 %2736 }
 0x59d   : > { %8286 = vpow2.f32 %v2761_v24  ;;  %v2755_v3 = vsub.f32 %v2700_v33, %v2737_v17 }
 0x59f   : > { %v2765_v50 = vmul.f32 1.442695, %v2755_v3 }
 0x5a0   : > { %v2743_v63 = vpop.xlane.xlu1 %2742  ;;  %v2740_v40 = vpop.xlane.xlu0 %2739 }
 0x5a1   : > { %v2756_v1 = vsub.f32 %v7191_v8, %v2740_v40  ;;  %v2757_v49 = vsub.f32 %v2710_v28, %v2743_v63  ;;  %8288 = vpow2.f32 %v2765_v50 }
 0x5a3   : > { %v2767_v35 = vmul.f32 1.442695, %v2756_v1  ;;  %v2769_v13 = vmul.f32 1.442695, %v2757_v49 }
 0x5a4   : > { %v8050_v31 = vpop.permute.xlu1 %8049  ;;  %v2746_v22 = vpop.xlane.xlu0 %2745 }
 0x5a5   : > { %v8052_v23 = vunpack.i.h.bf16 %v8050_v31  ;;  %v8051_v12 = vunpack.i.l.bf16 %v8050_v31  ;;  %v2758_v0 = vsub.f32 %v7194_v39, %v2746_v22  ;;  %8290 = vpow2.f32 %v2767_v35 }
 0x5a6   : > { %v9611_v25 = vpop.eup %8284  ;;  %8292 = vpow2.f32 %v2769_v13 }
 0x5a7   : > { %v9613_v7 = vpop.eup %8286  ;;  %v2780_v58 = vsel %vm1514_vm4, %v9611_v25, 0.0  ;;  %v7722_v52 = vpack.c.bf16 %v8052_v23, %v8051_v12  ;;  %v2771_v10 = vmul.f32 1.442695, %v2758_v0 }
 0x5a8   : > { %2781 = vadd.xlane.f32.xlu0 %v2780_v58  ;;  %v2777_v44 = vsel %vm1514_vm4, %v9613_v7, 0.0  ;;  %v2752_v59 = vpop.xlane.xlu0 %2751 }
 0x5a9   : > { %7723 = vmatprep.subr.bf16.mxu0 %v7722_v52  ;;  %2778 = vadd.xlane.f32.xlu1 %v2777_v44  ;;  %v2760_v43 = vsub.f32 %v7197_v60, %v2752_v59  ;;  %8294 = vpow2.f32 %v2771_v10  ;;  %v11134_v59 = vld [vmem:[#allocation16_spill] sm:$0xff]  ;;  %v11135_v10 = vld [vmem:[#allocation18_spill] sm:$0xff] }
 0x5aa   : > { %7725 = vmatpush3.bf16.msra.mxu0 %v7722_v52 }
 0x5ab   : > { %v2775_v42 = vmul.f32 1.442695, %v2760_v43  ;;  %v9623_v16 = vpop.eup %8288 }
 0x5ac   : > { %v2783_v33 = vsel %vm1514_vm4, %v9623_v16, 0.0 }
 0x5af   : > { %v9625_v8 = vpop.eup %8290 }
 0x5b0   : > { %v9629_v39 = vpop.eup %8292  ;;  %v2786_v28 = vsel %vm1514_vm4, %v9625_v8, 0.0 }
 0x5b1   : > { %v2789_v60 = vsel %vm1514_vm4, %v9629_v39, 0.0 }
 0x5ba   : > { %8064 = vrot.lane.b32.xlu1 %v11132_v38, %s8534_s3 }
 0x5be   : > { %8054 = vrot.lane.b32.xlu0 %v11133_v53, %s8534_s3 }
 0x5d5   : > { %v2749_v37 = vpop.xlane.xlu1 %2748 }
 0x5d6   : > { %v2759_v57 = vsub.f32 %v2720_v29, %v2749_v37  ;;  %v9635_v29 = vpop.eup %8294 }
 0x5d7   : > { %v2792_v19 = vsel %vm1514_vm4, %v9635_v29, 0.0 }
 0x5d8   : > { %v2773_v56 = vmul.f32 1.442695, %v2759_v57 }
 0x5d9   : > { %v8060_v31 = vpop.permute.xlu1 %8059 }
 0x5da   : > { %8296 = vpow2.f32 %v2773_v56  ;;  %v8062_v52 = vunpack.i.h.bf16 %v8060_v31  ;;  %v8061_v44 = vunpack.i.l.bf16 %v8060_v31 }
 0x5db   : > { %8298 = vpow2.f32 %v2775_v42 }
 0x5dc   : > { %v7730_v22 = vpack.c.bf16 %v8062_v52, %v8061_v44  ;;  %v11138_v44 = vld [vmem:[#allocation6_spill] sm:$0xff] }
 0x5dd   : > { %2784 = vadd.xlane.f32.xlu0 %v2783_v33 }
 0x5de   : > { %2787 = vadd.xlane.f32.xlu1 %v2786_v28 }
 0x5e1   : > { %2790 = vadd.xlane.f32.xlu0 %v2789_v60 }
 0x5e4   : > { %v9637_v51 = vpop.eup %8296 }
 0x5e5   : > { %v9641_v54 = vpop.eup %8298  ;;  %2793 = vadd.xlane.f32.xlu0 %v2792_v19  ;;  %v2795_v24 = vsel %vm1514_vm4, %v9637_v51, 0.0 }
 0x5e6   : > { %2796 = vadd.xlane.f32.xlu1 %v2795_v24  ;;  %v2798_v63 = vsel %vm1514_vm4, %v9641_v54, 0.0 }
 0x5e9   : > { %2799 = vadd.xlane.f32.xlu0 %v2798_v63 }
 0x635   : > { %v2782_v23 = vpop.xlane.xlu0 %2781 }
 0x636   : > { %v2779_v12 = vpop.xlane.xlu1 %2778 }
 0x637   : > { %8300 = vrcp.f32 %v2779_v12 }
 0x638   : > { %8302 = vrcp.f32 %v2782_v23 }
 0x639   : > { %v8055_v58 = vpop.permute.xlu0 %8054 }
 0x63a   : > { %v8057_v38 = vunpack.i.h.bf16 %v8055_v58  ;;  %v8056_v17 = vunpack.i.l.bf16 %v8055_v58  ;;  %v8065_v53 = vpop.permute.xlu1 %8064 }
 0x63b   : > { %v8067_v3 = vunpack.i.h.bf16 %v8065_v53  ;;  %v8066_v1 = vunpack.i.l.bf16 %v8065_v53 }
 0x63c   : > { %v7726_v40 = vpack.c.bf16 %v8057_v38, %v8056_v17  ;;  %v9687_v38 = vmul.f32 0.35355338, %v11138_v44 }
 0x63d   : > { %v7734_v49 = vpack.c.bf16 %v8067_v3, %v8066_v1  ;;  %v11143_v1 = vld [vmem:[#allocation9_spill] sm:$0xff] }
 0x63e   : > { %7727 = vmatprep.subr.bf16.mxu0 %v7726_v40 }
 0x63f   : > { %7729 = vmatpush3.bf16.msra.mxu0 %v7726_v40  ;;  %v11142_v40 = vld [vmem:[#allocation10_spill] sm:$0xff] }
 0x640   : > { %7731 = vmatprep.subr.bf16.mxu0 %v7730_v22  ;;  %v9706_v3 = vmul.f32 0.35355338, %v11142_v40 }
 0x641   : > { %v8301_v50 = vpop.eup %8300 }
 0x642   : > { %v2809_v35 = vmul.f32 %v8301_v50, %v9613_v7  ;;  %v8303_v13 = vpop.eup %8302  ;;  %v11136_v7 = vld [vmem:[#allocation20_spill] sm:$0xff] }
 0x643   : > { %7733 = vmatpush3.bf16.msra.mxu0 %v7730_v22  ;;  %v2810_v0 = vmul.f32 %v8303_v13, %v9611_v25  ;;  %v11137_v25 = vld [vmem:[#allocation22_spill] sm:$0xff]  ;;  %v9713_v22 = vmul.f32 0.35355338, %v11143_v1  ;;  %v11144_v50 = vld [vmem:[#allocation12_spill] sm:$0xff] }
 0x644   : > { %7735 = vmatprep.subr.bf16.mxu0 %v7734_v49  ;;  %7214 = vmatprep.mubr.msk.f32.mxu0 %vm1514_vm4, %v2809_v35  ;;  %v11145_v35 = vld [vmem:[#allocation11_spill] sm:$0xff] }
 0x645   : > { %v9723_v13 = vmul.f32 0.35355338, %v11145_v35 }
 0x647   : > { %7737 = vmatpush3.bf16.msra.mxu0 %v7734_v49  ;;  %v9716_v49 = vmul.f32 0.35355338, %v11144_v50 }
 0x648   : > { %7740 = vmatprep.subr.msk.bf16.mxu0 %vm8895_vm3, %v11134_v59 }
 0x64a   : > { %7215 = vmatmul.mubr.msk.f32.vlgmr.msra.gmra.mrb[40].mxu0 %vm1514_vm4, %v2810_v0 }
 0x650   : > { %7743 = vmatpush3.bf16.xpose.msk.msra.mxu0 %vm8895_vm3, %v11134_v59 }
 0x651   : > { %7746 = vmatprep.subr.msk.bf16.mxu0 %vm8895_vm3, %v11135_v10 }
 0x658   : > { %7749 = vmatpush3.bf16.xpose.msk.msra.mxu0 %vm8895_vm3, %v11135_v10 }
 0x659   : > { %7752 = vmatprep.subr.msk.bf16.mxu0 %vm8895_vm3, %v11136_v7 }
 0x660   : > { %7755 = vmatpush3.bf16.xpose.msk.msra.mxu0 %vm8895_vm3, %v11136_v7 }
 0x661   : > { %7758 = vmatprep.subr.msk.bf16.mxu0 %vm8895_vm3, %v11137_v25 }
 0x668   : > { %7761 = vmatpush3.bf16.xpose.msk.msra.mxu0 %vm8895_vm3, %v11137_v25 }
 0x66a   : > { %v2785_v43 = vpop.xlane.xlu0 %2784 }
 0x66b   : > { %8304 = vrcp.f32 %v2785_v43  ;;  %v2788_v37 = vpop.xlane.xlu1 %2787 }
 0x66c   : > { %8306 = vrcp.f32 %v2788_v37 }
 0x66e   : > { %v2791_v57 = vpop.xlane.xlu0 %2790 }
 0x66f   : > { %8308 = vrcp.f32 %v2791_v57 }
 0x672   : > { %v2794_v42 = vpop.xlane.xlu0 %2793 }
 0x673   : > { %8310 = vrcp.f32 %v2794_v42  ;;  %v2797_v56 = vpop.xlane.xlu1 %2796 }
 0x674   : > { %8312 = vrcp.f32 %v2797_v56 }
 0x675   : > { %v8305_v33 = vpop.eup %8304 }
 0x676   : > { %v8307_v28 = vpop.eup %8306  ;;  %v2800_v60 = vpop.xlane.xlu0 %2799  ;;  %v2811_v19 = vmul.f32 %v8305_v33, %v9623_v16 }
 0x677   : > { %8314 = vrcp.f32 %v2800_v60  ;;  %v2812_v24 = vmul.f32 %v8307_v28, %v9625_v8 }
 0x678   : > { %7217 = vmatprep.mubr.msk.f32.mxu0 %vm1514_vm4, %v2811_v19 }
 0x679   : > { %v8309_v63 = vpop.eup %8308  ;;  %7218 = vmatmul.mubr.msk.f32.gmra.mrb[42].mxu0 %vm1514_vm4, %v2812_v24 }
 0x67a   : > { %v2813_v31 = vmul.f32 %v8309_v63, %v9629_v39  ;;  %v11139_v39 = vld [vmem:[#allocation5_spill] sm:$0xff] }
 0x67b   : > { %v9693_v17 = vmul.f32 0.35355338, %v11139_v39  ;;  %v11147_v39 = vld [vmem:[#allocation17_spill] sm:$0xff] }
 0x67c   : > { %7220 = vmatprep.mubr.msk.f32.mxu0 %vm1514_vm4, %v2813_v31 }
 0x67d   : > { %v8311_v23 = vpop.eup %8310 }
 0x67e   : > { %v8313_v12 = vpop.eup %8312  ;;  %v2814_v58 = vmul.f32 %v8311_v23, %v9635_v29  ;;  %v11140_v29 = vld [vmem:[#allocation8_spill] sm:$0xff] }
 0x67f   : > { %v2815_v52 = vmul.f32 %v8313_v12, %v9637_v51  ;;  %v9696_v51 = vmul.f32 0.35355338, %v11140_v29 }
 0x680   : > { %7221 = vmatmul.mubr.msk.f32.gmra.mrb[44].mxu0 %vm1514_vm4, %v2814_v58 }
 0x681   : > { %v8315_v16 = vpop.eup %8314  ;;  %7223 = vmatprep.mubr.msk.f32.mxu0 %vm1514_vm4, %v2815_v52 }
 0x682   : > { %v2816_v8 = vmul.f32 %v8315_v16, %v9641_v54  ;;  %v11141_v54 = vld [vmem:[#allocation7_spill] sm:$0xff] }
 0x683   : > { %v9703_v53 = vmul.f32 0.35355338, %v11141_v54 }
 0x684   : > { %7224 = vmatmul.mubr.msk.f32.gmra.mrb[46].mxu0 %vm1514_vm4, %v2816_v8 }
 0x685   : > { %7242 = vmatprep.mubr.msk.f32.mxu0 %vm1360_vm2, %v9687_v38 }
 0x688   : > { %7243 = vmatmul.mubr.msk.f32.vlgmr.msra.gmra.mrb[48].mxu0 %vm1360_vm2, %v9693_v17 }
 0x689   : > { %7245 = vmatprep.mubr.msk.f32.mxu0 %vm1360_vm2, %v9696_v51 }
 0x68c   : > { %7246 = vmatmul.mubr.msk.f32.gmra.mrb[50].mxu0 %vm1360_vm2, %v9703_v53 }
 0x68d   : > { %7248 = vmatprep.mubr.msk.f32.mxu0 %vm1360_vm2, %v9706_v3 }
 0x690   : > { %7249 = vmatmul.mubr.msk.f32.gmra.mrb[52].mxu0 %vm1360_vm2, %v9713_v22 }
 0x691   : > { %7251 = vmatprep.mubr.msk.f32.mxu0 %vm1360_vm2, %v9716_v49 }
 0x694   : > { %7252 = vmatmul.mubr.msk.f32.gmra.mrb[54].mxu0 %vm1360_vm2, %v9723_v13 }
 0x71d   : > { %v9727_v0 = vpop.f32.mrb[40].mxu0 }
 0x71e   : > { %v9729_v59 = vpop.f32.mrb[41].mxu0 }
 0x74c   : > { %v9731_v10 = vpop.f32.mrb[42].mxu0 }
 0x74d   : > { %v9733_v7 = vpop.f32.mrb[43].mxu0 }
 0x753   : > { %v9735_v25 = vpop.f32.mrb[44].mxu0 }
 0x754   : > { %v9737_v43 = vpop.f32.mrb[45].mxu0 }
 0x757   : > { %v9739_v37 = vpop.f32.mrb[46].mxu0 }
 0x758   : > { %v9741_v57 = vpop.f32.mrb[47].mxu0 }
 0x759   : > { %11146 = vst [vmem:[#allocation14_spill] sm:$0xff] %v9741_v57 }
 0x75b   : > { %v7244_v42 = vpop.f32.mrb[48].mxu0 }
 0x75c   : > { %v3206_v56 = vpop.f32.mrb[49].mxu0  ;;  %v3248_v33 = vsel %vm1514_vm4, %v7244_v42, -inf }
 0x75d   : > { %3249 = vmax.xlane.f32.xlu0 %v3248_v33  ;;  %v3245_v28 = vsel %vm1514_vm4, %v3206_v56, -inf }
 0x75e   : > { %3246 = vmax.xlane.f32.xlu1 %v3245_v28 }
 0x75f   : > { %v7247_v60 = vpop.f32.mrb[50].mxu0 }
 0x760   : > { %v3216_v19 = vpop.f32.mrb[51].mxu0  ;;  %v3254_v24 = vsel %vm1514_vm4, %v7247_v60, -inf }
 0x761   : > { %3255 = vmax.xlane.f32.xlu0 %v3254_v24  ;;  %v3251_v63 = vsel %vm1514_vm4, %v3216_v19, -inf }
 0x762   : > { %3252 = vmax.xlane.f32.xlu1 %v3251_v63 }
 0x763   : > { %v7250_v31 = vpop.f32.mrb[52].mxu0 }
 0x764   : > { %v3226_v23 = vpop.f32.mrb[53].mxu0  ;;  %v3260_v12 = vsel %vm1514_vm4, %v7250_v31, -inf }
 0x765   : > { %3261 = vmax.xlane.f32.xlu0 %v3260_v12  ;;  %v3257_v58 = vsel %vm1514_vm4, %v3226_v23, -inf }
 0x766   : > { %3258 = vmax.xlane.f32.xlu1 %v3257_v58 }
 0x767   : > { %v7253_v52 = vpop.f32.mrb[54].mxu0 }
 0x768   : > { %v3236_v16 = vpop.f32.mrb[55].mxu0  ;;  %v3266_v8 = vsel %vm1514_vm4, %v7253_v52, -inf }
 0x769   : > { %3267 = vmax.xlane.f32.xlu0 %v3266_v8  ;;  %v3263_v44 = vsel %vm1514_vm4, %v3236_v16, -inf }
 0x76a   : > { %3264 = vmax.xlane.f32.xlu1 %v3263_v44 }
 0x77b   : > { %8069 = vrot.lane.b32.xlu1 %v11147_v39, %s8532_s16 }
 0x7ea   : > { %v3250_v29 = vpop.xlane.xlu0 %3249 }
 0x7eb   : > { %v3270_v54 = vsub.f32 %v7244_v42, %v3250_v29  ;;  %v3247_v40 = vpop.xlane.xlu1 %3246 }
 0x7ec   : > { %v3269_v1 = vsub.f32 %v3206_v56, %v3247_v40 }
 0x7ed   : > { %v3279_v50 = vmul.f32 1.442695, %v3270_v54 }
 0x7ee   : > { %v3277_v35 = vmul.f32 1.442695, %v3269_v1  ;;  %v3256_v33 = vpop.xlane.xlu0 %3255 }
 0x7ef   : > { %8316 = vpow2.f32 %v3279_v50  ;;  %v3272_v28 = vsub.f32 %v7247_v60, %v3256_v33  ;;  %v3253_v24 = vpop.xlane.xlu1 %3252 }
 0x7f0   : > { %8318 = vpow2.f32 %v3277_v35  ;;  %v3271_v63 = vsub.f32 %v3216_v19, %v3253_v24 }
 0x7f1   : > { %v3283_v12 = vmul.f32 1.442695, %v3272_v28 }
 0x7f2   : > { %v3281_v58 = vmul.f32 1.442695, %v3271_v63  ;;  %v3262_v8 = vpop.xlane.xlu0 %3261 }
 0x7f3   : > { %8320 = vpow2.f32 %v3283_v12  ;;  %v3274_v44 = vsub.f32 %v7250_v31, %v3262_v8  ;;  %v3259_v34 = vpop.xlane.xlu1 %3258 }
 0x7f4   : > { %8322 = vpow2.f32 %v3281_v58  ;;  %v3273_v6 = vsub.f32 %v3226_v23, %v3259_v34 }
 0x7f5   : > { %v3287_v11 = vmul.f32 1.442695, %v3274_v44 }
 0x7f6   : > { %v3285_v42 = vmul.f32 1.442695, %v3273_v6  ;;  %v3268_v29 = vpop.xlane.xlu0 %3267 }
 0x7f7   : > { %8324 = vpow2.f32 %v3287_v11  ;;  %v3276_v56 = vsub.f32 %v7253_v52, %v3268_v29  ;;  %v3265_v54 = vpop.xlane.xlu1 %3264 }
 0x7f8   : > { %8326 = vpow2.f32 %v3285_v42  ;;  %v3275_v40 = vsub.f32 %v3236_v16, %v3265_v54  ;;  %v11149_v54 = vld [vmem:[#allocation23_spill] sm:$0xff] }
 0x7f9   : > { %v8317_v60 = vpop.eup %8316  ;;  %v3291_v1 = vmul.f32 1.442695, %v3276_v56  ;;  %v11148_v56 = vld [vmem:[#allocation21_spill] sm:$0xff] }
 0x7fa   : > { %v8319_v50 = vpop.eup %8318  ;;  %v3289_v19 = vmul.f32 1.442695, %v3275_v40  ;;  %v3296_v35 = vsel %vm1514_vm4, %v8317_v60, 0.0  ;;  %v11150_v40 = vld [vmem:[#allocation19_spill] sm:$0xff] }
 0x7fb   : > { %8328 = vpow2.f32 %v3291_v1  ;;  %3297 = vadd.xlane.f32.xlu0 %v3296_v35  ;;  %v8070_v31 = vpop.permute.xlu1 %8069  ;;  %v3293_v33 = vsel %vm1514_vm4, %v8319_v50, 0.0 }
 0x7fc   : > { %v8072_v34 = vunpack.i.h.bf16 %v8070_v31  ;;  %v8071_v23 = vunpack.i.l.bf16 %v8070_v31  ;;  %3294 = vadd.xlane.f32.xlu1 %v3293_v33  ;;  %8330 = vpow2.f32 %v3289_v19 }
 0x7fd   : > { %v8321_v6 = vpop.eup %8320 }
 0x7fe   : > { %v8323_v11 = vpop.eup %8322  ;;  %v7778_v52 = vpack.c.bf16 %v8072_v34, %v8071_v23  ;;  %v3302_v16 = vsel %vm1514_vm4, %v8321_v6, 0.0 }
 0x7ff   : > { %3303 = vadd.xlane.f32.xlu0 %v3302_v16  ;;  %v3299_v28 = vsel %vm1514_vm4, %v8323_v11, 0.0 }
 0x800   : > { %3300 = vadd.xlane.f32.xlu1 %v3299_v28  ;;  %7780 = vmatprep.subr.msk.bf16.mxu1 %vm8895_vm3, %v7778_v52 }
 0x801   : > { %v8325_v24 = vpop.eup %8324 }
 0x802   : > { %v8327_v63 = vpop.eup %8326  ;;  %v3308_v12 = vsel %vm1514_vm4, %v8325_v24, 0.0 }
 0x803   : > { %3309 = vadd.xlane.f32.xlu0 %v3308_v12  ;;  %v3305_v58 = vsel %vm1514_vm4, %v8327_v63, 0.0 }
 0x804   : > { %3306 = vadd.xlane.f32.xlu1 %v3305_v58 }
 0x805   : > { %v9761_v8 = vpop.eup %8328 }
 0x806   : > { %v3314_v44 = vsel %vm1514_vm4, %v9761_v8, 0.0  ;;  %v9765_v42 = vpop.eup %8330 }
 0x807   : > { %3315 = vadd.xlane.f32.xlu0 %v3314_v44  ;;  %v3311_v29 = vsel %vm1514_vm4, %v9765_v42, 0.0 }
 0x80b   : > { %3312 = vadd.xlane.f32.xlu0 %v3311_v29 }
 0x815   : > { %8079 = vrot.lane.b32.xlu1 %v11148_v56, %s8532_s16 }
 0x819   : > { %8084 = vrot.lane.b32.xlu1 %v11149_v54, %s8532_s16 }
 0x81d   : > { %3462 = vrot.lane.b32.xlu1 %v9687_v38, %s8532_s16 }
 0x821   : > { %3464 = vrot.lane.b32.xlu1 %v9693_v17, %s8532_s16  ;;  %8074 = vrot.lane.b32.xlu0 %v11150_v40, %s8532_s16 }
 0x825   : > { %3468 = vrot.lane.b32.xlu1 %v9703_v53, %s8532_s16  ;;  %3466 = vrot.lane.b32.xlu0 %v9696_v51, %s8532_s16 }
 0x829   : > { %3472 = vrot.lane.b32.xlu1 %v9713_v22, %s8532_s16  ;;  %3470 = vrot.lane.b32.xlu0 %v9706_v3, %s8532_s16 }
 0x82d   : > { %3476 = vrot.lane.b32.xlu1 %v9723_v13, %s8532_s16  ;;  %3474 = vrot.lane.b32.xlu0 %v9716_v49, %s8532_s16 }
 0x888   : > { %v3298_v1 = vpop.xlane.xlu0 %3297 }
 0x889   : > { %8332 = vrcp.f32 %v3298_v1  ;;  %v3295_v19 = vpop.xlane.xlu1 %3294 }
 0x88a   : > { %8334 = vrcp.f32 %v3295_v19 }
 0x88c   : > { %v3304_v35 = vpop.xlane.xlu0 %3303 }
 0x88d   : > { %8336 = vrcp.f32 %v3304_v35  ;;  %v3301_v31 = vpop.xlane.xlu1 %3300 }
 0x88e   : > { %8338 = vrcp.f32 %v3301_v31 }
 0x890   : > { %v3310_v33 = vpop.xlane.xlu0 %3309 }
 0x891   : > { %8340 = vrcp.f32 %v3310_v33  ;;  %v3307_v34 = vpop.xlane.xlu1 %3306 }
 0x892   : > { %8342 = vrcp.f32 %v3307_v34 }
 0x893   : > { %v8333_v23 = vpop.eup %8332 }
 0x894   : > { %v8335_v16 = vpop.eup %8334  ;;  %v3316_v28 = vpop.xlane.xlu0 %3315  ;;  %v3326_v58 = vmul.f32 %v8333_v23, %v8317_v60 }
 0x895   : > { %v3325_v12 = vmul.f32 %v8335_v16, %v8319_v50  ;;  %8344 = vrcp.f32 %v3316_v28  ;;  %v8080_v19 = vpop.permute.xlu1 %8079 }
 0x896   : > { %v8082_v60 = vunpack.i.h.bf16 %v8080_v19  ;;  %v8081_v23 = vunpack.i.l.bf16 %v8080_v19 }
 0x897   : > { %v8337_v44 = vpop.eup %8336  ;;  %7270 = vmatprep.mubr.msk.f32.mxu1 %vm1514_vm4, %v3325_v12 }
 0x898   : > { %v8339_v29 = vpop.eup %8338  ;;  %v3313_v1 = vpop.xlane.xlu0 %3312  ;;  %7271 = vmatmul.mubr.msk.f32.vlgmr.msra.gmra.mrb[64].mxu1 %vm1514_vm4, %v3326_v58  ;;  %v3328_v31 = vmul.f32 %v8337_v44, %v8321_v6 }
 0x899   : > { %8346 = vrcp.f32 %v3313_v1  ;;  %7783 = vmatpush3.bf16.xpose.msk.msra.mxu1 %vm8895_vm3, %v7778_v52  ;;  %v3327_v35 = vmul.f32 %v8339_v29, %v8323_v11  ;;  %v7790_v11 = vpack.c.bf16 %v8082_v60, %v8081_v23  ;;  %v8085_v6 = vpop.permute.xlu1 %8084 }
 0x89a   : > { %v8086_v29 = vunpack.i.l.bf16 %v8085_v6 }
 0x89b   : > { %v8341_v33 = vpop.eup %8340  ;;  %7273 = vmatprep.mubr.msk.f32.mxu1 %vm1514_vm4, %v3327_v35 }
 0x89c   : > { %v8343_v50 = vpop.eup %8342  ;;  %v8075_v34 = vpop.permute.xlu0 %8074  ;;  %7274 = vmatmul.mubr.msk.f32.gmra.mrb[66].mxu1 %vm1514_vm4, %v3328_v31  ;;  %v3330_v58 = vmul.f32 %v8341_v33, %v8325_v24 }
 0x89d   : > { %v8077_v16 = vunpack.i.h.bf16 %v8075_v34  ;;  %v8076_v28 = vunpack.i.l.bf16 %v8075_v34  ;;  %v3329_v12 = vmul.f32 %v8343_v50, %v8327_v63  ;;  %v8087_v63 = vunpack.i.h.bf16 %v8085_v6  ;;  %v3463_v19 = vpop.permute.xlu1 %3462 }
 0x89f   : > { %v7784_v36 = vpack.c.bf16 %v8077_v16, %v8076_v28  ;;  %7276 = vmatprep.mubr.msk.f32.mxu1 %vm1514_vm4, %v3329_v12  ;;  %v8345_v52 = vpop.eup %8344  ;;  %v7796_v35 = vpack.c.bf16 %v8087_v63, %v8086_v29 }
 0x8a0   : > { %7277 = vmatmul.mubr.msk.f32.gmra.mrb[68].mxu1 %vm1514_vm4, %v3330_v58  ;;  %v3332_v1 = vmul.f32 %v8345_v52, %v9761_v8 }
 0x8a1   : > { %7786 = vmatprep.subr.msk.bf16.mxu1 %vm8895_vm3, %v7784_v36 }
 0x8a2   : > { %7789 = vmatpush3.bf16.xpose.msk.msra.mxu1 %vm8895_vm3, %v7784_v36  ;;  %v3465_v36 = vpop.permute.xlu1 %3464 }
 0x8a3   : > { %v8347_v44 = vpop.eup %8346  ;;  %7792 = vmatprep.subr.msk.bf16.mxu1 %vm8895_vm3, %v7790_v11 }
 0x8a4   : > { %v3331_v24 = vmul.f32 %v8347_v44, %v9765_v42  ;;  %v3467_v42 = vpop.permute.xlu0 %3466 }
 0x8a6   : > { %7279 = vmatprep.mubr.msk.f32.mxu1 %vm1514_vm4, %v3331_v24  ;;  %v3469_v8 = vpop.permute.xlu1 %3468 }
 0x8a7   : > { %7280 = vmatmul.mubr.msk.f32.gmra.mrb[70].mxu1 %vm1514_vm4, %v3332_v1 }
 0x8a8   : > { %7298 = vmatprep.mubr.msk.f32.mxu1 %vm1360_vm2, %v3463_v19  ;;  %v3471_v31 = vpop.permute.xlu0 %3470 }
 0x8aa   : > { %7795 = vmatpush3.bf16.xpose.msk.msra.mxu1 %vm8895_vm3, %v7790_v11  ;;  %v3473_v33 = vpop.permute.xlu1 %3472 }
 0x8ab   : > { %7798 = vmatprep.subr.msk.bf16.mxu1 %vm8895_vm3, %v7796_v35 }
 0x8ac   : > { %v3475_v50 = vpop.permute.xlu0 %3474 }
 0x8ae   : > { %v3477_v60 = vpop.permute.xlu1 %3476 }
 0x8b2   : > { %7801 = vmatpush3.bf16.xpose.msk.msra.mxu1 %vm8895_vm3, %v7796_v35 }
 0x8b9   : > { %7299 = vmatmul.mubr.msk.f32.vlgmr.msra.gmra.mrb[72].mxu1 %vm1360_vm2, %v3465_v36 }
 0x8ba   : > { %7301 = vmatprep.mubr.msk.f32.mxu1 %vm1360_vm2, %v3467_v42 }
 0x8bd   : > { %7302 = vmatmul.mubr.msk.f32.gmra.mrb[74].mxu1 %vm1360_vm2, %v3469_v8 }
 0x8be   : > { %7304 = vmatprep.mubr.msk.f32.mxu1 %vm1360_vm2, %v3471_v31 }
 0x8c1   : > { %7305 = vmatmul.mubr.msk.f32.gmra.mrb[76].mxu1 %vm1360_vm2, %v3473_v33 }
 0x8c2   : > { %7307 = vmatprep.mubr.msk.f32.mxu1 %vm1360_vm2, %v3475_v50 }
 0x8c5   : > { %7308 = vmatmul.mubr.msk.f32.gmra.mrb[78].mxu1 %vm1360_vm2, %v3477_v60  ;;  %v11159_v60 = vld [vmem:[#allocation24_spill] sm:$0xff] }
 0x96b   : > { %v9823_v34 = vpop.f32.mrb[64].mxu1 }
 0x96c   : > { %11151 = vst [vmem:[#allocation15_spill] sm:$0xff] %v9823_v34  ;;  %v9825_v23 = vpop.f32.mrb[65].mxu1 }
 0x96d   : > { %11152 = vst [vmem:[#allocation13_spill] sm:$0xff] %v9825_v23 }
 0x96f   : > { %v9827_v16 = vpop.f32.mrb[66].mxu1 }
 0x970   : > { %11153 = vst [vmem:[#allocation16_spill] sm:$0xff] %v9827_v16  ;;  %v9829_v28 = vpop.f32.mrb[67].mxu1 }
 0x971   : > { %11154 = vst [vmem:[#allocation18_spill] sm:$0xff] %v9829_v28 }
 0x973   : > { %v9831_v12 = vpop.f32.mrb[68].mxu1 }
 0x974   : > { %11155 = vst [vmem:[#allocation20_spill] sm:$0xff] %v9831_v12  ;;  %v9833_v58 = vpop.f32.mrb[69].mxu1 }
 0x975   : > { %11156 = vst [vmem:[#allocation22_spill] sm:$0xff] %v9833_v58 }
 0x97a   : > { %v9835_v11 = vpop.f32.mrb[70].mxu1 }
 0x97b   : > { %11157 = vst [vmem:[#allocation6_spill] sm:$0xff] %v9835_v11  ;;  %v9837_v6 = vpop.f32.mrb[71].mxu1 }
 0x97c   : > { %11158 = vst [vmem:[#allocation5_spill] sm:$0xff] %v9837_v6 }
 0x98c   : > { %v7300_v52 = vpop.f32.mrb[72].mxu1 }
 0x98d   : > { %v3592_v44 = vpop.f32.mrb[73].mxu1  ;;  %v3634_v24 = vsel %vm1514_vm4, %v7300_v52, -inf }
 0x98e   : > { %3635 = vmax.xlane.f32.xlu1 %v3634_v24  ;;  %v3631_v63 = vsel %vm1514_vm4, %v3592_v44, -inf  ;;  %v11160_v24 = vld [vmem:[#allocation25_spill] sm:$0xff] }
 0x98f   : > { %3632 = vmax.xlane.f32.xlu0 %v3631_v63 }
 0x990   : > { %v9841_v29 = vpop.f32.mrb[74].mxu1 }
 0x991   : > { %v3602_v1 = vpop.f32.mrb[75].mxu1  ;;  %v3640_v19 = vsel %vm1514_vm4, %v9841_v29, -inf }
 0x992   : > { %v3637_v42 = vsel %vm1514_vm4, %v3602_v1, -inf }
 0x993   : > { %3641 = vmax.xlane.f32.xlu0 %v3640_v19  ;;  %v11161_v19 = vld [vmem:[#allocation26_spill] sm:$0xff] }
 0x994   : > { %v7306_v35 = vpop.f32.mrb[76].mxu1 }
 0x995   : > { %v9845_v36 = vpop.f32.mrb[77].mxu1  ;;  %v3646_v33 = vsel %vm1514_vm4, %v7306_v35, -inf }
 0x996   : > { %v3643_v63 = vsel %vm1514_vm4, %v9845_v36, -inf }
 0x997   : > { %3638 = vmax.xlane.f32.xlu0 %v3637_v42 }
 0x998   : > { %v7309_v8 = vpop.f32.mrb[78].mxu1 }
 0x999   : > { %v9848_v31 = vpop.f32.mrb[79].mxu1  ;;  %v3652_v50 = vsel %vm1514_vm4, %v7309_v8, -inf }
 0x99a   : > { %v3649_v42 = vsel %vm1514_vm4, %v9848_v31, -inf }
 0x99b   : > { %3647 = vmax.xlane.f32.xlu0 %v3646_v33  ;;  %v11162_v33 = vld [vmem:[#allocation27_spill] sm:$0xff] }
 0x99f   : > { %8089 = vrot.lane.b32.xlu1 %v11159_v60, %s8532_s16  ;;  %3653 = vmax.xlane.f32.xlu0 %v3652_v50 }
 0x9b5   : > { %8094 = vrot.lane.b32.xlu0 %v11160_v24, %s8532_s16 }
 0x9c3   : > { %3644 = vmax.xlane.f32.xlu1 %v3643_v63 }
 0x9d4   : > { %8099 = vrot.lane.b32.xlu1 %v11161_v19, %s8532_s16 }
 0x9f8   : > { %3650 = vmax.xlane.f32.xlu1 %v3649_v42 }
 0xa09   : > { %8104 = vrot.lane.b32.xlu1 %v11162_v33, %s8532_s16 }
 0xa1b   : > { %v3636_v11 = vpop.xlane.xlu1 %3635 }
 0xa1c   : > { %v3656_v6 = vsub.f32 %v7300_v52, %v3636_v11  ;;  %v3633_v50 = vpop.xlane.xlu0 %3632 }
 0xa1d   : > { %v3655_v12 = vsub.f32 %v3592_v44, %v3633_v50 }
 0xa1e   : > { %v3665_v58 = vmul.f32 1.442695, %v3656_v6 }
 0xa1f   : > { %v3663_v16 = vmul.f32 1.442695, %v3655_v12  ;;  %v8090_v28 = vpop.permute.xlu1 %8089 }
 0xa20   : > { %8348 = vpow2.f32 %v3665_v58  ;;  %v8092_v34 = vunpack.i.h.bf16 %v8090_v28  ;;  %v8091_v63 = vunpack.i.l.bf16 %v8090_v28  ;;  %v3642_v23 = vpop.xlane.xlu0 %3641 }
 0xa21   : > { %8350 = vpow2.f32 %v3663_v16 }
 0xa22   : > { %v7802_v2 = vpack.c.bf16 %v8092_v34, %v8091_v63 }
 0xa24   : > { %7803 = vmatprep.subr.bf16.mxu0 %v7802_v2  ;;  %v3639_v30 = vpop.xlane.xlu0 %3638 }
 0xa25   : > { %v3657_v32 = vsub.f32 %v3602_v1, %v3639_v30  ;;  %7805 = vmatpush3.bf16.msra.mxu0 %v7802_v2  ;;  %v3658_v1 = vsub.f32 %v9841_v29, %v3642_v23 }
 0xa27   : > { %v3667_v42 = vmul.f32 1.442695, %v3657_v32  ;;  %v3669_v50 = vmul.f32 1.442695, %v3658_v1 }
 0xa28   : > { %v3648_v62 = vpop.xlane.xlu0 %3647 }
 0xa29   : > { %8352 = vpow2.f32 %v3667_v42  ;;  %v3660_v57 = vsub.f32 %v7306_v35, %v3648_v62 }
 0xa2a   : > { %v9864_v11 = vpop.eup %8348 }
 0xa2b   : > { %v9866_v52 = vpop.eup %8350  ;;  %v3673_v12 = vmul.f32 1.442695, %v3660_v57  ;;  %v3682_v58 = vsel %vm1514_vm4, %v9864_v11, 0.0 }
 0xa2c   : > { %3683 = vadd.xlane.f32.xlu0 %v3682_v58  ;;  %v3654_v28 = vpop.xlane.xlu0 %3653  ;;  %v3679_v34 = vsel %vm1514_vm4, %v9866_v52, 0.0 }
 0xa2d   : > { %8354 = vpow2.f32 %v3673_v12  ;;  %3680 = vadd.xlane.f32.xlu1 %v3679_v34  ;;  %v3662_v35 = vsub.f32 %v7309_v8, %v3654_v28 }
 0xa2e   : > { %8356 = vpow2.f32 %v3669_v50 }
 0xa2f   : > { %v3677_v12 = vmul.f32 1.442695, %v3662_v35 }
 0xa30   : > { %v8095_v2 = vpop.permute.xlu0 %8094 }
 0xa31   : > { %v8097_v32 = vunpack.i.h.bf16 %v8095_v2  ;;  %v8096_v30 = vunpack.i.l.bf16 %v8095_v2 }
 0xa33   : > { %v9872_v16 = vpop.eup %8352  ;;  %v7806_v62 = vpack.c.bf16 %v8097_v32, %v8096_v30 }
 0xa34   : > { %v3685_v6 = vsel %vm1514_vm4, %v9872_v16, 0.0 }
 0xa35   : > { %3686 = vadd.xlane.f32.xlu0 %v3685_v6  ;;  %7807 = vmatprep.subr.bf16.mxu0 %v7806_v62 }
 0xa36   : > { %7809 = vmatpush3.bf16.msra.mxu0 %v7806_v62 }
 0xa37   : > { %v9876_v57 = vpop.eup %8354 }
 0xa38   : > { %v3694_v44 = vsel %vm1514_vm4, %v9876_v57, 0.0  ;;  %v8357_v62 = vpop.eup %8356 }
 0xa39   : > { %3695 = vadd.xlane.f32.xlu0 %v3694_v44 }
 0xa3e   : > { %8109 = vrot.lane.b32.xlu1 %v11147_v39, %s8533_s30 }
 0xa50   : > { %v3645_v63 = vpop.xlane.xlu1 %3644 }
 0xa51   : > { %v3659_v42 = vsub.f32 %v9845_v36, %v3645_v63  ;;  %v3688_v36 = vsel %vm1514_vm4, %v8357_v62, 0.0 }
 0xa53   : > { %v3671_v58 = vmul.f32 1.442695, %v3659_v42 }
 0xa54   : > { %v8100_v34 = vpop.permute.xlu1 %8099 }
 0xa55   : > { %8358 = vpow2.f32 %v3671_v58  ;;  %v8102_v2 = vunpack.i.h.bf16 %v8100_v34  ;;  %v8101_v32 = vunpack.i.l.bf16 %v8100_v34 }
 0xa56   : > { %8360 = vpow2.f32 %v3677_v12 }
 0xa57   : > { %v7810_v30 = vpack.c.bf16 %v8102_v2, %v8101_v32 }
 0xa59   : > { %7811 = vmatprep.subr.bf16.mxu0 %v7810_v30 }
 0xa5a   : > { %7813 = vmatpush3.bf16.msra.mxu0 %v7810_v30 }
 0xa5f   : > { %v9884_v6 = vpop.eup %8358 }
 0xa60   : > { %v3691_v23 = vsel %vm1514_vm4, %v9884_v6, 0.0  ;;  %v9888_v29 = vpop.eup %8360 }
 0xa61   : > { %3692 = vadd.xlane.f32.xlu0 %v3691_v23  ;;  %v3700_v8 = vsel %vm1514_vm4, %v9888_v29, 0.0 }
 0xa62   : > { %3689 = vadd.xlane.f32.xlu1 %v3688_v36 }
 0xa65   : > { %3701 = vadd.xlane.f32.xlu0 %v3700_v8 }
 0xa73   : > { %8119 = vrot.lane.b32.xlu1 %v11148_v56, %s8533_s30 }
 0xa77   : > { %8124 = vrot.lane.b32.xlu1 %v11149_v54, %s8533_s30 }
 0xa7b   : > { %3880 = vrot.lane.b32.xlu1 %v9687_v38, %s8533_s30 }
 0xa7f   : > { %3882 = vrot.lane.b32.xlu1 %v9693_v17, %s8533_s30 }
 0xa83   : > { %3886 = vrot.lane.b32.xlu1 %v9703_v53, %s8533_s30 }
 0xa85   : > { %v3651_v28 = vpop.xlane.xlu1 %3650 }
 0xa86   : > { %v3661_v44 = vsub.f32 %v9848_v31, %v3651_v28 }
 0xa87   : > { %3890 = vrot.lane.b32.xlu1 %v9713_v22, %s8533_s30 }
 0xa88   : > { %v3675_v1 = vmul.f32 1.442695, %v3661_v44 }
 0xa89   : > { %v8105_v35 = vpop.permute.xlu1 %8104 }
 0xa8a   : > { %8362 = vpow2.f32 %v3675_v1  ;;  %v8107_v50 = vunpack.i.h.bf16 %v8105_v35  ;;  %v8106_v63 = vunpack.i.l.bf16 %v8105_v35 }
 0xa8b   : > { %3894 = vrot.lane.b32.xlu1 %v9723_v13, %s8533_s30 }
 0xa8c   : > { %v7814_v42 = vpack.c.bf16 %v8107_v50, %v8106_v63 }
 0xa8e   : > { %7815 = vmatprep.subr.bf16.mxu0 %v7814_v42 }
 0xa8f   : > { %7817 = vmatpush3.bf16.msra.mxu0 %v7814_v42 }
 0xa94   : > { %v8363_v12 = vpop.eup %8362 }
 0xa95   : > { %v3697_v58 = vsel %vm1514_vm4, %v8363_v12, 0.0 }
 0xa96   : > { %3698 = vadd.xlane.f32.xlu0 %v3697_v58 }
 0xaac   : > { %8114 = vrot.lane.b32.xlu0 %v11150_v40, %s8533_s30 }
 0xab0   : > { %3884 = vrot.lane.b32.xlu0 %v9696_v51, %s8533_s30 }
 0xab4   : > { %3888 = vrot.lane.b32.xlu0 %v9706_v3, %s8533_s30 }
 0xab8   : > { %3892 = vrot.lane.b32.xlu0 %v9716_v49, %s8533_s30 }
 0xab9   : > { %v3684_v31 = vpop.xlane.xlu0 %3683 }
 0xaba   : > { %8364 = vrcp.f32 %v3684_v31  ;;  %v3681_v34 = vpop.xlane.xlu1 %3680 }
 0xabb   : > { %8366 = vrcp.f32 %v3681_v34 }
 0xabe   : > { %v8110_v2 = vpop.permute.xlu1 %8109 }
 0xabf   : > { %v8112_v32 = vunpack.i.h.bf16 %v8110_v2  ;;  %v8111_v30 = vunpack.i.l.bf16 %v8110_v2 }
 0xac1   : > { %v7818_v23 = vpack.c.bf16 %v8112_v32, %v8111_v30 }
 0xac2   : > { %v3687_v36 = vpop.xlane.xlu0 %3686 }
 0xac3   : > { %8368 = vrcp.f32 %v3687_v36  ;;  %7820 = vmatprep.subr.msk.bf16.mxu0 %vm8895_vm3, %v7818_v23 }
 0xac4   : > { %v8365_v8 = vpop.eup %8364 }
 0xac5   : > { %v8367_v28 = vpop.eup %8366  ;;  %v3712_v1 = vmul.f32 %v8365_v8, %v9864_v11 }
 0xac6   : > { %v3711_v44 = vmul.f32 %v8367_v28, %v9866_v52  ;;  %v3696_v63 = vpop.xlane.xlu0 %3695 }
 0xac8   : > { %7326 = vmatprep.mubr.msk.f32.mxu0 %vm1514_vm4, %v3711_v44 }
 0xac9   : > { %7327 = vmatmul.mubr.msk.f32.vlgmr.msra.gmra.mrb[56].mxu0 %vm1514_vm4, %v3712_v1 }
 0xaca   : > { %7823 = vmatpush3.bf16.xpose.msk.msra.mxu0 %vm8895_vm3, %v7818_v23 }
 0xacd   : > { %v8369_v35 = vpop.eup %8368 }
 0xace   : > { %v3713_v50 = vmul.f32 %v8369_v35, %v9872_v16 }
 0xad0   : > { %7329 = vmatprep.mubr.msk.f32.mxu0 %vm1514_vm4, %v3713_v50 }
 0xaee   : > { %v3693_v42 = vpop.xlane.xlu0 %3692 }
 0xaef   : > { %8370 = vrcp.f32 %v3693_v42  ;;  %v3690_v58 = vpop.xlane.xlu1 %3689 }
 0xaf0   : > { %8372 = vrcp.f32 %v3690_v58 }
 0xaf1   : > { %8374 = vrcp.f32 %v3696_v63 }
 0xaf2   : > { %v3702_v32 = vpop.xlane.xlu0 %3701 }
 0xaf3   : > { %8376 = vrcp.f32 %v3702_v32  ;;  %v8120_v23 = vpop.permute.xlu1 %8119 }
 0xaf4   : > { %v8122_v8 = vunpack.i.h.bf16 %v8120_v23  ;;  %v8121_v28 = vunpack.i.l.bf16 %v8120_v23 }
 0xaf7   : > { %v8125_v35 = vpop.permute.xlu1 %8124 }
 0xaf8   : > { %v8127_v42 = vunpack.i.h.bf16 %v8125_v35  ;;  %v8126_v58 = vunpack.i.l.bf16 %v8125_v35 }
 0xaf9   : > { %v8371_v52 = vpop.eup %8370 }
 0xafa   : > { %v8373_v11 = vpop.eup %8372  ;;  %v3715_v2 = vmul.f32 %v8371_v52, %v9884_v6  ;;  %v7830_v6 = vpack.c.bf16 %v8122_v8, %v8121_v28 }
 0xafb   : > { %v3714_v31 = vmul.f32 %v8373_v11, %v8357_v62  ;;  %v8375_v34 = vpop.eup %8374  ;;  %v3881_v11 = vpop.permute.xlu1 %3880 }
 0xafc   : > { %v3716_v16 = vmul.f32 %v8375_v34, %v9876_v57 }
 0xafd   : > { %7330 = vmatmul.mubr.msk.f32.gmra.mrb[58].mxu0 %vm1514_vm4, %v3714_v31  ;;  %v8377_v50 = vpop.eup %8376  ;;  %v7836_v31 = vpack.c.bf16 %v8127_v42, %v8126_v58 }
 0xafe   : > { %7332 = vmatprep.mubr.msk.f32.mxu0 %vm1514_vm4, %v3715_v2  ;;  %v3718_v52 = vmul.f32 %v8377_v50, %v9888_v29 }
 0xaff   : > { %v3883_v34 = vpop.permute.xlu1 %3882 }
 0xb01   : > { %7333 = vmatmul.mubr.msk.f32.gmra.mrb[60].mxu0 %vm1514_vm4, %v3716_v16 }
 0xb03   : > { %v3887_v29 = vpop.permute.xlu1 %3886 }
 0xb07   : > { %v3891_v16 = vpop.permute.xlu1 %3890 }
 0xb23   : > { %v3699_v30 = vpop.xlane.xlu0 %3698 }
 0xb24   : > { %8378 = vrcp.f32 %v3699_v30  ;;  %v3895_v30 = vpop.permute.xlu1 %3894 }
 0xb27   : > { %v8115_v36 = vpop.permute.xlu0 %8114 }
 0xb28   : > { %v8117_v62 = vunpack.i.h.bf16 %v8115_v36  ;;  %v8116_v44 = vunpack.i.l.bf16 %v8115_v36 }
 0xb2a   : > { %v7824_v1 = vpack.c.bf16 %v8117_v62, %v8116_v44 }
 0xb2c   : > { %7826 = vmatprep.subr.msk.bf16.mxu0 %vm8895_vm3, %v7824_v1 }
 0xb2d   : > { %7829 = vmatpush3.bf16.xpose.msk.msra.mxu0 %vm8895_vm3, %v7824_v1 }
 0xb2e   : > { %v8379_v57 = vpop.eup %8378  ;;  %7832 = vmatprep.subr.msk.bf16.mxu0 %vm8895_vm3, %v7830_v6 }
 0xb2f   : > { %v3717_v63 = vmul.f32 %v8379_v57, %v8363_v12  ;;  %v3885_v12 = vpop.permute.xlu0 %3884 }
 0xb31   : > { %7335 = vmatprep.mubr.msk.f32.mxu0 %vm1514_vm4, %v3717_v63 }
 0xb32   : > { %7336 = vmatmul.mubr.msk.f32.gmra.mrb[62].mxu0 %vm1514_vm4, %v3718_v52 }
 0xb33   : > { %7354 = vmatprep.mubr.msk.f32.mxu0 %vm1360_vm2, %v3881_v11  ;;  %v3889_v2 = vpop.permute.xlu0 %3888 }
 0xb35   : > { %7835 = vmatpush3.bf16.xpose.msk.msra.mxu0 %vm8895_vm3, %v7830_v6 }
 0xb36   : > { %7838 = vmatprep.subr.msk.bf16.mxu0 %vm8895_vm3, %v7836_v31 }
 0xb37   : > { %v3893_v32 = vpop.permute.xlu0 %3892 }
 0xb3d   : > { %7841 = vmatpush3.bf16.xpose.msk.msra.mxu0 %vm8895_vm3, %v7836_v31 }
 0xb44   : > { %7355 = vmatmul.mubr.msk.f32.vlgmr.msra.gmra.mrb[64].mxu0 %vm1360_vm2, %v3883_v34 }
 0xb45   : > { %7357 = vmatprep.mubr.msk.f32.mxu0 %vm1360_vm2, %v3885_v12 }
 0xb48   : > { %7358 = vmatmul.mubr.msk.f32.gmra.mrb[66].mxu0 %vm1360_vm2, %v3887_v29 }
 0xb49   : > { %7360 = vmatprep.mubr.msk.f32.mxu0 %vm1360_vm2, %v3889_v2 }
 0xb4c   : > { %7361 = vmatmul.mubr.msk.f32.gmra.mrb[68].mxu0 %vm1360_vm2, %v3891_v16 }
 0xb4d   : > { %7363 = vmatprep.mubr.msk.f32.mxu0 %vm1360_vm2, %v3893_v32 }
 0xb50   : > { %7364 = vmatmul.mubr.msk.f32.gmra.mrb[70].mxu0 %vm1360_vm2, %v3895_v30 }
 0xb9c   : > { %v9955_v23 = vpop.f32.mrb[56].mxu0 }
 0xb9d   : > { %11163 = vst [vmem:[#allocation8_spill] sm:$0xff] %v9955_v23  ;;  %v9957_v36 = vpop.f32.mrb[57].mxu0 }
 0xb9e   : > { %11164 = vst [vmem:[#allocation7_spill] sm:$0xff] %v9957_v36 }
 0xbd0   : > { %v9959_v8 = vpop.f32.mrb[58].mxu0 }
 0xbd1   : > { %11165 = vst [vmem:[#allocation10_spill] sm:$0xff] %v9959_v8  ;;  %v9961_v28 = vpop.f32.mrb[59].mxu0 }
 0xbd2   : > { %11166 = vst [vmem:[#allocation9_spill] sm:$0xff] %v9961_v28 }
 0xbd4   : > { %v9963_v62 = vpop.f32.mrb[60].mxu0 }
 0xbd5   : > { %11167 = vst [vmem:[#allocation12_spill] sm:$0xff] %v9963_v62  ;;  %v9965_v44 = vpop.f32.mrb[61].mxu0 }
 0xbd6   : > { %11168 = vst [vmem:[#allocation11_spill] sm:$0xff] %v9965_v44 }
 0xc05   : > { %v9967_v1 = vpop.f32.mrb[62].mxu0 }
 0xc06   : > { %11169 = vst [vmem:[#allocation17_spill] sm:$0xff] %v9967_v1  ;;  %v9969_v6 = vpop.f32.mrb[63].mxu0 }
 0xc07   : > { %11170 = vst [vmem:[#allocation21_spill] sm:$0xff] %v9969_v6 }
 0xc17   : > { %v7356_v35 = vpop.f32.mrb[64].mxu0 }
 0xc18   : > { %v4010_v50 = vpop.f32.mrb[65].mxu0  ;;  %v4052_v57 = vsel %vm1514_vm4, %v7356_v35, -inf }
 0xc19   : > { %4053 = vmax.xlane.f32.xlu1 %v4052_v57  ;;  %v4049_v63 = vsel %vm1514_vm4, %v4010_v50, -inf }
 0xc1a   : > { %4050 = vmax.xlane.f32.xlu0 %v4049_v63 }
 0xc1b   : > { %v9973_v42 = vpop.f32.mrb[66].mxu0 }
 0xc1c   : > { %v4020_v58 = vpop.f32.mrb[67].mxu0  ;;  %v4058_v52 = vsel %vm1514_vm4, %v9973_v42, -inf }
 0xc1d   : > { %v4055_v34 = vsel %vm1514_vm4, %v4020_v58, -inf }
 0xc1e   : > { %4059 = vmax.xlane.f32.xlu0 %v4058_v52 }
 0xc1f   : > { %v7362_v11 = vpop.f32.mrb[68].mxu0 }
 0xc20   : > { %v9977_v31 = vpop.f32.mrb[69].mxu0  ;;  %v4064_v2 = vsel %vm1514_vm4, %v7362_v11, -inf }
 0xc21   : > { %v4061_v32 = vsel %vm1514_vm4, %v9977_v31, -inf }
 0xc22   : > { %4056 = vmax.xlane.f32.xlu0 %v4055_v34 }
 0xc23   : > { %v7365_v12 = vpop.f32.mrb[70].mxu0 }
 0xc24   : > { %v9980_v29 = vpop.f32.mrb[71].mxu0  ;;  %v4070_v16 = vsel %vm1514_vm4, %v7365_v12, -inf }
 0xc25   : > { %v4067_v30 = vsel %vm1514_vm4, %v9980_v29, -inf }
 0xc26   : > { %4065 = vmax.xlane.f32.xlu0 %v4064_v2 }
 0xc2a   : > { %8129 = vrot.lane.b32.xlu1 %v11159_v60, %s8533_s30  ;;  %4071 = vmax.xlane.f32.xlu0 %v4070_v16 }
 0xc40   : > { %8134 = vrot.lane.b32.xlu0 %v11160_v24, %s8533_s30 }
 0xc4e   : > { %4062 = vmax.xlane.f32.xlu1 %v4061_v32 }
 0xc5f   : > { %8139 = vrot.lane.b32.xlu1 %v11161_v19, %s8533_s30 }
 0xc83   : > { %4068 = vmax.xlane.f32.xlu1 %v4067_v30 }
 0xc94   : > { %8144 = vrot.lane.b32.xlu1 %v11162_v33, %s8533_s30 }
 0xca6   : > { %v4054_v57 = vpop.xlane.xlu1 %4053 }
 0xca7   : > { %v4074_v63 = vsub.f32 %v7356_v35, %v4054_v57  ;;  %v4051_v52 = vpop.xlane.xlu0 %4050 }
 0xca8   : > { %v4073_v34 = vsub.f32 %v4010_v50, %v4051_v52 }
 0xca9   : > { %v4083_v2 = vmul.f32 1.442695, %v4074_v63 }
 0xcaa   : > { %v4081_v16 = vmul.f32 1.442695, %v4073_v34  ;;  %v8130_v6 = vpop.permute.xlu1 %8129 }
 0xcab   : > { %8380 = vpow2.f32 %v4083_v2  ;;  %v8132_v1 = vunpack.i.h.bf16 %v8130_v6  ;;  %v8131_v32 = vunpack.i.l.bf16 %v8130_v6  ;;  %v4060_v44 = vpop.xlane.xlu0 %4059 }
 0xcac   : > { %8382 = vpow2.f32 %v4081_v16  ;;  %v4076_v34 = vsub.f32 %v9973_v42, %v4060_v44 }
 0xcad   : > { %v7842_v62 = vpack.c.bf16 %v8132_v1, %v8131_v32 }
 0xcae   : > { %v4087_v16 = vmul.f32 1.442695, %v4076_v34 }
 0xcaf   : > { %7843 = vmatprep.subr.bf16.mxu1 %v7842_v62  ;;  %v4057_v28 = vpop.xlane.xlu0 %4056 }
 0xcb0   : > { %v4075_v8 = vsub.f32 %v4020_v58, %v4057_v28  ;;  %7845 = vmatpush3.bf16.msra.mxu1 %v7842_v62 }
 0xcb2   : > { %v4085_v30 = vmul.f32 1.442695, %v4075_v8 }
 0xcb3   : > { %v4066_v36 = vpop.xlane.xlu0 %4065 }
 0xcb4   : > { %8384 = vpow2.f32 %v4085_v30  ;;  %v4078_v23 = vsub.f32 %v7362_v11, %v4066_v36 }
 0xcb5   : > { %v9996_v35 = vpop.eup %8380 }
 0xcb6   : > { %v9998_v50 = vpop.eup %8382  ;;  %v4091_v57 = vmul.f32 1.442695, %v4078_v23  ;;  %v4100_v63 = vsel %vm1514_vm4, %v9996_v35, 0.0 }
 0xcb7   : > { %4101 = vadd.xlane.f32.xlu0 %v4100_v63  ;;  %v4072_v6 = vpop.xlane.xlu0 %4071  ;;  %v4097_v1 = vsel %vm1514_vm4, %v9998_v50, 0.0 }
 0xcb8   : > { %8386 = vpow2.f32 %v4091_v57  ;;  %4098 = vadd.xlane.f32.xlu1 %v4097_v1  ;;  %v4080_v2 = vsub.f32 %v7365_v12, %v4072_v6 }
 0xcb9   : > { %8388 = vpow2.f32 %v4087_v16 }
 0xcba   : > { %v4095_v57 = vmul.f32 1.442695, %v4080_v2 }
 0xcbb   : > { %v8135_v28 = vpop.permute.xlu0 %8134 }
 0xcbc   : > { %v8137_v8 = vunpack.i.h.bf16 %v8135_v28  ;;  %v8136_v62 = vunpack.i.l.bf16 %v8135_v28 }
 0xcbe   : > { %v10004_v58 = vpop.eup %8384  ;;  %v7846_v36 = vpack.c.bf16 %v8137_v8, %v8136_v62 }
 0xcbf   : > { %v4103_v11 = vsel %vm1514_vm4, %v10004_v58, 0.0 }
 0xcc0   : > { %4104 = vadd.xlane.f32.xlu0 %v4103_v11  ;;  %7847 = vmatprep.subr.bf16.mxu1 %v7846_v36 }
 0xcc1   : > { %7849 = vmatpush3.bf16.msra.mxu1 %v7846_v36 }
 0xcc2   : > { %v10008_v23 = vpop.eup %8386 }
 0xcc3   : > { %v4112_v52 = vsel %vm1514_vm4, %v10008_v23, 0.0  ;;  %v8389_v36 = vpop.eup %8388 }
 0xcc4   : > { %4113 = vadd.xlane.f32.xlu0 %v4112_v52 }
 0xcc9   : > { %8149 = vrot.lane.b32.xlu1 %v11147_v39, %s8534_s3 }
 0xcdb   : > { %v4063_v32 = vpop.xlane.xlu1 %4062 }
 0xcdc   : > { %v4077_v30 = vsub.f32 %v9977_v31, %v4063_v32  ;;  %v4106_v31 = vsel %vm1514_vm4, %v8389_v36, 0.0 }
 0xcde   : > { %v4089_v63 = vmul.f32 1.442695, %v4077_v30 }
 0xcdf   : > { %v8140_v1 = vpop.permute.xlu1 %8139 }
 0xce0   : > { %8390 = vpow2.f32 %v4089_v63  ;;  %v8142_v28 = vunpack.i.h.bf16 %v8140_v1  ;;  %v8141_v8 = vunpack.i.l.bf16 %v8140_v1 }
 0xce1   : > { %8392 = vpow2.f32 %v4095_v57 }
 0xce2   : > { %v7850_v62 = vpack.c.bf16 %v8142_v28, %v8141_v8 }
 0xce4   : > { %7851 = vmatprep.subr.bf16.mxu1 %v7850_v62 }
 0xce5   : > { %7853 = vmatpush3.bf16.msra.mxu1 %v7850_v62 }
 0xcea   : > { %v10016_v39 = vpop.eup %8390 }
 0xceb   : > { %v4109_v44 = vsel %vm1514_vm4, %v10016_v39, 0.0  ;;  %v10020_v42 = vpop.eup %8392 }
 0xcec   : > { %4110 = vadd.xlane.f32.xlu0 %v4109_v44  ;;  %v4118_v12 = vsel %vm1514_vm4, %v10020_v42, 0.0 }
 0xced   : > { %4107 = vadd.xlane.f32.xlu1 %v4106_v31 }
 0xcf0   : > { %4119 = vadd.xlane.f32.xlu0 %v4118_v12 }
 0xcfe   : > { %8159 = vrot.lane.b32.xlu1 %v11148_v56, %s8534_s3 }
 0xd02   : > { %8164 = vrot.lane.b32.xlu1 %v11149_v54, %s8534_s3 }
 0xd06   : > { %4290 = vrot.lane.b32.xlu1 %v9687_v38, %s8534_s3 }
 0xd0a   : > { %4292 = vrot.lane.b32.xlu1 %v9693_v17, %s8534_s3 }
 0xd0e   : > { %4296 = vrot.lane.b32.xlu1 %v9703_v53, %s8534_s3 }
 0xd10   : > { %v4069_v6 = vpop.xlane.xlu1 %4068 }
 0xd11   : > { %v4079_v11 = vsub.f32 %v9980_v29, %v4069_v6 }
 0xd12   : > { %4300 = vrot.lane.b32.xlu1 %v9713_v22, %s8534_s3 }
 0xd13   : > { %v4093_v52 = vmul.f32 1.442695, %v4079_v11 }
 0xd14   : > { %v8145_v56 = vpop.permute.xlu1 %8144 }
 0xd15   : > { %8394 = vpow2.f32 %v4093_v52  ;;  %v8147_v34 = vunpack.i.h.bf16 %v8145_v56  ;;  %v8146_v54 = vunpack.i.l.bf16 %v8145_v56 }
 0xd16   : > { %4304 = vrot.lane.b32.xlu1 %v9723_v13, %s8534_s3 }
 0xd17   : > { %v7854_v38 = vpack.c.bf16 %v8147_v34, %v8146_v54 }
 0xd19   : > { %7855 = vmatprep.subr.bf16.mxu1 %v7854_v38 }
 0xd1a   : > { %7857 = vmatpush3.bf16.msra.mxu1 %v7854_v38 }
 0xd1f   : > { %v8395_v17 = vpop.eup %8394 }
 0xd20   : > { %v4115_v53 = vsel %vm1514_vm4, %v8395_v17, 0.0 }
 0xd21   : > { %4116 = vadd.xlane.f32.xlu0 %v4115_v53 }
 0xd37   : > { %8154 = vrot.lane.b32.xlu0 %v11150_v40, %s8534_s3 }
 0xd3b   : > { %4294 = vrot.lane.b32.xlu0 %v9696_v51, %s8534_s3 }
 0xd3f   : > { %4298 = vrot.lane.b32.xlu0 %v9706_v3, %s8534_s3 }
 0xd43   : > { %4302 = vrot.lane.b32.xlu0 %v9716_v49, %s8534_s3 }
 0xd44   : > { %v4102_v22 = vpop.xlane.xlu0 %4101 }
 0xd45   : > { %8396 = vrcp.f32 %v4102_v22  ;;  %v4099_v13 = vpop.xlane.xlu1 %4098 }
 0xd46   : > { %8398 = vrcp.f32 %v4099_v13 }
 0xd49   : > { %v8150_v29 = vpop.permute.xlu1 %8149 }
 0xd4a   : > { %v8152_v2 = vunpack.i.h.bf16 %v8150_v29  ;;  %v8151_v16 = vunpack.i.l.bf16 %v8150_v29 }
 0xd4c   : > { %v7858_v32 = vpack.c.bf16 %v8152_v2, %v8151_v16 }
 0xd4d   : > { %v4105_v30 = vpop.xlane.xlu0 %4104 }
 0xd4e   : > { %8400 = vrcp.f32 %v4105_v30  ;;  %7860 = vmatprep.subr.msk.bf16.mxu1 %vm8895_vm3, %v7858_v32 }
 0xd4f   : > { %v8397_v51 = vpop.eup %8396 }
 0xd50   : > { %v8399_v40 = vpop.eup %8398  ;;  %v4130_v57 = vmul.f32 %v8397_v51, %v9996_v35 }
 0xd51   : > { %v4129_v3 = vmul.f32 %v8399_v40, %v9998_v50  ;;  %v4114_v1 = vpop.xlane.xlu0 %4113 }
 0xd53   : > { %7382 = vmatprep.mubr.msk.f32.mxu1 %vm1514_vm4, %v4129_v3 }
 0xd54   : > { %7383 = vmatmul.mubr.msk.f32.vlgmr.msra.gmra.mrb[80].mxu1 %vm1514_vm4, %v4130_v57 }
 0xd55   : > { %7863 = vmatpush3.bf16.xpose.msk.msra.mxu1 %vm8895_vm3, %v7858_v32 }
 0xd58   : > { %v8401_v49 = vpop.eup %8400 }
 0xd59   : > { %v4131_v63 = vmul.f32 %v8401_v49, %v10004_v58 }
 0xd5b   : > { %7385 = vmatprep.mubr.msk.f32.mxu1 %vm1514_vm4, %v4131_v63 }
 0xd79   : > { %v4111_v28 = vpop.xlane.xlu0 %4110 }
 0xd7a   : > { %8402 = vrcp.f32 %v4111_v28  ;;  %v4108_v8 = vpop.xlane.xlu1 %4107 }
 0xd7b   : > { %8404 = vrcp.f32 %v4108_v8 }
 0xd7c   : > { %8406 = vrcp.f32 %v4114_v1 }
 0xd7d   : > { %v4120_v12 = vpop.xlane.xlu0 %4119 }
 0xd7e   : > { %8408 = vrcp.f32 %v4120_v12  ;;  %v8160_v11 = vpop.permute.xlu1 %8159 }
 0xd7f   : > { %v8162_v56 = vunpack.i.h.bf16 %v8160_v11  ;;  %v8161_v34 = vunpack.i.l.bf16 %v8160_v11 }
 0xd82   : > { %v8165_v53 = vpop.permute.xlu1 %8164 }
 0xd83   : > { %v8167_v29 = vunpack.i.h.bf16 %v8165_v53  ;;  %v8166_v2 = vunpack.i.l.bf16 %v8165_v53 }
 0xd84   : > { %v8403_v50 = vpop.eup %8402 }
 0xd85   : > { %v8405_v35 = vpop.eup %8404  ;;  %v4133_v31 = vmul.f32 %v8403_v50, %v10016_v39  ;;  %v7870_v39 = vpack.c.bf16 %v8162_v56, %v8161_v34  ;;  %v7876_v30 = vpack.c.bf16 %v8167_v29, %v8166_v2 }
 0xd86   : > { %v4132_v62 = vmul.f32 %v8405_v35, %v8389_v36  ;;  %v8407_v44 = vpop.eup %8406  ;;  %v4291_v32 = vpop.permute.xlu1 %4290 }
 0xd87   : > { %v4134_v58 = vmul.f32 %v8407_v44, %v10008_v23 }
 0xd88   : > { %7386 = vmatmul.mubr.msk.f32.gmra.mrb[82].mxu1 %vm1514_vm4, %v4132_v62  ;;  %v8409_v22 = vpop.eup %8408 }
 0xd89   : > { %7388 = vmatprep.mubr.msk.f32.mxu1 %vm1514_vm4, %v4133_v31  ;;  %v4136_v16 = vmul.f32 %v8409_v22, %v10020_v42 }
 0xd8a   : > { %v4293_v51 = vpop.permute.xlu1 %4292 }
 0xd8c   : > { %7389 = vmatmul.mubr.msk.f32.gmra.mrb[84].mxu1 %vm1514_vm4, %v4134_v58 }
 0xd8e   : > { %v4297_v42 = vpop.permute.xlu1 %4296 }
 0xd92   : > { %v4301_v3 = vpop.permute.xlu1 %4300 }
 0xd96   : > { %v4305_v49 = vpop.permute.xlu1 %4304 }
 0xdae   : > { %v4117_v6 = vpop.xlane.xlu0 %4116 }
 0xdaf   : > { %8410 = vrcp.f32 %v4117_v6 }
 0xdb2   : > { %v8155_v52 = vpop.permute.xlu0 %8154 }
 0xdb3   : > { %v8157_v36 = vunpack.i.h.bf16 %v8155_v52  ;;  %v8156_v54 = vunpack.i.l.bf16 %v8155_v52 }
 0xdb5   : > { %v7864_v38 = vpack.c.bf16 %v8157_v36, %v8156_v54 }
 0xdb7   : > { %7866 = vmatprep.subr.msk.bf16.mxu1 %vm8895_vm3, %v7864_v38 }
 0xdb8   : > { %7869 = vmatpush3.bf16.xpose.msk.msra.mxu1 %vm8895_vm3, %v7864_v38 }
 0xdb9   : > { %v8411_v23 = vpop.eup %8410  ;;  %7872 = vmatprep.subr.msk.bf16.mxu1 %vm8895_vm3, %v7870_v39 }
 0xdba   : > { %v4135_v13 = vmul.f32 %v8411_v23, %v8395_v17  ;;  %v4295_v17 = vpop.permute.xlu0 %4294 }
 0xdbc   : > { %7391 = vmatprep.mubr.msk.f32.mxu1 %vm1514_vm4, %v4135_v13 }
 0xdbd   : > { %7392 = vmatmul.mubr.msk.f32.gmra.mrb[86].mxu1 %vm1514_vm4, %v4136_v16 }
 0xdbe   : > { %7410 = vmatprep.mubr.msk.f32.mxu1 %vm1360_vm2, %v4291_v32  ;;  %v4299_v40 = vpop.permute.xlu0 %4298 }
 0xdc0   : > { %7875 = vmatpush3.bf16.xpose.msk.msra.mxu1 %vm8895_vm3, %v7870_v39 }
 0xdc1   : > { %7878 = vmatprep.subr.msk.bf16.mxu1 %vm8895_vm3, %v7876_v30 }
 0xdc2   : > { %v4303_v57 = vpop.permute.xlu0 %4302 }
 0xdc8   : > { %7881 = vmatpush3.bf16.xpose.msk.msra.mxu1 %vm8895_vm3, %v7876_v30 }
 0xdcf   : > { %7411 = vmatmul.mubr.msk.f32.vlgmr.msra.gmra.mrb[88].mxu1 %vm1360_vm2, %v4293_v51 }
 0xdd0   : > { %7413 = vmatprep.mubr.msk.f32.mxu1 %vm1360_vm2, %v4295_v17 }
 0xdd3   : > { %7414 = vmatmul.mubr.msk.f32.gmra.mrb[90].mxu1 %vm1360_vm2, %v4297_v42 }
 0xdd4   : > { %7416 = vmatprep.mubr.msk.f32.mxu1 %vm1360_vm2, %v4299_v40 }
 0xdd7   : > { %7417 = vmatmul.mubr.msk.f32.gmra.mrb[92].mxu1 %vm1360_vm2, %v4301_v3 }
 0xdd8   : > { %7419 = vmatprep.mubr.msk.f32.mxu1 %vm1360_vm2, %v4303_v57 }
 0xddb   : > { %7420 = vmatmul.mubr.msk.f32.gmra.mrb[94].mxu1 %vm1360_vm2, %v4305_v49 }
 0xe27   : > { %v10087_v18 = vpop.f32.mrb[80].mxu1 }
 0xe28   : > { %v10089_v63 = vpop.f32.mrb[81].mxu1 }
 0xe5b   : > { %v10091_v1 = vpop.f32.mrb[82].mxu1 }
 0xe5c   : > { %v10093_v28 = vpop.f32.mrb[83].mxu1 }
 0xe5f   : > { %v10095_v8 = vpop.f32.mrb[84].mxu1 }
 0xe60   : > { %v10097_v50 = vpop.f32.mrb[85].mxu1 }
 0xe90   : > { %v10099_v35 = vpop.f32.mrb[86].mxu1 }
 0xe91   : > { %v10101_v62 = vpop.f32.mrb[87].mxu1 }
 0xea2   : > { %v7412_v44 = vpop.f32.mrb[88].mxu1 }
 0xea3   : > { %v4420_v31 = vpop.f32.mrb[89].mxu1  ;;  %v4462_v58 = vsel %vm1514_vm4, %v7412_v44, -inf }
 0xea4   : > { %4463 = vmax.xlane.f32.xlu1 %v4462_v58  ;;  %v4459_v12 = vsel %vm1514_vm4, %v4420_v31, -inf }
 0xea5   : > { %4460 = vmax.xlane.f32.xlu0 %v4459_v12 }
 0xea6   : > { %v7415_v6 = vpop.f32.mrb[90].mxu1 }
 0xea7   : > { %v4430_v11 = vpop.f32.mrb[91].mxu1  ;;  %v4468_v36 = vsel %vm1514_vm4, %v7415_v6, -inf }
 0xea8   : > { %v4465_v52 = vsel %vm1514_vm4, %v4430_v11, -inf }
 0xea9   : > { %4466 = vmax.xlane.f32.xlu0 %v4465_v52 }
 0xeaa   : > { %v7418_v56 = vpop.f32.mrb[92].mxu1 }
 0xeab   : > { %v4440_v34 = vpop.f32.mrb[93].mxu1  ;;  %v4474_v53 = vsel %vm1514_vm4, %v7418_v56, -inf }
 0xeac   : > { %v4471_v54 = vsel %vm1514_vm4, %v4440_v34, -inf }
 0xead   : > { %4469 = vmax.xlane.f32.xlu0 %v4468_v36  ;;  %4472 = vmax.xlane.f32.xlu1 %v4471_v54 }
 0xeae   : > { %v7421_v38 = vpop.f32.mrb[94].mxu1 }
 0xeaf   : > { %v4450_v39 = vpop.f32.mrb[95].mxu1  ;;  %v4480_v23 = vsel %vm1514_vm4, %v7421_v38, -inf }
 0xeb0   : > { %v4477_v22 = vsel %vm1514_vm4, %v4450_v39, -inf }
 0xeb1   : > { %4475 = vmax.xlane.f32.xlu0 %v4474_v53  ;;  %4478 = vmax.xlane.f32.xlu1 %v4477_v22 }
 0xeb5   : > { %4481 = vmax.xlane.f32.xlu0 %v4480_v23 }
 0xec2   : > { %8169 = vrot.lane.b32.xlu1 %v11159_v60, %s8534_s3 }
 0xf31   : > { %v4464_v13 = vpop.xlane.xlu1 %4463 }
 0xf32   : > { %v4484_v29 = vsub.f32 %v7412_v44, %v4464_v13  ;;  %v4461_v2 = vpop.xlane.xlu0 %4460 }
 0xf33   : > { %v4483_v16 = vsub.f32 %v4420_v31, %v4461_v2 }
 0xf34   : > { %v4493_v32 = vmul.f32 1.442695, %v4484_v29 }
 0xf35   : > { %v4491_v30 = vmul.f32 1.442695, %v4483_v16 }
 0xf36   : > { %8412 = vpow2.f32 %v4493_v32  ;;  %v4467_v51 = vpop.xlane.xlu0 %4466 }
 0xf37   : > { %8414 = vpow2.f32 %v4491_v30  ;;  %v4485_v17 = vsub.f32 %v4430_v11, %v4467_v51 }
 0xf39   : > { %v4495_v42 = vmul.f32 1.442695, %v4485_v17 }
 0xf3a   : > { %v4470_v40 = vpop.xlane.xlu0 %4469  ;;  %v4473_v3 = vpop.xlane.xlu1 %4472 }
 0xf3b   : > { %8416 = vpow2.f32 %v4495_v42  ;;  %v4486_v57 = vsub.f32 %v7415_v6, %v4470_v40  ;;  %v4487_v49 = vsub.f32 %v4440_v34, %v4473_v3 }
 0xf3d   : > { %v4497_v58 = vmul.f32 1.442695, %v4486_v57  ;;  %v4499_v12 = vmul.f32 1.442695, %v4487_v49 }
 0xf3e   : > { %v4476_v52 = vpop.xlane.xlu0 %4475  ;;  %v4479_v60 = vpop.xlane.xlu1 %4478 }
 0xf3f   : > { %8418 = vpow2.f32 %v4497_v58  ;;  %v4488_v44 = vsub.f32 %v7418_v56, %v4476_v52  ;;  %v4489_v53 = vsub.f32 %v4450_v39, %v4479_v60  ;;  %v4820_v52 = vld [vmem:[%s8669_s2] sm:$0xff]  ;;  %v4821_v60 = vld [vmem:[%s8669_s2 + $0x8] sm:$0xff] }
 0xf40   : > { %v10113_v36 = vpop.eup %8412  ;;  %8420 = vpow2.f32 %v4499_v12 }
 0xf41   : > { %v10115_v31 = vpop.eup %8414  ;;  %v4501_v54 = vmul.f32 1.442695, %v4488_v44  ;;  %v4510_v11 = vsel %vm1514_vm4, %v10113_v36, 0.0  ;;  %v4503_v2 = vmul.f32 1.442695, %v4489_v53 }
 0xf42   : > { %4511 = vadd.xlane.f32.xlu0 %v4510_v11  ;;  %v4482_v22 = vpop.xlane.xlu0 %4481  ;;  %v8170_v6 = vpop.permute.xlu1 %8169  ;;  %v4507_v34 = vsel %vm1514_vm4, %v10115_v31, 0.0 }
 0xf43   : > { %8422 = vpow2.f32 %v4501_v54  ;;  %v4490_v23 = vsub.f32 %v7421_v38, %v4482_v22  ;;  %v8172_v13 = vunpack.i.h.bf16 %v8170_v6  ;;  %v8171_v56 = vunpack.i.l.bf16 %v8170_v6  ;;  %4508 = vadd.xlane.f32.xlu1 %v4507_v34  ;;  %v4822_v22 = vld [vmem:[%s8669_s2 + $0x10] sm:$0xff]  ;;  %v4823_v6 = vld [vmem:[%s8669_s2 + $0x18] sm:$0xff] }
 0xf44   : > { %v7898_v54 = vpack.c.bf16 %v4821_v60, %v4820_v52  ;;  %v11187_v52 = vld [vmem:[#allocation34_spill] sm:$0xff] }
 0xf45   : > { %v10121_v29 = vpop.eup %8416  ;;  %v4505_v16 = vmul.f32 1.442695, %v4490_v23  ;;  %v7882_v32 = vpack.c.bf16 %v8172_v13, %v8171_v56  ;;  %v7902_v56 = vpack.c.bf16 %v4823_v6, %v4822_v22 }
 0xf46   : > { %v4513_v39 = vsel %vm1514_vm4, %v10121_v29, 0.0 }
 0xf47   : > { %8424 = vpow2.f32 %v4505_v16  ;;  %4514 = vadd.xlane.f32.xlu1 %v4513_v39  ;;  %7883 = vmatprep.subr.bf16.mxu0 %v7882_v32 }
 0xf48   : > { %7885 = vmatpush3.bf16.msra.mxu0 %v7882_v32  ;;  %8426 = vpow2.f32 %v4503_v2 }
 0xf49   : > { %v10125_v30 = vpop.eup %8418 }
 0xf4a   : > { %v10127_v51 = vpop.eup %8420  ;;  %v4516_v38 = vsel %vm1514_vm4, %v10125_v30, 0.0 }
 0xf4b   : > { %4517 = vadd.xlane.f32.xlu0 %v4516_v38  ;;  %v4519_v17 = vsel %vm1514_vm4, %v10127_v51, 0.0 }
 0xf4c   : > { %4520 = vadd.xlane.f32.xlu1 %v4519_v17 }
 0xf4d   : > { %v10133_v42 = vpop.eup %8422 }
 0xf4e   : > { %v4522_v40 = vsel %vm1514_vm4, %v10133_v42, 0.0 }
 0xf4f   : > { %4523 = vadd.xlane.f32.xlu0 %v4522_v40 }
 0xf51   : > { %v10137_v3 = vpop.eup %8424 }
 0xf52   : > { %v4528_v57 = vsel %vm1514_vm4, %v10137_v3, 0.0  ;;  %v10141_v49 = vpop.eup %8426 }
 0xf53   : > { %4529 = vadd.xlane.f32.xlu0 %v4528_v57  ;;  %v4525_v58 = vsel %vm1514_vm4, %v10141_v49, 0.0 }
 0xf57   : > { %4526 = vadd.xlane.f32.xlu0 %v4525_v58 }
 0xf5d   : > { %8179 = vrot.lane.b32.xlu1 %v11161_v19, %s8534_s3 }
 0xf61   : > { %8184 = vrot.lane.b32.xlu1 %v11162_v33, %s8534_s3 }
 0xf65   : > { %2978 = vrot.lane.b32.xlu1 %v9569_v14, %s8535_s21  ;;  %v11172_v14 = vld [vmem:[#allocation14_spill] sm:$0xff] }
 0xf69   : > { %2980 = vrot.lane.b32.xlu1 %v9567_v27, %s8535_s21  ;;  %v11171_v27 = vld [vmem:[#allocation8_spill] sm:$0xff] }
 0xf6d   : > { %3012 = vrot.lane.b32.xlu1 %v9583_v15, %s8536_s27  ;;  %8174 = vrot.lane.b32.xlu0 %v11160_v24, %s8534_s3  ;;  %v11179_v15 = vld [vmem:[#allocation21_spill] sm:$0xff] }
 0xf71   : > { %3044 = vrot.lane.b32.xlu1 %v9727_v0, %s8537_s23  ;;  %3010 = vrot.lane.b32.xlu0 %v9585_v21, %s8536_s27 }
 0xf75   : > { %2984 = vrot.lane.b32.xlu1 %v9571_v48, %s8535_s21  ;;  %3042 = vrot.lane.b32.xlu0 %v9729_v59, %s8537_s23  ;;  %v11173_v48 = vld [vmem:[#allocation7_spill] sm:$0xff] }
 0xf79   : > { %3016 = vrot.lane.b32.xlu1 %v9587_v9, %s8536_s27  ;;  %2982 = vrot.lane.b32.xlu0 %v9573_v47, %s8535_s21  ;;  %v11174_v47 = vld [vmem:[#allocation10_spill] sm:$0xff] }
 0xf7d   : > { %3048 = vrot.lane.b32.xlu1 %v9731_v10, %s8537_s23  ;;  %3014 = vrot.lane.b32.xlu0 %v9589_v4, %s8536_s27 }
 0xf81   : > { %2988 = vrot.lane.b32.xlu1 %v9575_v41, %s8535_s21  ;;  %3046 = vrot.lane.b32.xlu0 %v9733_v7, %s8537_s23  ;;  %v11175_v41 = vld [vmem:[#allocation9_spill] sm:$0xff] }
 0xf85   : > { %3020 = vrot.lane.b32.xlu1 %v9591_v61, %s8536_s27  ;;  %2986 = vrot.lane.b32.xlu0 %v9577_v20, %s8535_s21  ;;  %v11176_v20 = vld [vmem:[#allocation12_spill] sm:$0xff] }
 0xf89   : > { %3052 = vrot.lane.b32.xlu1 %v9735_v25, %s8537_s23  ;;  %3018 = vrot.lane.b32.xlu0 %v9593_v45, %s8536_s27 }
 0xf8d   : > { %2992 = vrot.lane.b32.xlu1 %v9579_v55, %s8535_s21  ;;  %3050 = vrot.lane.b32.xlu0 %v9737_v43, %s8537_s23  ;;  %v11177_v55 = vld [vmem:[#allocation11_spill] sm:$0xff] }
 0xf91   : > { %3024 = vrot.lane.b32.xlu1 %v9595_v46, %s8536_s27  ;;  %2990 = vrot.lane.b32.xlu0 %v9581_v26, %s8535_s21  ;;  %v11178_v26 = vld [vmem:[#allocation17_spill] sm:$0xff] }
 0xf95   : > { %3056 = vrot.lane.b32.xlu1 %v9739_v37, %s8537_s23  ;;  %3022 = vrot.lane.b32.xlu0 %v9597_v5, %s8536_s27 }
 0xf99   : > { %4710 = vrot.lane.b32.xlu1 %v11171_v27, %s8535_s21  ;;  %3054 = vrot.lane.b32.xlu0 %v11172_v14, %s8537_s23 }
 0xf9d   : > { %4742 = vrot.lane.b32.xlu1 %v10087_v18, %s8536_s27  ;;  %4708 = vrot.lane.b32.xlu0 %v11173_v48, %s8535_s21 }
 0xfa1   : > { %4714 = vrot.lane.b32.xlu1 %v11174_v47, %s8535_s21  ;;  %4740 = vrot.lane.b32.xlu0 %v10089_v63, %s8536_s27 }
 0xfa5   : > { %4746 = vrot.lane.b32.xlu1 %v10091_v1, %s8536_s27  ;;  %4712 = vrot.lane.b32.xlu0 %v11175_v41, %s8535_s21 }
 0xfa9   : > { %4718 = vrot.lane.b32.xlu1 %v11176_v20, %s8535_s21  ;;  %4744 = vrot.lane.b32.xlu0 %v10093_v28, %s8536_s27 }
 0xfad   : > { %4750 = vrot.lane.b32.xlu1 %v10095_v8, %s8536_s27  ;;  %4716 = vrot.lane.b32.xlu0 %v11177_v55, %s8535_s21 }
 0xfb1   : > { %4722 = vrot.lane.b32.xlu1 %v11178_v26, %s8535_s21  ;;  %4748 = vrot.lane.b32.xlu0 %v10097_v50, %s8536_s27 }
 0xfb5   : > { %4754 = vrot.lane.b32.xlu1 %v10099_v35, %s8536_s27  ;;  %4720 = vrot.lane.b32.xlu0 %v11179_v15, %s8535_s21 }
 0xfb9   : > { %4752 = vrot.lane.b32.xlu0 %v10101_v62, %s8536_s27 }
 0xfcf   : > { %v4512_v9 = vpop.xlane.xlu0 %4511 }
 0xfd0   : > { %v4509_v21 = vpop.xlane.xlu1 %4508 }
 0xfd1   : > { %8428 = vrcp.f32 %v4509_v21 }
 0xfd2   : > { %8430 = vrcp.f32 %v4512_v9 }
 0xfd4   : > { %v4515_v4 = vpop.xlane.xlu1 %4514 }
 0xfd5   : > { %8432 = vrcp.f32 %v4515_v4  ;;  %v11182_v4 = vld [vmem:[#allocation31_spill] sm:$0xff] }
 0xfd8   : > { %v4518_v61 = vpop.xlane.xlu0 %4517 }
 0xfd9   : > { %v4521_v45 = vpop.xlane.xlu1 %4520  ;;  %8434 = vrcp.f32 %v4518_v61 }
 0xfda   : > { %8436 = vrcp.f32 %v4521_v45 }
 0xfdb   : > { %v8429_v46 = vpop.eup %8428 }
 0xfdc   : > { %v4524_v5 = vpop.xlane.xlu0 %4523  ;;  %v4539_v0 = vmul.f32 %v8429_v46, %v10115_v31  ;;  %v8431_v53 = vpop.eup %8430 }
 0xfdd   : > { %v8180_v59 = vpop.permute.xlu1 %8179  ;;  %8438 = vrcp.f32 %v4524_v5  ;;  %v4540_v13 = vmul.f32 %v8431_v53, %v10113_v36 }
 0xfde   : > { %7438 = vmatprep.mubr.msk.f32.mxu0 %vm1514_vm4, %v4539_v0  ;;  %v8182_v24 = vunpack.i.h.bf16 %v8180_v59  ;;  %v8181_v19 = vunpack.i.l.bf16 %v8180_v59  ;;  %v11183_v59 = vld [vmem:[#allocation30_spill] sm:$0xff] }
 0xfdf   : > { %v8433_v34 = vpop.eup %8432 }
 0xfe0   : > { %v4530_v10 = vpop.xlane.xlu0 %4529  ;;  %v7890_v62 = vpack.c.bf16 %v8182_v24, %v8181_v19  ;;  %v4541_v32 = vmul.f32 %v8433_v34, %v10121_v29 }
 0xfe1   : > { %v8185_v7 = vpop.permute.xlu1 %8184 }
 0xfe2   : > { %v8187_v8 = vunpack.i.h.bf16 %v8185_v7  ;;  %v8186_v50 = vunpack.i.l.bf16 %v8185_v7 }
 0xfe3   : > { %v8435_v2 = vpop.eup %8434 }
 0xfe4   : > { %v4527_v25 = vpop.xlane.xlu0 %4526  ;;  %v7894_v31 = vpack.c.bf16 %v8187_v8, %v8186_v50  ;;  %v8437_v39 = vpop.eup %8436  ;;  %v4542_v17 = vmul.f32 %v8435_v2, %v10125_v30 }
 0xfe5   : > { %v10233_v43 = vpop.permute.xlu1 %2978  ;;  %8440 = vrcp.f32 %v4527_v25  ;;  %v4543_v36 = vmul.f32 %v8437_v39, %v10127_v51  ;;  %v11180_v51 = vld [vmem:[#allocation29_spill] sm:$0xff] }
 0xfe6   : > { %8442 = vrcp.f32 %v4530_v10  ;;  %v3066_v41 = vsel %vm1360_vm2, %v11180_v51, %v10233_v43  ;;  %v11184_v25 = vld [vmem:[#allocation33_spill] sm:$0xff] }
 0xfe7   : > { %v8439_v40 = vpop.eup %8438 }
 0xfe8   : > { %v8175_v37 = vpop.permute.xlu0 %8174  ;;  %v4544_v29 = vmul.f32 %v8439_v40, %v10133_v42 }
 0xfe9   : > { %v8177_v33 = vunpack.i.h.bf16 %v8175_v37  ;;  %v8176_v18 = vunpack.i.l.bf16 %v8175_v37  ;;  %v10235_v63 = vpop.permute.xlu1 %2980 }
 0xfeb   : > { %v7886_v1 = vpack.c.bf16 %v8177_v33, %v8176_v18 }
 0xfec   : > { %v3011_v28 = vpop.permute.xlu0 %3010 }
 0xfed   : > { %v10237_v35 = vpop.permute.xlu1 %3012  ;;  %7887 = vmatprep.subr.bf16.mxu0 %v7886_v1  ;;  %v3075_v55 = vsel %vm3074_vm5, %v3066_v41, %v3011_v28  ;;  %v8509_v41 = vld [vmem:[#allocation2 + $0x8] sm:$0xff] }
 0xfee   : > { %7889 = vmatpush3.bf16.msra.mxu0 %v7886_v1 }
 0xfef   : > { %7891 = vmatprep.subr.bf16.mxu0 %v7890_v62  ;;  %v8441_v58 = vpop.eup %8440 }
 0xff0   : > { %v3043_v12 = vpop.permute.xlu0 %3042  ;;  %v8443_v14 = vpop.eup %8442  ;;  %v4545_v47 = vmul.f32 %v8441_v58, %v10141_v49  ;;  %v11181_v49 = vld [vmem:[#allocation28_spill] sm:$0xff] }
 0xff1   : > { %v3045_v44 = vpop.permute.xlu1 %3044  ;;  %v4546_v20 = vmul.f32 %v8443_v14, %v10137_v3  ;;  %v3084_v26 = vsel %vm3083_vm6, %v3075_v55, %v3043_v12  ;;  %v3067_v21 = vsel %vm1360_vm2, %v11181_v49, %v10235_v63  ;;  %v11185_v63 = vld [vmem:[#allocation32_spill] sm:$0xff] }
 0xff2   : > { %7893 = vmatpush3.bf16.msra.mxu0 %v7890_v62  ;;  %v3076_v9 = vsel %vm3074_vm5, %v3067_v21, %v10237_v35  ;;  %v11186_v62 = vld [vmem:[#allocation35_spill] sm:$0xff]  ;;  %v8511_v21 = vld [vmem:[#allocation2 + $0x18] sm:$0xff] }
 0xff3   : > { %7895 = vmatprep.subr.bf16.mxu0 %v7894_v31  ;;  %v3085_v61 = vsel %vm3083_vm6, %v3076_v9, %v3045_v44 }
 0xff4   : > { %v2983_v11 = vpop.permute.xlu0 %2982 }
 0xff5   : > { %v2985_v23 = vpop.permute.xlu1 %2984  ;;  %v3068_v3 = vsel %vm1360_vm2, %v11182_v4, %v2983_v11 }
 0xff6   : > { %7897 = vmatpush3.bf16.msra.mxu0 %v7894_v31  ;;  %v3069_v10 = vsel %vm1360_vm2, %v11183_v59, %v2985_v23  ;;  %v8513_v59 = vld [vmem:[#allocation2 + $0x28] sm:$0xff] }
 0xff7   : > { %7899 = vmatprep.subr.bf16.mxu0 %v7898_v54 }
 0xff8   : > { %v3015_v16 = vpop.permute.xlu0 %3014 }
 0xff9   : > { %v3017_v38 = vpop.permute.xlu1 %3016  ;;  %7439 = vmatmul.mubr.msk.f32.vlgmr.msra.gmra.mrb[72].mxu0 %vm1514_vm4, %v4540_v13  ;;  %v3077_v45 = vsel %vm3074_vm5, %v3068_v3, %v3015_v16 }
 0xffa   : > { %7441 = vmatprep.mubr.msk.f32.mxu0 %vm1514_vm4, %v4541_v32  ;;  %7901 = vmatpush3.bf16.msra.mxu0 %v7898_v54  ;;  %v3078_v7 = vsel %vm3074_vm5, %v3069_v10, %v3017_v38 }
 0xffb   : > { %7903 = vmatprep.subr.bf16.mxu0 %v7902_v56 }
 0xffc   : > { %v3047_v57 = vpop.permute.xlu0 %3046 }
 0xffd   : > { %v3049_v27 = vpop.permute.xlu1 %3048  ;;  %7442 = vmatmul.mubr.msk.f32.gmra.mrb[74].mxu0 %vm1514_vm4, %v4542_v17  ;;  %v3086_v5 = vsel %vm3083_vm6, %v3077_v45, %v3047_v57 }
 0xffe   : > { %7444 = vmatprep.mubr.msk.f32.mxu0 %vm1514_vm4, %v4543_v36  ;;  %7905 = vmatpush3.bf16.msra.mxu0 %v7902_v56  ;;  %v3087_v37 = vsel %vm3083_vm6, %v3078_v7, %v3049_v27 }
0x1000   : > { %v2987_v48 = vpop.permute.xlu0 %2986 }
0x1001   : > { %v2989_v30 = vpop.permute.xlu1 %2988  ;;  %7445 = vmatmul.mubr.msk.f32.gmra.mrb[76].mxu0 %vm1514_vm4, %v4544_v29  ;;  %v3070_v43 = vsel %vm1360_vm2, %v11184_v25, %v2987_v48  ;;  %v10313_v29 = vld [vmem:[%s11188_s22] ss:$0 sm:$0xff]  ;;  %v8514_v25 = vld [vmem:[#allocation2 + $0x30] sm:$0xff] }
0x1002   : > { %7447 = vmatprep.mubr.msk.f32.mxu0 %vm1514_vm4, %v4545_v47  ;;  %v3071_v1 = vsel %vm1360_vm2, %v11185_v63, %v2989_v30  ;;  %v8508_v47 = vld [vmem:[#allocation2] sm:$0xff] }
0x1004   : > { %v3019_v42 = vpop.permute.xlu0 %3018 }
0x1005   : > { %v3021_v15 = vpop.permute.xlu1 %3020  ;;  %7448 = vmatmul.mubr.msk.f32.gmra.mrb[78].mxu0 %vm1514_vm4, %v4546_v20  ;;  %v3079_v24 = vsel %vm3074_vm5, %v3070_v43, %v3019_v42  ;;  %v8510_v42 = vld [vmem:[#allocation2 + $0x10] sm:$0xff] }
0x1006   : > { %7458 = vmatprep.mubr.msk.f32.mxu0 %vm838_vm1, %v3084_v26  ;;  %v3080_v28 = vsel %vm3074_vm5, %v3071_v1, %v3021_v15 }
0x1008   : > { %v3051_v46 = vpop.permute.xlu0 %3050 }
0x1009   : > { %v3053_v0 = vpop.permute.xlu1 %3052  ;;  %7459 = vmatmul.mubr.msk.f32.vlgmr.msra.gmra.mrb[80].mxu0 %vm838_vm1, %v3085_v61  ;;  %v3088_v33 = vsel %vm3083_vm6, %v3079_v24, %v3051_v46  ;;  %v8512_v61 = vld [vmem:[#allocation2 + $0x20] sm:$0xff]  ;;  %v8515_v24 = vld [vmem:[#allocation2 + $0x38] sm:$0xff] }
0x100a   : > { %7461 = vmatprep.mubr.msk.f32.mxu0 %vm838_vm1, %v3086_v5  ;;  %v3089_v8 = vsel %vm3083_vm6, %v3080_v28, %v3053_v0 }
0x100c   : > { %v2991_v19 = vpop.permute.xlu0 %2990 }
0x100d   : > { %v2993_v18 = vpop.permute.xlu1 %2992  ;;  %7462 = vmatmul.mubr.msk.f32.gmra.mrb[82].mxu0 %vm838_vm1, %v3087_v37  ;;  %v3072_v12 = vsel %vm1360_vm2, %v11186_v62, %v2991_v19 }
0x100e   : > { %7464 = vmatprep.mubr.msk.f32.mxu0 %vm838_vm1, %v3088_v33  ;;  %v3073_v60 = vsel %vm1360_vm2, %v11187_v52, %v2993_v18 }
0x1010   : > { %v3023_v50 = vpop.permute.xlu0 %3022 }
0x1011   : > { %v3025_v35 = vpop.permute.xlu1 %3024  ;;  %7465 = vmatmul.mubr.msk.f32.gmra.mrb[84].mxu0 %vm838_vm1, %v3089_v8  ;;  %v3081_v44 = vsel %vm3074_vm5, %v3072_v12, %v3023_v50 }
0x1012   : > { %v3082_v54 = vsel %vm3074_vm5, %v3073_v60, %v3025_v35 }
0x1014   : > { %v3055_v31 = vpop.permute.xlu0 %3054 }
0x1015   : > { %v3090_v53 = vsel %vm3083_vm6, %v3081_v44, %v3055_v31  ;;  %v3057_v11 = vpop.permute.xlu1 %3056 }
0x1016   : > { %v3091_v22 = vsel %vm3083_vm6, %v3082_v54, %v3057_v11  ;;  %7467 = vmatprep.mubr.msk.f32.mxu0 %vm838_vm1, %v3090_v53 }
0x1017   : > { %7468 = vmatmul.mubr.msk.f32.gmra.mrb[86].mxu0 %vm838_vm1, %v3091_v22 }
0x1018   : > { %v4709_v28 = vpop.permute.xlu0 %4708 }
0x1019   : > { %v4711_v1 = vpop.permute.xlu1 %4710 }
0x101c   : > { %v4741_v50 = vpop.permute.xlu0 %4740 }
0x101d   : > { %v4743_v8 = vpop.permute.xlu1 %4742 }
0x1020   : > { %v4713_v62 = vpop.permute.xlu0 %4712 }
0x1021   : > { %v4715_v35 = vpop.permute.xlu1 %4714 }
0x1024   : > { %v4745_v52 = vpop.permute.xlu0 %4744 }
0x1025   : > { %v4747_v12 = vpop.permute.xlu1 %4746 }
0x1028   : > { %v4717_v44 = vpop.permute.xlu0 %4716 }
0x1029   : > { %v4719_v60 = vpop.permute.xlu1 %4718 }
0x102c   : > { %v4749_v54 = vpop.permute.xlu0 %4748 }
0x102d   : > { %v4751_v31 = vpop.permute.xlu1 %4750 }
0x1030   : > { %v4721_v11 = vpop.permute.xlu0 %4720 }
0x1031   : > { %v4723_v53 = vpop.permute.xlu1 %4722 }
0x1035   : > { %v4755_v22 = vpop.permute.xlu1 %4754 }
0x10cc   : > { %v7440_v6 = vpop.f32.mrb[72].mxu0 }
0x10cd   : > { %4774 = vrot.lane.b32.xlu1 %v7440_v6, %s8537_s23  ;;  %v4661_v34 = vpop.f32.mrb[73].mxu0  ;;  %v4753_v6 = vpop.permute.xlu0 %4752 }
0x10ce   : > { %4772 = vrot.lane.b32.xlu0 %v4661_v34, %s8537_s23  ;;  %v11189_v34 = vld [vmem:[#allocation13_spill] sm:$0xff] }
0x10d0   : > { %v7443_v23 = vpop.f32.mrb[74].mxu0 }
0x10d1   : > { %4778 = vrot.lane.b32.xlu1 %v7443_v23, %s8537_s23  ;;  %v4671_v13 = vpop.f32.mrb[75].mxu0  ;;  %v4796_v23 = vsel %vm1360_vm2, %v11189_v34, %v4709_v28 }
0x10d2   : > { %4776 = vrot.lane.b32.xlu0 %v4671_v13, %s8537_s23 }
0x10d4   : > { %v7446_v56 = vpop.f32.mrb[76].mxu0 }
0x10d5   : > { %4782 = vrot.lane.b32.xlu1 %v7446_v56, %s8537_s23  ;;  %v4681_v2 = vpop.f32.mrb[77].mxu0  ;;  %v11190_v56 = vld [vmem:[#allocation15_spill] sm:$0xff] }
0x10d6   : > { %4780 = vrot.lane.b32.xlu0 %v4681_v2, %s8537_s23  ;;  %v4797_v2 = vsel %vm1360_vm2, %v11190_v56, %v4711_v1  ;;  %v8518_v56 = vld [vmem:[#allocation2 + $0x58] sm:$0xff] }
0x10d8   : > { %v7449_v16 = vpop.f32.mrb[78].mxu0 }
0x10d9   : > { %4786 = vrot.lane.b32.xlu1 %v7449_v16, %s8537_s23  ;;  %v4691_v32 = vpop.f32.mrb[79].mxu0  ;;  %v4804_v16 = vsel %vm3074_vm5, %v4796_v23, %v4741_v50 }
0x10da   : > { %4784 = vrot.lane.b32.xlu0 %v4691_v32, %s8537_s23 }
0x10dc   : > { %v7460_v39 = vpop.f32.mrb[80].mxu0 }
0x10dd   : > { %v4945_v38 = vpop.f32.mrb[81].mxu0  ;;  %v4951_v48 = vadd.f32 %v7460_v39, %v10313_v29  ;;  %v4805_v39 = vsel %vm3074_vm5, %v4797_v2, %v4743_v8 }
0x10de   : > { %v4946_v14 = vadd.f32 %v10313_v29, %v4945_v38 }
0x10df   : > { %v10320_v20 = vadd.f32 %v8509_v41, %v4951_v48 }
0x10e0   : > { %v7463_v17 = vpop.f32.mrb[82].mxu0  ;;  %v10317_v30 = vadd.f32 %v8508_v47, %v4946_v14 }
0x10e1   : > { %v4955_v40 = vpop.f32.mrb[83].mxu0  ;;  %v4961_v55 = vadd.f32 %v7463_v17, %v10313_v29  ;;  %v5043_v4 = vsel %vm838_vm1, %v10320_v20, 0.0 }
0x10e2   : > { %v4956_v51 = vadd.f32 %v10313_v29, %v4955_v40  ;;  %v5040_v49 = vsel %vm838_vm1, %v10317_v30, 0.0  ;;  %v11191_v40 = vld [vmem:[#allocation18_spill] sm:$0xff] }
0x10e3   : > { %v10328_v9 = vadd.f32 %v8511_v21, %v4961_v55  ;;  %v11193_v55 = vld [vmem:[#allocation22_spill] sm:$0xff] }
0x10e4   : > { %v7466_v57 = vpop.f32.mrb[84].mxu0  ;;  %v10323_v26 = vadd.f32 %v8510_v42, %v4956_v51  ;;  %v4800_v42 = vsel %vm1360_vm2, %v11193_v55, %v4717_v44  ;;  %v8517_v44 = vld [vmem:[#allocation2 + $0x40] sm:$0xff] }
0x10e5   : > { %v4965_v36 = vpop.f32.mrb[85].mxu0  ;;  %v4971_v3 = vadd.f32 %v7466_v57, %v10313_v29  ;;  %v5049_v0 = vsel %vm838_vm1, %v10328_v9, 0.0  ;;  %v4798_v57 = vsel %vm1360_vm2, %v11191_v40, %v4713_v62 }
0x10e6   : > { %v4966_v15 = vadd.f32 %v10313_v29, %v4965_v36  ;;  %v5046_v5 = vsel %vm838_vm1, %v10323_v26, 0.0  ;;  %v4806_v14 = vsel %vm3074_vm5, %v4798_v57, %v4745_v52  ;;  %v8516_v52 = vld [vmem:[#allocation2 + $0x48] sm:$0xff] }
0x10e7   : > { %v10340_v10 = vadd.f32 %v8513_v59, %v4971_v3 }
0x10e8   : > { %v10333_v45 = vadd.f32 %v8512_v61, %v4966_v15 }
0x10e9   : > { %v5055_v18 = vsel %vm838_vm1, %v10340_v10, 0.0 }
0x10ea   : > { %v7469_v58 = vpop.f32.mrb[86].mxu0  ;;  %v5052_v37 = vsel %vm838_vm1, %v10333_v45, 0.0 }
0x10eb   : > { %v4975_v27 = vpop.f32.mrb[87].mxu0  ;;  %v4981_v7 = vadd.f32 %v7469_v58, %v10313_v29  ;;  %v11192_v58 = vld [vmem:[#allocation16_spill] sm:$0xff] }
0x10ec   : > { %v4976_v46 = vadd.f32 %v10313_v29, %v4975_v27  ;;  %v4799_v27 = vsel %vm1360_vm2, %v11192_v58, %v4715_v35 }
0x10ed   : > { %v10347_v19 = vadd.f32 %v8515_v24, %v4981_v7  ;;  %v4807_v47 = vsel %vm3074_vm5, %v4799_v27, %v4747_v12 }
0x10ee   : > { %v10343_v43 = vadd.f32 %v8514_v25, %v4976_v46  ;;  %v11196_v25 = vld [vmem:[#allocation6_spill] sm:$0xff] }
0x10ef   : > { %v5061_v63 = vsel %vm838_vm1, %v10347_v19, 0.0 }
0x10f0   : > { %v5058_v33 = vsel %vm838_vm1, %v10343_v43, 0.0 }
0x10f9   : > { %5041 = vadd.xlane.f32.xlu0 %v5040_v49  ;;  %v11194_v49 = vld [vmem:[#allocation20_spill] sm:$0xff] }
0x10fa   : > { %v4801_v21 = vsel %vm1360_vm2, %v11194_v49, %v4719_v60 }
0x10fb   : > { %v4809_v61 = vsel %vm3074_vm5, %v4801_v21, %v4751_v31 }
0x10fd   : > { %5044 = vadd.xlane.f32.xlu1 %v5043_v4  ;;  %5047 = vadd.xlane.f32.xlu0 %v5046_v5  ;;  %v4808_v4 = vsel %vm3074_vm5, %v4800_v42, %v4749_v54 }
0x1101   : > { %5053 = vadd.xlane.f32.xlu1 %v5052_v37  ;;  %5050 = vadd.xlane.f32.xlu0 %v5049_v0  ;;  %v11195_v0 = vld [vmem:[#allocation5_spill] sm:$0xff]  ;;  %v4803_v37 = vsel %vm1360_vm2, %v11196_v25, %v4723_v53 }
0x1102   : > { %v4802_v59 = vsel %vm1360_vm2, %v11195_v0, %v4721_v11 }
0x1103   : > { %v4810_v24 = vsel %vm3074_vm5, %v4802_v59, %v4753_v6 }
0x1105   : > { %5059 = vadd.xlane.f32.xlu1 %v5058_v33  ;;  %5056 = vadd.xlane.f32.xlu0 %v5055_v18  ;;  %v4811_v18 = vsel %vm3074_vm5, %v4803_v37, %v4755_v22 }
0x1109   : > { %5062 = vadd.xlane.f32.xlu0 %v5061_v63 }
0x113f   : > { %v4775_v13 = vpop.permute.xlu1 %4774 }
0x1140   : > { %v4773_v32 = vpop.permute.xlu0 %4772  ;;  %v4813_v17 = vsel %vm3083_vm6, %v4805_v39, %v4775_v13 }
0x1141   : > { %v4812_v38 = vsel %vm3083_vm6, %v4804_v16, %v4773_v32  ;;  %v8519_v16 = vld [vmem:[#allocation2 + $0x50] sm:$0xff] }
0x1142   : > { %7470 = vmatprep.mubr.msk.f32.mxu0 %vm838_vm1, %v4812_v38 }
0x1143   : > { %7471 = vmatmul.mubr.msk.f32.gmra.mrb[88].mxu0 %vm838_vm1, %v4813_v17  ;;  %v4779_v36 = vpop.permute.xlu1 %4778 }
0x1144   : > { %v4777_v48 = vpop.permute.xlu0 %4776  ;;  %v4815_v41 = vsel %vm3083_vm6, %v4807_v47, %v4779_v36 }
0x1145   : > { %v4814_v51 = vsel %vm3083_vm6, %v4806_v14, %v4777_v48  ;;  %v8520_v14 = vld [vmem:[#allocation2 + $0x68] sm:$0xff] }
0x1146   : > { %7473 = vmatprep.mubr.msk.f32.mxu0 %vm838_vm1, %v4814_v51  ;;  %v8521_v51 = vld [vmem:[#allocation2 + $0x60] sm:$0xff] }
0x1147   : > { %7474 = vmatmul.mubr.msk.f32.gmra.mrb[90].mxu0 %vm838_vm1, %v4815_v41  ;;  %v4783_v15 = vpop.permute.xlu1 %4782 }
0x1148   : > { %v4781_v3 = vpop.permute.xlu0 %4780  ;;  %v4817_v5 = vsel %vm3083_vm6, %v4809_v61, %v4783_v15 }
0x1149   : > { %v4816_v46 = vsel %vm3083_vm6, %v4808_v4, %v4781_v3 }
0x114a   : > { %7476 = vmatprep.mubr.msk.f32.mxu0 %vm838_vm1, %v4816_v46 }
0x114b   : > { %7477 = vmatmul.mubr.msk.f32.gmra.mrb[92].mxu0 %vm838_vm1, %v4817_v5  ;;  %v4787_v7 = vpop.permute.xlu1 %4786 }
0x114c   : > { %v4785_v33 = vpop.permute.xlu0 %4784  ;;  %v4819_v1 = vsel %vm3083_vm6, %v4811_v18, %v4787_v7  ;;  %v8523_v7 = vld [vmem:[#allocation2 + $0x70] sm:$0xff] }
0x114d   : > { %v4818_v63 = vsel %vm3083_vm6, %v4810_v24, %v4785_v33 }
0x114e   : > { %7479 = vmatprep.mubr.msk.f32.mxu0 %vm838_vm1, %v4818_v63 }
0x114f   : > { %7480 = vmatmul.mubr.msk.f32.gmra.mrb[94].mxu0 %vm838_vm1, %v4819_v1 }
0x1186   : > { %v5042_v28 = vpop.xlane.xlu0 %5041 }
0x1187   : > { %v5089_v36 = vmul.f32 0.03125, %v5042_v28 }
0x1189   : > { %v10428_v61 = vsub.f32 %v10317_v30, %v5089_v36 }
0x118a   : > { %v5048_v8 = vpop.xlane.xlu0 %5047  ;;  %v5045_v6 = vpop.xlane.xlu1 %5044 }
0x118b   : > { %v5090_v38 = vmul.f32 0.03125, %v5045_v6  ;;  %v5091_v46 = vmul.f32 0.03125, %v5048_v8 }
0x118d   : > { %v10422_v42 = vsub.f32 %v10320_v20, %v5090_v38  ;;  %v8522_v20 = vld [vmem:[#allocation2 + $0x78] sm:$0xff]  ;;  %v10445_v33 = vsub.f32 %v10323_v26, %v5091_v46  ;;  %v5297_v38 = vld [vmem:[%s11197_s28 + $0x10] sm:$0xff] }
0x118e   : > { %v5051_v34 = vpop.xlane.xlu0 %5050  ;;  %v5054_v15 = vpop.xlane.xlu1 %5053 }
0x118f   : > { %v5092_v49 = vmul.f32 0.03125, %v5051_v34  ;;  %v5093_v18 = vmul.f32 0.03125, %v5054_v15 }
0x1191   : > { %v10438_v37 = vsub.f32 %v10328_v9, %v5092_v49  ;;  %v5121_v9 = vmul.f32 %v10428_v61, %v10428_v61 }
0x1192   : > { %v5057_v47 = vpop.xlane.xlu0 %5056  ;;  %v5060_v28 = vpop.xlane.xlu1 %5059 }
0x1193   : > { %v5094_v24 = vmul.f32 0.03125, %v5057_v47  ;;  %v5124_v26 = vmul.f32 %v10438_v37, %v10438_v37 }
0x1195   : > { %v10452_v8 = vsub.f32 %v10340_v10, %v5094_v24 }
0x1196   : > { %v5063_v63 = vpop.xlane.xlu0 %5062 }
0x1216   : > { %v7472_v50 = vpop.f32.mrb[88].mxu0 }
0x1217   : > { %v4991_v35 = vadd.f32 %v7472_v50, %v10313_v29  ;;  %v4985_v62 = vpop.f32.mrb[89].mxu0  ;;  %v5096_v50 = vmul.f32 0.03125, %v5063_v63 }
0x1218   : > { %v4986_v12 = vadd.f32 %v10313_v29, %v4985_v62  ;;  %v10458_v62 = vsub.f32 %v10333_v45, %v5093_v18 }
0x1219   : > { %v10397_v60 = vadd.f32 %v8516_v52, %v4991_v35  ;;  %v5137_v52 = vsel %vm838_vm1, %v5121_v9, 0.0  ;;  %v10464_v10 = vsub.f32 %v10347_v19, %v5096_v50 }
0x121a   : > { %v10399_v31 = vadd.f32 %v8517_v44, %v4986_v12  ;;  %v7475_v54 = vpop.f32.mrb[90].mxu0  ;;  %v5095_v12 = vmul.f32 0.03125, %v5060_v28  ;;  %v5123_v44 = vmul.f32 %v10445_v33, %v10445_v33 }
0x121b   : > { %v5001_v53 = vadd.f32 %v7475_v54, %v10313_v29  ;;  %v4995_v11 = vpop.f32.mrb[91].mxu0  ;;  %v5067_v22 = vsel %vm838_vm1, %v10397_v60, 0.0  ;;  %v5146_v54 = vsel %vm838_vm1, %v5124_v26, 0.0  ;;  %v5128_v6 = vmul.f32 %v10464_v10, %v10464_v10 }
0x121c   : > { %v4996_v23 = vadd.f32 %v10313_v29, %v4995_v11  ;;  %5068 = vadd.xlane.f32.xlu0 %v5067_v22  ;;  %v5064_v13 = vsel %vm838_vm1, %v10399_v31, 0.0  ;;  %v10470_v45 = vsub.f32 %v10343_v43, %v5095_v12  ;;  %v5143_v11 = vsel %vm838_vm1, %v5123_v44, 0.0 }
0x121d   : > { %v10407_v2 = vadd.f32 %v8518_v56, %v5001_v53  ;;  %5065 = vadd.xlane.f32.xlu1 %v5064_v13  ;;  %v5126_v53 = vmul.f32 %v10452_v8, %v10452_v8  ;;  %v5125_v22 = vmul.f32 %v10458_v62, %v10458_v62  ;;  %v5295_v56 = vld [vmem:[%s11197_s28] sm:$0xff] }
0x121e   : > { %v10409_v32 = vadd.f32 %v8519_v16, %v4996_v23  ;;  %v7478_v39 = vpop.f32.mrb[92].mxu0  ;;  %v5127_v43 = vmul.f32 %v10470_v45, %v10470_v45  ;;  %v5158_v23 = vsel %vm838_vm1, %v5128_v6, 0.0  ;;  %v5296_v16 = vld [vmem:[%s11197_s28 + $0x8] sm:$0xff] }
0x121f   : > { %v5011_v17 = vadd.f32 %v7478_v39, %v10313_v29  ;;  %v5005_v40 = vpop.f32.mrb[93].mxu0  ;;  %v5073_v57 = vsel %vm838_vm1, %v10407_v2, 0.0  ;;  %v5152_v19 = vsel %vm838_vm1, %v5126_v53, 0.0  ;;  %v5149_v34 = vsel %vm838_vm1, %v5125_v22, 0.0 }
0x1220   : > { %v5006_v58 = vadd.f32 %v10313_v29, %v5005_v40  ;;  %5074 = vadd.xlane.f32.xlu0 %v5073_v57  ;;  %v5070_v27 = vsel %vm838_vm1, %v10409_v32, 0.0  ;;  %v5155_v13 = vsel %vm838_vm1, %v5127_v43, 0.0  ;;  %v7906_v39 = vpack.c.bf16 %v5296_v16, %v5295_v56 }
0x1221   : > { %v10417_v48 = vadd.f32 %v8520_v14, %v5011_v17  ;;  %5071 = vadd.xlane.f32.xlu1 %v5070_v27  ;;  %v5298_v17 = vld [vmem:[%s11197_s28 + $0x18] sm:$0xff] }
0x1222   : > { %v10419_v41 = vadd.f32 %v8521_v51, %v5006_v58  ;;  %v7481_v55 = vpop.f32.mrb[94].mxu0  ;;  %7907 = vmatprep.subr.bf16.mxu1 %v7906_v39  ;;  %v7910_v40 = vpack.c.bf16 %v5298_v17, %v5297_v38 }
0x1223   : > { %v5021_v21 = vadd.f32 %v7481_v55, %v10313_v29  ;;  %v5015_v4 = vpop.f32.mrb[95].mxu0  ;;  %v5079_v3 = vsel %vm838_vm1, %v10417_v48, 0.0  ;;  %7909 = vmatpush3.bf16.msra.mxu1 %v7906_v39 }
0x1224   : > { %v5016_v5 = vadd.f32 %v10313_v29, %v5015_v4  ;;  %5080 = vadd.xlane.f32.xlu0 %v5079_v3  ;;  %v5076_v0 = vsel %vm838_vm1, %v10419_v41, 0.0  ;;  %v5122_v29 = vmul.f32 %v10422_v42, %v10422_v42  ;;  %7911 = vmatprep.subr.bf16.mxu1 %v7910_v40 }
0x1225   : > { %v10433_v59 = vadd.f32 %v8522_v20, %v5021_v21  ;;  %5077 = vadd.xlane.f32.xlu1 %v5076_v0 }
0x1226   : > { %v10435_v25 = vadd.f32 %v8523_v7, %v5016_v5  ;;  %v5140_v35 = vsel %vm838_vm1, %v5122_v29, 0.0 }
0x1227   : > { %v5085_v30 = vsel %vm838_vm1, %v10433_v59, 0.0  ;;  %7913 = vmatpush3.bf16.msra.mxu1 %v7910_v40 }
0x1228   : > { %5086 = vadd.xlane.f32.xlu0 %v5085_v30  ;;  %v5082_v1 = vsel %vm838_vm1, %v10435_v25, 0.0 }
0x1229   : > { %5083 = vadd.xlane.f32.xlu1 %v5082_v1 }
0x122c   : > { %5141 = vadd.xlane.f32.xlu0 %v5140_v35 }
0x122d   : > { %5138 = vadd.xlane.f32.xlu1 %v5137_v52 }
0x1230   : > { %5147 = vadd.xlane.f32.xlu0 %v5146_v54 }
0x1231   : > { %5144 = vadd.xlane.f32.xlu1 %v5143_v11 }
0x1234   : > { %5153 = vadd.xlane.f32.xlu0 %v5152_v19 }
0x1235   : > { %5150 = vadd.xlane.f32.xlu1 %v5149_v34 }
0x1238   : > { %5159 = vadd.xlane.f32.xlu0 %v5158_v23 }
0x1239   : > { %5156 = vadd.xlane.f32.xlu1 %v5155_v13 }
0x12a9   : > { %v5069_v57 = vpop.xlane.xlu0 %5068 }
0x12aa   : > { %v5098_v36 = vmul.f32 0.03125, %v5069_v57  ;;  %v5066_v58 = vpop.xlane.xlu1 %5065 }
0x12ab   : > { %v5097_v27 = vmul.f32 0.03125, %v5066_v58 }
0x12ac   : > { %v10488_v14 = vsub.f32 %v10397_v60, %v5098_v36 }
0x12ad   : > { %v10491_v47 = vsub.f32 %v10399_v31, %v5097_v27  ;;  %v5075_v51 = vpop.xlane.xlu0 %5074 }
0x12ae   : > { %v5100_v55 = vmul.f32 0.03125, %v5075_v51  ;;  %v5072_v15 = vpop.xlane.xlu1 %5071  ;;  %v5130_v49 = vmul.f32 %v10488_v14, %v10488_v14 }
0x12af   : > { %v5099_v21 = vmul.f32 0.03125, %v5072_v15  ;;  %v5129_v4 = vmul.f32 %v10491_v47, %v10491_v47 }
0x12b0   : > { %v10498_v3 = vsub.f32 %v10407_v2, %v5100_v55  ;;  %v5164_v46 = vsel %vm838_vm1, %v5130_v49, 0.0  ;;  %v10540_v49 = vld [vmem:[%s764_s24] ss:$0 sm:$0xff]  ;;  %s11198_s24 = sld [smem:[#allocation43_spill]] }
0x12b1   : > { %v10502_v60 = vsub.f32 %v10409_v32, %v5099_v21  ;;  %5165 = vadd.xlane.f32.xlu0 %v5164_v46  ;;  %v5081_v31 = vpop.xlane.xlu0 %5080  ;;  %v5161_v5 = vsel %vm838_vm1, %v5129_v4, 0.0 }
0x12b2   : > { %v5102_v0 = vmul.f32 0.03125, %v5081_v31  ;;  %v5078_v20 = vpop.xlane.xlu1 %5077  ;;  %5162 = vadd.xlane.f32.xlu1 %v5161_v5  ;;  %v5132_v7 = vmul.f32 %v10498_v3, %v10498_v3 }
0x12b3   : > { %v5101_v24 = vmul.f32 0.03125, %v5078_v20  ;;  %v5131_v2 = vmul.f32 %v10502_v60, %v10502_v60 }
0x12b4   : > { %v10510_v30 = vsub.f32 %v10417_v48, %v5102_v0  ;;  %v5170_v32 = vsel %vm838_vm1, %v5132_v7, 0.0  ;;  %v10549_v0 = vld [vmem:[%s767_s9] ss:$0 sm:$0xff] }
0x12b5   : > { %v10514_v29 = vsub.f32 %v10419_v41, %v5101_v24  ;;  %5171 = vadd.xlane.f32.xlu0 %v5170_v32  ;;  %v5087_v18 = vpop.xlane.xlu0 %5086  ;;  %v5167_v63 = vsel %vm838_vm1, %v5131_v2, 0.0 }
0x12b6   : > { %v5104_v1 = vmul.f32 0.03125, %v5087_v18  ;;  %v5084_v9 = vpop.xlane.xlu1 %5083  ;;  %5168 = vadd.xlane.f32.xlu1 %v5167_v63  ;;  %v5134_v28 = vmul.f32 %v10510_v30, %v10510_v30  ;;  %s11199_s16 = scalar_lea.vmem %s11198_s24, %s8636_s26 }
0x12b7   : > { %v5103_v50 = vmul.f32 0.03125, %v5084_v9  ;;  %v5133_v48 = vmul.f32 %v10514_v29, %v10514_v29 }
0x12b8   : > { %v10522_v35 = vsub.f32 %v10433_v59, %v5104_v1  ;;  %v5176_v41 = vsel %vm838_vm1, %v5134_v28, 0.0 }
0x12b9   : > { %v10526_v26 = vsub.f32 %v10435_v25, %v5103_v50  ;;  %5177 = vadd.xlane.f32.xlu0 %v5176_v41  ;;  %v5142_v12 = vpop.xlane.xlu0 %5141  ;;  %v5173_v52 = vsel %vm838_vm1, %v5133_v48, 0.0 }
0x12ba   : > { %v5186_v44 = vmul.f32 0.03125, %v5142_v12  ;;  %v5139_v54 = vpop.xlane.xlu1 %5138  ;;  %5174 = vadd.xlane.f32.xlu1 %v5173_v52  ;;  %v5136_v53 = vmul.f32 %v10522_v35, %v10522_v35 }
0x12bb   : > { %v5185_v11 = vmul.f32 0.03125, %v5139_v54  ;;  %v5135_v59 = vmul.f32 %v10526_v26, %v10526_v26 }
0x12bc   : > { %v5202_v22 = vadd.f32 1e-05, %v5186_v44  ;;  %v5182_v19 = vsel %vm838_vm1, %v5136_v53, 0.0 }
0x12bd   : > { %v5201_v6 = vadd.f32 1e-05, %v5185_v11  ;;  %5183 = vadd.xlane.f32.xlu0 %v5182_v19  ;;  %v5148_v25 = vpop.xlane.xlu0 %5147  ;;  %v5179_v34 = vsel %vm838_vm1, %v5135_v59, 0.0  ;;  %v5516_v19 = vld [vmem:[%s8688_s18 + $0x8] sm:$0xff] }
0x12be   : > { %8444 = vrsqrt.f32 %v5202_v22  ;;  %v5188_v43 = vmul.f32 0.03125, %v5148_v25  ;;  %5180 = vadd.xlane.f32.xlu1 %v5179_v34  ;;  %v5145_v23 = vpop.xlane.xlu1 %5144  ;;  %v5515_v22 = vld [vmem:[%s8688_s18] sm:$0xff]  ;;  %v5518_v34 = vld [vmem:[%s8688_s18 + $0x18] sm:$0xff] }
0x12bf   : > { %8446 = vrsqrt.f32 %v5201_v6  ;;  %v5187_v13 = vmul.f32 0.03125, %v5145_v23  ;;  %v5517_v6 = vld [vmem:[%s8688_s18 + $0x10] sm:$0xff]  ;;  %v7914_v25 = vpack.c.bf16 %v5516_v19, %v5515_v22  ;;  %v5519_v23 = vld [vmem:[%s8688_s18 + $0x20] sm:$0xff] }
0x12c0   : > { %v5204_v56 = vadd.f32 1e-05, %v5188_v43  ;;  %v7918_v43 = vpack.c.bf16 %v5518_v34, %v5517_v6 }
0x12c1   : > { %v5203_v16 = vadd.f32 1e-05, %v5187_v13  ;;  %v5154_v39 = vpop.xlane.xlu0 %5153  ;;  %v5520_v13 = vld [vmem:[%s8688_s18 + $0x28] sm:$0xff]  ;;  %7915 = vmatprep.subr.bf16.mxu0 %v7914_v25 }
0x12c2   : > { %8448 = vrsqrt.f32 %v5204_v56  ;;  %v5190_v38 = vmul.f32 0.03125, %v5154_v39  ;;  %v5151_v17 = vpop.xlane.xlu1 %5150  ;;  %7917 = vmatpush3.bf16.msra.mxu0 %v7914_v25  ;;  %v7922_v56 = vpack.c.bf16 %v5520_v13, %v5519_v23  ;;  %v5522_v39 = vld [vmem:[%s8688_s18 + $0x38] sm:$0xff] }
0x12c3   : > { %8450 = vrsqrt.f32 %v5203_v16  ;;  %v5189_v40 = vmul.f32 0.03125, %v5151_v17  ;;  %7919 = vmatprep.subr.bf16.mxu0 %v7918_v43  ;;  %v5521_v16 = vld [vmem:[%s8688_s18 + $0x30] sm:$0xff] }
0x12c4   : > { %v5206_v57 = vadd.f32 1e-05, %v5190_v38  ;;  %v7926_v38 = vpack.c.bf16 %v5522_v39, %v5521_v16 }
0x12c5   : > { %v5205_v36 = vadd.f32 1e-05, %v5189_v40  ;;  %v5160_v58 = vpop.xlane.xlu0 %5159 }
0x12c6   : > { %8452 = vrsqrt.f32 %v5206_v57  ;;  %v5192_v27 = vmul.f32 0.03125, %v5160_v58  ;;  %v5157_v51 = vpop.xlane.xlu1 %5156  ;;  %7921 = vmatpush3.bf16.msra.mxu0 %v7918_v43 }
0x12c7   : > { %8454 = vrsqrt.f32 %v5205_v36  ;;  %v5191_v55 = vmul.f32 0.03125, %v5157_v51  ;;  %7923 = vmatprep.subr.bf16.mxu0 %v7922_v56 }
0x12c8   : > { %v8445_v15 = vpop.eup %8444  ;;  %v5208_v21 = vadd.f32 1e-05, %v5192_v27 }
0x12c9   : > { %v8447_v4 = vpop.eup %8446  ;;  %v5234_v46 = vmul.f32 %v8445_v15, %v10422_v42  ;;  %v5207_v31 = vadd.f32 1e-05, %v5191_v55 }
0x12ca   : > { %8456 = vrsqrt.f32 %v5208_v21  ;;  %v5233_v5 = vmul.f32 %v8447_v4, %v10428_v61  ;;  %7925 = vmatpush3.bf16.msra.mxu0 %v7922_v56 }
0x12cb   : > { %v5257_v20 = vmul.f32 %v10540_v49, %v5234_v46  ;;  %8458 = vrsqrt.f32 %v5207_v31  ;;  %7927 = vmatprep.subr.bf16.mxu0 %v7926_v38 }
0x12cc   : > { %v8449_v7 = vpop.eup %8448  ;;  %v5256_v24 = vmul.f32 %v10540_v49, %v5233_v5 }
0x12cd   : > { %v8451_v2 = vpop.eup %8450  ;;  %v5236_v32 = vmul.f32 %v8449_v7, %v10438_v37  ;;  %v10559_v18 = vadd.f32 %v10549_v0, %v5257_v20 }
0x12ce   : > { %v10555_v42 = vadd.f32 %v10549_v0, %v5256_v24  ;;  %v5235_v61 = vmul.f32 %v8451_v2, %v10445_v33  ;;  %7929 = vmatpush3.bf16.msra.mxu0 %v7926_v38 }
0x12cf   : > { %v5259_v63 = vmul.f32 %v10540_v49, %v5236_v32 }
0x12d0   : > { %v8453_v1 = vpop.eup %8452  ;;  %7490 = vmatprep.mubr.msk.f32.mxu1 %vm838_vm1, %v10555_v42  ;;  %v5258_v9 = vmul.f32 %v10540_v49, %v5235_v61 }
0x12d1   : > { %v8455_v28 = vpop.eup %8454  ;;  %7491 = vmatmul.mubr.msk.f32.vlgmr.msra.gmra.mrb[96].mxu1 %vm838_vm1, %v10559_v18  ;;  %v5238_v37 = vmul.f32 %v8453_v1, %v10452_v8  ;;  %v10573_v48 = vadd.f32 %v10549_v0, %v5259_v63 }
0x12d2   : > { %v10569_v50 = vadd.f32 %v10549_v0, %v5258_v9  ;;  %v5237_v33 = vmul.f32 %v8455_v28, %v10458_v62 }
0x12d3   : > { %v5261_v41 = vmul.f32 %v10540_v49, %v5238_v37 }
0x12d4   : > { %v8457_v12 = vpop.eup %8456  ;;  %7493 = vmatprep.mubr.msk.f32.mxu1 %vm838_vm1, %v10569_v50  ;;  %v5260_v52 = vmul.f32 %v10540_v49, %v5237_v33 }
0x12d5   : > { %v8459_v44 = vpop.eup %8458  ;;  %7494 = vmatmul.mubr.msk.f32.gmra.mrb[98].mxu1 %vm838_vm1, %v10573_v48  ;;  %v5240_v8 = vmul.f32 %v8457_v12, %v10464_v10  ;;  %v10587_v53 = vadd.f32 %v10549_v0, %v5261_v41 }
0x12d6   : > { %v10583_v62 = vadd.f32 %v10549_v0, %v5260_v52  ;;  %v5239_v54 = vmul.f32 %v8459_v44, %v10470_v45 }
0x12d7   : > { %v5263_v11 = vmul.f32 %v10540_v49, %v5240_v8 }
0x12d8   : > { %7496 = vmatprep.mubr.msk.f32.mxu1 %vm838_vm1, %v10583_v62  ;;  %v5262_v59 = vmul.f32 %v10540_v49, %v5239_v54 }
0x12d9   : > { %7497 = vmatmul.mubr.msk.f32.gmra.mrb[100].mxu1 %vm838_vm1, %v10587_v53  ;;  %v10599_v45 = vadd.f32 %v10549_v0, %v5263_v11 }
0x12da   : > { %v10596_v10 = vadd.f32 %v10549_v0, %v5262_v59 }
0x12dc   : > { %7499 = vmatprep.mubr.msk.f32.mxu1 %vm838_vm1, %v10596_v10 }
0x12dd   : > { %7500 = vmatmul.mubr.msk.f32.gmra.mrb[102].mxu1 %vm838_vm1, %v10599_v45 }
0x133e   : > { %v5166_v17 = vpop.xlane.xlu0 %5165 }
0x133f   : > { %v5194_v40 = vmul.f32 0.03125, %v5166_v17  ;;  %v5163_v57 = vpop.xlane.xlu1 %5162 }
0x1340   : > { %v5193_v36 = vmul.f32 0.03125, %v5163_v57 }
0x1341   : > { %v5210_v58 = vadd.f32 1e-05, %v5194_v40 }
0x1342   : > { %v5209_v27 = vadd.f32 1e-05, %v5193_v36  ;;  %v5172_v51 = vpop.xlane.xlu0 %5171 }
0x1343   : > { %8460 = vrsqrt.f32 %v5210_v58  ;;  %v5196_v55 = vmul.f32 0.03125, %v5172_v51  ;;  %v5169_v15 = vpop.xlane.xlu1 %5168 }
0x1344   : > { %8462 = vrsqrt.f32 %v5209_v27  ;;  %v5195_v21 = vmul.f32 0.03125, %v5169_v15 }
0x1345   : > { %v5212_v4 = vadd.f32 1e-05, %v5196_v55 }
0x1346   : > { %v5211_v46 = vadd.f32 1e-05, %v5195_v21  ;;  %v5178_v31 = vpop.xlane.xlu0 %5177 }
0x1347   : > { %8464 = vrsqrt.f32 %v5212_v4  ;;  %v5198_v5 = vmul.f32 0.03125, %v5178_v31  ;;  %v5175_v20 = vpop.xlane.xlu1 %5174 }
0x1348   : > { %8466 = vrsqrt.f32 %v5211_v46  ;;  %v5197_v7 = vmul.f32 0.03125, %v5175_v20 }
0x1349   : > { %v5214_v24 = vadd.f32 1e-05, %v5198_v5 }
0x134a   : > { %v5213_v2 = vadd.f32 1e-05, %v5197_v7  ;;  %v5184_v32 = vpop.xlane.xlu0 %5183 }
0x134b   : > { %8468 = vrsqrt.f32 %v5214_v24  ;;  %v5200_v61 = vmul.f32 0.03125, %v5184_v32  ;;  %v5181_v63 = vpop.xlane.xlu1 %5180 }
0x134c   : > { %8470 = vrsqrt.f32 %v5213_v2  ;;  %v5199_v1 = vmul.f32 0.03125, %v5181_v63 }
0x134d   : > { %v8461_v9 = vpop.eup %8460  ;;  %v5216_v28 = vadd.f32 1e-05, %v5200_v61 }
0x134e   : > { %v8463_v37 = vpop.eup %8462  ;;  %v5215_v33 = vadd.f32 1e-05, %v5199_v1  ;;  %v5242_v41 = vmul.f32 %v8461_v9, %v10488_v14 }
0x134f   : > { %8472 = vrsqrt.f32 %v5216_v28  ;;  %v5241_v12 = vmul.f32 %v8463_v37, %v10491_v47 }
0x1350   : > { %8474 = vrsqrt.f32 %v5215_v33  ;;  %v5265_v52 = vmul.f32 %v10540_v49, %v5242_v41 }
0x1351   : > { %v8465_v44 = vpop.eup %8464  ;;  %v5264_v8 = vmul.f32 %v10540_v49, %v5241_v12 }
0x1352   : > { %v8467_v54 = vpop.eup %8466  ;;  %v5244_v11 = vmul.f32 %v8465_v44, %v10498_v3  ;;  %v10623_v19 = vadd.f32 %v10549_v0, %v5265_v52 }
0x1353   : > { %v10619_v59 = vadd.f32 %v10549_v0, %v5264_v8  ;;  %v5243_v22 = vmul.f32 %v8467_v54, %v10502_v60 }
0x1354   : > { %v5267_v14 = vmul.f32 %v10540_v49, %v5244_v11 }
0x1355   : > { %v8469_v47 = vpop.eup %8468  ;;  %7502 = vmatprep.mubr.msk.f32.mxu1 %vm838_vm1, %v10619_v59  ;;  %v5266_v6 = vmul.f32 %v10540_v49, %v5243_v22 }
0x1356   : > { %v8471_v25 = vpop.eup %8470  ;;  %7503 = vmatmul.mubr.msk.f32.gmra.mrb[104].mxu1 %vm838_vm1, %v10623_v19  ;;  %v5246_v3 = vmul.f32 %v8469_v47, %v10510_v30  ;;  %v10637_v43 = vadd.f32 %v10549_v0, %v5267_v14 }
0x1357   : > { %v10633_v34 = vadd.f32 %v10549_v0, %v5266_v6  ;;  %v5245_v60 = vmul.f32 %v8471_v25, %v10514_v29 }
0x1358   : > { %v5269_v23 = vmul.f32 %v10540_v49, %v5246_v3 }
0x1359   : > { %v8473_v13 = vpop.eup %8472  ;;  %7505 = vmatprep.mubr.msk.f32.mxu1 %vm838_vm1, %v10633_v34  ;;  %v5268_v56 = vmul.f32 %v10540_v49, %v5245_v60 }
0x135a   : > { %v8475_v16 = vpop.eup %8474  ;;  %7506 = vmatmul.mubr.msk.f32.gmra.mrb[106].mxu1 %vm838_vm1, %v10637_v43  ;;  %v5248_v30 = vmul.f32 %v8473_v13, %v10522_v35  ;;  %v10651_v38 = vadd.f32 %v10549_v0, %v5269_v23 }
0x135b   : > { %v10647_v29 = vadd.f32 %v10549_v0, %v5268_v56  ;;  %v5247_v39 = vmul.f32 %v8475_v16, %v10526_v26  ;;  %v6482_v26 = vld [vmem:[%s11199_s16] ss:$0 sm:$0xff] }
0x135c   : > { %v5271_v17 = vmul.f32 %v10540_v49, %v5248_v30 }
0x135d   : > { %7508 = vmatprep.mubr.msk.f32.mxu1 %vm838_vm1, %v10647_v29  ;;  %v5270_v40 = vmul.f32 %v10540_v49, %v5247_v39 }
0x135e   : > { %7509 = vmatmul.mubr.msk.f32.gmra.mrb[108].mxu1 %vm838_vm1, %v10651_v38  ;;  %v10663_v57 = vadd.f32 %v10549_v0, %v5271_v17 }
0x135f   : > { %v10660_v35 = vadd.f32 %v10549_v0, %v5270_v40 }
0x1361   : > { %7511 = vmatprep.mubr.msk.f32.mxu1 %vm838_vm1, %v10660_v35 }
0x1362   : > { %7512 = vmatmul.mubr.msk.f32.gmra.mrb[110].mxu1 %vm838_vm1, %v10663_v57 }
0x13a4   : > { %v7492_v49 = vpop.f32.mrb[96].mxu1 }
0x13a5   : > { %v5426_v36 = vadd.f32 %v7492_v49, %v6482_v26  ;;  %v5420_v58 = vpop.f32.mrb[97].mxu1 }
0x13a6   : > { %v5421_v27 = vadd.f32 %v6482_v26, %v5420_v58 }
0x13a7   : > { %v5500_v15 = vmax.f32 %v5426_v36, 0.0  ;;  %v10695_v36 = vld [vmem:[%s11200_s7] ss:$0 sm:$0xff] }
0x13a8   : > { %v5499_v51 = vmax.f32 %v5421_v27, 0.0  ;;  %v7495_v55 = vpop.f32.mrb[98].mxu1 }
0x13a9   : > { %v5436_v0 = vadd.f32 %v7495_v55, %v6482_v26  ;;  %v5430_v21 = vpop.f32.mrb[99].mxu1 }
0x13aa   : > { %v5431_v4 = vadd.f32 %v6482_v26, %v5430_v21  ;;  %7530 = vmatprep.mubr.msk.f32.mxu0 %vm1514_vm4, %v5499_v51 }
0x13ab   : > { %7531 = vmatmul.mubr.msk.f32.vlgmr.msra.gmra.mrb[96].mxu0 %vm1514_vm4, %v5500_v15  ;;  %v5502_v5 = vmax.f32 %v5436_v0, 0.0 }
0x13ac   : > { %v5501_v46 = vmax.f32 %v5431_v4, 0.0  ;;  %v7498_v31 = vpop.f32.mrb[100].mxu1 }
0x13ad   : > { %v5446_v20 = vadd.f32 %v7498_v31, %v6482_v26  ;;  %v5440_v7 = vpop.f32.mrb[101].mxu1 }
0x13ae   : > { %v5441_v24 = vadd.f32 %v6482_v26, %v5440_v7  ;;  %7533 = vmatprep.mubr.msk.f32.mxu0 %vm1514_vm4, %v5501_v46 }
0x13af   : > { %7534 = vmatmul.mubr.msk.f32.gmra.mrb[98].mxu0 %vm1514_vm4, %v5502_v5  ;;  %v5504_v61 = vmax.f32 %v5446_v20, 0.0 }
0x13b0   : > { %v5503_v2 = vmax.f32 %v5441_v24, 0.0  ;;  %v7501_v32 = vpop.f32.mrb[102].mxu1 }
0x13b1   : > { %v5456_v63 = vadd.f32 %v7501_v32, %v6482_v26  ;;  %v5450_v1 = vpop.f32.mrb[103].mxu1 }
0x13b2   : > { %v5451_v9 = vadd.f32 %v6482_v26, %v5450_v1  ;;  %7536 = vmatprep.mubr.msk.f32.mxu0 %vm1514_vm4, %v5503_v2 }
0x13b3   : > { %7537 = vmatmul.mubr.msk.f32.gmra.mrb[100].mxu0 %vm1514_vm4, %v5504_v61  ;;  %v5506_v37 = vmax.f32 %v5456_v63, 0.0 }
0x13b4   : > { %v5505_v28 = vmax.f32 %v5451_v9, 0.0 }
0x13b6   : > { %7539 = vmatprep.mubr.msk.f32.mxu0 %vm1514_vm4, %v5505_v28 }
0x13b7   : > { %7540 = vmatmul.mubr.msk.f32.gmra.mrb[102].mxu0 %vm1514_vm4, %v5506_v37 }
0x1429   : > { %v7504_v33 = vpop.f32.mrb[104].mxu1 }
0x142a   : > { %v5466_v41 = vadd.f32 %v7504_v33, %v6482_v26  ;;  %v5460_v12 = vpop.f32.mrb[105].mxu1 }
0x142b   : > { %v5461_v52 = vadd.f32 %v6482_v26, %v5460_v12 }
0x142c   : > { %v5508_v54 = vmax.f32 %v5466_v41, 0.0 }
0x142d   : > { %v5507_v44 = vmax.f32 %v5461_v52, 0.0  ;;  %v7507_v8 = vpop.f32.mrb[106].mxu1 }
0x142e   : > { %v5476_v11 = vadd.f32 %v7507_v8, %v6482_v26  ;;  %v5470_v22 = vpop.f32.mrb[107].mxu1 }
0x142f   : > { %v5471_v14 = vadd.f32 %v6482_v26, %v5470_v22  ;;  %7542 = vmatprep.mubr.msk.f32.mxu0 %vm1514_vm4, %v5507_v44 }
0x1430   : > { %7543 = vmatmul.mubr.msk.f32.gmra.mrb[104].mxu0 %vm1514_vm4, %v5508_v54  ;;  %v5510_v25 = vmax.f32 %v5476_v11, 0.0 }
0x1431   : > { %v5509_v47 = vmax.f32 %v5471_v14, 0.0  ;;  %v7510_v6 = vpop.f32.mrb[108].mxu1 }
0x1432   : > { %v5486_v3 = vadd.f32 %v7510_v6, %v6482_v26  ;;  %v5480_v60 = vpop.f32.mrb[109].mxu1 }
0x1433   : > { %v5481_v23 = vadd.f32 %v6482_v26, %v5480_v60  ;;  %7545 = vmatprep.mubr.msk.f32.mxu0 %vm1514_vm4, %v5509_v47 }
0x1434   : > { %7546 = vmatmul.mubr.msk.f32.gmra.mrb[106].mxu0 %vm1514_vm4, %v5510_v25  ;;  %v5512_v16 = vmax.f32 %v5486_v3, 0.0 }
0x1435   : > { %v5511_v13 = vmax.f32 %v5481_v23, 0.0  ;;  %v7513_v56 = vpop.f32.mrb[110].mxu1 }
0x1436   : > { %v5496_v30 = vadd.f32 %v7513_v56, %v6482_v26  ;;  %v5490_v39 = vpop.f32.mrb[111].mxu1 }
0x1437   : > { %v5491_v17 = vadd.f32 %v6482_v26, %v5490_v39  ;;  %7548 = vmatprep.mubr.msk.f32.mxu0 %vm1514_vm4, %v5511_v13 }
0x1438   : > { %7549 = vmatmul.mubr.msk.f32.gmra.mrb[108].mxu0 %vm1514_vm4, %v5512_v16  ;;  %v5514_v49 = vmax.f32 %v5496_v30, 0.0 }
0x1439   : > { %v5513_v40 = vmax.f32 %v5491_v17, 0.0 }
0x143b   : > { %7551 = vmatprep.mubr.msk.f32.mxu0 %vm1514_vm4, %v5513_v40 }
0x143c   : > { %7552 = vmatmul.mubr.msk.f32.gmra.mrb[110].mxu0 %vm1514_vm4, %v5514_v49 }
0x147e   : > { %v7532_v58 = vpop.f32.mrb[96].mxu0 }
0x147f   : > { %v5650_v27 = vadd.f32 %v7532_v58, %v10695_v36  ;;  %v5644_v26 = vpop.f32.mrb[97].mxu0 }
0x1480   : > { %v5645_v51 = vadd.f32 %v10695_v36, %v5644_v26 }
0x1481   : > { %v10700_v55 = vadd.f32 %v5650_v27, %v10559_v18 }
0x1482   : > { %v10703_v15 = vadd.f32 %v5645_v51, %v10555_v42  ;;  %v7535_v0 = vpop.f32.mrb[98].mxu0 }
0x1483   : > { %v5660_v21 = vadd.f32 %v7535_v0, %v10695_v36  ;;  %v5654_v4 = vpop.f32.mrb[99].mxu0  ;;  %v5742_v46 = vsel %vm838_vm1, %v10700_v55, 0.0 }
0x1484   : > { %v5655_v31 = vadd.f32 %v10695_v36, %v5654_v4  ;;  %5743 = vadd.xlane.f32.xlu0 %v5742_v46  ;;  %v5739_v5 = vsel %vm838_vm1, %v10703_v15, 0.0 }
0x1485   : > { %v10712_v20 = vadd.f32 %v5660_v21, %v10573_v48  ;;  %5740 = vadd.xlane.f32.xlu1 %v5739_v5 }
0x1486   : > { %v10715_v42 = vadd.f32 %v5655_v31, %v10569_v50  ;;  %v7538_v18 = vpop.f32.mrb[100].mxu0 }
0x1487   : > { %v5670_v7 = vadd.f32 %v7538_v18, %v10695_v36  ;;  %v5664_v24 = vpop.f32.mrb[101].mxu0  ;;  %v5748_v2 = vsel %vm838_vm1, %v10712_v20, 0.0 }
0x1488   : > { %v5665_v32 = vadd.f32 %v10695_v36, %v5664_v24  ;;  %5749 = vadd.xlane.f32.xlu0 %v5748_v2  ;;  %v5745_v61 = vsel %vm838_vm1, %v10715_v42, 0.0 }
0x1489   : > { %v10724_v48 = vadd.f32 %v5670_v7, %v10587_v53  ;;  %5746 = vadd.xlane.f32.xlu1 %v5745_v61 }
0x148a   : > { %v10727_v50 = vadd.f32 %v5665_v32, %v10583_v62  ;;  %v7541_v63 = vpop.f32.mrb[102].mxu0 }
0x148b   : > { %v5680_v1 = vadd.f32 %v7541_v63, %v10695_v36  ;;  %v5674_v9 = vpop.f32.mrb[103].mxu0  ;;  %v5754_v28 = vsel %vm838_vm1, %v10724_v48, 0.0 }
0x148c   : > { %v5675_v37 = vadd.f32 %v10695_v36, %v5674_v9  ;;  %5755 = vadd.xlane.f32.xlu0 %v5754_v28  ;;  %v5751_v33 = vsel %vm838_vm1, %v10727_v50, 0.0 }
0x148d   : > { %v10736_v53 = vadd.f32 %v5680_v1, %v10599_v45  ;;  %5752 = vadd.xlane.f32.xlu1 %v5751_v33 }
0x148e   : > { %v10739_v62 = vadd.f32 %v5675_v37, %v10596_v10 }
0x148f   : > { %v5760_v41 = vsel %vm838_vm1, %v10736_v53, 0.0 }
0x1490   : > { %5761 = vadd.xlane.f32.xlu0 %v5760_v41  ;;  %v5757_v12 = vsel %vm838_vm1, %v10739_v62, 0.0 }
0x1491   : > { %5758 = vadd.xlane.f32.xlu1 %v5757_v12 }
0x1503   : > { %v7544_v52 = vpop.f32.mrb[104].mxu0 }
0x1504   : > { %v5690_v44 = vadd.f32 %v7544_v52, %v10695_v36  ;;  %v5684_v8 = vpop.f32.mrb[105].mxu0 }
0x1505   : > { %v5685_v54 = vadd.f32 %v10695_v36, %v5684_v8 }
0x1506   : > { %v10748_v45 = vadd.f32 %v5690_v44, %v10623_v19 }
0x1507   : > { %v10751_v10 = vadd.f32 %v5685_v54, %v10619_v59  ;;  %v7547_v11 = vpop.f32.mrb[106].mxu0 }
0x1508   : > { %v5700_v22 = vadd.f32 %v7547_v11, %v10695_v36  ;;  %v5694_v14 = vpop.f32.mrb[107].mxu0  ;;  %v5766_v47 = vsel %vm838_vm1, %v10748_v45, 0.0 }
0x1509   : > { %v5695_v6 = vadd.f32 %v10695_v36, %v5694_v14  ;;  %5767 = vadd.xlane.f32.xlu0 %v5766_v47  ;;  %v5763_v25 = vsel %vm838_vm1, %v10751_v10, 0.0 }
0x150a   : > { %v10760_v3 = vadd.f32 %v5700_v22, %v10637_v43  ;;  %5764 = vadd.xlane.f32.xlu1 %v5763_v25 }
0x150b   : > { %v10763_v59 = vadd.f32 %v5695_v6, %v10633_v34  ;;  %v7550_v19 = vpop.f32.mrb[108].mxu0 }
0x150c   : > { %v5710_v60 = vadd.f32 %v7550_v19, %v10695_v36  ;;  %v5704_v23 = vpop.f32.mrb[109].mxu0  ;;  %v5772_v13 = vsel %vm838_vm1, %v10760_v3, 0.0 }
0x150d   : > { %v5705_v56 = vadd.f32 %v10695_v36, %v5704_v23  ;;  %5773 = vadd.xlane.f32.xlu0 %v5772_v13  ;;  %v5769_v16 = vsel %vm838_vm1, %v10763_v59, 0.0 }
0x150e   : > { %v10772_v43 = vadd.f32 %v5710_v60, %v10651_v38  ;;  %5770 = vadd.xlane.f32.xlu1 %v5769_v16 }
0x150f   : > { %v10775_v34 = vadd.f32 %v5705_v56, %v10647_v29  ;;  %v7553_v30 = vpop.f32.mrb[110].mxu0 }
0x1510   : > { %v5720_v39 = vadd.f32 %v7553_v30, %v10695_v36  ;;  %v5714_v17 = vpop.f32.mrb[111].mxu0  ;;  %v5778_v40 = vsel %vm838_vm1, %v10772_v43, 0.0 }
0x1511   : > { %v5715_v49 = vadd.f32 %v10695_v36, %v5714_v17  ;;  %5779 = vadd.xlane.f32.xlu0 %v5778_v40  ;;  %v5744_v58 = vpop.xlane.xlu0 %5743  ;;  %v5775_v27 = vsel %vm838_vm1, %v10775_v34, 0.0 }
0x1512   : > { %v10784_v38 = vadd.f32 %v5720_v39, %v10663_v57  ;;  %v5788_v26 = vmul.f32 0.03125, %v5744_v58  ;;  %v5741_v29 = vpop.xlane.xlu1 %5740  ;;  %5776 = vadd.xlane.f32.xlu1 %v5775_v27 }
0x1513   : > { %v10787_v51 = vadd.f32 %v5715_v49, %v10660_v35  ;;  %v5787_v0 = vmul.f32 0.03125, %v5741_v29 }
0x1514   : > { %v10790_v21 = vsub.f32 %v10700_v55, %v5788_v26  ;;  %v5784_v36 = vsel %vm838_vm1, %v10784_v38, 0.0 }
0x1515   : > { %v10795_v4 = vsub.f32 %v10703_v15, %v5787_v0  ;;  %5785 = vadd.xlane.f32.xlu0 %v5784_v36  ;;  %v5750_v46 = vpop.xlane.xlu0 %5749  ;;  %v5781_v57 = vsel %vm838_vm1, %v10787_v51, 0.0 }
0x1516   : > { %v5790_v31 = vmul.f32 0.03125, %v5750_v46  ;;  %v5747_v5 = vpop.xlane.xlu1 %5746  ;;  %5782 = vadd.xlane.f32.xlu1 %v5781_v57  ;;  %v5820_v35 = vmul.f32 %v10790_v21, %v10790_v21 }
0x1517   : > { %v5789_v18 = vmul.f32 0.03125, %v5747_v5  ;;  %v5819_v55 = vmul.f32 %v10795_v4, %v10795_v4 }
0x1518   : > { %v10804_v7 = vsub.f32 %v10712_v20, %v5790_v31  ;;  %v5838_v15 = vsel %vm838_vm1, %v5820_v35, 0.0 }
0x1519   : > { %v10808_v24 = vsub.f32 %v10715_v42, %v5789_v18  ;;  %5839 = vadd.xlane.f32.xlu0 %v5838_v15  ;;  %v5756_v2 = vpop.xlane.xlu0 %5755  ;;  %v5835_v32 = vsel %vm838_vm1, %v5819_v55, 0.0 }
0x151a   : > { %v5792_v61 = vmul.f32 0.03125, %v5756_v2  ;;  %v5753_v63 = vpop.xlane.xlu1 %5752  ;;  %5836 = vadd.xlane.f32.xlu1 %v5835_v32  ;;  %v5822_v1 = vmul.f32 %v10804_v7, %v10804_v7 }
0x151b   : > { %v5791_v9 = vmul.f32 0.03125, %v5753_v63  ;;  %v5821_v20 = vmul.f32 %v10808_v24, %v10808_v24 }
0x151c   : > { %v10816_v28 = vsub.f32 %v10724_v48, %v5792_v61  ;;  %v5844_v42 = vsel %vm838_vm1, %v5822_v1, 0.0 }
0x151d   : > { %v10820_v37 = vsub.f32 %v10727_v50, %v5791_v9  ;;  %5845 = vadd.xlane.f32.xlu0 %v5844_v42  ;;  %v5762_v33 = vpop.xlane.xlu0 %5761  ;;  %v5841_v41 = vsel %vm838_vm1, %v5821_v20, 0.0 }
0x151e   : > { %v5794_v12 = vmul.f32 0.03125, %v5762_v33  ;;  %v5759_v52 = vpop.xlane.xlu1 %5758  ;;  %5842 = vadd.xlane.f32.xlu1 %v5841_v41  ;;  %v5824_v44 = vmul.f32 %v10816_v28, %v10816_v28 }
0x151f   : > { %v5793_v8 = vmul.f32 0.03125, %v5759_v52  ;;  %v5823_v48 = vmul.f32 %v10820_v37, %v10820_v37 }
0x1520   : > { %v10828_v54 = vsub.f32 %v10736_v53, %v5794_v12  ;;  %v5850_v50 = vsel %vm838_vm1, %v5824_v44, 0.0 }
0x1521   : > { %v10832_v11 = vsub.f32 %v10739_v62, %v5793_v8  ;;  %5851 = vadd.xlane.f32.xlu0 %v5850_v50  ;;  %v5847_v22 = vsel %vm838_vm1, %v5823_v48, 0.0 }
0x1522   : > { %5848 = vadd.xlane.f32.xlu1 %v5847_v22  ;;  %v5826_v14 = vmul.f32 %v10828_v54, %v10828_v54 }
0x1523   : > { %v5825_v47 = vmul.f32 %v10832_v11, %v10832_v11 }
0x1524   : > { %v5856_v6 = vsel %vm838_vm1, %v5826_v14, 0.0 }
0x1525   : > { %5857 = vadd.xlane.f32.xlu0 %v5856_v6  ;;  %v5853_v53 = vsel %vm838_vm1, %v5825_v47, 0.0 }
0x1526   : > { %5854 = vadd.xlane.f32.xlu1 %v5853_v53 }
0x1596   : > { %v5768_v25 = vpop.xlane.xlu0 %5767 }
0x1597   : > { %v5796_v19 = vmul.f32 0.03125, %v5768_v25  ;;  %v5765_v62 = vpop.xlane.xlu1 %5764 }
0x1598   : > { %v5795_v60 = vmul.f32 0.03125, %v5765_v62 }
0x1599   : > { %v10842_v23 = vsub.f32 %v10748_v45, %v5796_v19 }
0x159a   : > { %v10845_v13 = vsub.f32 %v10751_v10, %v5795_v60  ;;  %v5774_v56 = vpop.xlane.xlu0 %5773 }
0x159b   : > { %v5798_v16 = vmul.f32 0.03125, %v5774_v56  ;;  %v5771_v30 = vpop.xlane.xlu1 %5770  ;;  %v5828_v39 = vmul.f32 %v10842_v23, %v10842_v23 }
0x159c   : > { %v5797_v17 = vmul.f32 0.03125, %v5771_v30  ;;  %v5827_v40 = vmul.f32 %v10845_v13, %v10845_v13 }
0x159d   : > { %v10852_v49 = vsub.f32 %v10760_v3, %v5798_v16  ;;  %v5862_v58 = vsel %vm838_vm1, %v5828_v39, 0.0  ;;  %v10894_v39 = vld [vmem:[%s770_s10] ss:$0 sm:$0xff] }
0x159e   : > { %v10856_v45 = vsub.f32 %v10763_v59, %v5797_v17  ;;  %5863 = vadd.xlane.f32.xlu0 %v5862_v58  ;;  %v5780_v10 = vpop.xlane.xlu0 %5779  ;;  %v5859_v27 = vsel %vm838_vm1, %v5827_v40, 0.0 }
0x159f   : > { %v5800_v26 = vmul.f32 0.03125, %v5780_v10  ;;  %v5777_v29 = vpop.xlane.xlu1 %5776  ;;  %5860 = vadd.xlane.f32.xlu1 %v5859_v27  ;;  %v5830_v0 = vmul.f32 %v10852_v49, %v10852_v49  ;;  %v10902_v27 = vld [vmem:[%s773_s29] ss:$0 sm:$0xff]  ;;  %s11203_s29 = sld [smem:[#allocation46_spill]] }
0x15a0   : > { %v5799_v36 = vmul.f32 0.03125, %v5777_v29  ;;  %v5829_v3 = vmul.f32 %v10856_v45, %v10856_v45 }
0x15a1   : > { %v10864_v46 = vsub.f32 %v10772_v43, %v5800_v26  ;;  %v5868_v59 = vsel %vm838_vm1, %v5830_v0, 0.0 }
0x15a2   : > { %v10868_v57 = vsub.f32 %v10775_v34, %v5799_v36  ;;  %5869 = vadd.xlane.f32.xlu0 %v5868_v59  ;;  %v5786_v31 = vpop.xlane.xlu0 %5785  ;;  %v5865_v5 = vsel %vm838_vm1, %v5829_v3, 0.0 }
0x15a3   : > { %v5802_v35 = vmul.f32 0.03125, %v5786_v31  ;;  %5866 = vadd.xlane.f32.xlu1 %v5865_v5  ;;  %v5783_v18 = vpop.xlane.xlu1 %5782  ;;  %v5832_v55 = vmul.f32 %v10864_v46, %v10864_v46 }
0x15a4   : > { %v5801_v15 = vmul.f32 0.03125, %v5783_v18  ;;  %v5831_v43 = vmul.f32 %v10868_v57, %v10868_v57 }
0x15a5   : > { %v10876_v2 = vsub.f32 %v10784_v38, %v5802_v35  ;;  %v5874_v34 = vsel %vm838_vm1, %v5832_v55, 0.0 }
0x15a6   : > { %v10880_v32 = vsub.f32 %v10787_v51, %v5801_v15  ;;  %5875 = vadd.xlane.f32.xlu0 %v5874_v34  ;;  %v5840_v61 = vpop.xlane.xlu0 %5839  ;;  %v5871_v63 = vsel %vm838_vm1, %v5831_v43, 0.0 }
0x15a7   : > { %v5884_v1 = vmul.f32 0.03125, %v5840_v61  ;;  %5872 = vadd.xlane.f32.xlu1 %v5871_v63  ;;  %v5837_v9 = vpop.xlane.xlu1 %5836  ;;  %v5834_v20 = vmul.f32 %v10876_v2, %v10876_v2 }
0x15a8   : > { %v5883_v42 = vmul.f32 0.03125, %v5837_v9  ;;  %v5833_v38 = vmul.f32 %v10880_v32, %v10880_v32 }
0x15a9   : > { %v5900_v33 = vadd.f32 1e-05, %v5884_v1  ;;  %v5880_v41 = vsel %vm838_vm1, %v5834_v20, 0.0 }
0x15aa   : > { %v5899_v12 = vadd.f32 1e-05, %v5883_v42  ;;  %5881 = vadd.xlane.f32.xlu0 %v5880_v41  ;;  %v5846_v51 = vpop.xlane.xlu0 %5845  ;;  %v5877_v52 = vsel %vm838_vm1, %v5833_v38, 0.0 }
0x15ab   : > { %8476 = vrsqrt.f32 %v5900_v33  ;;  %v5886_v44 = vmul.f32 0.03125, %v5846_v51  ;;  %5878 = vadd.xlane.f32.xlu1 %v5877_v52  ;;  %v5843_v8 = vpop.xlane.xlu1 %5842 }
0x15ac   : > { %8478 = vrsqrt.f32 %v5899_v12  ;;  %v5885_v48 = vmul.f32 0.03125, %v5843_v8 }
0x15ad   : > { %v5902_v50 = vadd.f32 1e-05, %v5886_v44 }
0x15ae   : > { %v5901_v22 = vadd.f32 1e-05, %v5885_v48  ;;  %v5852_v14 = vpop.xlane.xlu0 %5851 }
0x15af   : > { %8480 = vrsqrt.f32 %v5902_v50  ;;  %v5888_v47 = vmul.f32 0.03125, %v5852_v14  ;;  %v5849_v6 = vpop.xlane.xlu1 %5848 }
0x15b0   : > { %8482 = vrsqrt.f32 %v5901_v22  ;;  %v5887_v53 = vmul.f32 0.03125, %v5849_v6 }
0x15b1   : > { %v5904_v25 = vadd.f32 1e-05, %v5888_v47 }
0x15b2   : > { %v5903_v19 = vadd.f32 1e-05, %v5887_v53  ;;  %v5858_v62 = vpop.xlane.xlu0 %5857 }
0x15b3   : > { %8484 = vrsqrt.f32 %v5904_v25  ;;  %v5890_v60 = vmul.f32 0.03125, %v5858_v62  ;;  %v5855_v56 = vpop.xlane.xlu1 %5854 }
0x15b4   : > { %8486 = vrsqrt.f32 %v5903_v19  ;;  %v5889_v16 = vmul.f32 0.03125, %v5855_v56 }
0x15b5   : > { %v8477_v30 = vpop.eup %8476  ;;  %v5906_v17 = vadd.f32 1e-05, %v5890_v60 }
0x15b6   : > { %v8479_v40 = vpop.eup %8478  ;;  %v5932_v58 = vmul.f32 %v8477_v30, %v10790_v21  ;;  %v5905_v10 = vadd.f32 1e-05, %v5889_v16 }
0x15b7   : > { %v5931_v26 = vmul.f32 %v8479_v40, %v10795_v4  ;;  %8488 = vrsqrt.f32 %v5906_v17 }
0x15b8   : > { %v5955_v29 = vmul.f32 %v10894_v39, %v5932_v58  ;;  %8490 = vrsqrt.f32 %v5905_v10 }
0x15b9   : > { %v8481_v0 = vpop.eup %8480  ;;  %v5954_v36 = vmul.f32 %v10894_v39, %v5931_v26 }
0x15ba   : > { %v8483_v3 = vpop.eup %8482  ;;  %v5978_v59 = vadd.f32 %v10902_v27, %v5955_v29  ;;  %v5934_v21 = vmul.f32 %v8481_v0, %v10804_v7 }
0x15bb   : > { %v5977_v31 = vadd.f32 %v10902_v27, %v5954_v36  ;;  %v5933_v5 = vmul.f32 %v8483_v3, %v10808_v24 }
0x15bc   : > { %5994 = vst.msk [vmem:[#allocation2 + $0x8] sm:$0xff] %vm838_vm1, %v5978_v59  ;;  %6010 = vst.msk [vmem:[%s11203_s29 + $0x8] sm:$0xff] %vm838_vm1, %v5978_v59  ;;  %v5957_v4 = vmul.f32 %v10894_v39, %v5934_v21 }
0x15bd   : > { %v8485_v35 = vpop.eup %8484  ;;  %5993 = vst.msk [vmem:[#allocation2] sm:$0xff] %vm838_vm1, %v5977_v31  ;;  %6009 = vst.msk [vmem:[%s11203_s29] sm:$0xff] %vm838_vm1, %v5977_v31  ;;  %v5956_v7 = vmul.f32 %v10894_v39, %v5933_v5 }
0x15be   : > { %v8487_v24 = vpop.eup %8486  ;;  %v5980_v18 = vadd.f32 %v10902_v27, %v5957_v4  ;;  %v5936_v55 = vmul.f32 %v8485_v35, %v10816_v28 }
0x15bf   : > { %v5979_v15 = vadd.f32 %v10902_v27, %v5956_v7  ;;  %v5935_v43 = vmul.f32 %v8487_v24, %v10820_v37 }
0x15c0   : > { %5996 = vst.msk [vmem:[#allocation2 + $0x18] sm:$0xff] %vm838_vm1, %v5980_v18  ;;  %6012 = vst.msk [vmem:[%s11203_s29 + $0x18] sm:$0xff] %vm838_vm1, %v5980_v18  ;;  %v5959_v34 = vmul.f32 %v10894_v39, %v5936_v55 }
0x15c1   : > { %v8489_v61 = vpop.eup %8488  ;;  %5995 = vst.msk [vmem:[#allocation2 + $0x10] sm:$0xff] %vm838_vm1, %v5979_v15  ;;  %6011 = vst.msk [vmem:[%s11203_s29 + $0x10] sm:$0xff] %vm838_vm1, %v5979_v15  ;;  %v5958_v28 = vmul.f32 %v10894_v39, %v5935_v43 }
0x15c2   : > { %v8491_v37 = vpop.eup %8490  ;;  %v5982_v63 = vadd.f32 %v10902_v27, %v5959_v34  ;;  %v5938_v1 = vmul.f32 %v8489_v61, %v10828_v54 }
0x15c3   : > { %v5981_v9 = vadd.f32 %v10902_v27, %v5958_v28  ;;  %v5937_v20 = vmul.f32 %v8491_v37, %v10832_v11 }
0x15c4   : > { %5998 = vst.msk [vmem:[#allocation2 + $0x28] sm:$0xff] %vm838_vm1, %v5982_v63  ;;  %6014 = vst.msk [vmem:[%s11203_s29 + $0x28] sm:$0xff] %vm838_vm1, %v5982_v63  ;;  %v5961_v42 = vmul.f32 %v10894_v39, %v5938_v1 }
0x15c5   : > { %5997 = vst.msk [vmem:[#allocation2 + $0x20] sm:$0xff] %vm838_vm1, %v5981_v9  ;;  %6013 = vst.msk [vmem:[%s11203_s29 + $0x20] sm:$0xff] %vm838_vm1, %v5981_v9  ;;  %v5960_v54 = vmul.f32 %v10894_v39, %v5937_v20 }
0x15c6   : > { %v5984_v11 = vadd.f32 %v10902_v27, %v5961_v42 }
0x15c7   : > { %v5983_v38 = vadd.f32 %v10902_v27, %v5960_v54 }
0x15c8   : > { %6000 = vst.msk [vmem:[#allocation2 + $0x38] sm:$0xff] %vm838_vm1, %v5984_v11  ;;  %6016 = vst.msk [vmem:[%s11203_s29 + $0x38] sm:$0xff] %vm838_vm1, %v5984_v11 }
0x15c9   : > { %5999 = vst.msk [vmem:[#allocation2 + $0x30] sm:$0xff] %vm838_vm1, %v5983_v38  ;;  %6015 = vst.msk [vmem:[%s11203_s29 + $0x30] sm:$0xff] %vm838_vm1, %v5983_v38 }
0x162b   : > { %v5864_v33 = vpop.xlane.xlu0 %5863 }
0x162c   : > { %v5892_v41 = vmul.f32 0.03125, %v5864_v33  ;;  %v5861_v12 = vpop.xlane.xlu1 %5860 }
0x162d   : > { %v5891_v51 = vmul.f32 0.03125, %v5861_v12 }
0x162e   : > { %v5908_v52 = vadd.f32 1e-05, %v5892_v41 }
0x162f   : > { %v5907_v44 = vadd.f32 1e-05, %v5891_v51  ;;  %v5870_v8 = vpop.xlane.xlu0 %5869 }
0x1630   : > { %8492 = vrsqrt.f32 %v5908_v52  ;;  %v5894_v48 = vmul.f32 0.03125, %v5870_v8  ;;  %v5867_v50 = vpop.xlane.xlu1 %5866 }
0x1631   : > { %8494 = vrsqrt.f32 %v5907_v44  ;;  %v5893_v22 = vmul.f32 0.03125, %v5867_v50 }
0x1632   : > { %v5910_v14 = vadd.f32 1e-05, %v5894_v48 }
0x1633   : > { %v5909_v47 = vadd.f32 1e-05, %v5893_v22  ;;  %v5876_v6 = vpop.xlane.xlu0 %5875 }
0x1634   : > { %8496 = vrsqrt.f32 %v5910_v14  ;;  %v5896_v53 = vmul.f32 0.03125, %v5876_v6  ;;  %v5873_v25 = vpop.xlane.xlu1 %5872 }
0x1635   : > { %8498 = vrsqrt.f32 %v5909_v47  ;;  %v5895_v19 = vmul.f32 0.03125, %v5873_v25 }
0x1636   : > { %v5912_v62 = vadd.f32 1e-05, %v5896_v53 }
0x1637   : > { %v5911_v60 = vadd.f32 1e-05, %v5895_v19  ;;  %v5882_v56 = vpop.xlane.xlu0 %5881 }
0x1638   : > { %8500 = vrsqrt.f32 %v5912_v62  ;;  %v5898_v16 = vmul.f32 0.03125, %v5882_v56  ;;  %v5879_v30 = vpop.xlane.xlu1 %5878 }
0x1639   : > { %8502 = vrsqrt.f32 %v5911_v60  ;;  %v5897_v17 = vmul.f32 0.03125, %v5879_v30 }
0x163a   : > { %v8493_v40 = vpop.eup %8492  ;;  %v5914_v58 = vadd.f32 1e-05, %v5898_v16 }
0x163b   : > { %v8495_v10 = vpop.eup %8494  ;;  %v5940_v26 = vmul.f32 %v8493_v40, %v10842_v23  ;;  %v5913_v29 = vadd.f32 1e-05, %v5897_v17 }
0x163c   : > { %v5939_v0 = vmul.f32 %v8495_v10, %v10845_v13  ;;  %8504 = vrsqrt.f32 %v5914_v58 }
0x163d   : > { %v5963_v36 = vmul.f32 %v10894_v39, %v5940_v26  ;;  %8506 = vrsqrt.f32 %v5913_v29 }
0x163e   : > { %v8497_v3 = vpop.eup %8496  ;;  %v5962_v59 = vmul.f32 %v10894_v39, %v5939_v0 }
0x163f   : > { %v8499_v21 = vpop.eup %8498  ;;  %v5986_v31 = vadd.f32 %v10902_v27, %v5963_v36  ;;  %v5942_v5 = vmul.f32 %v8497_v3, %v10852_v49 }
0x1640   : > { %v5985_v4 = vadd.f32 %v10902_v27, %v5962_v59  ;;  %v5941_v35 = vmul.f32 %v8499_v21, %v10856_v45 }
0x1641   : > { %6002 = vst.msk [vmem:[#allocation2 + $0x48] sm:$0xff] %vm838_vm1, %v5986_v31  ;;  %6018 = vst.msk [vmem:[%s11203_s29 + $0x48] sm:$0xff] %vm838_vm1, %v5986_v31  ;;  %v5965_v23 = vmul.f32 %v10894_v39, %v5942_v5 }
0x1642   : > { %v8501_v13 = vpop.eup %8500  ;;  %6001 = vst.msk [vmem:[#allocation2 + $0x40] sm:$0xff] %vm838_vm1, %v5985_v4  ;;  %6017 = vst.msk [vmem:[%s11203_s29 + $0x40] sm:$0xff] %vm838_vm1, %v5985_v4  ;;  %v5964_v49 = vmul.f32 %v10894_v39, %v5941_v35 }
0x1643   : > { %v8503_v45 = vpop.eup %8502  ;;  %v5988_v7 = vadd.f32 %v10902_v27, %v5965_v23  ;;  %v5944_v24 = vmul.f32 %v8501_v13, %v10864_v46 }
0x1644   : > { %v5987_v18 = vadd.f32 %v10902_v27, %v5964_v49  ;;  %v5943_v55 = vmul.f32 %v8503_v45, %v10868_v57 }
0x1645   : > { %6004 = vst.msk [vmem:[#allocation2 + $0x58] sm:$0xff] %vm838_vm1, %v5988_v7  ;;  %6020 = vst.msk [vmem:[%s11203_s29 + $0x58] sm:$0xff] %vm838_vm1, %v5988_v7  ;;  %v5967_v15 = vmul.f32 %v10894_v39, %v5944_v24 }
0x1646   : > { %v8505_v43 = vpop.eup %8504  ;;  %6003 = vst.msk [vmem:[#allocation2 + $0x50] sm:$0xff] %vm838_vm1, %v5987_v18  ;;  %6019 = vst.msk [vmem:[%s11203_s29 + $0x50] sm:$0xff] %vm838_vm1, %v5987_v18  ;;  %v5966_v46 = vmul.f32 %v10894_v39, %v5943_v55 }
0x1647   : > { %v8507_v57 = vpop.eup %8506  ;;  %v5990_v34 = vadd.f32 %v10902_v27, %v5967_v15  ;;  %v5946_v61 = vmul.f32 %v8505_v43, %v10876_v2 }
0x1648   : > { %v5989_v28 = vadd.f32 %v10902_v27, %v5966_v46  ;;  %v5945_v37 = vmul.f32 %v8507_v57, %v10880_v32 }
0x1649   : > { %6006 = vst.msk [vmem:[#allocation2 + $0x68] sm:$0xff] %vm838_vm1, %v5990_v34  ;;  %6022 = vst.msk [vmem:[%s11203_s29 + $0x68] sm:$0xff] %vm838_vm1, %v5990_v34  ;;  %v5969_v63 = vmul.f32 %v10894_v39, %v5946_v61 }
0x164a   : > { %6005 = vst.msk [vmem:[#allocation2 + $0x60] sm:$0xff] %vm838_vm1, %v5989_v28  ;;  %6021 = vst.msk [vmem:[%s11203_s29 + $0x60] sm:$0xff] %vm838_vm1, %v5989_v28  ;;  %v5968_v2 = vmul.f32 %v10894_v39, %v5945_v37 }
0x164b   : > { %v5992_v32 = vadd.f32 %v10902_v27, %v5969_v63 }
0x164c   : > { %v5991_v1 = vadd.f32 %v10902_v27, %v5968_v2 }
0x164d   : > { %6008 = vst.msk [vmem:[#allocation2 + $0x78] sm:$0xff] %vm838_vm1, %v5992_v32  ;;  %6024 = vst.msk [vmem:[%s11203_s29 + $0x78] sm:$0xff] %vm838_vm1, %v5992_v32 }
0x164e   : > { %6007 = vst.msk [vmem:[#allocation2 + $0x70] sm:$0xff] %vm838_vm1, %v5991_v1  ;;  %6023 = vst.msk [vmem:[%s11203_s29 + $0x70] sm:$0xff] %vm838_vm1, %v5991_v1 }
0x164f PF: > { %s11204_s18 = sld [smem:[#allocation3_spill]] }
0x1655   : > { %s27_s24 = sadd.s32 1, %s11204_s18  }
0x1656   : > { %p24_p5 = scmp.ge.s32.totalorder %s27_s24, 4  }
0x1658   :  { %26 = sbr.rel (!%p24_p5) target bundleno = 12 (0xc), region = 163 }

</bundles_post_ra>
